<compile_context>
chip_gen: v5e
topology: v5e:2x2
jax: 0.10.0
libtpu: 0.0.40
codegen_flags: <defaults>
</compile_context>

<pallas_src>
import jax
import jax.numpy as jnp
from jax.experimental import pallas as pl
from jax.experimental.pallas import tpu as pltpu

EPS = 1e-5
LANE = 128
SUB = 16          # bf16 sublane packing granularity


def _round_up(x, m):
    return ((x + m - 1) // m) * m


def double_conv_pallas(x_nchw, params):
    """x_nchw: (N, Cin, H, W) f32 -> (N, Cout, H, W) f32 (PyTorch layout)."""
    w1, _b1, g1, be1, w2, _b2, g2, be2 = params   # conv biases unused: exact BN cancellation
    N, Cin, H, W = x_nchw.shape
    Cout = w1.shape[-1]

    CIN = _round_up(Cin, LANE)
    COUT = _round_up(Cout, LANE)

    Hp = H + 2
    Wp = W + 2
    Wp += Wp % 2                        # even Wp -> +/-Wp tap shifts stay pair-aligned for bf16
    M_img = N * Hp * Wp                 # flattened zero-padded frame rows
    LEAD = _round_up(Wp + 1, SUB)       # aligned guard strips (>= 3x3 tap reach)
    M_core = _round_up(M_img, SUB)      # rows the kernel computes (aligned; extras masked)
    M_buf = M_core + 2 * LEAD           # h1 staging frame rows
    inv_n = 1.0 / float(N * H * W)      # static BN count (batch statistics)

    packed_conv1 = 9 * Cin <= LANE      # fold the 9 taps into K for a single conv1 matmul
    shifts = [(dy - 1) * Wp + (dx - 1) for dy in range(3) for dx in range(3)]

    # ---- layout plumbing (lane-dense bf16 slabs in, lane-dense f32 slab out)
    x_nhwc = jnp.transpose(x_nchw, (0, 2, 3, 1))
    x_pad = jnp.pad(x_nhwc, ((0, 0), (1, 1), (1, Wp - W - 1), (0, 0)))   # (N, Hp, Wp, Cin)

    if packed_conv1:
        K1 = LANE
        x_flat = x_pad.reshape(M_img, Cin)
        x_ext = jnp.pad(x_flat, ((Wp + 1, (M_core - M_img) + Wp + 1), (0, 0)))
        # tap-major im2col: column block t holds x[frame_row + shift_t, :Cin]
        xcol = jnp.concatenate(
            [x_ext[(Wp + 1) + s:(Wp + 1) + s + M_core, :] for s in shifts], axis=1)
        x_in = jnp.pad(xcol, ((0, 0), (0, K1 - 9 * Cin))).astype(jnp.bfloat16)
        w1_in = jnp.pad(w1.reshape(9 * Cin, Cout),
                        ((0, K1 - 9 * Cin), (0, COUT - Cout))).astype(jnp.bfloat16)
    else:
        x_flat = jnp.pad(x_pad, ((0, 0), (0, 0), (0, 0), (0, CIN - Cin))).reshape(M_img, CIN)
        x_in = jnp.pad(x_flat, ((LEAD, M_buf - LEAD - M_img), (0, 0))).astype(jnp.bfloat16)
        w1_in = jnp.pad(w1, ((0, 0), (0, 0), (0, CIN - Cin), (0, COUT - Cout))
                        ).reshape(9, CIN, COUT).astype(jnp.bfloat16)

    w2_in = jnp.pad(w2, ((0, 0), (0, 0), (0, COUT - Cout), (0, COUT - Cout))
                    ).reshape(9, COUT, COUT).astype(jnp.bfloat16)

    def pad_vec(v, fill):
        return jnp.pad(v.reshape(1, -1), ((0, 0), (0, COUT - Cout)),
                       constant_values=fill).astype(jnp.float32)

    g1p, be1p = pad_vec(g1, 1.0), pad_vec(be1, 0.0)
    g2p, be2p = pad_vec(g2, 1.0), pad_vec(be2, 0.0)

    # validity mask over the computed rows (1 = real (n,h,w)); bf16 to halve its VMEM footprint
    r = jnp.arange(M_core)
    rem = r % (Hp * Wp)
    hh = rem // Wp
    ww = rem % Wp
    valid = (r < M_img) & (hh >= 1) & (hh <= H) & (ww >= 1) & (ww <= W)
    mask = valid.astype(jnp.bfloat16).reshape(M_core, 1)

    # ---- fused kernel (closes over static geometry only) --------------------
    def kernel(x_ref, w1_ref, g1_ref, be1_ref, w2_ref, g2_ref, be2_ref,
               mask_ref, o_ref, h1_ref):
        msk = mask_ref[...].astype(jnp.float32)                       # (M_core, 1)

        def conv3x3(src_ref, w_ref):
            # 3x3 'SAME' conv over a zero-guarded bf16 frame: each tap is one
            # lane-dense bf16 MXU matmul (f32 accum) on a static shifted view.
            acc = jnp.zeros((M_core, COUT), jnp.float32)
            for t, s in enumerate(shifts):
                acc = acc + jnp.dot(src_ref[pl.ds(LEAD + s, M_core), :], w_ref[t],
                                    preferred_element_type=jnp.float32)
            return acc

        def bn_relu(acc, g_ref, be_ref, apply_mask):
            # Training-mode BatchNorm, single statistics pass (E[x^2]-mean^2),
            # static 1/(N*H*W); gamma*rsqrt(var+eps) fused into one FMA.
            a = acc * msk                                             # zero out non-real rows
            ssum = jnp.sum(a, axis=0, keepdims=True)                  # (1, C)
            ssq = jnp.sum(a * acc, axis=0, keepdims=True)             # (1, C) = sum mask*acc^2
            mean = ssum * inv_n
            var = ssq * inv_n - mean * mean
            scale = g_ref[...] * jax.lax.rsqrt(var + EPS)
            y = jnp.maximum((acc - mean) * scale + be_ref[...], 0.0)
            return y * msk if apply_mask else y

        # ---- conv1 -> BN1 -> ReLU (bias omitted: cancelled by batch-stat BN)
        if packed_conv1:
            acc1 = jnp.dot(x_ref[...], w1_ref[...], preferred_element_type=jnp.float32)
        else:
            acc1 = conv3x3(x_ref, w1_ref)
        h1 = bn_relu(acc1, g1_ref, be1_ref, apply_mask=True).astype(jnp.bfloat16)

        # ---- stage h1 as a zero-guarded bf16 frame for conv2 (aligned stores)
        h1_ref[pl.ds(0, LEAD), :] = jnp.zeros((LEAD, COUT), jnp.bfloat16)
        h1_ref[pl.ds(LEAD + M_core, LEAD), :] = jnp.zeros((LEAD, COUT), jnp.bfloat16)
        h1_ref[pl.ds(LEAD, M_core), :] = h1

        # ---- conv2 -> BN2 -> ReLU, stored as one lane-dense f32 slab
        o_ref[...] = bn_relu(conv3x3(h1_ref, w2_ref), g2_ref, be2_ref, apply_mask=False)

    def full(shape):
        return pl.BlockSpec(shape, lambda i, nd=len(shape): (0,) * nd)

    out_core = pl.pallas_call(
        kernel,
        out_shape=jax.ShapeDtypeStruct((M_core, COUT), jnp.float32),
        grid_spec=pltpu.PrefetchScalarGridSpec(
            num_scalar_prefetch=0,
            grid=(1,),
            in_specs=[
                full(tuple(x_in.shape)),        # conv1 input slab (bf16)
                full(tuple(w1_in.shape)),       # conv1 weights (bf16)
                full((1, COUT)), full((1, COUT)),
                full((9, COUT, COUT)),          # conv2 weights (bf16)
                full((1, COUT)), full((1, COUT)),
                full((M_core, 1)),              # validity mask (bf16)
            ],
            out_specs=full((M_core, COUT)),
            scratch_shapes=[pltpu.VMEM((M_buf, COUT), jnp.bfloat16)],  # bf16 h1 frame
        ),
        compiler_params=pltpu.CompilerParams(
            dimension_semantics=("arbitrary",),
            # Working set at this size is ~3 MiB; 32 MiB leaves headroom on
            # every generation including v7x (64 MiB physical VMEM).
            vmem_limit_bytes=32 * 1024 * 1024,
        ),
    )(x_in, w1_in, g1p, be1p, w2_in, g2p, be2p, mask)

    out_nhwc = out_core[:M_img].reshape(N, Hp, Wp, COUT)[:, 1:H + 1, 1:W + 1, :Cout]
    return jnp.transpose(out_nhwc, (0, 3, 1, 2))


def ref_double_conv(x_nchw, params, mxu_dtype=None):
    """Pure-JAX reference (training-mode BN).  mxu_dtype=jnp.bfloat16
    reproduces the kernel's MXU operand precision (f32 accumulation);
    None keeps the full-f32 semantics of the PyTorch module."""
    w1, b1, g1, be1, w2, b2, g2, be2 = params

    def conv(x, w, b):
        if mxu_dtype is not None:
            x, w = x.astype(mxu_dtype), w.astype(mxu_dtype)
        y = jax.lax.conv_general_dilated(
            x, w, window_strides=(1, 1), padding="SAME",
            dimension_numbers=("NHWC", "HWIO", "NHWC"),
            preferred_element_type=jnp.float32)
        return y + b.reshape(1, 1, 1, -1)

    def bn_relu(y, g, be):
        mean = jnp.mean(y, axis=(0, 1, 2), keepdims=True)
        var = jnp.mean((y - mean) ** 2, axis=(0, 1, 2), keepdims=True)
        yn = (y - mean) * (g.reshape(1, 1, 1, -1) * jax.lax.rsqrt(var + EPS))
        return jnp.maximum(yn + be.reshape(1, 1, 1, -1), 0.0)

    x = jnp.transpose(x_nchw, (0, 2, 3, 1))
    h = bn_relu(conv(x, w1, b1), g1, be1)
    y = bn_relu(conv(h, w2, b2), g2, be2)
    return jnp.transpose(y, (0, 3, 1, 2))


def init_params(key, in_ch, out_ch):
    ks = jax.random.split(key, 8)
    bound1 = 1.0 / jnp.sqrt(in_ch * 9.0)
    bound2 = 1.0 / jnp.sqrt(out_ch * 9.0)
    # conv weights stored directly in HWIO
    w1 = jax.random.uniform(ks[0], (3, 3, in_ch, out_ch), jnp.float32, -bound1, bound1)
    b1 = jax.random.uniform(ks[1], (out_ch,), jnp.float32, -bound1, bound1)
    g1 = 1.0 + 0.1 * jax.random.normal(ks[2], (out_ch,), jnp.float32)
    be1 = 0.1 * jax.random.normal(ks[3], (out_ch,), jnp.float32)
    w2 = jax.random.uniform(ks[4], (3, 3, out_ch, out_ch), jnp.float32, -bound2, bound2)
    b2 = jax.random.uniform(ks[5], (out_ch,), jnp.float32, -bound2, bound2)
    g2 = 1.0 + 0.1 * jax.random.normal(ks[6], (out_ch,), jnp.float32)
    be2 = 0.1 * jax.random.normal(ks[7], (out_ch,), jnp.float32)
    return (w1, b1, g1, be1, w2, b2, g2, be2)


if __name__ == "__main__":
    key = jax.random.PRNGKey(0)
    k_x, k_p = jax.random.split(key)

    N, Cin, Cout, H, W = 2, 4, 8, 16, 16
    x = jax.random.normal(k_x, (N, Cin, H, W), jnp.float32)
    params = init_params(k_p, Cin, Cout)

    out = jax.block_until_ready(double_conv_pallas(x, params))
    assert out.shape == (N, Cout, H, W), out.shape

    # Tight check vs. a reference that feeds the MXU the same bf16 operands
    # (f32 accumulation) -- verifies conv / BN / ReLU / masking structure.
    ref_mxu = jax.block_until_ready(ref_double_conv(x, params, jnp.bfloat16))
    err_mxu = float(jnp.max(jnp.abs(out - ref_mxu)))
    assert jnp.allclose(out, ref_mxu, atol=5e-3, rtol=5e-3), err_mxu

    # Loose check vs. the full-f32 module semantics: bf16 MXU operand feeds
    # only perturb the BN-normalized output at the ~1e-2 level.
    ref_f32 = jax.block_until_ready(ref_double_conv(x, params, None))
    err_f32 = float(jnp.max(jnp.abs(out - ref_f32)))
    assert jnp.allclose(out, ref_f32, atol=5e-2, rtol=5e-2), err_f32

    print("KERNEL_OK")
</pallas_src>

<mosaic_0001>
module attributes {stable_mosaic.version = 11 : i64} {
  func.func @kernel(%arg0: i32, %arg1: memref<656x128xbf16, #tpu.memory_space<vmem>>, %arg2: memref<128x128xbf16, #tpu.memory_space<vmem>>, %arg3: memref<1x128xf32, #tpu.memory_space<vmem>>, %arg4: memref<1x128xf32, #tpu.memory_space<vmem>>, %arg5: memref<9x128x128xbf16, #tpu.memory_space<vmem>>, %arg6: memref<1x128xf32, #tpu.memory_space<vmem>>, %arg7: memref<1x128xf32, #tpu.memory_space<vmem>>, %arg8: memref<656x1xbf16, #tpu.memory_space<vmem>>, %arg9: memref<656x128xf32, #tpu.memory_space<vmem>>, %arg10: memref<720x128xbf16, #tpu.memory_space<vmem>>) attributes {dimension_semantics = [#tpu.dimension_semantics<arbitrary>], iteration_bounds = array<i64: 1>, scalar_prefetch = 0 : i64, scratch_operands = 1 : i64, tpu.core_type = #tpu.core_type<tc>, window_params = [{pipeline_mode = #tpu.pipeline_mode<synchronous>, transform_indices = @transform_0, window_bounds = array<i64: 656, 128>}, {pipeline_mode = #tpu.pipeline_mode<synchronous>, transform_indices = @transform_1, window_bounds = array<i64: 128, 128>}, {pipeline_mode = #tpu.pipeline_mode<synchronous>, transform_indices = @transform_2, window_bounds = array<i64: 1, 128>}, {pipeline_mode = #tpu.pipeline_mode<synchronous>, transform_indices = @transform_3, window_bounds = array<i64: 1, 128>}, {pipeline_mode = #tpu.pipeline_mode<synchronous>, transform_indices = @transform_4, window_bounds = array<i64: 9, 128, 128>}, {pipeline_mode = #tpu.pipeline_mode<synchronous>, transform_indices = @transform_5, window_bounds = array<i64: 1, 128>}, {pipeline_mode = #tpu.pipeline_mode<synchronous>, transform_indices = @transform_6, window_bounds = array<i64: 1, 128>}, {pipeline_mode = #tpu.pipeline_mode<synchronous>, transform_indices = @transform_7, window_bounds = array<i64: 656, 1>}, {pipeline_mode = #tpu.pipeline_mode<synchronous>, transform_indices = @transform_8, window_bounds = array<i64: 656, 128>}]} {
    %c0 = arith.constant 0 : index
    %c0_0 = arith.constant 0 : index
    %0 = vector.load %arg8[%c0, %c0_0] : memref<656x1xbf16, #tpu.memory_space<vmem>>, vector<656x1xbf16>
    %1 = arith.extf %0 : vector<656x1xbf16> to vector<656x1xf32>
    %c0_1 = arith.constant 0 : index
    %c0_2 = arith.constant 0 : index
    %2 = vector.load %arg1[%c0_1, %c0_2] : memref<656x128xbf16, #tpu.memory_space<vmem>>, vector<656x128xbf16>
    %c0_3 = arith.constant 0 : index
    %c0_4 = arith.constant 0 : index
    %3 = vector.load %arg2[%c0_3, %c0_4] : memref<128x128xbf16, #tpu.memory_space<vmem>>, vector<128x128xbf16>
    %cst = arith.constant dense<0.000000e+00> : vector<656x128xf32>
    %4 = tpu.matmul %2, %3, %cst {dimension_numbers = #tpu.dot_dimension_numbers<[1], [0], [0], [1], [0, 0, 1, 1], [], []>} : vector<656x128xbf16>, vector<128x128xbf16>, vector<656x128xf32> -> vector<656x128xf32>
    %5 = vector.broadcast %1 : vector<656x1xf32> to vector<656x128xf32>
    %6 = arith.mulf %4, %5 : vector<656x128xf32>
    %cst_5 = arith.constant dense<0.000000e+00> : vector<128xf32>
    %7 = vector.multi_reduction <add>, %6, %cst_5 [0] : vector<656x128xf32> to vector<128xf32>
    %8 = vector.shape_cast %7 : vector<128xf32> to vector<1x128xf32>
    %9 = arith.mulf %6, %4 : vector<656x128xf32>
    %cst_6 = arith.constant dense<0.000000e+00> : vector<128xf32>
    %10 = vector.multi_reduction <add>, %9, %cst_6 [0] : vector<656x128xf32> to vector<128xf32>
    %11 = vector.shape_cast %10 : vector<128xf32> to vector<1x128xf32>
    %cst_7 = arith.constant 0.001953125 : f32
    %12 = vector.broadcast %cst_7 : f32 to vector<1x128xf32>
    %13 = arith.mulf %8, %12 : vector<1x128xf32>
    %cst_8 = arith.constant 0.001953125 : f32
    %14 = vector.broadcast %cst_8 : f32 to vector<1x128xf32>
    %15 = arith.mulf %11, %14 : vector<1x128xf32>
    %16 = arith.mulf %13, %13 : vector<1x128xf32>
    %17 = arith.subf %15, %16 : vector<1x128xf32>
    %c0_9 = arith.constant 0 : index
    %c0_10 = arith.constant 0 : index
    %18 = vector.load %arg3[%c0_9, %c0_10] : memref<1x128xf32, #tpu.memory_space<vmem>>, vector<1x128xf32>
    %cst_11 = arith.constant 9.99999974E-6 : f32
    %19 = vector.broadcast %cst_11 : f32 to vector<1x128xf32>
    %20 = arith.addf %17, %19 : vector<1x128xf32>
    %21 = math.rsqrt %20 : vector<1x128xf32>
    %22 = arith.mulf %18, %21 : vector<1x128xf32>
    %23 = vector.broadcast %13 : vector<1x128xf32> to vector<656x128xf32>
    %24 = arith.subf %4, %23 : vector<656x128xf32>
    %25 = vector.broadcast %22 : vector<1x128xf32> to vector<656x128xf32>
    %26 = arith.mulf %24, %25 : vector<656x128xf32>
    %c0_12 = arith.constant 0 : index
    %c0_13 = arith.constant 0 : index
    %27 = vector.load %arg4[%c0_12, %c0_13] : memref<1x128xf32, #tpu.memory_space<vmem>>, vector<1x128xf32>
    %28 = vector.broadcast %27 : vector<1x128xf32> to vector<656x128xf32>
    %29 = arith.addf %26, %28 : vector<656x128xf32>
    %cst_14 = arith.constant 0.000000e+00 : f32
    %30 = vector.broadcast %cst_14 : f32 to vector<656x128xf32>
    %31 = arith.maximumf %29, %30 : vector<656x128xf32>
    %32 = vector.broadcast %1 : vector<656x1xf32> to vector<656x128xf32>
    %33 = arith.mulf %31, %32 : vector<656x128xf32>
    %34 = arith.truncf %33 : vector<656x128xf32> to vector<656x128xbf16>
    %cst_15 = arith.constant 0.000000e+00 : bf16
    %35 = vector.broadcast %cst_15 : bf16 to vector<32x128xbf16>
    %c0_16 = arith.constant 0 : index
    %c0_17 = arith.constant 0 : index
    %36 = vector.load %arg10[%c0_16, %c0_17] : memref<720x128xbf16, #tpu.memory_space<vmem>>, vector<32x128xbf16>
    tpu.vector_store %arg10[%c0_16, %c0_17], %35 {strides = array<i32>} : memref<720x128xbf16, #tpu.memory_space<vmem>>, vector<32x128xbf16>,
    %cst_18 = arith.constant 0.000000e+00 : bf16
    %37 = vector.broadcast %cst_18 : bf16 to vector<32x128xbf16>
    %c688 = arith.constant 688 : index
    %c0_19 = arith.constant 0 : index
    %38 = vector.load %arg10[%c688, %c0_19] : memref<720x128xbf16, #tpu.memory_space<vmem>>, vector<32x128xbf16>
    tpu.vector_store %arg10[%c688, %c0_19], %37 {strides = array<i32>} : memref<720x128xbf16, #tpu.memory_space<vmem>>, vector<32x128xbf16>,
    %c32 = arith.constant 32 : index
    %c0_20 = arith.constant 0 : index
    %39 = vector.load %arg10[%c32, %c0_20] : memref<720x128xbf16, #tpu.memory_space<vmem>>, vector<656x128xbf16>
    tpu.vector_store %arg10[%c32, %c0_20], %34 {strides = array<i32>} : memref<720x128xbf16, #tpu.memory_space<vmem>>, vector<656x128xbf16>,
    %cst_21 = arith.constant 0.000000e+00 : f32
    %40 = vector.broadcast %cst_21 : f32 to vector<656x128xf32>
    %c13 = arith.constant 13 : index
    %c0_22 = arith.constant 0 : index
    %41 = vector.load %arg10[%c13, %c0_22] : memref<720x128xbf16, #tpu.memory_space<vmem>>, vector<656x128xbf16>
    %c0_23 = arith.constant 0 : index
    %c0_24 = arith.constant 0 : index
    %c0_25 = arith.constant 0 : index
    %42 = vector.load %arg5[%c0_23, %c0_24, %c0_25] : memref<9x128x128xbf16, #tpu.memory_space<vmem>>, vector<1x128x128xbf16>
    %43 = vector.shape_cast %42 : vector<1x128x128xbf16> to vector<128x128xbf16>
    %cst_26 = arith.constant dense<0.000000e+00> : vector<656x128xf32>
    %44 = tpu.matmul %41, %43, %cst_26 {dimension_numbers = #tpu.dot_dimension_numbers<[1], [0], [0], [1], [0, 0, 1, 1], [], []>} : vector<656x128xbf16>, vector<128x128xbf16>, vector<656x128xf32> -> vector<656x128xf32>
    %45 = arith.addf %40, %44 : vector<656x128xf32>
    %c14 = arith.constant 14 : index
    %c0_27 = arith.constant 0 : index
    %46 = vector.load %arg10[%c14, %c0_27] : memref<720x128xbf16, #tpu.memory_space<vmem>>, vector<656x128xbf16>
    %c1 = arith.constant 1 : index
    %c0_28 = arith.constant 0 : index
    %c0_29 = arith.constant 0 : index
    %47 = vector.load %arg5[%c1, %c0_28, %c0_29] : memref<9x128x128xbf16, #tpu.memory_space<vmem>>, vector<1x128x128xbf16>
    %48 = vector.shape_cast %47 : vector<1x128x128xbf16> to vector<128x128xbf16>
    %cst_30 = arith.constant dense<0.000000e+00> : vector<656x128xf32>
    %49 = tpu.matmul %46, %48, %cst_30 {dimension_numbers = #tpu.dot_dimension_numbers<[1], [0], [0], [1], [0, 0, 1, 1], [], []>} : vector<656x128xbf16>, vector<128x128xbf16>, vector<656x128xf32> -> vector<656x128xf32>
    %50 = arith.addf %45, %49 : vector<656x128xf32>
    %c15 = arith.constant 15 : index
    %c0_31 = arith.constant 0 : index
    %51 = vector.load %arg10[%c15, %c0_31] : memref<720x128xbf16, #tpu.memory_space<vmem>>, vector<656x128xbf16>
    %c2 = arith.constant 2 : index
    %c0_32 = arith.constant 0 : index
    %c0_33 = arith.constant 0 : index
    %52 = vector.load %arg5[%c2, %c0_32, %c0_33] : memref<9x128x128xbf16, #tpu.memory_space<vmem>>, vector<1x128x128xbf16>
    %53 = vector.shape_cast %52 : vector<1x128x128xbf16> to vector<128x128xbf16>
    %cst_34 = arith.constant dense<0.000000e+00> : vector<656x128xf32>
    %54 = tpu.matmul %51, %53, %cst_34 {dimension_numbers = #tpu.dot_dimension_numbers<[1], [0], [0], [1], [0, 0, 1, 1], [], []>} : vector<656x128xbf16>, vector<128x128xbf16>, vector<656x128xf32> -> vector<656x128xf32>
    %55 = arith.addf %50, %54 : vector<656x128xf32>
    %c31 = arith.constant 31 : index
    %c0_35 = arith.constant 0 : index
    %56 = vector.load %arg10[%c31, %c0_35] : memref<720x128xbf16, #tpu.memory_space<vmem>>, vector<656x128xbf16>
    %c3 = arith.constant 3 : index
    %c0_36 = arith.constant 0 : index
    %c0_37 = arith.constant 0 : index
    %57 = vector.load %arg5[%c3, %c0_36, %c0_37] : memref<9x128x128xbf16, #tpu.memory_space<vmem>>, vector<1x128x128xbf16>
    %58 = vector.shape_cast %57 : vector<1x128x128xbf16> to vector<128x128xbf16>
    %cst_38 = arith.constant dense<0.000000e+00> : vector<656x128xf32>
    %59 = tpu.matmul %56, %58, %cst_38 {dimension_numbers = #tpu.dot_dimension_numbers<[1], [0], [0], [1], [0, 0, 1, 1], [], []>} : vector<656x128xbf16>, vector<128x128xbf16>, vector<656x128xf32> -> vector<656x128xf32>
    %60 = arith.addf %55, %59 : vector<656x128xf32>
    %c32_39 = arith.constant 32 : index
    %c0_40 = arith.constant 0 : index
    %61 = vector.load %arg10[%c32_39, %c0_40] : memref<720x128xbf16, #tpu.memory_space<vmem>>, vector<656x128xbf16>
    %c4 = arith.constant 4 : index
    %c0_41 = arith.constant 0 : index
    %c0_42 = arith.constant 0 : index
    %62 = vector.load %arg5[%c4, %c0_41, %c0_42] : memref<9x128x128xbf16, #tpu.memory_space<vmem>>, vector<1x128x128xbf16>
    %63 = vector.shape_cast %62 : vector<1x128x128xbf16> to vector<128x128xbf16>
    %cst_43 = arith.constant dense<0.000000e+00> : vector<656x128xf32>
    %64 = tpu.matmul %61, %63, %cst_43 {dimension_numbers = #tpu.dot_dimension_numbers<[1], [0], [0], [1], [0, 0, 1, 1], [], []>} : vector<656x128xbf16>, vector<128x128xbf16>, vector<656x128xf32> -> vector<656x128xf32>
    %65 = arith.addf %60, %64 : vector<656x128xf32>
    %c33 = arith.constant 33 : index
    %c0_44 = arith.constant 0 : index
    %66 = vector.load %arg10[%c33, %c0_44] : memref<720x128xbf16, #tpu.memory_space<vmem>>, vector<656x128xbf16>
    %c5 = arith.constant 5 : index
    %c0_45 = arith.constant 0 : index
    %c0_46 = arith.constant 0 : index
    %67 = vector.load %arg5[%c5, %c0_45, %c0_46] : memref<9x128x128xbf16, #tpu.memory_space<vmem>>, vector<1x128x128xbf16>
    %68 = vector.shape_cast %67 : vector<1x128x128xbf16> to vector<128x128xbf16>
    %cst_47 = arith.constant dense<0.000000e+00> : vector<656x128xf32>
    %69 = tpu.matmul %66, %68, %cst_47 {dimension_numbers = #tpu.dot_dimension_numbers<[1], [0], [0], [1], [0, 0, 1, 1], [], []>} : vector<656x128xbf16>, vector<128x128xbf16>, vector<656x128xf32> -> vector<656x128xf32>
    %70 = arith.addf %65, %69 : vector<656x128xf32>
    %c49 = arith.constant 49 : index
    %c0_48 = arith.constant 0 : index
    %71 = vector.load %arg10[%c49, %c0_48] : memref<720x128xbf16, #tpu.memory_space<vmem>>, vector<656x128xbf16>
    %c6 = arith.constant 6 : index
    %c0_49 = arith.constant 0 : index
    %c0_50 = arith.constant 0 : index
    %72 = vector.load %arg5[%c6, %c0_49, %c0_50] : memref<9x128x128xbf16, #tpu.memory_space<vmem>>, vector<1x128x128xbf16>
    %73 = vector.shape_cast %72 : vector<1x128x128xbf16> to vector<128x128xbf16>
    %cst_51 = arith.constant dense<0.000000e+00> : vector<656x128xf32>
    %74 = tpu.matmul %71, %73, %cst_51 {dimension_numbers = #tpu.dot_dimension_numbers<[1], [0], [0], [1], [0, 0, 1, 1], [], []>} : vector<656x128xbf16>, vector<128x128xbf16>, vector<656x128xf32> -> vector<656x128xf32>
    %75 = arith.addf %70, %74 : vector<656x128xf32>
    %c50 = arith.constant 50 : index
    %c0_52 = arith.constant 0 : index
    %76 = vector.load %arg10[%c50, %c0_52] : memref<720x128xbf16, #tpu.memory_space<vmem>>, vector<656x128xbf16>
    %c7 = arith.constant 7 : index
    %c0_53 = arith.constant 0 : index
    %c0_54 = arith.constant 0 : index
    %77 = vector.load %arg5[%c7, %c0_53, %c0_54] : memref<9x128x128xbf16, #tpu.memory_space<vmem>>, vector<1x128x128xbf16>
    %78 = vector.shape_cast %77 : vector<1x128x128xbf16> to vector<128x128xbf16>
    %cst_55 = arith.constant dense<0.000000e+00> : vector<656x128xf32>
    %79 = tpu.matmul %76, %78, %cst_55 {dimension_numbers = #tpu.dot_dimension_numbers<[1], [0], [0], [1], [0, 0, 1, 1], [], []>} : vector<656x128xbf16>, vector<128x128xbf16>, vector<656x128xf32> -> vector<656x128xf32>
    %80 = arith.addf %75, %79 : vector<656x128xf32>
    %c51 = arith.constant 51 : index
    %c0_56 = arith.constant 0 : index
    %81 = vector.load %arg10[%c51, %c0_56] : memref<720x128xbf16, #tpu.memory_space<vmem>>, vector<656x128xbf16>
    %c8 = arith.constant 8 : index
    %c0_57 = arith.constant 0 : index
    %c0_58 = arith.constant 0 : index
    %82 = vector.load %arg5[%c8, %c0_57, %c0_58] : memref<9x128x128xbf16, #tpu.memory_space<vmem>>, vector<1x128x128xbf16>
    %83 = vector.shape_cast %82 : vector<1x128x128xbf16> to vector<128x128xbf16>
    %cst_59 = arith.constant dense<0.000000e+00> : vector<656x128xf32>
    %84 = tpu.matmul %81, %83, %cst_59 {dimension_numbers = #tpu.dot_dimension_numbers<[1], [0], [0], [1], [0, 0, 1, 1], [], []>} : vector<656x128xbf16>, vector<128x128xbf16>, vector<656x128xf32> -> vector<656x128xf32>
    %85 = arith.addf %80, %84 : vector<656x128xf32>
    %86 = vector.broadcast %1 : vector<656x1xf32> to vector<656x128xf32>
    %87 = arith.mulf %85, %86 : vector<656x128xf32>
    %cst_60 = arith.constant dense<0.000000e+00> : vector<128xf32>
    %88 = vector.multi_reduction <add>, %87, %cst_60 [0] : vector<656x128xf32> to vector<128xf32>
    %89 = vector.shape_cast %88 : vector<128xf32> to vector<1x128xf32>
    %90 = arith.mulf %87, %85 : vector<656x128xf32>
    %cst_61 = arith.constant dense<0.000000e+00> : vector<128xf32>
    %91 = vector.multi_reduction <add>, %90, %cst_61 [0] : vector<656x128xf32> to vector<128xf32>
    %92 = vector.shape_cast %91 : vector<128xf32> to vector<1x128xf32>
    %cst_62 = arith.constant 0.001953125 : f32
    %93 = vector.broadcast %cst_62 : f32 to vector<1x128xf32>
    %94 = arith.mulf %89, %93 : vector<1x128xf32>
    %cst_63 = arith.constant 0.001953125 : f32
    %95 = vector.broadcast %cst_63 : f32 to vector<1x128xf32>
    %96 = arith.mulf %92, %95 : vector<1x128xf32>
    %97 = arith.mulf %94, %94 : vector<1x128xf32>
    %98 = arith.subf %96, %97 : vector<1x128xf32>
    %c0_64 = arith.constant 0 : index
    %c0_65 = arith.constant 0 : index
    %99 = vector.load %arg6[%c0_64, %c0_65] : memref<1x128xf32, #tpu.memory_space<vmem>>, vector<1x128xf32>
    %cst_66 = arith.constant 9.99999974E-6 : f32
    %100 = vector.broadcast %cst_66 : f32 to vector<1x128xf32>
    %101 = arith.addf %98, %100 : vector<1x128xf32>
    %102 = math.rsqrt %101 : vector<1x128xf32>
    %103 = arith.mulf %99, %102 : vector<1x128xf32>
    %104 = vector.broadcast %94 : vector<1x128xf32> to vector<656x128xf32>
    %105 = arith.subf %85, %104 : vector<656x128xf32>
    %106 = vector.broadcast %103 : vector<1x128xf32> to vector<656x128xf32>
    %107 = arith.mulf %105, %106 : vector<656x128xf32>
    %c0_67 = arith.constant 0 : index
    %c0_68 = arith.constant 0 : index
    %108 = vector.load %arg7[%c0_67, %c0_68] : memref<1x128xf32, #tpu.memory_space<vmem>>, vector<1x128xf32>
    %109 = vector.broadcast %108 : vector<1x128xf32> to vector<656x128xf32>
    %110 = arith.addf %107, %109 : vector<656x128xf32>
    %cst_69 = arith.constant 0.000000e+00 : f32
    %111 = vector.broadcast %cst_69 : f32 to vector<656x128xf32>
    %112 = arith.maximumf %110, %111 : vector<656x128xf32>
    %c0_70 = arith.constant 0 : index
    %c0_71 = arith.constant 0 : index
    %113 = vector.load %arg9[%c0_70, %c0_71] : memref<656x128xf32, #tpu.memory_space<vmem>>, vector<656x128xf32>
    tpu.vector_store %arg9[%c0_70, %c0_71], %112 {strides = array<i32>} : memref<656x128xf32, #tpu.memory_space<vmem>>, vector<656x128xf32>,
    return
  }
  func.func @transform_0(%arg0: i32) -> (i32, i32) {
    %c0_i32 = arith.constant 0 : i32
    %c0_i32_0 = arith.constant 0 : i32
    %c0_i32_1 = arith.constant 0 : i32
    return %c0_i32, %c0_i32_0 : i32, i32
  }
  func.func @transform_1(%arg0: i32) -> (i32, i32) {
    %c0_i32 = arith.constant 0 : i32
    %c0_i32_0 = arith.constant 0 : i32
    %c0_i32_1 = arith.constant 0 : i32
    return %c0_i32, %c0_i32_0 : i32, i32
  }
  func.func @transform_2(%arg0: i32) -> (i32, i32) {
    %c0_i32 = arith.constant 0 : i32
    %c0_i32_0 = arith.constant 0 : i32
    %c0_i32_1 = arith.constant 0 : i32
    return %c0_i32, %c0_i32_0 : i32, i32
  }
  func.func @transform_3(%arg0: i32) -> (i32, i32) {
    %c0_i32 = arith.constant 0 : i32
    %c0_i32_0 = arith.constant 0 : i32
    %c0_i32_1 = arith.constant 0 : i32
    return %c0_i32, %c0_i32_0 : i32, i32
  }
  func.func @transform_4(%arg0: i32) -> (i32, i32, i32) {
    %c0_i32 = arith.constant 0 : i32
    %c0_i32_0 = arith.constant 0 : i32
    %c0_i32_1 = arith.constant 0 : i32
    %c0_i32_2 = arith.constant 0 : i32
    return %c0_i32, %c0_i32_0, %c0_i32_1 : i32, i32, i32
  }
  func.func @transform_5(%arg0: i32) -> (i32, i32) {
    %c0_i32 = arith.constant 0 : i32
    %c0_i32_0 = arith.constant 0 : i32
    %c0_i32_1 = arith.constant 0 : i32
    return %c0_i32, %c0_i32_0 : i32, i32
  }
  func.func @transform_6(%arg0: i32) -> (i32, i32) {
    %c0_i32 = arith.constant 0 : i32
    %c0_i32_0 = arith.constant 0 : i32
    %c0_i32_1 = arith.constant 0 : i32
    return %c0_i32, %c0_i32_0 : i32, i32
  }
  func.func @transform_7(%arg0: i32) -> (i32, i32) {
    %c0_i32 = arith.constant 0 : i32
    %c0_i32_0 = arith.constant 0 : i32
    %c0_i32_1 = arith.constant 0 : i32
    return %c0_i32, %c0_i32_0 : i32, i32
  }
  func.func @transform_8(%arg0: i32) -> (i32, i32) {
    %c0_i32 = arith.constant 0 : i32
    %c0_i32_0 = arith.constant 0 : i32
    %c0_i32_1 = arith.constant 0 : i32
    return %c0_i32, %c0_i32_0 : i32, i32
  }
}

</mosaic_0001>

<bundles_post_ra>
// kernel: tpu_custom_call.1
= control target key start
LH: loop header
LB: loop body
LE: loop exit
PB: predicated region body
PF: predicated region fallthrough
CT: control target
= control target key end

     0   :  { %13 = vsyncpa [#allocation4], 0  ;;  %s18351_s0 = inlined_call_operand.vmem [shape: bf16[656,128], index: 0, kind: input, shape index: {}]   ;;  %s18352_s1 = inlined_call_operand.hbm [shape: bf16[128,128], index: 1, kind: input, shape index: {}]   ;;  %s18353_s2 = inlined_call_operand.vmem [shape: f32[1,128], index: 2, kind: input, shape index: {}]   ;;  %s18354_s3 = inlined_call_operand.vmem [shape: f32[1,128], index: 3, kind: input, shape index: {}]   ;;  %s18355_s4 = inlined_call_operand.hbm [shape: bf16[9,128,128], index: 4, kind: input, shape index: {}]   ;;  %s18356_s5 = inlined_call_operand.vmem [shape: f32[1,128], index: 5, kind: input, shape index: {}]   ;;  %s18357_s6 = inlined_call_operand.vmem [shape: f32[1,128], index: 6, kind: input, shape index: {}]   ;;  %s18358_s7 = inlined_call_operand.vmem [shape: bf16[656,1], index: 7, kind: input, shape index: {}]   ;;  %s18359_s8 = inlined_call_operand.hbm [shape: f32[656,128], index: 8, kind: output, shape index: {}]  }
   0x1   :  { %14 = vsyncpa [#allocation7], 0 }
   0x2   :  { %15 = vsyncpa [#allocation5], 0  ;;  %s22_s29 = sshll.u32 %s18352_s1, 4  ;;  %s12127_s30 = smov [#allocation3]   ;;  %s23_s29 = int_to_ptr.hbm [resolvable:$true] %s22_s29 }
   0x3   :  { %s24_s9 = sshll.u32 %s12127_s30, 4  ;;  %s39_s12 = sshll.u32 %s18355_s4, 4  ;;  %s25_s9 = int_to_ptr.vmem [resolvable:$true] %s24_s9  ;;  %s40_s12 = int_to_ptr.hbm [resolvable:$true] %s39_s12 }
   0x4   :  { %s12128_s13 = smov 64   ;;  %s12129_s14 = smov 4  }
   0x5   :  { %30 = dma.hbm_to_vmem [thread:$0]  %s23_s29, 1024, %s25_s9, [#allocation4], %s12128_s13, %s12128_s13, %s12129_s14  }
   0x6   :  { %s12130_s15 = smov [#allocation6]  }
   0x7   :  { %s41_s16 = sshll.u32 %s12130_s15, 4  ;;  %s42_s16 = int_to_ptr.vmem [resolvable:$true] %s41_s16 }
   0x8   :  { %47 = dma.hbm_to_vmem [thread:$0]  %s40_s12, 9216, %s42_s16, [#allocation7], %s12128_s13, %s12128_s13, %s12129_s14  }
   0x9   :  { %12121 = dma.done.wait [#allocation4], 1024  }
   0xa   :  { %12122 = vsyncadd [#allocation4], 4294966272 }
   0xb   :  { %12123 = dma.done.wait [#allocation7], 9216  }
   0xc   :  { %12124 = vsyncadd [#allocation7], 4294958080  ;;  %v10613_v0 = vld [vmem:[#allocation3 + $0x38] sm:$0xff]  ;;  %v10612_v1 = vld [vmem:[#allocation3 + $0x30] sm:$0xff]  ;;  %v12131_v2 = vmov 0   ;;  %vm2512_vm3 = vcmask 1044480  }
   0xd   :  { %619 = vmatpush.bf16.msra.mxu0 %v10613_v0  ;;  %11674 = vmatpush.bf16.msra.mxu2 %v10613_v0  ;;  %v10808_v3 = vld [vmem:[%s18358_s7] sm:$0xff]   ;;  %2098 = vst [vmem:[#allocation2 + $0x4] sm:$0xf] %v12131_v2  ;;  %v10611_v6 = vld [vmem:[#allocation3 + $0x28] sm:$0xff]  ;;  %v10610_v8 = vld [vmem:[#allocation3 + $0x20] sm:$0xff]  ;;  %vm7752_vm8 = vcmask 1046528  }
   0xe   :  { %11779 = vset.pattern.permute.xlu0 %v12131_v2  ;;  %11790 = vset.pattern.permute.xlu1 %v12131_v2  ;;  %v10809_v4 = vunpack.c.l.bf16 %v10808_v3  ;;  %v10810_v5 = vunpack.c.h.bf16 %v10808_v3  ;;  %2099 = vst [vmem:[#allocation2 + $0x8] sm:$0xf] %v12131_v2  ;;  %v10609_v9 = vld [vmem:[#allocation3 + $0x18] sm:$0xff]  ;;  %v11344_v10 = vld [vmem:[%s18358_s7 + $0x8] sm:$0xff]   ;;  %v10608_v11 = vld [vmem:[#allocation3 + $0x10] sm:$0xff]  ;;  %s9583_s17 = sshll.u32 %s18359_s8, 4  ;;  %s9584_s17 = int_to_ptr.hbm [resolvable:$true] %s9583_s17 }
   0xf   :  { %11801 = vset.pattern.permute.xlu2 %v12131_v2  ;;  %2100 = vst [vmem:[#allocation2 + $0xc] sm:$0xf] %v12131_v2  ;;  %v10813_v12 = vunpack.c.l.bf16 %v11344_v10  ;;  %v10814_v13 = vunpack.c.h.bf16 %v11344_v10  ;;  %v10607_v15 = vld [vmem:[#allocation3 + $0x8] sm:$0xff]  ;;  %v10606_v16 = vld [vmem:[#allocation3] sm:$0xff]  ;;  %v10565_v17 = vld [vmem:[%s18351_s0] sm:$0xff]  ;;  %s12133_s18 = smov 128  }
  0x10   :  { %v11780_v7 = vpack.i.bf16 %v10810_v5, %v10809_v4  ;;  %2101 = vst [vmem:[#allocation2 + $0x158] sm:$0xf] %v12131_v2  ;;  %v10586_v18 = vld [vmem:[%s18351_s0 + $0xa8] sm:$0xff]  ;;  %v11345_v19 = vld [vmem:[%s18358_s7 + $0x10] sm:$0xff]   ;;  %v11346_v25 = vld [vmem:[%s18358_s7 + $0x18] sm:$0xff]   ;;  %s12134_s19 = smov 8  }
  0x11   :  { %620 = vmatpush.bf16.msra.mxu0 %v10612_v1  ;;  %11675 = vmatpush.bf16.msra.mxu2 %v10612_v1  ;;  %2102 = vst [vmem:[#allocation2 + $0x15c] sm:$0xf] %v12131_v2  ;;  %v11785_v14 = vpack.i.bf16 %v10814_v13, %v10813_v12  ;;  %v10817_v20 = vunpack.c.l.bf16 %v11345_v19  ;;  %v10818_v21 = vunpack.c.h.bf16 %v11345_v19  ;;  %v10566_v23 = vld [vmem:[%s18351_s0 + $0x8] sm:$0xff]  ;;  %v10587_v24 = vld [vmem:[%s18351_s0 + $0xb0] sm:$0xff]  ;;  %v10821_v27 = vunpack.c.l.bf16 %v11346_v25  ;;  %v10588_v34 = vld [vmem:[%s18351_s0 + $0xb8] sm:$0xff] }
  0x12   :  { %11781 = vperm.xlu0 %11779, %v11780_v7   ;;  %2103 = vst [vmem:[#allocation2 + $0x160] sm:$0xf] %v12131_v2  ;;  %v11349_v26 = vld [vmem:[%s18358_s7 + $0x30] sm:$0xff]   ;;  %v10822_v28 = vunpack.c.h.bf16 %v11346_v25  ;;  %v11352_v35 = vld [vmem:[%s18358_s7 + $0x48] sm:$0xff]   ;;  %v11350_v36 = vld [vmem:[%s18358_s7 + $0x38] sm:$0xff]  }
  0x13   :  { %v11791_v22 = vpack.i.bf16 %v10818_v21, %v10817_v20  ;;  %v10833_v29 = vunpack.c.l.bf16 %v11349_v26  ;;  %v10834_v30 = vunpack.c.h.bf16 %v11349_v26  ;;  %v10567_v33 = vld [vmem:[%s18351_s0 + $0x10] sm:$0xff]  ;;  %v10845_v37 = vunpack.c.l.bf16 %v11352_v35  ;;  %v11355_v41 = vld [vmem:[%s18358_s7 + $0x60] sm:$0xff]   ;;  %v10568_v47 = vld [vmem:[%s18351_s0 + $0x18] sm:$0xff] }
  0x14   :  { %v11796_v31 = vpack.i.bf16 %v10822_v28, %v10821_v27  ;;  %v10846_v38 = vunpack.c.h.bf16 %v11352_v35  ;;  %v10837_v39 = vunpack.c.l.bf16 %v11350_v36  ;;  %v10838_v40 = vunpack.c.h.bf16 %v11350_v36  ;;  %v10589_v48 = vld [vmem:[%s18351_s0 + $0xc0] sm:$0xff]  ;;  %v11353_v49 = vld [vmem:[%s18358_s7 + $0x50] sm:$0xff]   ;;  %v11358_v50 = vld [vmem:[%s18358_s7 + $0x78] sm:$0xff]  }
  0x15   :  { %621 = vmatpush.bf16.msra.mxu0 %v10611_v6  ;;  %11676 = vmatpush.bf16.msra.mxu2 %v10611_v6  ;;  %v11812_v32 = vpack.i.bf16 %v10834_v30, %v10833_v29  ;;  %v10857_v44 = vunpack.c.l.bf16 %v11355_v41  ;;  %v10858_v45 = vunpack.c.h.bf16 %v11355_v41  ;;  %v10849_v51 = vunpack.c.l.bf16 %v11353_v49  ;;  %v11356_v55 = vld [vmem:[%s18358_s7 + $0x68] sm:$0xff]   ;;  %v11361_v56 = vld [vmem:[%s18358_s7 + $0x90] sm:$0xff]   ;;  %v10569_v1 = vld [vmem:[%s18351_s0 + $0x20] sm:$0xff] }
  0x16   :  { %11792 = vperm.xlu1 %11790, %v11791_v22   ;;  %v11827_v42 = vpack.i.bf16 %v10846_v38, %v10845_v37  ;;  %v11817_v43 = vpack.i.bf16 %v10838_v40, %v10837_v39  ;;  %v10850_v52 = vunpack.c.h.bf16 %v11353_v49  ;;  %v10869_v53 = vunpack.c.l.bf16 %v11358_v50  ;;  %v10590_v2 = vld [vmem:[%s18351_s0 + $0xc8] sm:$0xff]  ;;  %v11347_v3 = vld [vmem:[%s18358_s7 + $0x20] sm:$0xff]   ;;  %v11365_v26 = vld [vmem:[%s18358_s7 + $0xb0] sm:$0xff]  }
  0x17   :  { %v11842_v46 = vpack.i.bf16 %v10858_v45, %v10857_v44  ;;  %v10870_v54 = vunpack.c.h.bf16 %v11358_v50  ;;  %v10861_v59 = vunpack.c.l.bf16 %v11356_v55  ;;  %v10862_v60 = vunpack.c.h.bf16 %v11356_v55  ;;  %v11359_v7 = vld [vmem:[%s18358_s7 + $0x80] sm:$0xff]   ;;  %v10571_v36 = vld [vmem:[%s18351_s0 + $0x30] sm:$0xff]  ;;  %v10592_v37 = vld [vmem:[%s18351_s0 + $0xd8] sm:$0xff] }
  0x18   :  { %v11832_v57 = vpack.i.bf16 %v10850_v52, %v10849_v51  ;;  %v10881_v61 = vunpack.c.l.bf16 %v11361_v56  ;;  %v10882_v62 = vunpack.c.h.bf16 %v11361_v56  ;;  %v10825_v4 = vunpack.c.l.bf16 %v11347_v3  ;;  %v11351_v25 = vld [vmem:[%s18358_s7 + $0x40] sm:$0xff]   ;;  %v11357_v39 = vld [vmem:[%s18358_s7 + $0x70] sm:$0xff]  }
  0x19   :  { %622 = vmatpush.bf16.msra.mxu0 %v10610_v8  ;;  %11677 = vmatpush.bf16.msra.mxu2 %v10610_v8  ;;  %v11857_v58 = vpack.i.bf16 %v10870_v54, %v10869_v53  ;;  %v11847_v63 = vpack.i.bf16 %v10862_v60, %v10861_v59  ;;  %v10826_v5 = vunpack.c.h.bf16 %v11347_v3  ;;  %v11364_v8 = vld [vmem:[%s18358_s7 + $0xa8] sm:$0xff]   ;;  %v10873_v10 = vunpack.c.l.bf16 %v11359_v7  ;;  %v11363_v49 = vld [vmem:[%s18358_s7 + $0xa0] sm:$0xff]  }
  0x1a   :  { %11786 = vperm.xlu0 %11779, %v11785_v14   ;;  %v11872_v0 = vpack.i.bf16 %v10882_v62, %v10881_v61  ;;  %v10893_v12 = vunpack.c.l.bf16 %v11364_v8  ;;  %v10894_v13 = vunpack.c.h.bf16 %v11364_v8  ;;  %v10841_v27 = vunpack.c.l.bf16 %v11351_v25  ;;  %v11367_v50 = vld [vmem:[%s18358_s7 + $0xc0] sm:$0xff]   ;;  %v10594_v61 = vld [vmem:[%s18351_s0 + $0xe8] sm:$0xff] }
  0x1b   :  { %v11802_v6 = vpack.i.bf16 %v10826_v5, %v10825_v4  ;;  %v10842_v28 = vunpack.c.h.bf16 %v11351_v25  ;;  %v10897_v29 = vunpack.c.l.bf16 %v11365_v26  ;;  %v10898_v30 = vunpack.c.h.bf16 %v11365_v26  ;;  %v10573_v60 = vld [vmem:[%s18351_s0 + $0x40] sm:$0xff] }
  0x1c   :  { %v10865_v40 = vunpack.c.l.bf16 %v11357_v39  ;;  %v10866_v41 = vunpack.c.h.bf16 %v11357_v39  ;;  %v10889_v51 = vunpack.c.l.bf16 %v11363_v49  ;;  %v10890_v52 = vunpack.c.h.bf16 %v11363_v49  ;;  %v10597_v25 = vld [vmem:[%s18351_s0 + $0x100] sm:$0xff] }
  0x1d   :  { %623 = vmatpush.bf16.msra.mxu0 %v10609_v9  ;;  %11678 = vmatpush.bf16.msra.mxu2 %v10609_v9  ;;  %v11348_v9 = vld [vmem:[%s18358_s7 + $0x28] sm:$0xff]   ;;  %v10905_v53 = vunpack.c.l.bf16 %v11367_v50  ;;  %v10906_v54 = vunpack.c.h.bf16 %v11367_v50  ;;  %vm2902_vm4 = vsmask.f32 5376  ;;  %vm3604_vm5 = vsmask.f32 4352 }
  0x1e   :  { %11797 = vperm.xlu1 %11790, %v11796_v31   ;;  %11803 = vperm.xlu2 %11801, %v11802_v6   ;;  %v10829_v14 = vunpack.c.l.bf16 %v11348_v9  ;;  %v11822_v31 = vpack.i.bf16 %v10842_v28, %v10841_v27  ;;  %v11882_v55 = vpack.i.bf16 %v10890_v52, %v10889_v51  ;;  %v10574_v6 = vld [vmem:[%s18351_s0 + $0x48] sm:$0xff]  ;;  %v11371_v28 = vld [vmem:[%s18358_s7 + $0xe0] sm:$0xff]   ;;  %vm5988_vm6 = vsmask.f32 7424 }
  0x1f   :  { %v11902_v56 = vpack.i.bf16 %v10906_v54, %v10905_v53  ;;  %v10578_v52 = vld [vmem:[%s18351_s0 + $0x68] sm:$0xff]  ;;  %v10599_v53 = vld [vmem:[%s18351_s0 + $0x110] sm:$0xff]  ;;  %vm8242_vm7 = vsmask.f32 6400 }
  0x21   :  { %624 = vmatpush.bf16.msra.mxu0 %v10608_v11  ;;  %11679 = vmatpush.bf16.msra.mxu2 %v10608_v11  ;;  %v10874_v11 = vunpack.c.h.bf16 %v11359_v7  ;;  %v10595_v7 = vld [vmem:[%s18351_s0 + $0xf0] sm:$0xff] }
  0x22   :  { %11813 = vperm.xlu0 %11779, %v11812_v32   ;;  %v11892_v32 = vpack.i.bf16 %v10898_v30, %v10897_v29  ;;  %v10921_v30 = vunpack.c.l.bf16 %v11371_v28 }
  0x25   :  { %625 = vmatpush.bf16.msra.mxu0 %v10607_v15  ;;  %11680 = vmatpush.bf16.msra.mxu2 %v10607_v15  ;;  %v10830_v15 = vunpack.c.h.bf16 %v11348_v9 }
  0x26   :  { %11818 = vperm.xlu1 %11790, %v11817_v43   ;;  %v11360_v43 = vld [vmem:[%s18358_s7 + $0x88] sm:$0xff]  }
  0x27   :  { %v11807_v19 = vpack.i.bf16 %v10830_v15, %v10829_v14  ;;  %v10877_v44 = vunpack.c.l.bf16 %v11360_v43  ;;  %v10878_v45 = vunpack.c.h.bf16 %v11360_v43  ;;  %v11370_v15 = vld [vmem:[%s18358_s7 + $0xd8] sm:$0xff]  }
  0x28   :  { %v11374_v43 = vld [vmem:[%s18358_s7 + $0xf8] sm:$0xff]  }
  0x29   :  { %626 = vmatpush.bf16.msra.mxu0 %v10606_v16  ;;  %11681 = vmatpush.bf16.msra.mxu2 %v10606_v16  ;;  %v11362_v16 = vld [vmem:[%s18358_s7 + $0x98] sm:$0xff]  }
  0x2a   :  { %11828 = vperm.xlu0 %11779, %v11827_v42   ;;  %v10885_v20 = vunpack.c.l.bf16 %v11362_v16  ;;  %v10886_v21 = vunpack.c.h.bf16 %v11362_v16  ;;  %11808 = vperm.xlu2 %11801, %v11807_v19   ;;  %v11852_v42 = vpack.i.bf16 %v10866_v41, %v10865_v40  ;;  %v10917_v16 = vunpack.c.l.bf16 %v11370_v15 }
  0x2c   :  { %627 = vmatmul.bf16.vlgmr.msra.gmra.mxu0 %v10565_v17  ;;  %732 = vmatmul.bf16.vlgmr.msra.gmra.mxu2 %v10586_v18  ;;  %v11862_v17 = vpack.i.bf16 %v10874_v11, %v10873_v10  ;;  %v11887_v18 = vpack.i.bf16 %v10894_v13, %v10893_v12  ;;  %v11877_v22 = vpack.i.bf16 %v10886_v21, %v10885_v20  ;;  %v10575_v11 = vld [vmem:[%s18351_s0 + $0x50] sm:$0xff]  ;;  %v10596_v12 = vld [vmem:[%s18351_s0 + $0xf8] sm:$0xff] }
  0x2d   :  { %v11369_v21 = vld [vmem:[%s18358_s7 + $0xd0] sm:$0xff]  }
  0x2e   :  { %11833 = vperm.xlu1 %11790, %v11832_v57   ;;  %v11366_v57 = vld [vmem:[%s18358_s7 + $0xb8] sm:$0xff]  }
  0x2f   :  { %v10902_v59 = vunpack.c.h.bf16 %v11366_v57 }
  0x32   :  { %11843 = vperm.xlu0 %11779, %v11842_v46   ;;  %11823 = vperm.xlu2 %11801, %v11822_v31   ;;  %v10572_v46 = vld [vmem:[%s18351_s0 + $0x38] sm:$0xff]  ;;  %v10922_v31 = vunpack.c.h.bf16 %v11371_v28  ;;  %v11383_v28 = vld [vmem:[%s18358_s7 + $0x140] sm:$0xff]  }
  0x36   :  { %11848 = vperm.xlu1 %11790, %v11847_v63  }
  0x3a   :  { %11858 = vperm.xlu0 %11779, %v11857_v58   ;;  %v10901_v58 = vunpack.c.l.bf16 %v11366_v57 }
  0x3c   :  { %632 = vmatmul.bf16.gmra.mxu0 %v10566_v23  ;;  %737 = vmatmul.bf16.gmra.mxu2 %v10587_v24  ;;  %v10570_v23 = vld [vmem:[%s18351_s0 + $0x28] sm:$0xff]  ;;  %v10591_v24 = vld [vmem:[%s18351_s0 + $0xd0] sm:$0xff]  ;;  %v11897_v63 = vpack.i.bf16 %v10902_v59, %v10901_v58  ;;  %v11379_v58 = vld [vmem:[%s18358_s7 + $0x120] sm:$0xff]  }
  0x3d   :  { %v10953_v59 = vunpack.c.l.bf16 %v11379_v58 }
  0x3e   :  { %11863 = vperm.xlu1 %11790, %v11862_v17   ;;  %v10918_v17 = vunpack.c.h.bf16 %v11370_v15 }
  0x40   :  { %v11917_v19 = vpack.i.bf16 %v10918_v17, %v10917_v16  ;;  %v11372_v17 = vld [vmem:[%s18358_s7 + $0xe8] sm:$0xff]  }
  0x42   :  { %11873 = vperm.xlu0 %11779, %v11872_v0   ;;  %v11368_v0 = vld [vmem:[%s18358_s7 + $0xc8] sm:$0xff]  }
  0x46   :  { %11878 = vperm.xlu1 %11790, %v11877_v22   ;;  %v10913_v22 = vunpack.c.l.bf16 %v11369_v21 }
  0x4a   :  { %11888 = vperm.xlu0 %11779, %v11887_v18  }
  0x4c   :  { %637 = vmatmul.bf16.gmra.mxu0 %v10567_v33  ;;  %742 = vmatmul.bf16.gmra.mxu2 %v10588_v34  ;;  %v11354_v33 = vld [vmem:[%s18358_s7 + $0x58] sm:$0xff]  }
  0x4d   :  { %v10853_v34 = vunpack.c.l.bf16 %v11354_v33  ;;  %v10854_v35 = vunpack.c.h.bf16 %v11354_v33  ;;  %v11922_v33 = vpack.i.bf16 %v10922_v31, %v10921_v30  ;;  %v10969_v30 = vunpack.c.l.bf16 %v11383_v28 }
  0x4e   :  { %11893 = vperm.xlu1 %11790, %v11892_v32   ;;  %v10970_v31 = vunpack.c.h.bf16 %v11383_v28  ;;  %v10605_v28 = vld [vmem:[%s18351_s0 + $0x140] sm:$0xff] }
  0x4f   :  { %v11837_v38 = vpack.i.bf16 %v10854_v35, %v10853_v34  ;;  %v10577_v34 = vld [vmem:[%s18351_s0 + $0x60] sm:$0xff]  ;;  %v10598_v35 = vld [vmem:[%s18351_s0 + $0x108] sm:$0xff] }
  0x51   :  { %11838 = vperm.xlu2 %11801, %v11837_v38   ;;  %v11373_v38 = vld [vmem:[%s18358_s7 + $0xf0] sm:$0xff]  }
  0x52   :  { %11903 = vperm.xlu0 %11779, %v11902_v56   ;;  %v10929_v39 = vunpack.c.l.bf16 %v11373_v38  ;;  %v10930_v40 = vunpack.c.h.bf16 %v11373_v38  ;;  %v10580_v38 = vld [vmem:[%s18351_s0 + $0x78] sm:$0xff] }
  0x54   :  { %v11932_v41 = vpack.i.bf16 %v10930_v40, %v10929_v39  ;;  %v10601_v39 = vld [vmem:[%s18351_s0 + $0x120] sm:$0xff] }
  0x59   :  { %11853 = vperm.xlu2 %11801, %v11852_v42  }
  0x5a   :  { %11918 = vperm.xlu0 %11779, %v11917_v19  }
  0x5c   :  { %642 = vmatmul.bf16.gmra.mxu0 %v10568_v47  ;;  %747 = vmatmul.bf16.gmra.mxu2 %v10589_v48  ;;  %v10593_v47 = vld [vmem:[%s18351_s0 + $0xe0] sm:$0xff]  ;;  %v11867_v48 = vpack.i.bf16 %v10878_v45, %v10877_v44  ;;  %v11376_v44 = vld [vmem:[%s18358_s7 + $0x108] sm:$0xff]  }
  0x5d   :  { %v10942_v49 = vunpack.c.h.bf16 %v11376_v44 }
  0x61   :  { %11868 = vperm.xlu2 %11801, %v11867_v48   ;;  %v10941_v48 = vunpack.c.l.bf16 %v11376_v44 }
  0x62   :  { %11933 = vperm.xlu0 %11779, %v11932_v41   ;;  %v11375_v41 = vld [vmem:[%s18358_s7 + $0x100] sm:$0xff]  }
  0x63   :  { %v11947_v51 = vpack.i.bf16 %v10942_v49, %v10941_v48  ;;  %v10937_v44 = vunpack.c.l.bf16 %v11375_v41  ;;  %v11378_v49 = vld [vmem:[%s18358_s7 + $0x118] sm:$0xff]  }
  0x69   :  { %11883 = vperm.xlu2 %11801, %v11882_v55   ;;  %v11377_v55 = vld [vmem:[%s18358_s7 + $0x110] sm:$0xff]  }
  0x6a   :  { %11948 = vperm.xlu0 %11779, %v11947_v51   ;;  %v10945_v56 = vunpack.c.l.bf16 %v11377_v55  ;;  %v10946_v57 = vunpack.c.h.bf16 %v11377_v55  ;;  %v10950_v51 = vunpack.c.h.bf16 %v11378_v49  ;;  %v10581_v55 = vld [vmem:[%s18351_s0 + $0x80] sm:$0xff] }
  0x6c   :  { %647 = vmatmul.bf16.gmra.mxu0 %v10569_v1  ;;  %752 = vmatmul.bf16.gmra.mxu2 %v10590_v2  ;;  %v10909_v1 = vunpack.c.l.bf16 %v11368_v0  ;;  %v10910_v2 = vunpack.c.h.bf16 %v11368_v0 }
  0x6e   :  { %v11907_v4 = vpack.i.bf16 %v10910_v2, %v10909_v1  ;;  %v11380_v2 = vld [vmem:[%s18358_s7 + $0x128] sm:$0xff]  }
  0x70   :  { %11908 = vperm.xlu1 %11790, %v11907_v4   ;;  %v11382_v4 = vld [vmem:[%s18358_s7 + $0x138] sm:$0xff]  }
  0x71   :  { %11898 = vperm.xlu2 %11801, %v11897_v63   ;;  %v11952_v63 = vpack.i.bf16 %v10946_v57, %v10945_v56  ;;  %v10602_v56 = vld [vmem:[%s18351_s0 + $0x128] sm:$0xff] }
  0x78   :  { %11923 = vperm.xlu1 %11790, %v11922_v33   ;;  %v11982_v33 = vpack.i.bf16 %v10970_v31, %v10969_v30 }
  0x7c   :  { %652 = vmatmul.bf16.gmra.mxu0 %v10570_v23  ;;  %757 = vmatmul.bf16.gmra.mxu2 %v10591_v24  ;;  %v10914_v23 = vunpack.c.h.bf16 %v11369_v21  ;;  %v10576_v24 = vld [vmem:[%s18351_s0 + $0x58] sm:$0xff]  ;;  %v10925_v21 = vunpack.c.l.bf16 %v11372_v17 }
  0x7e   :  { %v11912_v27 = vpack.i.bf16 %v10914_v23, %v10913_v22  ;;  %v10926_v22 = vunpack.c.h.bf16 %v11372_v17  ;;  %v10579_v23 = vld [vmem:[%s18351_s0 + $0x70] sm:$0xff]  ;;  %v10604_v17 = vld [vmem:[%s18351_s0 + $0x138] sm:$0xff] }
  0x80   :  { %11913 = vperm.xlu2 %11801, %v11912_v27   ;;  %v11927_v27 = vpack.i.bf16 %v10926_v22, %v10925_v21 }
  0x88   :  { %11928 = vperm.xlu2 %11801, %v11927_v27   ;;  %v10584_v27 = vld [vmem:[%s18351_s0 + $0x98] sm:$0xff] }
  0x8c   :  { %657 = vmatmul.bf16.gmra.mxu0 %v10571_v36  ;;  %762 = vmatmul.bf16.gmra.mxu2 %v10592_v37 }
  0x9c   :  { %662 = vmatmul.bf16.gmra.mxu0 %v10572_v46  ;;  %767 = vmatmul.bf16.gmra.mxu2 %v10593_v47  ;;  %v10933_v46 = vunpack.c.l.bf16 %v11374_v43  ;;  %v10934_v47 = vunpack.c.h.bf16 %v11374_v43 }
  0x9e   :  { %v11937_v50 = vpack.i.bf16 %v10934_v47, %v10933_v46  ;;  %v10938_v46 = vunpack.c.h.bf16 %v11375_v41 }
  0xa0   :  { %11938 = vperm.xlu1 %11790, %v11937_v50   ;;  %v11942_v47 = vpack.i.bf16 %v10938_v46, %v10937_v44  ;;  %v10949_v50 = vunpack.c.l.bf16 %v11378_v49 }
  0xa2   :  { %11943 = vperm.xlu2 %11801, %v11942_v47  }
  0xa8   :  { %11953 = vperm.xlu1 %11790, %v11952_v63  }
  0xa9   :  { %v12315_v62 = vpop.f32.mrf.mxu0 }
  0xaa   :  { %18938 = vst [vmem:[#allocation12_spill] sm:$0xff] %v12315_v62 }
  0xac   :  { %667 = vmatmul.bf16.gmra.mxu0 %v10573_v60  ;;  %772 = vmatmul.bf16.gmra.mxu2 %v10594_v61  ;;  %v10954_v60 = vunpack.c.h.bf16 %v11379_v58  ;;  %v11381_v58 = vld [vmem:[%s18358_s7 + $0x130] sm:$0xff]  }
  0xae   :  { %v11962_v0 = vpack.i.bf16 %v10954_v60, %v10953_v59  ;;  %v10961_v59 = vunpack.c.l.bf16 %v11381_v58  ;;  %v10962_v60 = vunpack.c.h.bf16 %v11381_v58 }
  0xaf   :  { %v12322_v5 = vpop.f32.mrf.mxu2 }
  0xb0   :  { %18940 = vst [vmem:[#allocation14_spill] sm:$0xff] %v12322_v5  ;;  %11963 = vperm.xlu0 %11779, %v11962_v0   ;;  %v11972_v63 = vpack.i.bf16 %v10962_v60, %v10961_v59 }
  0xb1   :  { %v12320_v3 = vpop.f32.mrf.mxu0 }
  0xb2   :  { %18939 = vst [vmem:[#allocation13_spill] sm:$0xff] %v12320_v3 }
  0xb7   :  { %v12332_v9 = vpop.f32.mrf.mxu2 }
  0xb8   :  { %18942 = vst [vmem:[#allocation16_spill] sm:$0xff] %v12332_v9 }
  0xb9   :  { %v12330_v8 = vpop.f32.mrf.mxu0 }
  0xba   :  { %18941 = vst [vmem:[#allocation15_spill] sm:$0xff] %v12330_v8 }
  0xbc   :  { %672 = vmatmul.bf16.gmra.mxu0 %v10574_v6  ;;  %777 = vmatmul.bf16.gmra.mxu2 %v10595_v7  ;;  %v10957_v6 = vunpack.c.l.bf16 %v11380_v2  ;;  %v10958_v7 = vunpack.c.h.bf16 %v11380_v2 }
  0xbe   :  { %v11967_v15 = vpack.i.bf16 %v10958_v7, %v10957_v6  ;;  %v10603_v6 = vld [vmem:[%s18351_s0 + $0x130] sm:$0xff] }
  0xbf   :  { %v12344_v14 = vpop.f32.mrf.mxu2 }
  0xc0   :  { %18943 = vst [vmem:[#allocation17_spill] sm:$0xff] %v12344_v14  ;;  %11968 = vperm.xlu1 %11790, %v11967_v15  }
  0xc1   :  { %v12334_v10 = vpop.f32.mrf.mxu0 }
  0xc7   :  { %v12351_v20 = vpop.f32.mrf.mxu2 }
  0xc8   :  { %18945 = vst [vmem:[#allocation19_spill] sm:$0xff] %v12351_v20  ;;  %11983 = vperm.xlu1 %11790, %v11982_v33  }
  0xc9   :  { %v12342_v13 = vpop.f32.mrf.mxu0 }
  0xcc   :  { %677 = vmatmul.bf16.gmra.mxu0 %v10575_v11  ;;  %782 = vmatmul.bf16.gmra.mxu2 %v10596_v12  ;;  %v10965_v11 = vunpack.c.l.bf16 %v11382_v4  ;;  %v10966_v12 = vunpack.c.h.bf16 %v11382_v4  ;;  %v10582_v4 = vld [vmem:[%s18351_s0 + $0x88] sm:$0xff] }
  0xce   :  { %v11977_v16 = vpack.i.bf16 %v10966_v12, %v10965_v11 }
  0xcf   :  { %v12367_v29 = vpop.f32.mrf.mxu2 }
  0xd0   :  { %18946 = vst [vmem:[#allocation20_spill] sm:$0xff] %v12367_v29  ;;  %11978 = vperm.xlu0 %11779, %v11977_v16   ;;  %v10583_v16 = vld [vmem:[%s18351_s0 + $0x90] sm:$0xff] }
  0xd1   :  { %v12349_v18 = vpop.f32.mrf.mxu0 }
  0xd2   :  { %18944 = vst [vmem:[#allocation18_spill] sm:$0xff] %v12349_v18 }
  0xd7   :  { %v12377_v36 = vpop.f32.mrf.mxu2 }
  0xd8   :  { %18948 = vst [vmem:[#allocation22_spill] sm:$0xff] %v12377_v36 }
  0xd9   :  { %v12362_v26 = vpop.f32.mrf.mxu0 }
  0xdc   :  { %682 = vmatmul.bf16.gmra.mxu0 %v10576_v24  ;;  %787 = vmatmul.bf16.gmra.mxu2 %v10597_v25  ;;  %v10600_v24 = vld [vmem:[%s18351_s0 + $0x118] sm:$0xff] }
  0xdf   :  { %v12392_v45 = vpop.f32.mrf.mxu2 }
  0xe0   :  { %18951 = vst [vmem:[#allocation25_spill] sm:$0xff] %v12392_v45 }
  0xe1   :  { %v12369_v32 = vpop.f32.mrf.mxu0 }
  0xe2   :  { %18947 = vst [vmem:[#allocation21_spill] sm:$0xff] %v12369_v32 }
  0xe7   :  { %v12408_v61 = vpop.f32.mrf.mxu2 }
  0xe8   :  { %18952 = vst [vmem:[#allocation26_spill] sm:$0xff] %v12408_v61 }
  0xe9   :  { %v12379_v37 = vpop.f32.mrf.mxu0 }
  0xea   :  { %18949 = vst [vmem:[#allocation23_spill] sm:$0xff] %v12379_v37 }
  0xec   :  { %687 = vmatmul.bf16.gmra.mxu0 %v10577_v34  ;;  %792 = vmatmul.bf16.gmra.mxu2 %v10598_v35 }
  0xef   :  { %v12421_v19 = vpop.f32.mrf.mxu2 }
  0xf0   :  { %18953 = vst [vmem:[#allocation27_spill] sm:$0xff] %v12421_v19 }
  0xf1   :  { %v12384_v42 = vpop.f32.mrf.mxu0 }
  0xf2   :  { %18950 = vst [vmem:[#allocation24_spill] sm:$0xff] %v12384_v42 }
  0xf7   :  { %v12434_v34 = vpop.f32.mrf.mxu2 }
  0xf8   :  { %18955 = vst [vmem:[#allocation29_spill] sm:$0xff] %v12434_v34 }
  0xf9   :  { %v12400_v54 = vpop.f32.mrf.mxu0 }
  0xfc   :  { %692 = vmatmul.bf16.gmra.mxu0 %v10578_v52  ;;  %797 = vmatmul.bf16.gmra.mxu2 %v10599_v53  ;;  %v11957_v53 = vpack.i.bf16 %v10950_v51, %v10949_v50 }
  0xfe   :  { %11958 = vperm.xlu2 %11801, %v11957_v53  }
  0xff   :  { %v12449_v43 = vpop.f32.mrf.mxu2 }
 0x100   :  { %18957 = vst [vmem:[#allocation31_spill] sm:$0xff] %v12449_v43 }
 0x101   :  { %v12410_v1 = vpop.f32.mrf.mxu0 }
 0x106   :  { %11973 = vperm.xlu2 %11801, %v11972_v63   ;;  %v11793_v63 = vpop.permute.xlu1 %11792 }
 0x107   :  { %v12456_v52 = vpop.f32.mrf.mxu2 }
 0x108   :  { %18958 = vst [vmem:[#allocation32_spill] sm:$0xff] %v12456_v52 }
 0x109   :  { %v12429_v25 = vpop.f32.mrf.mxu0 }
 0x10a   :  { %18954 = vst [vmem:[#allocation28_spill] sm:$0xff] %v12429_v25 }
 0x10c   :  { %697 = vmatmul.bf16.gmra.mxu0 %v10579_v23  ;;  %802 = vmatmul.bf16.gmra.mxu2 %v10600_v24 }
 0x10f   :  { %v12469_v0 = vpop.f32.mrf.mxu2 }
 0x110   :  { %18959 = vst [vmem:[#allocation33_spill] sm:$0xff] %v12469_v0 }
 0x111   :  { %v12436_v35 = vpop.f32.mrf.mxu0 }
 0x112   :  { %18956 = vst [vmem:[#allocation30_spill] sm:$0xff] %v12436_v35 }
 0x117   :  { %v12479_v7 = vpop.f32.mrf.mxu2 }
 0x118   :  { %18961 = vst [vmem:[#allocation35_spill] sm:$0xff] %v12479_v7 }
 0x119   :  { %v12444_v40 = vpop.f32.mrf.mxu0 }
 0x11c   :  { %702 = vmatmul.bf16.gmra.mxu0 %v10580_v38  ;;  %807 = vmatmul.bf16.gmra.mxu2 %v10601_v39  ;;  %v10585_v38 = vld [vmem:[%s18351_s0 + $0xa0] sm:$0xff] }
 0x11f   :  { %v12485_v15 = vpop.f32.mrf.mxu2 }
 0x120   :  { %18963 = vst [vmem:[#allocation37_spill] sm:$0xff] %v12485_v15 }
 0x121   :  { %v12451_v48 = vpop.f32.mrf.mxu0 }
 0x127   :  { %v12495_v22 = vpop.f32.mrf.mxu2 }
 0x128   :  { %18965 = vst [vmem:[#allocation39_spill] sm:$0xff] %v12495_v22 }
 0x129   :  { %v12464_v57 = vpop.f32.mrf.mxu0 }
 0x12c   :  { %707 = vmatmul.bf16.gmra.mxu0 %v10581_v55  ;;  %812 = vmatmul.bf16.gmra.mxu2 %v10602_v56  ;;  %v11782_v55 = vpop.permute.xlu0 %11781 }
 0x12d   :  { %v12538_v60 = vunpack.i.h.bf16 %v11782_v55 }
 0x12f   :  { %v12499_v24 = vpop.f32.mrf.mxu2  ;;  %18980 = vst [vmem:[#allocation54_spill] sm:$0xff] %v12538_v60 }
 0x130   :  { %18966 = vst [vmem:[#allocation40_spill] sm:$0xff] %v12499_v24 }
 0x131   :  { %v12471_v2 = vpop.f32.mrf.mxu0 }
 0x132   :  { %18960 = vst [vmem:[#allocation34_spill] sm:$0xff] %v12471_v2 }
 0x134   :  { %v11787_v59 = vpop.permute.xlu0 %11786 }
 0x137   :  { %v12509_v31 = vpop.f32.mrf.mxu2 }
 0x138   :  { %18967 = vst [vmem:[#allocation41_spill] sm:$0xff] %v12509_v31 }
 0x139   :  { %v12481_v11 = vpop.f32.mrf.mxu0 }
 0x13c   :  { %712 = vmatmul.bf16.gmra.mxu0 %v10582_v4  ;;  %817 = vmatmul.bf16.gmra.mxu2 %v10603_v6  ;;  %v12542_v6 = vunpack.i.l.bf16 %v11782_v55 }
 0x13e   :  { %18981 = vst [vmem:[#allocation55_spill] sm:$0xff] %v12542_v6 }
 0x13f   :  { %v12518_v41 = vpop.f32.mrf.mxu2 }
 0x140   :  { %18970 = vst [vmem:[#allocation44_spill] sm:$0xff] %v12518_v41 }
 0x141   :  { %v12483_v12 = vpop.f32.mrf.mxu0 }
 0x142   :  { %18962 = vst [vmem:[#allocation36_spill] sm:$0xff] %v12483_v12 }
 0x147   :  { %v12522_v46 = vpop.f32.mrf.mxu2 }
 0x148   :  { %18972 = vst [vmem:[#allocation46_spill] sm:$0xff] %v12522_v46  ;;  %v11798_v46 = vpop.permute.xlu1 %11797 }
 0x149   :  { %v12493_v21 = vpop.f32.mrf.mxu0  ;;  %v12569_v24 = vunpack.i.l.bf16 %v11798_v46 }
 0x14a   :  { %18964 = vst [vmem:[#allocation38_spill] sm:$0xff] %v12493_v21 }
 0x14b   :  { %18987 = vst [vmem:[#allocation61_spill] sm:$0xff] %v12569_v24 }
 0x14c   :  { %717 = vmatmul.bf16.gmra.mxu0 %v10583_v16  ;;  %822 = vmatmul.bf16.gmra.mxu2 %v10604_v17  ;;  %v12544_v16 = vunpack.i.l.bf16 %v11787_v59  ;;  %v1244_v17 = vmul.f32 %v12538_v60, %v12320_v3 }
 0x14e   :  { %18982 = vst [vmem:[#allocation56_spill] sm:$0xff] %v12544_v16  ;;  %v1413_v55 = vmul.f32 %v1244_v17, %v12320_v3 }
 0x14f   :  { %v12526_v49 = vpop.f32.mrf.mxu2 }
 0x150   :  { %18974 = vst [vmem:[#allocation48_spill] sm:$0xff] %v12526_v49 }
 0x151   :  { %v12497_v23 = vpop.f32.mrf.mxu0 }
 0x157   :  { %v12530_v51 = vpop.f32.mrf.mxu2 }
 0x158   :  { %18976 = vst [vmem:[#allocation50_spill] sm:$0xff] %v12530_v51  ;;  %v12556_v51 = vunpack.i.l.bf16 %v11793_v63 }
 0x159   :  { %v12507_v30 = vpop.f32.mrf.mxu0 }
 0x15a   :  { %18985 = vst [vmem:[#allocation59_spill] sm:$0xff] %v12556_v51 }
 0x15c   :  { %722 = vmatmul.bf16.gmra.mxu0 %v10584_v27  ;;  %827 = vmatmul.bf16.gmra.mxu2 %v10605_v28  ;;  %v12548_v27 = vunpack.i.h.bf16 %v11787_v59  ;;  %v12563_v59 = vunpack.i.h.bf16 %v11793_v63  ;;  %v12574_v63 = vunpack.i.h.bf16 %v11798_v46 }
 0x15e   :  { %18983 = vst [vmem:[#allocation57_spill] sm:$0xff] %v12548_v27  ;;  %v1246_v49 = vmul.f32 %v12548_v27, %v12334_v10  ;;  %v1248_v15 = vmul.f32 %v12563_v59, %v12349_v18  ;;  %v1250_v46 = vmul.f32 %v12574_v63, %v12369_v32 }
 0x15f   :  { %v12536_v58 = vpop.f32.mrf.mxu2  ;;  %18986 = vst [vmem:[#allocation60_spill] sm:$0xff] %v12563_v59 }
 0x160   :  { %18979 = vst [vmem:[#allocation53_spill] sm:$0xff] %v12536_v58  ;;  %v1245_v58 = vmul.f32 %v12544_v16, %v12330_v8  ;;  %v11804_v16 = vpop.permute.xlu2 %11803  ;;  %v1415_v22 = vmul.f32 %v1246_v49, %v12334_v10 }
 0x161   :  { %v12511_v33 = vpop.f32.mrf.mxu0  ;;  %18988 = vst [vmem:[#allocation62_spill] sm:$0xff] %v12574_v63 }
 0x162   :  { %18968 = vst [vmem:[#allocation42_spill] sm:$0xff] %v12511_v33 }
 0x167   :  { %v12550_v28 = vpop.f32.mrf.mxu2 }
 0x168   :  { %18984 = vst [vmem:[#allocation58_spill] sm:$0xff] %v12550_v28  ;;  %v1414_v28 = vmul.f32 %v1245_v58, %v12330_v8  ;;  %v11809_v59 = vpop.permute.xlu2 %11808 }
 0x169   :  { %v12516_v39 = vpop.f32.mrf.mxu0 }
 0x16a   :  { %18969 = vst [vmem:[#allocation43_spill] sm:$0xff] %v12516_v39 }
 0x16c   :  { %727 = vmatmul.bf16.gmra.mxu0 %v10585_v38  ;;  %v1243_v38 = vmul.f32 %v12542_v6, %v12315_v62  ;;  %v1247_v6 = vmul.f32 %v12556_v51, %v12342_v13 }
 0x16e   :  { %v1412_v60 = vmul.f32 %v1243_v38, %v12315_v62  ;;  %v1325_v31 = vadd.f32 %v1244_v17, %v1243_v38  ;;  %v1416_v62 = vmul.f32 %v1247_v6, %v12342_v13  ;;  %v1249_v17 = vmul.f32 %v12569_v24, %v12362_v26 }
 0x16f   :  { %v12577_v8 = vpop.f32.mrf.mxu2  ;;  %v12581_v38 = vunpack.i.l.bf16 %v11804_v16  ;;  %v12593_v24 = vunpack.i.l.bf16 %v11809_v59 }
 0x170   :  { %v1494_v3 = vadd.f32 %v1413_v55, %v1412_v60  ;;  %v1326_v27 = vadd.f32 %v1325_v31, %v1245_v58  ;;  %18989 = vst [vmem:[#allocation63_spill] sm:$0xff] %v12577_v8  ;;  %v1417_v58 = vmul.f32 %v1248_v15, %v12349_v18  ;;  %v1419_v18 = vmul.f32 %v1250_v46, %v12369_v32 }
 0x171   :  { %v12520_v44 = vpop.f32.mrf.mxu0  ;;  %18990 = vst [vmem:[#allocation64_spill] sm:$0xff] %v12581_v38 }
 0x172   :  { %18971 = vst [vmem:[#allocation45_spill] sm:$0xff] %v12520_v44  ;;  %v1495_v7 = vadd.f32 %v1494_v3, %v1414_v28  ;;  %v1327_v0 = vadd.f32 %v1326_v27, %v1246_v49  ;;  %v12588_v3 = vunpack.i.h.bf16 %v11804_v16  ;;  %v1418_v49 = vmul.f32 %v1249_v17, %v12362_v26 }
 0x173   :  { %v1251_v27 = vmul.f32 %v12581_v38, %v12379_v37  ;;  %18993 = vst [vmem:[#allocation67_spill] sm:$0xff] %v12593_v24  ;;  %v1253_v38 = vmul.f32 %v12593_v24, %v12400_v54 }
 0x174   :  { %v1496_v60 = vadd.f32 %v1495_v7, %v1415_v22  ;;  %v1328_v31 = vadd.f32 %v1327_v0, %v1247_v6  ;;  %18992 = vst [vmem:[#allocation66_spill] sm:$0xff] %v12588_v3  ;;  %v12595_v7 = vunpack.i.h.bf16 %v11809_v59  ;;  %v11814_v6 = vpop.permute.xlu0 %11813  ;;  %v1252_v16 = vmul.f32 %v12588_v3, %v12384_v42 }
 0x175   :  { %v12605_v63 = vunpack.i.h.bf16 %v11814_v6  ;;  %v1422_v24 = vmul.f32 %v1253_v38, %v12400_v54 }
 0x176   :  { %v1497_v28 = vadd.f32 %v1496_v60, %v1416_v62  ;;  %v1329_v51 = vadd.f32 %v1328_v31, %v1248_v15  ;;  %18994 = vst [vmem:[#allocation68_spill] sm:$0xff] %v12595_v7  ;;  %v12600_v62 = vunpack.i.l.bf16 %v11814_v6  ;;  %v1420_v31 = vmul.f32 %v1251_v27, %v12379_v37 }
 0x177   :  { %18996 = vst [vmem:[#allocation70_spill] sm:$0xff] %v12605_v63  ;;  %v12607_v59 = vpop.f32.mrf.mxu2  ;;  %v1421_v3 = vmul.f32 %v1252_v16, %v12384_v42 }
 0x178   :  { %v1330_v0 = vadd.f32 %v1329_v51, %v1249_v17  ;;  %v1498_v22 = vadd.f32 %v1497_v28, %v1417_v58  ;;  %18995 = vst [vmem:[#allocation69_spill] sm:$0xff] %v12600_v62  ;;  %v11819_v28 = vpop.permute.xlu1 %11818  ;;  %v1255_v6 = vmul.f32 %v12600_v62, %v12429_v25 }
 0x179   :  { %v12524_v47 = vpop.f32.mrf.mxu0  ;;  %v12619_v37 = vunpack.i.h.bf16 %v11819_v28 }
 0x17a   :  { %18973 = vst [vmem:[#allocation47_spill] sm:$0xff] %v12524_v47  ;;  %v1499_v15 = vadd.f32 %v1498_v22, %v1418_v49  ;;  %v1331_v60 = vadd.f32 %v1330_v0, %v1250_v46  ;;  %v1254_v49 = vmul.f32 %v12595_v7, %v12410_v1  ;;  %v12614_v46 = vunpack.i.l.bf16 %v11819_v28 }
 0x17b   :  { %18999 = vst [vmem:[#allocation73_spill] sm:$0xff] %v12619_v37 }
 0x17c   :  { %v1332_v17 = vadd.f32 %v1331_v60, %v1251_v27  ;;  %v1500_v58 = vadd.f32 %v1499_v15, %v1419_v18  ;;  %18998 = vst [vmem:[#allocation72_spill] sm:$0xff] %v12614_v46  ;;  %v11824_v18 = vpop.permute.xlu2 %11823  ;;  %v1423_v15 = vmul.f32 %v1254_v49, %v12410_v1  ;;  %v1256_v60 = vmul.f32 %v12605_v63, %v12436_v35 }
 0x17d   :  { %v12624_v7 = vunpack.i.l.bf16 %v11824_v18  ;;  %v1258_v63 = vmul.f32 %v12619_v37, %v12451_v48 }
 0x17e   :  { %v1501_v0 = vadd.f32 %v1500_v58, %v1420_v31  ;;  %v1333_v22 = vadd.f32 %v1332_v17, %v1252_v16  ;;  %v1424_v16 = vmul.f32 %v1255_v6, %v12429_v25  ;;  %v1257_v17 = vmul.f32 %v12614_v46, %v12444_v40 }
 0x17f   :  { %19000 = vst [vmem:[#allocation74_spill] sm:$0xff] %v12624_v7  ;;  %v12629_v58 = vunpack.i.h.bf16 %v11824_v18  ;;  %v1259_v18 = vmul.f32 %v12624_v7, %v12464_v57 }
 0x180   :  { %v1334_v32 = vadd.f32 %v1333_v22, %v1253_v38  ;;  %v1502_v27 = vadd.f32 %v1501_v0, %v1421_v3  ;;  %v11829_v38 = vpop.permute.xlu0 %11828  ;;  %v1425_v22 = vmul.f32 %v1256_v60, %v12436_v35 }
 0x181   :  { %v12528_v50 = vpop.f32.mrf.mxu0  ;;  %19001 = vst [vmem:[#allocation75_spill] sm:$0xff] %v12629_v58  ;;  %v12636_v62 = vunpack.i.l.bf16 %v11829_v38  ;;  %v12643_v46 = vunpack.i.h.bf16 %v11829_v38  ;;  %v1260_v37 = vmul.f32 %v12629_v58, %v12471_v2 }
 0x182   :  { %18975 = vst [vmem:[#allocation49_spill] sm:$0xff] %v12528_v50  ;;  %v1503_v42 = vadd.f32 %v1502_v27, %v1422_v24  ;;  %v1335_v31 = vadd.f32 %v1334_v32, %v1254_v49  ;;  %v12638_v32 = vpop.f32.mrf.mxu2  ;;  %v1426_v27 = vmul.f32 %v1257_v17, %v12444_v40 }
 0x183   :  { %19003 = vst [vmem:[#allocation77_spill] sm:$0xff] %v12636_v62  ;;  %v1262_v58 = vmul.f32 %v12643_v46, %v12483_v12 }
 0x184   :  { %v1336_v3 = vadd.f32 %v1335_v31, %v1255_v6  ;;  %v1504_v0 = vadd.f32 %v1503_v42, %v1423_v15  ;;  %19004 = vst [vmem:[#allocation78_spill] sm:$0xff] %v12643_v46  ;;  %v11834_v6 = vpop.permute.xlu1 %11833  ;;  %v1427_v31 = vmul.f32 %v1258_v63, %v12451_v48 }
 0x185   :  { %v12648_v35 = vunpack.i.l.bf16 %v11834_v6 }
 0x186   :  { %v1505_v24 = vadd.f32 %v1504_v0, %v1424_v16  ;;  %v1337_v49 = vadd.f32 %v1336_v3, %v1256_v60  ;;  %v1428_v60 = vmul.f32 %v1259_v18, %v12464_v57  ;;  %v1261_v3 = vmul.f32 %v12636_v62, %v12481_v11 }
 0x187   :  { %19005 = vst [vmem:[#allocation79_spill] sm:$0xff] %v12648_v35  ;;  %v12653_v0 = vunpack.i.h.bf16 %v11834_v6  ;;  %v1263_v6 = vmul.f32 %v12648_v35, %v12493_v21 }
 0x188   :  { %v1338_v42 = vadd.f32 %v1337_v49, %v1257_v17  ;;  %v1506_v15 = vadd.f32 %v1505_v24, %v1425_v22  ;;  %v11839_v17 = vpop.permute.xlu2 %11838  ;;  %v1429_v49 = vmul.f32 %v1260_v37, %v12471_v2 }
 0x189   :  { %v12532_v53 = vpop.f32.mrf.mxu0  ;;  %19006 = vst [vmem:[#allocation80_spill] sm:$0xff] %v12653_v0  ;;  %v12660_v7 = vunpack.i.l.bf16 %v11839_v17  ;;  %v1264_v46 = vmul.f32 %v12653_v0, %v12497_v23 }
 0x18a   :  { %18977 = vst [vmem:[#allocation51_spill] sm:$0xff] %v12532_v53  ;;  %v1507_v25 = vadd.f32 %v1506_v15, %v1426_v27  ;;  %v1339_v16 = vadd.f32 %v1338_v42, %v1258_v63  ;;  %v1430_v42 = vmul.f32 %v1261_v3, %v12481_v11  ;;  %v12665_v15 = vunpack.i.h.bf16 %v11839_v17  ;;  %v12667_v62 = vpop.f32.mrf.mxu2 }
 0x18b   :  { %19008 = vst [vmem:[#allocation82_spill] sm:$0xff] %v12660_v7  ;;  %v1265_v17 = vmul.f32 %v12660_v7, %v12507_v30 }
 0x18c   :  { %v1340_v22 = vadd.f32 %v1339_v16, %v1259_v18  ;;  %v1508_v24 = vadd.f32 %v1507_v25, %v1427_v31  ;;  %19009 = vst [vmem:[#allocation83_spill] sm:$0xff] %v12665_v15  ;;  %v11844_v18 = vpop.permute.xlu0 %11843  ;;  %v1431_v16 = vmul.f32 %v1262_v58, %v12483_v12  ;;  %v1266_v0 = vmul.f32 %v12665_v15, %v12511_v33 }
 0x18d   :  { %v12672_v2 = vunpack.i.l.bf16 %v11844_v18 }
 0x18e   :  { %v1509_v63 = vadd.f32 %v1508_v24, %v1428_v60  ;;  %v1341_v27 = vadd.f32 %v1340_v22, %v1260_v37  ;;  %v1432_v22 = vmul.f32 %v1263_v6, %v12493_v21  ;;  %v12677_v24 = vunpack.i.h.bf16 %v11844_v18 }
 0x18f   :  { %19010 = vst [vmem:[#allocation84_spill] sm:$0xff] %v12672_v2  ;;  %v1267_v18 = vmul.f32 %v12672_v2, %v12516_v39 }
 0x190   :  { %v1342_v25 = vadd.f32 %v1341_v27, %v1261_v3  ;;  %v1510_v31 = vadd.f32 %v1509_v63, %v1429_v49  ;;  %19011 = vst [vmem:[#allocation85_spill] sm:$0xff] %v12677_v24  ;;  %v11849_v3 = vpop.permute.xlu1 %11848  ;;  %v1433_v27 = vmul.f32 %v1264_v46, %v12497_v23  ;;  %v11854_v7 = vpop.permute.xlu2 %11853 }
 0x191   :  { %v12534_v56 = vpop.f32.mrf.mxu0  ;;  %v12684_v12 = vunpack.i.l.bf16 %v11849_v3 }
 0x192   :  { %18978 = vst [vmem:[#allocation52_spill] sm:$0xff] %v12534_v56  ;;  %v1511_v37 = vadd.f32 %v1510_v31, %v1430_v42  ;;  %v1343_v60 = vadd.f32 %v1342_v25, %v1262_v58  ;;  %v1434_v25 = vmul.f32 %v1265_v17, %v12507_v30  ;;  %v12689_v31 = vunpack.i.h.bf16 %v11849_v3  ;;  %v12696_v15 = vpop.f32.mrf.mxu2 }
 0x193   :  { %19013 = vst [vmem:[#allocation87_spill] sm:$0xff] %v12684_v12  ;;  %v1269_v3 = vmul.f32 %v12684_v12, %v12524_v47 }
 0x194   :  { %v1344_v49 = vadd.f32 %v1343_v60, %v1263_v6  ;;  %v1512_v63 = vadd.f32 %v1511_v37, %v1431_v16  ;;  %19014 = vst [vmem:[#allocation88_spill] sm:$0xff] %v12689_v31  ;;  %v1435_v16 = vmul.f32 %v1266_v0, %v12511_v33  ;;  %v1268_v37 = vmul.f32 %v12677_v24, %v12520_v44 }
 0x195   :  { %v12694_v60 = vunpack.i.l.bf16 %v11854_v7  ;;  %v1270_v2 = vmul.f32 %v12689_v31, %v12528_v50 }
 0x196   :  { %v1513_v58 = vadd.f32 %v1512_v63, %v1432_v22  ;;  %v1345_v42 = vadd.f32 %v1344_v49, %v1264_v46  ;;  %v1436_v49 = vmul.f32 %v1267_v18, %v12516_v39  ;;  %v12701_v63 = vunpack.i.h.bf16 %v11854_v7 }
 0x197   :  { %19015 = vst [vmem:[#allocation89_spill] sm:$0xff] %v12694_v60  ;;  %v1437_v24 = vmul.f32 %v1268_v37, %v12520_v44  ;;  %v1271_v7 = vmul.f32 %v12694_v60, %v12532_v53  ;;  %v1439_v39 = vmul.f32 %v1270_v2, %v12528_v50  ;;  %v19126_v50 = vld [vmem:[#allocation48_spill] sm:$0xff] }
 0x198   :  { %v1346_v21 = vadd.f32 %v1345_v42, %v1265_v17  ;;  %v1514_v6 = vadd.f32 %v1513_v58, %v1433_v27  ;;  %19016 = vst [vmem:[#allocation90_spill] sm:$0xff] %v12701_v63  ;;  %v11859_v27 = vpop.permute.xlu0 %11858 }
 0x199   :  { %v12540_v4 = vpop.f32.mrf.mxu0  ;;  %v12708_v33 = vunpack.i.l.bf16 %v11859_v27 }
 0x19a   :  { %v1515_v46 = vadd.f32 %v1514_v6, %v1434_v25  ;;  %v1347_v22 = vadd.f32 %v1346_v21, %v1266_v0  ;;  %v1438_v25 = vmul.f32 %v1269_v3, %v12524_v47 }
 0x19b   :  { %19017 = vst [vmem:[#allocation91_spill] sm:$0xff] %v12708_v33 }
 0x19c   :  { %v1348_v58 = vadd.f32 %v1347_v22, %v1267_v18  ;;  %v1516_v42 = vadd.f32 %v1515_v46, %v1435_v16  ;;  %v1272_v18 = vmul.f32 %v12701_v63, %v12534_v56  ;;  %v12716_v16 = vunpack.i.h.bf16 %v11859_v27  ;;  %v11864_v46 = vpop.permute.xlu1 %11863 }
 0x19e   :  { %v1517_v21 = vadd.f32 %v1516_v42, %v1436_v49  ;;  %v1349_v0 = vadd.f32 %v1348_v58, %v1268_v37  ;;  %19018 = vst [vmem:[#allocation92_spill] sm:$0xff] %v12716_v16  ;;  %v1440_v49 = vmul.f32 %v1271_v7, %v12532_v53  ;;  %v1273_v37 = vmul.f32 %v12708_v33, %v12540_v4  ;;  %v12723_v42 = vpop.f32.mrf.mxu2 }
 0x19f   :  { %v12721_v58 = vunpack.i.l.bf16 %v11864_v46  ;;  %19020 = vst [vmem:[#allocation94_spill] sm:$0xff] %v12723_v42 }
 0x1a0   :  { %v1350_v6 = vadd.f32 %v1349_v0, %v1269_v3  ;;  %v1518_v12 = vadd.f32 %v1517_v21, %v1437_v24  ;;  %v1441_v0 = vmul.f32 %v1272_v18, %v12534_v56  ;;  %v1442_v33 = vmul.f32 %v1273_v37, %v12540_v4 }
 0x1a1   :  { %v12561_v41 = vpop.f32.mrf.mxu0  ;;  %19019 = vst [vmem:[#allocation93_spill] sm:$0xff] %v12721_v58 }
 0x1a2   :  { %v1519_v22 = vadd.f32 %v1518_v12, %v1438_v25  ;;  %v1351_v31 = vadd.f32 %v1350_v6, %v1270_v2  ;;  %v1274_v27 = vmul.f32 %v12716_v16, %v12561_v41  ;;  %v12730_v12 = vunpack.i.h.bf16 %v11864_v46  ;;  %v11869_v2 = vpop.permute.xlu2 %11868  ;;  %v11874_v46 = vpop.permute.xlu0 %11873 }
 0x1a3   :  { %v12735_v60 = vunpack.i.l.bf16 %v11869_v2 }
 0x1a4   :  { %v1352_v3 = vadd.f32 %v1351_v31, %v1271_v7  ;;  %v1520_v21 = vadd.f32 %v1519_v22, %v1439_v39  ;;  %19022 = vst [vmem:[#allocation96_spill] sm:$0xff] %v12730_v12  ;;  %v1443_v39 = vmul.f32 %v1274_v27, %v12561_v41  ;;  %v12740_v22 = vunpack.i.h.bf16 %v11869_v2 }
 0x1a5   :  { %19023 = vst [vmem:[#allocation97_spill] sm:$0xff] %v12735_v60 }
 0x1a6   :  { %v1521_v25 = vadd.f32 %v1520_v21, %v1440_v49  ;;  %v1353_v6 = vadd.f32 %v1352_v3, %v1272_v18  ;;  %19024 = vst [vmem:[#allocation98_spill] sm:$0xff] %v12740_v22  ;;  %v12745_v21 = vunpack.i.l.bf16 %v11874_v46 }
 0x1a8   :  { %v1354_v53 = vadd.f32 %v1353_v6, %v1273_v37  ;;  %v1522_v31 = vadd.f32 %v1521_v25, %v1441_v0  ;;  %19025 = vst [vmem:[#allocation99_spill] sm:$0xff] %v12745_v21  ;;  %v12752_v6 = vunpack.i.h.bf16 %v11874_v46 }
 0x1a9   :  { %v12583_v55 = vpop.f32.mrf.mxu0 }
 0x1aa   :  { %18991 = vst [vmem:[#allocation65_spill] sm:$0xff] %v12583_v55  ;;  %v1275_v63 = vmul.f32 %v12721_v58, %v12583_v55  ;;  %v1523_v16 = vadd.f32 %v1522_v31, %v1442_v33  ;;  %v1355_v49 = vadd.f32 %v1354_v53, %v1274_v27  ;;  %v12754_v33 = vpop.f32.mrf.mxu2  ;;  %v11879_v53 = vpop.permute.xlu1 %11878 }
 0x1ab   :  { %19027 = vst [vmem:[#allocation101_spill] sm:$0xff] %v12752_v6 }
 0x1ac   :  { %v1444_v18 = vmul.f32 %v1275_v63, %v12583_v55  ;;  %v1356_v37 = vadd.f32 %v1355_v49, %v1275_v63  ;;  %v1524_v0 = vadd.f32 %v1523_v16, %v1443_v39  ;;  %19028 = vst [vmem:[#allocation102_spill] sm:$0xff] %v12754_v33  ;;  %v12759_v55 = vunpack.i.l.bf16 %v11879_v53 }
 0x1ad   :  { %v12764_v49 = vunpack.i.h.bf16 %v11879_v53 }
 0x1ae   :  { %v1525_v27 = vadd.f32 %v1524_v0, %v1444_v18  ;;  %19029 = vst [vmem:[#allocation103_spill] sm:$0xff] %v12759_v55 }
 0x1af   :  { %19030 = vst [vmem:[#allocation104_spill] sm:$0xff] %v12764_v49 }
 0x1b1   :  { %v12609_v51 = vpop.f32.mrf.mxu0 }
 0x1b2   :  { %18997 = vst [vmem:[#allocation71_spill] sm:$0xff] %v12609_v51  ;;  %v1276_v7 = vmul.f32 %v12730_v12, %v12609_v51 }
 0x1b4   :  { %v1445_v25 = vmul.f32 %v1276_v7, %v12609_v51  ;;  %v1357_v31 = vadd.f32 %v1356_v37, %v1276_v7 }
 0x1b6   :  { %v1526_v16 = vadd.f32 %v1525_v27, %v1445_v25 }
 0x1b9   :  { %v12631_v28 = vpop.f32.mrf.mxu0 }
 0x1ba   :  { %19002 = vst [vmem:[#allocation76_spill] sm:$0xff] %v12631_v28  ;;  %v1277_v3 = vmul.f32 %v12735_v60, %v12631_v28 }
 0x1bc   :  { %v1446_v60 = vmul.f32 %v1277_v3, %v12631_v28  ;;  %v1358_v63 = vadd.f32 %v1357_v31, %v1277_v3  ;;  %v11889_v3 = vpop.permute.xlu0 %11888  ;;  %v19121_v28 = vld [vmem:[#allocation37_spill] sm:$0xff] }
 0x1be   :  { %v1527_v51 = vadd.f32 %v1526_v16, %v1446_v60  ;;  %v12779_v16 = vunpack.i.l.bf16 %v11889_v3 }
 0x1c0   :  { %19032 = vst [vmem:[#allocation106_spill] sm:$0xff] %v12779_v16 }
 0x1c1   :  { %v12655_v38 = vpop.f32.mrf.mxu0 }
 0x1c2   :  { %19007 = vst [vmem:[#allocation81_spill] sm:$0xff] %v12655_v38  ;;  %v1278_v2 = vmul.f32 %v12740_v22, %v12655_v38  ;;  %v11884_v22 = vpop.permute.xlu2 %11883 }
 0x1c3   :  { %v12769_v0 = vunpack.i.l.bf16 %v11884_v22 }
 0x1c4   :  { %v1447_v39 = vmul.f32 %v1278_v2, %v12655_v38  ;;  %v1359_v18 = vadd.f32 %v1358_v63, %v1278_v2 }
 0x1c5   :  { %19031 = vst [vmem:[#allocation105_spill] sm:$0xff] %v12769_v0 }
 0x1c6   :  { %v1528_v27 = vadd.f32 %v1527_v51, %v1447_v39  ;;  %v11894_v39 = vpop.permute.xlu1 %11893 }
 0x1c9   :  { %v12679_v35 = vpop.f32.mrf.mxu0 }
 0x1ca   :  { %19012 = vst [vmem:[#allocation86_spill] sm:$0xff] %v12679_v35  ;;  %v1279_v12 = vmul.f32 %v12745_v21, %v12679_v35 }
 0x1cc   :  { %v1448_v7 = vmul.f32 %v1279_v12, %v12679_v35  ;;  %v1360_v25 = vadd.f32 %v1359_v18, %v1279_v12  ;;  %v12784_v12 = vunpack.i.h.bf16 %v11889_v3  ;;  %v12786_v18 = vunpack.i.h.bf16 %v11884_v22 }
 0x1ce   :  { %19034 = vst [vmem:[#allocation108_spill] sm:$0xff] %v12784_v12  ;;  %v1286_v22 = vmul.f32 %v12784_v12, %v12332_v9 }
 0x1cf   :  { %19035 = vst [vmem:[#allocation109_spill] sm:$0xff] %v12786_v18 }
 0x1d1   :  { %v12703_v17 = vpop.f32.mrf.mxu0 }
 0x1d2   :  { %v1280_v46 = vmul.f32 %v12752_v6, %v12703_v17  ;;  %v1529_v6 = vadd.f32 %v1528_v27, %v1448_v7  ;;  %v1285_v27 = vmul.f32 %v12779_v16, %v12322_v5 }
 0x1d4   :  { %v1449_v31 = vmul.f32 %v1280_v46, %v12703_v17  ;;  %v1361_v60 = vadd.f32 %v1360_v25, %v1280_v46 }
 0x1d6   :  { %v1530_v38 = vadd.f32 %v1529_v6, %v1449_v31  ;;  %v11899_v31 = vpop.permute.xlu2 %11898 }
 0x1d9   :  { %v12725_v24 = vpop.f32.mrf.mxu0 }
 0x1da   :  { %19021 = vst [vmem:[#allocation95_spill] sm:$0xff] %v12725_v24  ;;  %v1281_v37 = vmul.f32 %v12759_v55, %v12725_v24  ;;  %v12781_v55 = vpop.f32.mrf.mxu2 }
 0x1db   :  { %19033 = vst [vmem:[#allocation107_spill] sm:$0xff] %v12781_v55 }
 0x1dc   :  { %v1450_v2 = vmul.f32 %v1281_v37, %v12725_v24  ;;  %v1362_v35 = vadd.f32 %v1361_v60, %v1281_v37  ;;  %v1585_v24 = vld [vmem:[%s18353_s2] sm:$0x1] }
 0x1de   :  { %v1531_v7 = vadd.f32 %v1530_v38, %v1450_v2  ;;  %v12799_v38 = vunpack.i.h.bf16 %v11894_v39  ;;  %v1454_v2 = vmul.f32 %v1285_v27, %v12322_v5 }
 0x1e0   :  { %19037 = vst [vmem:[#allocation111_spill] sm:$0xff] %v12799_v38 }
 0x1e1   :  { %v12747_v58 = vpop.f32.mrf.mxu0 }
 0x1e2   :  { %19026 = vst [vmem:[#allocation100_spill] sm:$0xff] %v12747_v58  ;;  %v1282_v53 = vmul.f32 %v12764_v49, %v12747_v58  ;;  %v12808_v12 = vpop.f32.mrf.mxu2 }
 0x1e3   :  { %19039 = vst [vmem:[#allocation113_spill] sm:$0xff] %v12808_v12 }
 0x1e4   :  { %v1451_v51 = vmul.f32 %v1282_v53, %v12747_v58  ;;  %v1363_v46 = vadd.f32 %v1362_v35, %v1282_v53 }
 0x1e6   :  { %v1532_v6 = vadd.f32 %v1531_v7, %v1451_v51  ;;  %v11904_v51 = vpop.permute.xlu0 %11903 }
 0x1e9   :  { %v12771_v21 = vpop.f32.mrf.mxu0 }
 0x1ea   :  { %v1283_v63 = vmul.f32 %v12769_v0, %v12771_v21  ;;  %v12793_v0 = vunpack.i.l.bf16 %v11894_v39  ;;  %v1288_v39 = vmul.f32 %v12799_v38, %v12351_v20 }
 0x1ec   :  { %v1452_v25 = vmul.f32 %v1283_v63, %v12771_v21  ;;  %19036 = vst [vmem:[#allocation110_spill] sm:$0xff] %v12793_v0  ;;  %v1364_v37 = vadd.f32 %v1363_v46, %v1283_v63  ;;  %v1287_v16 = vmul.f32 %v12793_v0, %v12344_v14  ;;  %v12805_v63 = vunpack.i.l.bf16 %v11899_v31 }
 0x1ee   :  { %v1533_v35 = vadd.f32 %v1532_v6, %v1452_v25  ;;  %19038 = vst [vmem:[#allocation112_spill] sm:$0xff] %v12805_v63  ;;  %v12812_v25 = vunpack.i.h.bf16 %v11899_v31  ;;  %v1456_v0 = vmul.f32 %v1287_v16, %v12344_v14  ;;  %v1289_v5 = vmul.f32 %v12805_v63, %v12367_v29  ;;  %v19116_v14 = vld [vmem:[#allocation29_spill] sm:$0xff] }
 0x1f0   :  { %19040 = vst [vmem:[#allocation114_spill] sm:$0xff] %v12812_v25  ;;  %v1290_v31 = vmul.f32 %v12812_v25, %v12377_v36 }
 0x1f1   :  { %v12791_v49 = vpop.f32.mrf.mxu0 }
 0x1f2   :  { %v1284_v3 = vmul.f32 %v12786_v18, %v12791_v49  ;;  %v1455_v18 = vmul.f32 %v1286_v22, %v12332_v9  ;;  %v1457_v9 = vmul.f32 %v1288_v39, %v12351_v20 }
 0x1f4   :  { %v1365_v53 = vadd.f32 %v1364_v37, %v1284_v3  ;;  %v1453_v60 = vmul.f32 %v1284_v3, %v12791_v49  ;;  %v12814_v3 = vunpack.i.l.bf16 %v11904_v51 }
 0x1f6   :  { %v1366_v7 = vadd.f32 %v1365_v53, %v1285_v27  ;;  %v1534_v46 = vadd.f32 %v1533_v35, %v1453_v60  ;;  %19041 = vst [vmem:[#allocation115_spill] sm:$0xff] %v12814_v3  ;;  %v12819_v53 = vunpack.i.h.bf16 %v11904_v51  ;;  %v11909_v60 = vpop.permute.xlu1 %11908  ;;  %v11914_v51 = vpop.permute.xlu2 %11913 }
 0x1f8   :  { %v1367_v37 = vadd.f32 %v1366_v7, %v1286_v22  ;;  %v1535_v6 = vadd.f32 %v1534_v46, %v1454_v2  ;;  %19042 = vst [vmem:[#allocation116_spill] sm:$0xff] %v12819_v53  ;;  %v1291_v2 = vmul.f32 %v12814_v3, %v12392_v45  ;;  %v1458_v7 = vmul.f32 %v1289_v5, %v12367_v29  ;;  %v19127_v29 = vld [vmem:[#allocation53_spill] sm:$0xff] }
 0x1f9   :  { %v12827_v46 = vunpack.i.l.bf16 %v11909_v60  ;;  %v12839_v3 = vunpack.i.l.bf16 %v11914_v51 }
 0x1fa   :  { %v1368_v27 = vadd.f32 %v1367_v37, %v1287_v16  ;;  %v1536_v35 = vadd.f32 %v1535_v6, %v1455_v18  ;;  %v1292_v18 = vmul.f32 %v12819_v53, %v12408_v61  ;;  %v1459_v37 = vmul.f32 %v1290_v31, %v12377_v36 }
 0x1fb   :  { %19043 = vst [vmem:[#allocation117_spill] sm:$0xff] %v12827_v46  ;;  %v12832_v6 = vunpack.i.h.bf16 %v11909_v60  ;;  %v12844_v53 = vunpack.i.h.bf16 %v11914_v51 }
 0x1fc   :  { %v1369_v38 = vadd.f32 %v1368_v27, %v1288_v39  ;;  %v1537_v22 = vadd.f32 %v1536_v35, %v1456_v0  ;;  %v1460_v0 = vmul.f32 %v1291_v2, %v12392_v45  ;;  %v12835_v27 = vpop.f32.mrf.mxu2  ;;  %v1293_v35 = vmul.f32 %v12827_v46, %v12421_v19  ;;  %19045 = vst [vmem:[#allocation119_spill] sm:$0xff] %v12839_v3 }
 0x1fd   :  { %19044 = vst [vmem:[#allocation118_spill] sm:$0xff] %v12832_v6  ;;  %v1294_v60 = vmul.f32 %v12832_v6, %v12434_v34  ;;  %v1295_v46 = vmul.f32 %v12839_v3, %v12449_v43  ;;  %v1296_v51 = vmul.f32 %v12844_v53, %v12456_v52 }
 0x1fe   :  { %v1370_v63 = vadd.f32 %v1369_v38, %v1289_v5  ;;  %v1538_v16 = vadd.f32 %v1537_v22, %v1457_v9  ;;  %v11919_v5 = vpop.permute.xlu0 %11918  ;;  %v1461_v22 = vmul.f32 %v1292_v18, %v12408_v61  ;;  %19046 = vst [vmem:[#allocation120_spill] sm:$0xff] %v12844_v53 }
 0x200   :  { %v1371_v25 = vadd.f32 %v1370_v63, %v1290_v31  ;;  %v1539_v39 = vadd.f32 %v1538_v16, %v1458_v7  ;;  %v12846_v7 = vunpack.i.l.bf16 %v11919_v5  ;;  %v1462_v16 = vmul.f32 %v1293_v35, %v12421_v19 }
 0x202   :  { %v1372_v9 = vadd.f32 %v1371_v25, %v1291_v2  ;;  %v1540_v38 = vadd.f32 %v1539_v39, %v1459_v37  ;;  %19047 = vst [vmem:[#allocation121_spill] sm:$0xff] %v12846_v7  ;;  %v12851_v25 = vunpack.i.h.bf16 %v11919_v5  ;;  %v11924_v2 = vpop.permute.xlu1 %11923  ;;  %v1463_v37 = vmul.f32 %v1294_v60, %v12434_v34 }
 0x203   :  { %v12859_v6 = vunpack.i.l.bf16 %v11924_v2  ;;  %v1465_v34 = vmul.f32 %v1296_v51, %v12456_v52  ;;  %v12866_v53 = vunpack.i.h.bf16 %v11924_v2 }
 0x204   :  { %v1373_v63 = vadd.f32 %v1372_v9, %v1292_v18  ;;  %v1541_v31 = vadd.f32 %v1540_v38, %v1460_v0  ;;  %19048 = vst [vmem:[#allocation122_spill] sm:$0xff] %v12851_v25  ;;  %v19049_v0 = vld [vmem:[#allocation33_spill] sm:$0xff]  ;;  %v1464_v38 = vmul.f32 %v1295_v46, %v12449_v43 }
 0x205   :  { %v1297_v9 = vmul.f32 %v12846_v7, %v19049_v0  ;;  %19050 = vst [vmem:[#allocation123_spill] sm:$0xff] %v12859_v6 }
 0x206   :  { %v1374_v45 = vadd.f32 %v1373_v63, %v1293_v35  ;;  %v1542_v36 = vadd.f32 %v1541_v31, %v1461_v22  ;;  %v19051_v22 = vld [vmem:[#allocation35_spill] sm:$0xff]  ;;  %v11929_v63 = vpop.permute.xlu2 %11928  ;;  %v12863_v31 = vpop.f32.mrf.mxu2  ;;  %19053 = vst [vmem:[#allocation125_spill] sm:$0xff] %v12866_v53 }
 0x207   :  { %v1298_v5 = vmul.f32 %v12851_v25, %v19051_v22  ;;  %19052 = vst [vmem:[#allocation124_spill] sm:$0xff] %v12863_v31  ;;  %v12871_v43 = vunpack.i.l.bf16 %v11929_v63  ;;  %v11934_v19 = vpop.permute.xlu0 %11933  ;;  %v12876_v52 = vunpack.i.h.bf16 %v11929_v63 }
 0x208   :  { %v1375_v39 = vadd.f32 %v1374_v45, %v1294_v60  ;;  %v1543_v18 = vadd.f32 %v1542_v36, %v1462_v16  ;;  %v1466_v60 = vmul.f32 %v1297_v9, %v19049_v0  ;;  %v19054_v16 = vld [vmem:[#allocation37_spill] sm:$0xff] }
 0x209   :  { %v1299_v7 = vmul.f32 %v12859_v6, %v19054_v16  ;;  %19055 = vst [vmem:[#allocation126_spill] sm:$0xff] %v12871_v43 }
 0x20a   :  { %v1376_v3 = vadd.f32 %v1375_v39, %v1295_v46  ;;  %v1544_v35 = vadd.f32 %v1543_v18, %v1463_v37  ;;  %v1467_v39 = vmul.f32 %v1298_v5, %v19051_v22  ;;  %v19056_v18 = vld [vmem:[#allocation39_spill] sm:$0xff]  ;;  %19057 = vst [vmem:[#allocation127_spill] sm:$0xff] %v12876_v52 }
 0x20b   :  { %v1300_v25 = vmul.f32 %v12866_v53, %v19056_v18 }
 0x20c   :  { %v1377_v36 = vadd.f32 %v1376_v3, %v1296_v51  ;;  %v1545_v45 = vadd.f32 %v1544_v35, %v1464_v38  ;;  %v12878_v51 = vunpack.i.l.bf16 %v11934_v19  ;;  %v1468_v38 = vmul.f32 %v1299_v7, %v19054_v16  ;;  %v19059_v35 = vld [vmem:[#allocation40_spill] sm:$0xff] }
 0x20d   :  { %v1301_v6 = vmul.f32 %v12871_v43, %v19059_v35 }
 0x20e   :  { %v1378_v46 = vadd.f32 %v1377_v36, %v1297_v9  ;;  %v1546_v37 = vadd.f32 %v1545_v45, %v1465_v34  ;;  %19058 = vst [vmem:[#allocation128_spill] sm:$0xff] %v12878_v51  ;;  %v12883_v34 = vunpack.i.h.bf16 %v11934_v19  ;;  %v1469_v36 = vmul.f32 %v1300_v25, %v19056_v18  ;;  %v19061_v45 = vld [vmem:[#allocation41_spill] sm:$0xff] }
 0x20f   :  { %v1302_v53 = vmul.f32 %v12876_v52, %v19061_v45  ;;  %v1470_v16 = vmul.f32 %v1301_v6, %v19059_v35 }
 0x210   :  { %v1379_v2 = vadd.f32 %v1378_v46, %v1298_v5  ;;  %v1547_v3 = vadd.f32 %v1546_v37, %v1466_v60  ;;  %19060 = vst [vmem:[#allocation129_spill] sm:$0xff] %v12883_v34  ;;  %v19062_v5 = vld [vmem:[#allocation44_spill] sm:$0xff]  ;;  %v11939_v46 = vpop.permute.xlu1 %11938  ;;  %v12890_v37 = vpop.f32.mrf.mxu2 }
 0x211   :  { %v1303_v60 = vmul.f32 %v12878_v51, %v19062_v5  ;;  %19063 = vst [vmem:[#allocation130_spill] sm:$0xff] %v12890_v37  ;;  %v12893_v43 = vunpack.i.l.bf16 %v11939_v46  ;;  %v12898_v52 = vunpack.i.h.bf16 %v11939_v46  ;;  %v19067_v51 = vld [vmem:[#allocation48_spill] sm:$0xff] }
 0x212   :  { %v1380_v0 = vadd.f32 %v1379_v2, %v1299_v7  ;;  %v1548_v9 = vadd.f32 %v1547_v3, %v1467_v39  ;;  %v19065_v39 = vld [vmem:[#allocation46_spill] sm:$0xff]  ;;  %v1471_v3 = vmul.f32 %v1302_v53, %v19061_v45 }
 0x213   :  { %19064 = vst [vmem:[#allocation131_spill] sm:$0xff] %v12893_v43  ;;  %v1304_v2 = vmul.f32 %v12883_v34, %v19065_v39  ;;  %v1305_v18 = vmul.f32 %v12893_v43, %v19067_v51  ;;  %v11949_v34 = vpop.permute.xlu0 %11948 }
 0x214   :  { %v1381_v63 = vadd.f32 %v1380_v0, %v1300_v25  ;;  %v1549_v22 = vadd.f32 %v1548_v9, %v1468_v38  ;;  %19066 = vst [vmem:[#allocation46_spill] sm:$0xff] %v12898_v52  ;;  %v1472_v38 = vmul.f32 %v1303_v60, %v19062_v5  ;;  %v11944_v9 = vpop.permute.xlu2 %11943  ;;  %v19072_v5 = vld [vmem:[#allocation53_spill] sm:$0xff] }
 0x215   :  { %v12903_v35 = vunpack.i.l.bf16 %v11944_v9  ;;  %v12908_v46 = vunpack.i.h.bf16 %v11944_v9 }
 0x216   :  { %v1382_v7 = vadd.f32 %v1381_v63, %v1301_v6  ;;  %v1550_v19 = vadd.f32 %v1549_v22, %v1469_v36  ;;  %v1473_v22 = vmul.f32 %v1304_v2, %v19065_v39  ;;  %v19069_v36 = vld [vmem:[#allocation50_spill] sm:$0xff] }
 0x217   :  { %19068 = vst [vmem:[#allocation132_spill] sm:$0xff] %v12903_v35  ;;  %v1306_v63 = vmul.f32 %v12898_v52, %v19069_v36  ;;  %v1307_v43 = vmul.f32 %v12903_v35, %v19072_v5  ;;  %v19075_v52 = vld [vmem:[#allocation58_spill] sm:$0xff] }
 0x218   :  { %v1383_v25 = vadd.f32 %v1382_v7, %v1302_v53  ;;  %v1551_v0 = vadd.f32 %v1550_v19, %v1470_v16  ;;  %19070 = vst [vmem:[#allocation50_spill] sm:$0xff] %v12908_v46  ;;  %v12910_v7 = vunpack.i.l.bf16 %v11949_v34  ;;  %v1474_v19 = vmul.f32 %v1305_v18, %v19067_v51 }
 0x219   :  { %v1308_v9 = vmul.f32 %v12908_v46, %v19075_v52 }
 0x21a   :  { %v1384_v61 = vadd.f32 %v1383_v25, %v1303_v60  ;;  %v1552_v6 = vadd.f32 %v1551_v0, %v1471_v3  ;;  %19071 = vst [vmem:[#allocation133_spill] sm:$0xff] %v12910_v7  ;;  %v12915_v3 = vunpack.i.h.bf16 %v11949_v34  ;;  %v12917_v25 = vpop.f32.mrf.mxu2  ;;  %v1475_v0 = vmul.f32 %v1306_v63, %v19069_v36 }
 0x21b   :  { %19074 = vst [vmem:[#allocation135_spill] sm:$0xff] %v12917_v25  ;;  %v1477_v35 = vmul.f32 %v1308_v9, %v19075_v52 }
 0x21c   :  { %v1385_v53 = vadd.f32 %v1384_v61, %v1304_v2  ;;  %v1553_v16 = vadd.f32 %v1552_v6, %v1472_v38  ;;  %19073 = vst [vmem:[#allocation134_spill] sm:$0xff] %v12915_v3  ;;  %v1309_v38 = vmul.f32 %v12910_v7, %v12577_v8  ;;  %v11954_v6 = vpop.permute.xlu1 %11953 }
 0x21d   :  { %v12924_v51 = vunpack.i.l.bf16 %v11954_v6 }
 0x21e   :  { %v1386_v45 = vadd.f32 %v1385_v53, %v1305_v18  ;;  %v1554_v60 = vadd.f32 %v1553_v16, %v1473_v22  ;;  %v1476_v18 = vmul.f32 %v1307_v43, %v19072_v5  ;;  %v1310_v53 = vmul.f32 %v12915_v3, %v12607_v59 }
 0x21f   :  { %19076 = vst [vmem:[#allocation58_spill] sm:$0xff] %v12924_v51  ;;  %v12929_v16 = vunpack.i.h.bf16 %v11954_v6 }
 0x220   :  { %v1387_v61 = vadd.f32 %v1386_v45, %v1306_v63  ;;  %v1555_v2 = vadd.f32 %v1554_v60, %v1474_v19  ;;  %v1478_v63 = vmul.f32 %v1309_v38, %v12577_v8  ;;  %v11959_v19 = vpop.permute.xlu2 %11958  ;;  %v1311_v60 = vmul.f32 %v12924_v51, %v12638_v32 }
 0x221   :  { %19077 = vst [vmem:[#allocation136_spill] sm:$0xff] %v12929_v16  ;;  %v12935_v7 = vunpack.i.l.bf16 %v11959_v19 }
 0x222   :  { %v1388_v22 = vadd.f32 %v1387_v61, %v1307_v43  ;;  %v1556_v34 = vadd.f32 %v1555_v2, %v1475_v0  ;;  %v1479_v0 = vmul.f32 %v1310_v53, %v12607_v59  ;;  %v1312_v61 = vmul.f32 %v12929_v16, %v12667_v62  ;;  %v19132_v8 = vld [vmem:[#allocation135_spill] sm:$0xff] }
 0x223   :  { %19078 = vst [vmem:[#allocation137_spill] sm:$0xff] %v12935_v7  ;;  %v12940_v2 = vunpack.i.h.bf16 %v11959_v19  ;;  %v1313_v51 = vmul.f32 %v12935_v7, %v12696_v15 }
 0x224   :  { %v1389_v46 = vadd.f32 %v1388_v22, %v1308_v9  ;;  %v1557_v45 = vadd.f32 %v1556_v34, %v1476_v18  ;;  %v12942_v18 = vpop.f32.mrf.mxu2  ;;  %v1480_v22 = vmul.f32 %v1311_v60, %v12638_v32  ;;  %v11964_v34 = vpop.permute.xlu0 %11963 }
 0x225   :  { %19079 = vst [vmem:[#allocation138_spill] sm:$0xff] %v12940_v2  ;;  %v1482_v16 = vmul.f32 %v1313_v51, %v12696_v15 }
 0x226   :  { %v1390_v5 = vadd.f32 %v1389_v46, %v1309_v38  ;;  %v1558_v43 = vadd.f32 %v1557_v45, %v1477_v35  ;;  %19080 = vst [vmem:[#allocation139_spill] sm:$0xff] %v12942_v18  ;;  %v12947_v35 = vunpack.i.l.bf16 %v11964_v34  ;;  %v1481_v38 = vmul.f32 %v1312_v61, %v12667_v62 }
 0x227   :  { %v1314_v45 = vmul.f32 %v12940_v2, %v12723_v42 }
 0x228   :  { %v1391_v6 = vadd.f32 %v1390_v5, %v1310_v53  ;;  %v1559_v9 = vadd.f32 %v1558_v43, %v1478_v63  ;;  %19081 = vst [vmem:[#allocation140_spill] sm:$0xff] %v12947_v35  ;;  %v12952_v53 = vunpack.i.h.bf16 %v11964_v34  ;;  %v11969_v63 = vpop.permute.xlu1 %11968  ;;  %v1315_v43 = vmul.f32 %v12947_v35, %v12754_v33  ;;  %v11974_v2 = vpop.permute.xlu2 %11973 }
 0x22a   :  { %v1392_v3 = vadd.f32 %v1391_v6, %v1311_v60  ;;  %v1560_v46 = vadd.f32 %v1559_v9, %v1479_v0  ;;  %19082 = vst [vmem:[#allocation141_spill] sm:$0xff] %v12952_v53  ;;  %v12957_v0 = vunpack.i.l.bf16 %v11969_v63  ;;  %v1483_v6 = vmul.f32 %v1314_v45, %v12723_v42 }
 0x22b   :  { %v1316_v9 = vmul.f32 %v12952_v53, %v12781_v55  ;;  %v1484_v34 = vmul.f32 %v1315_v43, %v12754_v33 }
 0x22c   :  { %v1393_v19 = vadd.f32 %v1392_v3, %v1312_v61  ;;  %v1561_v5 = vadd.f32 %v1560_v46, %v1480_v22  ;;  %19083 = vst [vmem:[#allocation142_spill] sm:$0xff] %v12957_v0  ;;  %v12962_v22 = vunpack.i.h.bf16 %v11969_v63  ;;  %v1317_v46 = vmul.f32 %v12957_v0, %v12808_v12 }
 0x22d   :  { %v1485_v42 = vmul.f32 %v1316_v9, %v12781_v55  ;;  %v12974_v63 = vunpack.i.h.bf16 %v11974_v2 }
 0x22e   :  { %v1394_v7 = vadd.f32 %v1393_v19, %v1313_v51  ;;  %v1562_v60 = vadd.f32 %v1561_v5, %v1481_v38  ;;  %19084 = vst [vmem:[#allocation143_spill] sm:$0xff] %v12962_v22  ;;  %v12967_v38 = vunpack.i.l.bf16 %v11974_v2  ;;  %v12969_v19 = vpop.f32.mrf.mxu2  ;;  %v11979_v5 = vpop.permute.xlu0 %11978 }
 0x22f   :  { %19086 = vst [vmem:[#allocation145_spill] sm:$0xff] %v12974_v63  ;;  %v1320_v55 = vmul.f32 %v12974_v63, %v12890_v37 }
 0x230   :  { %v1395_v3 = vadd.f32 %v1394_v7, %v1314_v45  ;;  %v1563_v61 = vadd.f32 %v1562_v60, %v1482_v16  ;;  %19085 = vst [vmem:[#allocation144_spill] sm:$0xff] %v12967_v38  ;;  %v1318_v7 = vmul.f32 %v12962_v22, %v12835_v27  ;;  %v1486_v60 = vmul.f32 %v1317_v46, %v12808_v12  ;;  %v11984_v0 = vpop.permute.xlu1 %11983 }
 0x232   :  { %v1396_v35 = vadd.f32 %v1395_v3, %v1315_v43  ;;  %v1564_v51 = vadd.f32 %v1563_v61, %v1483_v6  ;;  %v1319_v43 = vmul.f32 %v12967_v38, %v12863_v31  ;;  %v12979_v61 = vunpack.i.l.bf16 %v11979_v5 }
 0x233   :  { %v1487_v53 = vmul.f32 %v1318_v7, %v12835_v27 }
 0x234   :  { %v1397_v16 = vadd.f32 %v1396_v35, %v1316_v9  ;;  %v1565_v45 = vadd.f32 %v1564_v51, %v1484_v34  ;;  %19087 = vst [vmem:[#allocation146_spill] sm:$0xff] %v12979_v61  ;;  %v12984_v9 = vunpack.i.h.bf16 %v11979_v5  ;;  %v1488_v2 = vmul.f32 %v1319_v43, %v12863_v31 }
 0x235   :  { %v1321_v34 = vmul.f32 %v12979_v61, %v12917_v25 }
 0x236   :  { %v1398_v6 = vadd.f32 %v1397_v16, %v1317_v46  ;;  %v1566_v3 = vadd.f32 %v1565_v45, %v1485_v42  ;;  %19088 = vst [vmem:[#allocation147_spill] sm:$0xff] %v12984_v9  ;;  %v12989_v42 = vunpack.i.l.bf16 %v11984_v0  ;;  %v1489_v16 = vmul.f32 %v1320_v55, %v12890_v37  ;;  %v12996_v5 = vpop.f32.mrf.mxu2 }
 0x237   :  { %v1322_v45 = vmul.f32 %v12984_v9, %v12942_v18 }
 0x238   :  { %v1399_v22 = vadd.f32 %v1398_v6, %v1318_v7  ;;  %v1567_v35 = vadd.f32 %v1566_v3, %v1486_v60  ;;  %19089 = vst [vmem:[#allocation148_spill] sm:$0xff] %v12989_v42  ;;  %v12994_v7 = vunpack.i.h.bf16 %v11984_v0  ;;  %v1490_v60 = vmul.f32 %v1321_v34, %v12917_v25 }
 0x239   :  { %v1323_v6 = vmul.f32 %v12989_v42, %v12969_v19 }
 0x23a   :  { %v1400_v51 = vadd.f32 %v1399_v22, %v1319_v43  ;;  %v1568_v46 = vadd.f32 %v1567_v35, %v1487_v53  ;;  %19090 = vst [vmem:[#allocation149_spill] sm:$0xff] %v12994_v7  ;;  %v1491_v43 = vmul.f32 %v1322_v45, %v12942_v18  ;;  %v1324_v3 = vmul.f32 %v12994_v7, %v12996_v5 }
 0x23c   :  { %v1401_v38 = vadd.f32 %v1400_v51, %v1320_v55  ;;  %v1569_v63 = vadd.f32 %v1568_v46, %v1488_v2  ;;  %v1492_v55 = vmul.f32 %v1323_v6, %v12969_v19  ;;  %v1493_v51 = vmul.f32 %v1324_v3, %v12996_v5 }
 0x23e   :  { %v1402_v22 = vadd.f32 %v1401_v38, %v1321_v34  ;;  %v1570_v53 = vadd.f32 %v1569_v63, %v1489_v16 }
 0x240   :  { %v1403_v35 = vadd.f32 %v1402_v22, %v1322_v45  ;;  %v1571_v9 = vadd.f32 %v1570_v53, %v1490_v60 }
 0x242   :  { %v1404_v0 = vadd.f32 %v1403_v35, %v1323_v6  ;;  %v1572_v2 = vadd.f32 %v1571_v9, %v1491_v43  ;;  %v19120_v35 = vld [vmem:[#allocation35_spill] sm:$0xff] }
 0x244   :  { %v1405_v46 = vadd.f32 %v1404_v0, %v1324_v3  ;;  %v1573_v61 = vadd.f32 %v1572_v2, %v1492_v55  ;;  %v19094_v2 = vld [vmem:[#allocation18_spill] sm:$0xff]  ;;  %v19106_v55 = vld [vmem:[#allocation65_spill] sm:$0xff] }
 0x246   :  { %v1406_v25 = vrot.slane %v1405_v46, 4  ;;  %v1574_v37 = vadd.f32 %v1573_v61, %v1493_v51  ;;  %v19092_v61 = vld [vmem:[#allocation13_spill] sm:$0xff]  ;;  %v19102_v51 = vld [vmem:[#allocation38_spill] sm:$0xff] }
 0x248   :  { %v1407_v42 = vadd.f32 %v1406_v25, %v1405_v46  ;;  %v1575_v38 = vrot.slane %v1574_v37, 4  ;;  %v19099_v46 = vld [vmem:[#allocation30_spill] sm:$0xff]  ;;  %v19115_v25 = vld [vmem:[#allocation27_spill] sm:$0xff] }
 0x24a   :  { %v1408_v63 = vrot.slane %v1407_v42, 2  ;;  %v1576_v34 = vadd.f32 %v1575_v38, %v1574_v37  ;;  %v19095_v38 = vld [vmem:[#allocation21_spill] sm:$0xff] }
 0x24c   :  { %v1409_v16 = vadd.f32 %v1408_v63, %v1407_v42  ;;  %v1577_v18 = vrot.slane %v1576_v34, 2  ;;  %v19108_v63 = vld [vmem:[#allocation81_spill] sm:$0xff] }
 0x24e   :  { %v1410_v31 = vrot.slane %v1409_v16, 1  ;;  %v1578_v7 = vadd.f32 %v1577_v18, %v1576_v34  ;;  %v19091_v18 = vld [vmem:[#allocation12_spill] sm:$0xff]  ;;  %v19096_v34 = vld [vmem:[#allocation23_spill] sm:$0xff] }
 0x250   :  { %v1411_v45 = vadd.f32 %v1410_v31, %v1409_v16  ;;  %v1579_v60 = vrot.slane %v1578_v7, 1  ;;  %v19109_v31 = vld [vmem:[#allocation86_spill] sm:$0xff] }
 0x252   :  { %v1580_v22 = vadd.f32 %v1579_v60, %v1578_v7  ;;  %v13006_v53 = vmul.f32 0.001953125, %v1411_v45  ;;  %v19093_v7 = vld [vmem:[#allocation15_spill] sm:$0xff]  ;;  %v19097_v45 = vld [vmem:[#allocation24_spill] sm:$0xff]  ;;  %v19103_v60 = vld [vmem:[#allocation42_spill] sm:$0xff] }
 0x254   :  { %v1582_v9 = vmul.f32 0.001953125, %v1580_v22  ;;  %v1583_v6 = vmul.f32 %v13006_v53, %v13006_v53  ;;  %v19100_v22 = vld [vmem:[#allocation34_spill] sm:$0xff]  ;;  %v19134_v42 = vsub.f32 %v12771_v21, %v13006_v53  ;;  %v19135_v47 = vsub.f32 %v12791_v49, %v13006_v53 }
 0x255   :  { %v19137_v33 = vsub.f32 %v19092_v61, %v13006_v53  ;;  %v19138_v21 = vsub.f32 %v19093_v7, %v13006_v53 }
 0x256   :  { %v1584_v43 = vsub.f32 %v1582_v9, %v1583_v6  ;;  %v19098_v6 = vld [vmem:[#allocation28_spill] sm:$0xff]  ;;  %v19124_v9 = vld [vmem:[#allocation41_spill] sm:$0xff] }
 0x258   :  { %v13010_v3 = vadd.f32 1e-05, %v1584_v43  ;;  %v19101_v43 = vld [vmem:[#allocation36_spill] sm:$0xff] }
 0x25a   :  { %11989 = vrsqrt.f32 %v13010_v3  ;;  %vm1593_vm0 = vweird.f32 %v13010_v3 }
 0x260   :  { %v11990_v37 = vpop.eup %11989 }
 0x261   :  { %v1588_v16 = vmul.f32 %v11990_v37, %v13010_v3  ;;  %vm1594_vm1 = vweird.f32 %v11990_v37  ;;  %v19136_v3 = vsub.f32 %v19091_v18, %v13006_v53  ;;  %v19140_v18 = vsub.f32 %v12342_v13, %v13006_v53 }
 0x262   :  { %vm1595_vm2 = vmor %vm1593_vm0, %vm1594_vm1  ;;  %v19143_v13 = vsub.f32 %v19095_v38, %v13006_v53 }
 0x263   :  { %v1589_v0 = vmul.f32 %v11990_v37, %v1588_v16 }
 0x265   :  { %v1590_v44 = vmul.f32 0.5, %v1589_v0 }
 0x267   :  { %v1591_v0 = vsub.f32 1.5, %v1590_v44 }
 0x269   :  { %v1592_v20 = vmul.f32 %v11990_v37, %v1591_v0 }
 0x26b   :  { %v1596_v56 = vsel %vm1595_vm2, %v11990_v37, %v1592_v20  ;;  %v19128_v20 = vld [vmem:[#allocation94_spill] sm:$0xff]  ;;  %v19130_v37 = vld [vmem:[#allocation124_spill] sm:$0xff] }
 0x26c   :  { %v1597_v16 = vmul.f32 %v1596_v56, %v1585_v24  ;;  %v13174_v24 = vld [vmem:[%s18354_s3] ss:$0 sm:$0xff]  ;;  %v19133_v56 = vld [vmem:[#allocation139_spill] sm:$0xff] }
 0x26e   :  { %v13176_v0 = vperm.slane %v1597_v16, 0 }
 0x270   :  { %v1723_v44 = vmul.f32 %v13176_v0, %v19134_v42  ;;  %v1724_v58 = vmul.f32 %v13176_v0, %v19135_v47  ;;  %v13204_v12 = vmul.f32 %v13176_v0, %v19136_v3  ;;  %v13210_v16 = vmul.f32 %v13176_v0, %v19137_v33 }
 0x271   :  { %v13216_v42 = vmul.f32 %v13176_v0, %v19138_v21  ;;  %v19139_v47 = vsub.f32 %v12334_v10, %v13006_v53  ;;  %v13228_v61 = vmul.f32 %v13176_v0, %v19140_v18  ;;  %v19141_v33 = vsub.f32 %v19094_v2, %v13006_v53 }
 0x272   :  { %v1809_v3 = vadd.f32 %v13174_v24, %v1723_v44  ;;  %v1810_v21 = vadd.f32 %v13174_v24, %v1724_v58  ;;  %v19142_v10 = vsub.f32 %v12362_v26, %v13006_v53  ;;  %v13248_v18 = vmul.f32 %v13176_v0, %v19143_v13 }
 0x273   :  { %v13222_v49 = vmul.f32 %v13176_v0, %v19139_v47  ;;  %v13234_v7 = vmul.f32 %v13176_v0, %v19141_v33  ;;  %v19144_v2 = vsub.f32 %v19096_v34, %v13006_v53  ;;  %v19145_v58 = vsub.f32 %v19097_v45, %v13006_v53 }
 0x274   :  { %v13242_v47 = vmul.f32 %v13176_v0, %v19142_v10  ;;  %v19146_v44 = vsub.f32 %v12400_v54, %v13006_v53  ;;  %v19147_v10 = vsub.f32 %v12410_v1, %v13006_v53  ;;  %v1891_v13 = vmax.f32 %v1809_v3, 0.0 }
 0x275   :  { %v13254_v33 = vmul.f32 %v13176_v0, %v19144_v2  ;;  %v13260_v26 = vmul.f32 %v13176_v0, %v19145_v58  ;;  %v1892_v2 = vmax.f32 %v1810_v21, 0.0  ;;  %v19148_v45 = vsub.f32 %v19098_v6, %v13006_v53 }
 0x276   :  { %v13266_v38 = vmul.f32 %v13176_v0, %v19146_v44  ;;  %v13272_v34 = vmul.f32 %v13176_v0, %v19147_v10  ;;  %v19149_v54 = vsub.f32 %v19099_v46, %v13006_v53  ;;  %v19151_v1 = vsub.f32 %v12444_v40, %v13006_v53 }
 0x277   :  { %v13278_v58 = vmul.f32 %v13176_v0, %v19148_v45  ;;  %v19153_v3 = vsub.f32 %v12451_v48, %v13006_v53  ;;  %v19154_v21 = vsub.f32 %v12464_v57, %v13006_v53  ;;  %v19155_v45 = vsub.f32 %v19100_v22, %v13006_v53 }
 0x278   :  { %v13284_v44 = vmul.f32 %v13176_v0, %v19149_v54  ;;  %v13290_v10 = vmul.f32 %v13176_v0, %v19151_v1  ;;  %v19156_v54 = vld [vmem:[#allocation105_spill] sm:$0xff]  ;;  %v19158_v48 = vsub.f32 %v12481_v11, %v13006_v53  ;;  %v19159_v57 = vsub.f32 %v19101_v43, %v13006_v53 }
 0x279   :  { %v13296_v6 = vmul.f32 %v13176_v0, %v19153_v3  ;;  %v13302_v46 = vmul.f32 %v13176_v0, %v19154_v21  ;;  %v13308_v40 = vmul.f32 %v13176_v0, %v19155_v45  ;;  %v1973_v1 = vmul.f32 %v19156_v54, %v1891_v13 }
 0x27a   :  { %19150 = vst [vmem:[#allocation12_spill] sm:$0xff] %v13284_v44  ;;  %v13316_v3 = vmul.f32 %v13176_v0, %v19158_v48  ;;  %v13322_v21 = vmul.f32 %v13176_v0, %v19159_v57  ;;  %v19160_v22 = vsub.f32 %v19102_v51, %v13006_v53  ;;  %v19161_v13 = vsub.f32 %v12497_v23, %v13006_v53 }
 0x27b   :  { %19152 = vst [vmem:[#allocation13_spill] sm:$0xff] %v13290_v10  ;;  %v19157_v10 = vld [vmem:[#allocation109_spill] sm:$0xff]  ;;  %v19164_v48 = vsub.f32 %v19103_v60, %v13006_v53 }
 0x27c   :  { %v1974_v44 = vmul.f32 %v19157_v10, %v1892_v2  ;;  %v13328_v45 = vmul.f32 %v13176_v0, %v19160_v22  ;;  %v13334_v11 = vmul.f32 %v13176_v0, %v19161_v13  ;;  %v19162_v2 = vsub.f32 %v12507_v30, %v13006_v53  ;;  %v19165_v22 = vld [vmem:[#allocation43_spill] sm:$0xff]  ;;  %v19167_v13 = vld [vmem:[#allocation45_spill] sm:$0xff] }
 0x27d   :  { %v13346_v51 = vmul.f32 %v13176_v0, %v19164_v48  ;;  %v19166_v10 = vsub.f32 %v19165_v22, %v13006_v53  ;;  %v19168_v54 = vsub.f32 %v19167_v13, %v13006_v53  ;;  %v19172_v48 = vld [vmem:[#allocation49_spill] sm:$0xff] }
 0x27e   :  { %v13340_v43 = vmul.f32 %v13176_v0, %v19162_v2  ;;  %v11074_v57 = vpack.c.bf16 %v1974_v44, %v1973_v1  ;;  %v19170_v2 = vld [vmem:[#allocation47_spill] sm:$0xff]  ;;  %v19173_v44 = vsub.f32 %v19172_v48, %v13006_v53 }
 0x27f   :  { %v13352_v23 = vmul.f32 %v13176_v0, %v19166_v10  ;;  %v13358_v30 = vmul.f32 %v13176_v0, %v19168_v54  ;;  %v19174_v10 = vld [vmem:[#allocation51_spill] sm:$0xff]  ;;  %v19176_v54 = vld [vmem:[#allocation52_spill] sm:$0xff] }
 0x280   :  { %19163 = vst [vmem:[#allocation15_spill] sm:$0xff] %v13340_v43  ;;  %v19171_v43 = vsub.f32 %v19170_v2, %v13006_v53  ;;  %v13370_v1 = vmul.f32 %v13176_v0, %v19173_v44  ;;  %v19175_v22 = vsub.f32 %v19174_v10, %v13006_v53  ;;  %v19180_v44 = vsub.f32 %v12561_v41, %v13006_v53 }
 0x281   :  { %19169 = vst [vmem:[#allocation18_spill] sm:$0xff] %v13358_v30  ;;  %v19177_v30 = vsub.f32 %v19176_v54, %v13006_v53 }
 0x282   :  { %v13364_v60 = vmul.f32 %v13176_v0, %v19171_v43  ;;  %v13376_v13 = vmul.f32 %v13176_v0, %v19175_v22  ;;  %v19179_v43 = vsub.f32 %v12540_v4, %v13006_v53  ;;  %11404 = vst [vmem:[#allocation2 + $0xb0] sm:$0xff] %v11074_v57   ;;  %v13394_v10 = vmul.f32 %v13176_v0, %v19180_v44 }
 0x283   :  { %v13382_v2 = vmul.f32 %v13176_v0, %v19177_v30  ;;  %v19181_v22 = vsub.f32 %v19106_v55, %v13006_v53  ;;  %v19182_v30 = vld [vmem:[#allocation71_spill] sm:$0xff]  ;;  %v19187_v44 = vsub.f32 %v19108_v63, %v13006_v53 }
 0x284   :  { %v13388_v48 = vmul.f32 %v13176_v0, %v19179_v43  ;;  %v19184_v43 = vld [vmem:[#allocation76_spill] sm:$0xff] }
 0x285   :  { %19178 = vst [vmem:[#allocation21_spill] sm:$0xff] %v13382_v2  ;;  %v13400_v54 = vmul.f32 %v13176_v0, %v19181_v22  ;;  %v19183_v2 = vsub.f32 %v19182_v30, %v13006_v53  ;;  %v19185_v57 = vsub.f32 %v19184_v43, %v13006_v53  ;;  %v13418_v55 = vmul.f32 %v13176_v0, %v19187_v44  ;;  %v19196_v44 = vld [vmem:[#allocation100_spill] sm:$0xff] }
 0x286   :  { %v19189_v22 = vsub.f32 %v19109_v31, %v13006_v53 }
 0x287   :  { %v13406_v4 = vmul.f32 %v13176_v0, %v19183_v2  ;;  %v13412_v41 = vmul.f32 %v13176_v0, %v19185_v57  ;;  %19188 = vst [vmem:[#allocation24_spill] sm:$0xff] %v13418_v55  ;;  %v19191_v2 = vsub.f32 %v12703_v17, %v13006_v53  ;;  %v19193_v57 = vld [vmem:[#allocation95_spill] sm:$0xff]  ;;  %v19197_v55 = vsub.f32 %v19196_v44, %v13006_v53 }
 0x288   :  { %v13424_v30 = vmul.f32 %v13176_v0, %v19189_v22  ;;  %v19199_v22 = vld [vmem:[#allocation14_spill] sm:$0xff] }
 0x289   :  { %19186 = vst [vmem:[#allocation23_spill] sm:$0xff] %v13412_v41  ;;  %v13430_v43 = vmul.f32 %v13176_v0, %v19191_v2  ;;  %v19194_v41 = vsub.f32 %v19193_v57, %v13006_v53  ;;  %v13442_v31 = vmul.f32 %v13176_v0, %v19197_v55  ;;  %v19202_v2 = vld [vmem:[#allocation16_spill] sm:$0xff]  ;;  %v19208_v55 = vld [vmem:[#allocation19_spill] sm:$0xff] }
 0x28a   :  { %19190 = vst [vmem:[#allocation28_spill] sm:$0xff] %v13424_v30  ;;  %v19200_v30 = vsub.f32 %v19199_v22, %v13006_v53 }
 0x28b   :  { %19192 = vst [vmem:[#allocation30_spill] sm:$0xff] %v13430_v43  ;;  %v13436_v63 = vmul.f32 %v13176_v0, %v19194_v41  ;;  %v19203_v43 = vsub.f32 %v19202_v2, %v13006_v53  ;;  %v19205_v41 = vld [vmem:[#allocation17_spill] sm:$0xff] }
 0x28c   :  { %19198 = vst [vmem:[#allocation36_spill] sm:$0xff] %v13442_v31  ;;  %v13448_v17 = vmul.f32 %v13176_v0, %v19200_v30  ;;  %v19209_v31 = vsub.f32 %v19208_v55, %v13006_v53  ;;  %v19211_v30 = vld [vmem:[#allocation20_spill] sm:$0xff] }
 0x28d   :  { %19195 = vst [vmem:[#allocation34_spill] sm:$0xff] %v13436_v63  ;;  %v13454_v57 = vmul.f32 %v13176_v0, %v19203_v43  ;;  %v19206_v63 = vsub.f32 %v19205_v41, %v13006_v53  ;;  %v19213_v43 = vld [vmem:[#allocation22_spill] sm:$0xff] }
 0x28e   :  { %19201 = vst [vmem:[#allocation38_spill] sm:$0xff] %v13448_v17  ;;  %v13466_v22 = vmul.f32 %v13176_v0, %v19209_v31  ;;  %v19212_v17 = vsub.f32 %v19211_v30, %v13006_v53  ;;  %v19218_v31 = vld [vmem:[#allocation26_spill] sm:$0xff] }
 0x28f   :  { %19204 = vst [vmem:[#allocation42_spill] sm:$0xff] %v13454_v57  ;;  %v13460_v44 = vmul.f32 %v13176_v0, %v19206_v63  ;;  %v19214_v57 = vsub.f32 %v19213_v43, %v13006_v53  ;;  %v19215_v63 = vld [vmem:[#allocation25_spill] sm:$0xff] }
 0x290   :  { %19210 = vst [vmem:[#allocation81_spill] sm:$0xff] %v13466_v22  ;;  %v13472_v2 = vmul.f32 %v13176_v0, %v19212_v17  ;;  %v19219_v22 = vsub.f32 %v19218_v31, %v13006_v53  ;;  %v19221_v17 = vsub.f32 %v19115_v25, %v13006_v53 }
 0x291   :  { %19207 = vst [vmem:[#allocation65_spill] sm:$0xff] %v13460_v44  ;;  %v13478_v41 = vmul.f32 %v13176_v0, %v19214_v57  ;;  %v19216_v44 = vsub.f32 %v19215_v63, %v13006_v53  ;;  %v19223_v57 = vsub.f32 %v19116_v14, %v13006_v53 }
 0x292   :  { %v13490_v30 = vmul.f32 %v13176_v0, %v19219_v22  ;;  %v13496_v43 = vmul.f32 %v13176_v0, %v19221_v17  ;;  %v19226_v22 = vld [vmem:[#allocation32_spill] sm:$0xff]  ;;  %v19229_v17 = vld [vmem:[#allocation33_spill] sm:$0xff] }
 0x293   :  { %v13484_v55 = vmul.f32 %v13176_v0, %v19216_v44  ;;  %v13502_v63 = vmul.f32 %v13176_v0, %v19223_v57  ;;  %v19224_v44 = vld [vmem:[#allocation31_spill] sm:$0xff]  ;;  %v19232_v57 = vsub.f32 %v19120_v35, %v13006_v53 }
 0x294   :  { %19220 = vst [vmem:[#allocation27_spill] sm:$0xff] %v13490_v30  ;;  %v19227_v30 = vsub.f32 %v19226_v22, %v13006_v53 }
 0x295   :  { %19217 = vst [vmem:[#allocation86_spill] sm:$0xff] %v13484_v55  ;;  %v19225_v55 = vsub.f32 %v19224_v44, %v13006_v53  ;;  %v13526_v44 = vmul.f32 %v13176_v0, %v19232_v57  ;;  %v19239_v57 = vsub.f32 %v19124_v9, %v13006_v53 }
 0x296   :  { %19222 = vst [vmem:[#allocation29_spill] sm:$0xff] %v13496_v43  ;;  %v13514_v25 = vmul.f32 %v13176_v0, %v19227_v30  ;;  %v19230_v43 = vsub.f32 %v19229_v17, %v13006_v53  ;;  %v19235_v30 = vld [vmem:[#allocation39_spill] sm:$0xff] }
 0x297   :  { %v13508_v31 = vmul.f32 %v13176_v0, %v19225_v55  ;;  %v19233_v55 = vsub.f32 %v19121_v28, %v13006_v53  ;;  %v13550_v28 = vmul.f32 %v13176_v0, %v19239_v57  ;;  %v19245_v57 = vsub.f32 %v19069_v36, %v13006_v53 }
 0x298   :  { %19228 = vst [vmem:[#allocation35_spill] sm:$0xff] %v13514_v25  ;;  %v13520_v14 = vmul.f32 %v13176_v0, %v19230_v43  ;;  %v19236_v25 = vsub.f32 %v19235_v30, %v13006_v53  ;;  %v19237_v43 = vld [vmem:[#allocation40_spill] sm:$0xff] }
 0x299   :  { %v13532_v22 = vmul.f32 %v13176_v0, %v19233_v55  ;;  %v19240_v55 = vld [vmem:[#allocation44_spill] sm:$0xff] }
 0x29a   :  { %19231 = vst [vmem:[#allocation37_spill] sm:$0xff] %v13520_v14  ;;  %v13538_v17 = vmul.f32 %v13176_v0, %v19236_v25  ;;  %v19238_v14 = vsub.f32 %v19237_v43, %v13006_v53  ;;  %v19242_v25 = vsub.f32 %v19065_v39, %v13006_v53 }
 0x29b   :  { %19234 = vst [vmem:[#allocation41_spill] sm:$0xff] %v13532_v22  ;;  %v19241_v22 = vsub.f32 %v19240_v55, %v13006_v53  ;;  %v13574_v55 = vmul.f32 %v13176_v0, %v19245_v57  ;;  %v19250_v57 = vsub.f32 %v12607_v59, %v13006_v53 }
 0x29c   :  { %v13544_v35 = vmul.f32 %v13176_v0, %v19238_v14  ;;  %v13562_v43 = vmul.f32 %v13176_v0, %v19242_v25  ;;  %v19243_v14 = vsub.f32 %v19126_v50, %v13006_v53  ;;  %v19247_v25 = vsub.f32 %v19075_v52, %v13006_v53 }
 0x29d   :  { %v13556_v30 = vmul.f32 %v13176_v0, %v19241_v22  ;;  %v19246_v22 = vsub.f32 %v19127_v29, %v13006_v53  ;;  %v13598_v29 = vmul.f32 %v13176_v0, %v19250_v57  ;;  %v19257_v57 = vsub.f32 %v19128_v20, %v13006_v53 }
 0x29e   :  { %v13568_v9 = vmul.f32 %v13176_v0, %v19243_v14  ;;  %v13586_v50 = vmul.f32 %v13176_v0, %v19247_v25  ;;  %v19248_v14 = vld [vmem:[#allocation63_spill] sm:$0xff]  ;;  %v19253_v25 = vsub.f32 %v12667_v62, %v13006_v53 }
 0x29f   :  { %v13580_v39 = vmul.f32 %v13176_v0, %v19246_v22  ;;  %v19251_v22 = vsub.f32 %v12638_v32, %v13006_v53  ;;  %v13622_v32 = vmul.f32 %v13176_v0, %v19257_v57  ;;  %v19265_v57 = vsub.f32 %v12835_v27, %v13006_v53 }
 0x2a0   :  { %19244 = vst [vmem:[#allocation48_spill] sm:$0xff] %v13568_v9  ;;  %v19249_v9 = vsub.f32 %v19248_v14, %v13006_v53  ;;  %v13610_v14 = vmul.f32 %v13176_v0, %v19253_v25  ;;  %v19260_v25 = vld [vmem:[#allocation107_spill] sm:$0xff] }
 0x2a1   :  { %v13604_v52 = vmul.f32 %v13176_v0, %v19251_v22  ;;  %v19258_v22 = vld [vmem:[#allocation102_spill] sm:$0xff] }
 0x2a2   :  { %v13592_v36 = vmul.f32 %v13176_v0, %v19249_v9  ;;  %19254 = vst [vmem:[#allocation94_spill] sm:$0xff] %v13610_v14  ;;  %v19255_v9 = vsub.f32 %v12696_v15, %v13006_v53  ;;  %v19261_v14 = vsub.f32 %v19260_v25, %v13006_v53 }
 0x2a3   :  { %19252 = vst [vmem:[#allocation53_spill] sm:$0xff] %v13604_v52  ;;  %v19259_v52 = vsub.f32 %v19258_v22, %v13006_v53  ;;  %v13646_v22 = vmul.f32 %v13176_v0, %v19265_v57  ;;  %v19270_v57 = vsub.f32 %v19133_v56, %v13006_v53  ;;  %v13690_v56 = vadd.f32 %v13174_v24, %v13210_v16 }
 0x2a4   :  { %v13616_v59 = vmul.f32 %v13176_v0, %v19255_v9  ;;  %v13634_v15 = vmul.f32 %v13176_v0, %v19261_v14  ;;  %v19263_v9 = vld [vmem:[#allocation113_spill] sm:$0xff]  ;;  %v19267_v14 = vld [vmem:[#allocation130_spill] sm:$0xff]  ;;  %v13718_v16 = vadd.f32 %v13174_v24, %v13254_v33 }
 0x2a5   :  { %v13628_v62 = vmul.f32 %v13176_v0, %v19259_v52  ;;  %v19266_v52 = vsub.f32 %v19130_v37, %v13006_v53  ;;  %v13670_v37 = vmul.f32 %v13176_v0, %v19270_v57  ;;  %v13698_v57 = vadd.f32 %v13174_v24, %v13222_v49  ;;  %v19274_v33 = vld [vmem:[#allocation13_spill] sm:$0xff] }
 0x2a6   :  { %19256 = vst [vmem:[#allocation124_spill] sm:$0xff] %v13616_v59  ;;  %v19264_v59 = vsub.f32 %v19263_v9, %v13006_v53  ;;  %v13726_v49 = vadd.f32 %v13174_v24, %v13266_v38  ;;  %v13746_v38 = vadd.f32 %v13174_v24, %v13296_v6  ;;  %v13766_v6 = vadd.f32 %v13174_v24, %v13328_v45 }
 0x2a7   :  { %19262 = vst [vmem:[#allocation135_spill] sm:$0xff] %v13634_v15  ;;  %v13652_v25 = vmul.f32 %v13176_v0, %v19266_v52  ;;  %v19268_v15 = vsub.f32 %v19267_v14, %v13006_v53  ;;  %v19271_v52 = vsub.f32 %v12969_v19, %v13006_v53  ;;  %v13694_v19 = vadd.f32 %v13174_v24, %v13216_v42 }
 0x2a8   :  { %v13640_v20 = vmul.f32 %v13176_v0, %v19264_v59  ;;  %v19269_v59 = vsub.f32 %v19132_v8, %v13006_v53  ;;  %v13722_v42 = vadd.f32 %v13174_v24, %v13260_v26  ;;  %v13742_v26 = vadd.f32 %v13174_v24, %v19274_v33  ;;  %19278 = vst [vmem:[#allocation47_spill] sm:$0xff] %v13766_v6  ;;  %v19284_v33 = vld [vmem:[#allocation18_spill] sm:$0xff] }
 0x2a9   :  { %v13658_v9 = vmul.f32 %v13176_v0, %v19268_v15  ;;  %v13676_v14 = vmul.f32 %v13176_v0, %v19271_v52  ;;  %v19272_v15 = vsub.f32 %v12996_v5, %v13006_v53  ;;  %v13702_v5 = vadd.f32 %v13174_v24, %v13228_v61 }
 0x2aa   :  { %v13664_v27 = vmul.f32 %v13176_v0, %v19269_v59  ;;  %v13686_v59 = vadd.f32 %v13174_v24, %v13204_v12  ;;  %v13706_v12 = vadd.f32 %v13174_v24, %v13234_v7  ;;  %v13710_v53 = vadd.f32 %v13174_v24, %v13242_v47  ;;  %v19273_v47 = vld [vmem:[#allocation12_spill] sm:$0xff] }
 0x2ab   :  { %v13682_v8 = vmul.f32 %v13176_v0, %v19272_v15  ;;  %v13714_v0 = vadd.f32 %v13174_v24, %v13248_v18  ;;  %v13730_v61 = vadd.f32 %v13174_v24, %v13272_v34  ;;  %v13734_v7 = vadd.f32 %v13174_v24, %v13278_v58 }
 0x2ac   :  { %v13738_v18 = vadd.f32 %v13174_v24, %v19273_v47  ;;  %v13750_v34 = vadd.f32 %v13174_v24, %v13302_v46  ;;  %v13754_v58 = vadd.f32 %v13174_v24, %v13308_v40  ;;  %v13758_v52 = vadd.f32 %v13174_v24, %v13316_v3  ;;  %v19280_v47 = vld [vmem:[#allocation15_spill] sm:$0xff] }
 0x2ad   :  { %v13762_v15 = vadd.f32 %v13174_v24, %v13322_v21  ;;  %v13770_v46 = vadd.f32 %v13174_v24, %v13334_v11  ;;  %v13774_v40 = vadd.f32 %v13174_v24, %v19280_v47  ;;  %v13778_v3 = vadd.f32 %v13174_v24, %v13346_v51 }
 0x2ae   :  { %19275 = vst [vmem:[#allocation139_spill] sm:$0xff] %v13754_v58  ;;  %v13782_v21 = vadd.f32 %v13174_v24, %v13352_v23  ;;  %v13786_v45 = vadd.f32 %v13174_v24, %v19284_v33  ;;  %v13790_v11 = vadd.f32 %v13174_v24, %v13364_v60  ;;  %v13794_v47 = vadd.f32 %v13174_v24, %v13370_v1 }
 0x2af   :  { %19276 = vst [vmem:[#allocation43_spill] sm:$0xff] %v13758_v52  ;;  %v13798_v51 = vadd.f32 %v13174_v24, %v13376_v13  ;;  %v13806_v33 = vadd.f32 %v13174_v24, %v13388_v48  ;;  %v13810_v60 = vadd.f32 %v13174_v24, %v13394_v10  ;;  %v13814_v1 = vadd.f32 %v13174_v24, %v13400_v54 }
 0x2b0   :  { %19277 = vst [vmem:[#allocation45_spill] sm:$0xff] %v13762_v15  ;;  %v13818_v13 = vadd.f32 %v13174_v24, %v13406_v4 }
 0x2b1   :  { %19279 = vst [vmem:[#allocation49_spill] sm:$0xff] %v13770_v46 }
 0x2b2   :  { %19281 = vst [vmem:[#allocation51_spill] sm:$0xff] %v13774_v40 }
 0x2b3   :  { %19282 = vst [vmem:[#allocation52_spill] sm:$0xff] %v13778_v3  ;;  %v19288_v3 = vld [vmem:[#allocation21_spill] sm:$0xff] }
 0x2b4   :  { %19283 = vst [vmem:[#allocation71_spill] sm:$0xff] %v13782_v21  ;;  %v13802_v23 = vadd.f32 %v13174_v24, %v19288_v3 }
 0x2b5   :  { %19285 = vst [vmem:[#allocation76_spill] sm:$0xff] %v13786_v45 }
 0x2b6   :  { %19286 = vst [vmem:[#allocation95_spill] sm:$0xff] %v13790_v11 }
 0x2b7   :  { %19287 = vst [vmem:[#allocation100_spill] sm:$0xff] %v13798_v51  ;;  %v19294_v51 = vld [vmem:[#allocation23_spill] sm:$0xff] }
 0x2b8   :  { %19289 = vst [vmem:[#allocation14_spill] sm:$0xff] %v13802_v23  ;;  %v13822_v3 = vadd.f32 %v13174_v24, %v19294_v51  ;;  %v19296_v23 = vld [vmem:[#allocation24_spill] sm:$0xff] }
 0x2b9   :  { %19290 = vst [vmem:[#allocation16_spill] sm:$0xff] %v13806_v33  ;;  %v13826_v48 = vadd.f32 %v13174_v24, %v19296_v23  ;;  %v19298_v33 = vld [vmem:[#allocation28_spill] sm:$0xff] }
 0x2ba   :  { %19291 = vst [vmem:[#allocation17_spill] sm:$0xff] %v13810_v60  ;;  %v13830_v10 = vadd.f32 %v13174_v24, %v19298_v33  ;;  %v19300_v60 = vld [vmem:[#allocation30_spill] sm:$0xff] }
 0x2bb   :  { %19292 = vst [vmem:[#allocation19_spill] sm:$0xff] %v13814_v1  ;;  %v13834_v54 = vadd.f32 %v13174_v24, %v19300_v60  ;;  %v19302_v1 = vld [vmem:[#allocation34_spill] sm:$0xff] }
 0x2bc   :  { %19293 = vst [vmem:[#allocation20_spill] sm:$0xff] %v13818_v13  ;;  %v13838_v4 = vadd.f32 %v13174_v24, %v19302_v1  ;;  %v19303_v13 = vld [vmem:[#allocation36_spill] sm:$0xff] }
 0x2bd   :  { %19295 = vst [vmem:[#allocation22_spill] sm:$0xff] %v13822_v3  ;;  %v13842_v51 = vadd.f32 %v13174_v24, %v19303_v13  ;;  %v19304_v3 = vld [vmem:[#allocation38_spill] sm:$0xff]  ;;  %v13862_v13 = vadd.f32 %v13174_v24, %v13472_v2  ;;  %v13882_v2 = vadd.f32 %v13174_v24, %v13502_v63 }
 0x2be   :  { %19297 = vst [vmem:[#allocation25_spill] sm:$0xff] %v13826_v48  ;;  %v13846_v23 = vadd.f32 %v13174_v24, %v19304_v3  ;;  %v19306_v48 = vld [vmem:[#allocation42_spill] sm:$0xff]  ;;  %v13866_v3 = vadd.f32 %v13174_v24, %v13478_v41  ;;  %v13886_v41 = vadd.f32 %v13174_v24, %v13508_v31  ;;  %v13906_v31 = vadd.f32 %v13174_v24, %v13538_v17  ;;  %v19346_v58 = vld [vmem:[#allocation100_spill] sm:$0xff] }
 0x2bf   :  { %19299 = vst [vmem:[#allocation26_spill] sm:$0xff] %v13830_v10  ;;  %v13850_v33 = vadd.f32 %v13174_v24, %v19306_v48  ;;  %v19308_v10 = vld [vmem:[#allocation65_spill] sm:$0xff] }
 0x2c0   :  { %19301 = vst [vmem:[#allocation31_spill] sm:$0xff] %v13834_v54  ;;  %v13854_v60 = vadd.f32 %v13174_v24, %v19308_v10  ;;  %v19310_v54 = vld [vmem:[#allocation81_spill] sm:$0xff] }
 0x2c1   :  { %19305 = vst [vmem:[#allocation32_spill] sm:$0xff] %v13846_v23  ;;  %v13858_v1 = vadd.f32 %v13174_v24, %v19310_v54  ;;  %v19313_v23 = vld [vmem:[#allocation86_spill] sm:$0xff] }
 0x2c2   :  { %19307 = vst [vmem:[#allocation33_spill] sm:$0xff] %v13850_v33  ;;  %v13870_v48 = vadd.f32 %v13174_v24, %v19313_v23  ;;  %v19315_v33 = vld [vmem:[#allocation27_spill] sm:$0xff] }
 0x2c3   :  { %19309 = vst [vmem:[#allocation39_spill] sm:$0xff] %v13854_v60  ;;  %v13874_v10 = vadd.f32 %v13174_v24, %v19315_v33  ;;  %v19316_v60 = vld [vmem:[#allocation29_spill] sm:$0xff]  ;;  %v19350_v46 = vld [vmem:[#allocation19_spill] sm:$0xff]  ;;  %v19351_v40 = vld [vmem:[#allocation20_spill] sm:$0xff] }
 0x2c4   :  { %19311 = vst [vmem:[#allocation40_spill] sm:$0xff] %v13858_v1  ;;  %v13878_v54 = vadd.f32 %v13174_v24, %v19316_v60  ;;  %v13898_v60 = vadd.f32 %v13174_v24, %v13526_v44  ;;  %v13918_v44 = vadd.f32 %v13174_v24, %v13556_v30  ;;  %v13938_v30 = vadd.f32 %v13174_v24, %v13586_v50 }
 0x2c5   :  { %19312 = vst [vmem:[#allocation44_spill] sm:$0xff] %v13866_v3  ;;  %v19320_v3 = vld [vmem:[#allocation35_spill] sm:$0xff] }
 0x2c6   :  { %19314 = vst [vmem:[#allocation63_spill] sm:$0xff] %v13870_v48  ;;  %v13890_v23 = vadd.f32 %v13174_v24, %v19320_v3  ;;  %v19322_v48 = vld [vmem:[#allocation37_spill] sm:$0xff]  ;;  %v13910_v3 = vadd.f32 %v13174_v24, %v13544_v35  ;;  %v13930_v35 = vadd.f32 %v13174_v24, %v13574_v55  ;;  %v19354_v45 = vld [vmem:[#allocation26_spill] sm:$0xff] }
 0x2c7   :  { %19317 = vst [vmem:[#allocation102_spill] sm:$0xff] %v13878_v54  ;;  %v13894_v33 = vadd.f32 %v13174_v24, %v19322_v48  ;;  %v19323_v54 = vld [vmem:[#allocation41_spill] sm:$0xff]  ;;  %v13914_v48 = vadd.f32 %v13174_v24, %v13550_v28  ;;  %v13934_v28 = vadd.f32 %v13174_v24, %v13580_v39 }
 0x2c8   :  { %19318 = vst [vmem:[#allocation107_spill] sm:$0xff] %v13882_v2  ;;  %v13902_v63 = vadd.f32 %v13174_v24, %v19323_v54  ;;  %v13922_v54 = vadd.f32 %v13174_v24, %v13562_v43  ;;  %v13942_v43 = vadd.f32 %v13174_v24, %v13592_v36  ;;  %v13962_v36 = vadd.f32 %v13174_v24, %v13622_v32  ;;  %v19356_v52 = vld [vmem:[#allocation32_spill] sm:$0xff] }
 0x2c9   :  { %19319 = vst [vmem:[#allocation113_spill] sm:$0xff] %v13886_v41  ;;  %v13982_v32 = vadd.f32 %v13174_v24, %v13652_v25  ;;  %v14002_v25 = vadd.f32 %v13174_v24, %v13682_v8  ;;  %v19357_v15 = vld [vmem:[#allocation33_spill] sm:$0xff]  ;;  %v19372_v8 = vmax.f32 %v13686_v59, 0.0  ;;  %v19380_v59 = vmax.f32 %v13702_v5, 0.0 }
 0x2ca   :  { %19321 = vst [vmem:[#allocation130_spill] sm:$0xff] %v13890_v23  ;;  %v19358_v6 = vld [vmem:[#allocation39_spill] sm:$0xff]  ;;  %v19388_v5 = vmax.f32 %v13718_v16, 0.0  ;;  %v19396_v16 = vmax.f32 %v13734_v7, 0.0  ;;  %v19408_v7 = vmax.f32 %v13750_v34, 0.0 }
 0x2cb   :  { %19324 = vst [vmem:[#allocation12_spill] sm:$0xff] %v13902_v63  ;;  %v19325_v63 = vld [vmem:[#allocation48_spill] sm:$0xff] }
 0x2cc   :  { %v13926_v17 = vadd.f32 %v13174_v24, %v19325_v63  ;;  %19327 = vst [vmem:[#allocation15_spill] sm:$0xff] %v13930_v35  ;;  %v13946_v63 = vadd.f32 %v13174_v24, %v13598_v29  ;;  %v19334_v35 = vld [vmem:[#allocation94_spill] sm:$0xff]  ;;  %v13966_v29 = vadd.f32 %v13174_v24, %v13628_v62  ;;  %v13986_v62 = vadd.f32 %v13174_v24, %v13658_v9 }
 0x2cd   :  { %19328 = vst [vmem:[#allocation18_spill] sm:$0xff] %v13934_v28  ;;  %v13954_v39 = vadd.f32 %v13174_v24, %v19334_v35  ;;  %v19336_v28 = vld [vmem:[#allocation124_spill] sm:$0xff]  ;;  %v13974_v35 = vadd.f32 %v13174_v24, %v13640_v20  ;;  %v13994_v20 = vadd.f32 %v13174_v24, %v13670_v37  ;;  %v19360_v21 = vld [vmem:[#allocation63_spill] sm:$0xff]  ;;  %v19376_v37 = vmax.f32 %v13694_v19, 0.0 }
 0x2ce   :  { %19326 = vst [vmem:[#allocation13_spill] sm:$0xff] %v13926_v17  ;;  %v19332_v17 = vld [vmem:[#allocation53_spill] sm:$0xff]  ;;  %v13958_v50 = vadd.f32 %v13174_v24, %v19336_v28  ;;  %v13978_v28 = vadd.f32 %v13174_v24, %v13646_v22  ;;  %v13998_v22 = vadd.f32 %v13174_v24, %v13676_v14  ;;  %v19361_v11 = vld [vmem:[#allocation102_spill] sm:$0xff]  ;;  %v19378_v14 = vmax.f32 %v13698_v57, 0.0 }
 0x2cf   :  { %19329 = vst [vmem:[#allocation21_spill] sm:$0xff] %v13938_v30  ;;  %v13950_v55 = vadd.f32 %v13174_v24, %v19332_v17  ;;  %v19384_v19 = vmax.f32 %v13710_v53, 0.0  ;;  %v19386_v57 = vmax.f32 %v13714_v0, 0.0  ;;  %v19392_v53 = vmax.f32 %v13726_v49, 0.0 }
 0x2d0   :  { %19330 = vst [vmem:[#allocation23_spill] sm:$0xff] %v13942_v43  ;;  %v19368_v43 = vmov %v13986_v62  ;;  %v19394_v0 = vmax.f32 %v13730_v61, 0.0  ;;  %v19402_v49 = vmax.f32 %v13742_v26, 0.0  ;;  %v19405_v61 = vmax.f32 %v13746_v38, 0.0 }
 0x2d1   :  { %19331 = vst [vmem:[#allocation24_spill] sm:$0xff] %v13946_v63  ;;  %v19338_v63 = vld [vmem:[#allocation135_spill] sm:$0xff] }
 0x2d2   :  { %19333 = vst [vmem:[#allocation28_spill] sm:$0xff] %v13950_v55  ;;  %v13970_v17 = vadd.f32 %v13174_v24, %v19338_v63  ;;  %v13990_v63 = vadd.f32 %v13174_v24, %v13664_v27  ;;  %v19370_v55 = vmov %v13994_v20  ;;  %v19375_v27 = vld [vmem:[#allocation54_spill] sm:$0xff]  ;;  %v19381_v24 = vld [vmem:[#allocation59_spill] sm:$0xff] }
 0x2d3   :  { %19335 = vst [vmem:[#allocation30_spill] sm:$0xff] %v13954_v39  ;;  %v19364_v41 = vld [vmem:[#allocation15_spill] sm:$0xff] }
 0x2d4   :  { %19337 = vst [vmem:[#allocation34_spill] sm:$0xff] %v13966_v29  ;;  %v19365_v23 = vld [vmem:[#allocation18_spill] sm:$0xff]  ;;  %v19369_v1 = vmov %v13990_v63  ;;  %v19373_v29 = vld [vmem:[#allocation55_spill] sm:$0xff] }
 0x2d5   :  { %19339 = vst [vmem:[#allocation36_spill] sm:$0xff] %v13978_v28  ;;  %v19363_v2 = vld [vmem:[#allocation13_spill] sm:$0xff]  ;;  %v14087_v9 = vmul.f32 %v19373_v29, %v19372_v8  ;;  %v14107_v8 = vmul.f32 %v19381_v24, %v19380_v59  ;;  %v19383_v29 = vld [vmem:[#allocation60_spill] sm:$0xff]  ;;  %v19391_v24 = vld [vmem:[#allocation66_spill] sm:$0xff] }
 0x2d6   :  { %19340 = vst [vmem:[#allocation38_spill] sm:$0xff] %v13982_v32  ;;  %v19359_v32 = vld [vmem:[#allocation44_spill] sm:$0xff] }
 0x2d7   :  { %19341 = vst [vmem:[#allocation42_spill] sm:$0xff] %v13986_v62  ;;  %v19374_v62 = vmax.f32 %v13690_v56, 0.0  ;;  %v19382_v56 = vmax.f32 %v13706_v12, 0.0  ;;  %v19390_v12 = vmax.f32 %v13722_v42, 0.0  ;;  %v19399_v42 = vmax.f32 %v13738_v18, 0.0 }
 0x2d8   :  { %19342 = vst [vmem:[#allocation65_spill] sm:$0xff] %v13990_v63  ;;  %v19377_v63 = vld [vmem:[#allocation56_spill] sm:$0xff] }
 0x2d9   :  { %19343 = vst [vmem:[#allocation81_spill] sm:$0xff] %v13994_v20  ;;  %v14092_v28 = vmul.f32 %v19375_v27, %v19374_v62  ;;  %v14097_v20 = vmul.f32 %v19377_v63, %v19376_v37  ;;  %v14112_v62 = vmul.f32 %v19383_v29, %v19382_v56  ;;  %v19385_v27 = vld [vmem:[#allocation61_spill] sm:$0xff]  ;;  %v19387_v63 = vld [vmem:[#allocation62_spill] sm:$0xff]  ;;  %v14132_v56 = vmul.f32 %v19391_v24, %v19390_v12  ;;  %v19393_v29 = vld [vmem:[#allocation67_spill] sm:$0xff] }
 0x2da   :  { %19344 = vst [vmem:[#allocation86_spill] sm:$0xff] %v13998_v22  ;;  %v19379_v22 = vld [vmem:[#allocation57_spill] sm:$0xff]  ;;  %v14117_v37 = vmul.f32 %v19385_v27, %v19384_v19  ;;  %v14137_v19 = vmul.f32 %v19393_v29, %v19392_v53  ;;  %v19395_v27 = vld [vmem:[#allocation68_spill] sm:$0xff] }
 0x2db   :  { %v14102_v39 = vmul.f32 %v19379_v22, %v19378_v14  ;;  %v14122_v14 = vmul.f32 %v19387_v63, %v19386_v57  ;;  %v19389_v22 = vld [vmem:[#allocation64_spill] sm:$0xff]  ;;  %v14142_v57 = vmul.f32 %v19395_v27, %v19394_v0  ;;  %v19397_v63 = vld [vmem:[#allocation69_spill] sm:$0xff]  ;;  %v19409_v27 = vld [vmem:[#allocation74_spill] sm:$0xff] }
 0x2dc   :  { %v14127_v59 = vmul.f32 %v19389_v22, %v19388_v5  ;;  %v14147_v5 = vmul.f32 %v19397_v63, %v19396_v16  ;;  %v19400_v22 = vld [vmem:[#allocation70_spill] sm:$0xff]  ;;  %v19403_v24 = vld [vmem:[#allocation72_spill] sm:$0xff]  ;;  %v19406_v29 = vld [vmem:[#allocation73_spill] sm:$0xff]  ;;  %v14167_v16 = vmul.f32 %v19409_v27, %v19408_v7 }
 0x2dd   :  { %v19367_v30 = vld [vmem:[#allocation38_spill] sm:$0xff]  ;;  %v14152_v12 = vmul.f32 %v19400_v22, %v19399_v42  ;;  %v14157_v53 = vmul.f32 %v19403_v24, %v19402_v49  ;;  %v14162_v0 = vmul.f32 %v19406_v29, %v19405_v61  ;;  %v19411_v63 = vld [vmem:[#allocation139_spill] sm:$0xff]  ;;  %v19419_v24 = vld [vmem:[#allocation45_spill] sm:$0xff] }
 0x2de   :  { %19398 = vst [vmem:[#allocation27_spill] sm:$0xff] %v14147_v5  ;;  %v19412_v18 = vmax.f32 %v19411_v63, 0.0  ;;  %v19413_v5 = vld [vmem:[#allocation75_spill] sm:$0xff]  ;;  %v19420_v38 = vmax.f32 %v19419_v24, 0.0  ;;  %v19427_v27 = vld [vmem:[#allocation49_spill] sm:$0xff] }
 0x2df   :  { %19401 = vst [vmem:[#allocation29_spill] sm:$0xff] %v14152_v12  ;;  %v19415_v22 = vld [vmem:[#allocation43_spill] sm:$0xff]  ;;  %v19417_v12 = vld [vmem:[#allocation77_spill] sm:$0xff]  ;;  %v19428_v63 = vmax.f32 %v19427_v27, 0.0 }
 0x2e0   :  { %19404 = vst [vmem:[#allocation35_spill] sm:$0xff] %v14157_v53  ;;  %v14172_v42 = vmul.f32 %v19413_v5, %v19412_v18  ;;  %v19416_v26 = vmax.f32 %v19415_v22, 0.0  ;;  %v19421_v53 = vld [vmem:[#allocation78_spill] sm:$0xff]  ;;  %v19423_v29 = vld [vmem:[#allocation47_spill] sm:$0xff] }
 0x2e1   :  { %19407 = vst [vmem:[#allocation37_spill] sm:$0xff] %v14162_v0  ;;  %v14182_v61 = vmul.f32 %v19421_v53, %v19420_v38  ;;  %v19424_v34 = vmax.f32 %v19423_v29, 0.0  ;;  %v19425_v0 = vld [vmem:[#allocation79_spill] sm:$0xff] }
 0x2e2   :  { %19410 = vst [vmem:[#allocation41_spill] sm:$0xff] %v14167_v16  ;;  %v14177_v49 = vmul.f32 %v19417_v12, %v19416_v26  ;;  %v19429_v16 = vld [vmem:[#allocation80_spill] sm:$0xff]  ;;  %v19431_v5 = vld [vmem:[#allocation51_spill] sm:$0xff] }
 0x2e3   :  { %19414 = vst [vmem:[#allocation48_spill] sm:$0xff] %v14172_v42  ;;  %v14187_v7 = vmul.f32 %v19425_v0, %v19424_v34  ;;  %v14192_v18 = vmul.f32 %v19429_v16, %v19428_v63  ;;  %v19432_v22 = vmax.f32 %v19431_v5, 0.0  ;;  %v19433_v42 = vld [vmem:[#allocation82_spill] sm:$0xff]  ;;  %v19434_v12 = vld [vmem:[#allocation52_spill] sm:$0xff]  ;;  %v19437_v53 = vld [vmem:[#allocation71_spill] sm:$0xff] }
 0x2e4   :  { %19418 = vst [vmem:[#allocation53_spill] sm:$0xff] %v14177_v49  ;;  %v19435_v24 = vmax.f32 %v19434_v12, 0.0  ;;  %v19436_v49 = vld [vmem:[#allocation83_spill] sm:$0xff]  ;;  %v19438_v29 = vmax.f32 %v19437_v53, 0.0  ;;  %v19441_v0 = vld [vmem:[#allocation76_spill] sm:$0xff]  ;;  %v19449_v12 = vmax.f32 %v13794_v47, 0.0 }
 0x2e5   :  { %19422 = vst [vmem:[#allocation94_spill] sm:$0xff] %v14182_v61  ;;  %v14197_v26 = vmul.f32 %v19433_v42, %v19432_v22  ;;  %v19439_v61 = vld [vmem:[#allocation84_spill] sm:$0xff]  ;;  %v19442_v27 = vmax.f32 %v19441_v0, 0.0  ;;  %v19445_v16 = vld [vmem:[#allocation95_spill] sm:$0xff]  ;;  %v19451_v53 = vmax.f32 %v19346_v58, 0.0  ;;  %v19464_v58 = vmax.f32 %v19350_v46, 0.0 }
 0x2e6   :  { %19426 = vst [vmem:[#allocation124_spill] sm:$0xff] %v14187_v7  ;;  %v14202_v38 = vmul.f32 %v19436_v49, %v19435_v24  ;;  %v14207_v34 = vmul.f32 %v19439_v61, %v19438_v29  ;;  %v19443_v7 = vld [vmem:[#allocation85_spill] sm:$0xff]  ;;  %v19446_v5 = vmax.f32 %v19445_v16, 0.0  ;;  %v19450_v42 = vld [vmem:[#allocation88_spill] sm:$0xff]  ;;  %v19453_v61 = vld [vmem:[#allocation14_spill] sm:$0xff]  ;;  %v19476_v46 = vmax.f32 %v19354_v45, 0.0 }
 0x2e7   :  { %19430 = vst [vmem:[#allocation135_spill] sm:$0xff] %v14192_v18  ;;  %v14212_v63 = vmul.f32 %v19443_v7, %v19442_v27  ;;  %v19447_v18 = vld [vmem:[#allocation87_spill] sm:$0xff]  ;;  %v14222_v24 = vmul.f32 %v19450_v42, %v19449_v12  ;;  %v19452_v49 = vld [vmem:[#allocation89_spill] sm:$0xff]  ;;  %v19454_v0 = vmax.f32 %v19453_v61, 0.0  ;;  %v19457_v7 = vld [vmem:[#allocation16_spill] sm:$0xff]  ;;  %v19467_v61 = vmax.f32 %v19351_v40, 0.0 }
 0x2e8   :  { %19440 = vst [vmem:[#allocation100_spill] sm:$0xff] %v14207_v34  ;;  %v14217_v22 = vmul.f32 %v19447_v18, %v19446_v5  ;;  %v14227_v29 = vmul.f32 %v19452_v49, %v19451_v53  ;;  %v19455_v34 = vld [vmem:[#allocation90_spill] sm:$0xff]  ;;  %v19458_v16 = vmax.f32 %v19457_v7, 0.0  ;;  %v19461_v18 = vld [vmem:[#allocation17_spill] sm:$0xff]  ;;  %v19468_v49 = vld [vmem:[#allocation96_spill] sm:$0xff]  ;;  %v19485_v45 = vmax.f32 %v19356_v52, 0.0 }
 0x2e9   :  { %19444 = vst [vmem:[#allocation19_spill] sm:$0xff] %v14212_v63  ;;  %v14232_v27 = vmul.f32 %v19455_v34, %v19454_v0  ;;  %v19459_v63 = vld [vmem:[#allocation91_spill] sm:$0xff]  ;;  %v19462_v47 = vmax.f32 %v19461_v18, 0.0  ;;  %v19465_v42 = vld [vmem:[#allocation93_spill] sm:$0xff]  ;;  %v14252_v0 = vmul.f32 %v19468_v49, %v19467_v61  ;;  %v19469_v34 = vld [vmem:[#allocation22_spill] sm:$0xff]  ;;  %v19494_v52 = vmax.f32 %v13862_v13, 0.0 }
 0x2ea   :  { %19448 = vst [vmem:[#allocation20_spill] sm:$0xff] %v14217_v22  ;;  %v14237_v5 = vmul.f32 %v19459_v63, %v19458_v16  ;;  %v19463_v22 = vld [vmem:[#allocation92_spill] sm:$0xff]  ;;  %v14247_v53 = vmul.f32 %v19465_v42, %v19464_v58  ;;  %v19470_v7 = vmax.f32 %v19469_v34, 0.0  ;;  %v10669_v63 = vld [vmem:[#allocation6 + $0x78] sm:$0xff]  ;;  %v19477_v58 = vld [vmem:[#allocation99_spill] sm:$0xff]  ;;  %v19481_v34 = vmax.f32 %v13838_v4, 0.0 }
 0x2eb   :  { %19456 = vst [vmem:[#allocation26_spill] sm:$0xff] %v14232_v27  ;;  %v14242_v12 = vmul.f32 %v19463_v22, %v19462_v47  ;;  %v19471_v27 = vld [vmem:[#allocation97_spill] sm:$0xff]  ;;  %v19475_v47 = vld [vmem:[#allocation98_spill] sm:$0xff]  ;;  %v14267_v42 = vmul.f32 %v19477_v58, %v19476_v46  ;;  %v19478_v40 = vld [vmem:[#allocation31_spill] sm:$0xff]  ;;  %v19489_v4 = vmax.f32 %v19358_v6, 0.0  ;;  %2685 = vmatpush.bf16.msra.mxu1 %v10669_v63  ;;  %v19500_v6 = vmax.f32 %v19360_v21, 0.0  ;;  %11682 = vmatpush.bf16.msra.mxu3 %v10669_v63 }
 0x2ec   :  { %19460 = vst [vmem:[#allocation32_spill] sm:$0xff] %v14237_v5  ;;  %v14257_v16 = vmul.f32 %v19471_v27, %v19470_v7  ;;  %v19473_v18 = vld [vmem:[#allocation25_spill] sm:$0xff]  ;;  %v19482_v7 = vld [vmem:[#allocation103_spill] sm:$0xff]  ;;  %v19488_v58 = vld [vmem:[#allocation108_spill] sm:$0xff]  ;;  %v19506_v13 = vmax.f32 %v19361_v11, 0.0  ;;  %v19520_v11 = vmax.f32 %v13894_v33, 0.0 }
 0x2ed   :  { %19466 = vst [vmem:[#allocation33_spill] sm:$0xff] %v14247_v53  ;;  %v19474_v5 = vmax.f32 %v19473_v18, 0.0  ;;  %v19479_v53 = vmax.f32 %v19478_v40, 0.0  ;;  %v19480_v61 = vld [vmem:[#allocation101_spill] sm:$0xff]  ;;  %v14277_v27 = vmul.f32 %v19482_v7, %v19481_v34  ;;  %v19483_v18 = vmax.f32 %v13842_v51, 0.0  ;;  %v19491_v51 = vld [vmem:[#allocation40_spill] sm:$0xff] }
 0x2ee   :  { %19472 = vst [vmem:[#allocation39_spill] sm:$0xff] %v14257_v16  ;;  %v19484_v16 = vld [vmem:[#allocation104_spill] sm:$0xff]  ;;  %v19487_v40 = vmax.f32 %v19357_v15, 0.0  ;;  %v19492_v7 = vmax.f32 %v19491_v51, 0.0  ;;  %v19497_v15 = vmax.f32 %v19359_v32, 0.0  ;;  %v19503_v51 = vmax.f32 %v13874_v10, 0.0 }
 0x2ef   :  { %v14262_v22 = vmul.f32 %v19475_v47, %v19474_v5  ;;  %v14272_v49 = vmul.f32 %v19480_v61, %v19479_v53  ;;  %v14282_v5 = vmul.f32 %v19484_v16, %v19483_v18  ;;  %v19486_v47 = vld [vmem:[#allocation106_spill] sm:$0xff]  ;;  %v19493_v18 = vld [vmem:[#allocation111_spill] sm:$0xff]  ;;  %v19513_v21 = vld [vmem:[#allocation113_spill] sm:$0xff]  ;;  %v19531_v33 = vmax.f32 %v13910_v3, 0.0 }
 0x2f0   :  { %v14287_v46 = vmul.f32 %v19486_v47, %v19485_v45  ;;  %v14292_v53 = vmul.f32 %v19488_v58, %v19487_v40  ;;  %v19490_v61 = vld [vmem:[#allocation110_spill] sm:$0xff]  ;;  %v14302_v16 = vmul.f32 %v19493_v18, %v19492_v7  ;;  %v19495_v45 = vld [vmem:[#allocation112_spill] sm:$0xff]  ;;  %v19509_v32 = vld [vmem:[#allocation107_spill] sm:$0xff]  ;;  %v19542_v3 = vmax.f32 %v19363_v2, 0.0 }
 0x2f1   :  { %v14297_v34 = vmul.f32 %v19490_v61, %v19489_v4  ;;  %v14307_v47 = vmul.f32 %v19495_v45, %v19494_v52  ;;  %v19498_v40 = vld [vmem:[#allocation114_spill] sm:$0xff]  ;;  %v19501_v4 = vld [vmem:[#allocation115_spill] sm:$0xff]  ;;  %v19504_v7 = vld [vmem:[#allocation116_spill] sm:$0xff] }
 0x2f2   :  { %v14312_v58 = vmul.f32 %v19498_v40, %v19497_v15  ;;  %v14317_v61 = vmul.f32 %v19501_v4, %v19500_v6  ;;  %v14322_v18 = vmul.f32 %v19504_v7, %v19503_v51  ;;  %v19507_v52 = vld [vmem:[#allocation117_spill] sm:$0xff]  ;;  %v19511_v15 = vld [vmem:[#allocation118_spill] sm:$0xff]  ;;  %v19515_v6 = vld [vmem:[#allocation119_spill] sm:$0xff] }
 0x2f3   :  { %19496 = vst [vmem:[#allocation44_spill] sm:$0xff] %v14307_v47  ;;  %v14327_v45 = vmul.f32 %v19507_v52, %v19506_v13  ;;  %v19510_v47 = vmax.f32 %v19509_v32, 0.0  ;;  %v10668_v63 = vld [vmem:[#allocation6 + $0x70] sm:$0xff]  ;;  %v10661_v10 = vld [vmem:[#allocation6 + $0x38] sm:$0xff]  ;;  %v19524_v32 = vld [vmem:[#allocation122_spill] sm:$0xff] }
 0x2f4   :  { %19499 = vst [vmem:[#allocation63_spill] sm:$0xff] %v14312_v58  ;;  %v19514_v58 = vmax.f32 %v19513_v21, 0.0  ;;  %v19519_v7 = vld [vmem:[#allocation120_spill] sm:$0xff]  ;;  %v19521_v13 = vld [vmem:[#allocation121_spill] sm:$0xff]  ;;  %2686 = vmatpush.bf16.msra.mxu1 %v10668_v63  ;;  %11683 = vmatpush.bf16.msra.mxu3 %v10668_v63  ;;  %v19554_v2 = vld [vmem:[#allocation23_spill] sm:$0xff] }
 0x2f5   :  { %19502 = vst [vmem:[#allocation102_spill] sm:$0xff] %v14317_v61  ;;  %v14332_v40 = vmul.f32 %v19511_v15, %v19510_v47  ;;  %v19517_v61 = vld [vmem:[#allocation130_spill] sm:$0xff]  ;;  %v14347_v52 = vmul.f32 %v19521_v13, %v19520_v11  ;;  %v19523_v47 = vmax.f32 %v13898_v60, 0.0  ;;  %v19525_v21 = vld [vmem:[#allocation12_spill] sm:$0xff]  ;;  %v19534_v60 = vmax.f32 %v13914_v48, 0.0  ;;  %3369 = vmatpush.bf16.msrb.mxu2 %v10661_v10  ;;  %v10667_v63 = vld [vmem:[#allocation6 + $0x68] sm:$0xff] }
 0x2f6   :  { %19505 = vst [vmem:[#allocation13_spill] sm:$0xff] %v14322_v18  ;;  %v14337_v4 = vmul.f32 %v19515_v6, %v19514_v58  ;;  %v19518_v51 = vmax.f32 %v19517_v61, 0.0  ;;  %v19526_v58 = vmax.f32 %v19525_v21, 0.0  ;;  %v19527_v6 = vld [vmem:[#allocation123_spill] sm:$0xff]  ;;  %v19529_v61 = vmax.f32 %v13906_v31, 0.0  ;;  %v19532_v11 = vld [vmem:[#allocation126_spill] sm:$0xff] }
 0x2f7   :  { %19508 = vst [vmem:[#allocation15_spill] sm:$0xff] %v14327_v45  ;;  %v14352_v15 = vmul.f32 %v19524_v32, %v19523_v47  ;;  %v14367_v13 = vmul.f32 %v19532_v11, %v19531_v33  ;;  %v19535_v47 = vld [vmem:[#allocation127_spill] sm:$0xff]  ;;  %v19536_v21 = vmax.f32 %v13918_v44, 0.0  ;;  %v19539_v31 = vmax.f32 %v13922_v54, 0.0  ;;  %v19550_v54 = vld [vmem:[#allocation21_spill] sm:$0xff]  ;;  %v19575_v10 = vld [vmem:[#allocation140_spill] sm:$0xff] }
 0x2f8   :  { %19512 = vst [vmem:[#allocation18_spill] sm:$0xff] %v14332_v40  ;;  %v14342_v18 = vmul.f32 %v19519_v7, %v19518_v51  ;;  %v10685_v40 = vld [vmem:[#allocation6 + $0xf8] sm:$0xff]  ;;  %v14372_v32 = vmul.f32 %v19535_v47, %v19534_v60  ;;  %v19543_v33 = vld [vmem:[#allocation131_spill] sm:$0xff]  ;;  %v19545_v48 = vmax.f32 %v19364_v41, 0.0  ;;  %v19546_v60 = vld [vmem:[#allocation46_spill] sm:$0xff]  ;;  %v19548_v44 = vmax.f32 %v19365_v23, 0.0  ;;  %2687 = vmatpush.bf16.msra.mxu1 %v10667_v63  ;;  %11684 = vmatpush.bf16.msra.mxu3 %v10667_v63 }
 0x2f9   :  { %19516 = vst [vmem:[#allocation38_spill] sm:$0xff] %v14337_v4  ;;  %v14357_v4 = vmul.f32 %v19527_v6, %v19526_v58  ;;  %v19530_v51 = vld [vmem:[#allocation125_spill] sm:$0xff]  ;;  %v19537_v58 = vld [vmem:[#allocation128_spill] sm:$0xff]  ;;  %v14387_v11 = vmul.f32 %v19543_v33, %v19542_v3  ;;  %4941 = vmatpush.bf16.msrb.mxu0 %v10685_v40  ;;  %v10994_v63 = vpack.c.bf16 %v14132_v56, %v14127_v59  ;;  %v10659_v45 = vld [vmem:[#allocation6 + $0x28] sm:$0xff] }
 0x2fa   :  { %19522 = vst [vmem:[#allocation42_spill] sm:$0xff] %v14347_v52  ;;  %v14362_v7 = vmul.f32 %v19530_v51, %v19529_v61  ;;  %v14377_v6 = vmul.f32 %v19537_v58, %v19536_v21  ;;  %v19540_v61 = vld [vmem:[#allocation129_spill] sm:$0xff]  ;;  %v14392_v47 = vmul.f32 %v19546_v60, %v19545_v48  ;;  %v19549_v21 = vld [vmem:[#allocation132_spill] sm:$0xff]  ;;  %v19559_v48 = vld [vmem:[#allocation134_spill] sm:$0xff]  ;;  %v11029_v56 = vpack.c.bf16 %v14202_v38, %v14197_v26 }
 0x2fb   :  { %19528 = vst [vmem:[#allocation65_spill] sm:$0xff] %v14357_v4  ;;  %v14382_v51 = vmul.f32 %v19540_v61, %v19539_v31  ;;  %v14397_v58 = vmul.f32 %v19549_v21, %v19548_v44  ;;  %v19552_v31 = vld [vmem:[#allocation50_spill] sm:$0xff]  ;;  %v19556_v3 = vld [vmem:[#allocation133_spill] sm:$0xff]  ;;  %v19557_v41 = vld [vmem:[#allocation24_spill] sm:$0xff] }
 0x2fc   :  { %19533 = vst [vmem:[#allocation81_spill] sm:$0xff] %v14367_v13  ;;  %v19560_v23 = vld [vmem:[#allocation28_spill] sm:$0xff]  ;;  %v19562_v44 = vld [vmem:[#allocation58_spill] sm:$0xff]  ;;  %v10665_v13 = vld [vmem:[#allocation6 + $0x58] sm:$0xff] }
 0x2fd   :  { %19538 = vst [vmem:[#allocation139_spill] sm:$0xff] %v14377_v6  ;;  %v19551_v6 = vmax.f32 %v19550_v54, 0.0  ;;  %v10660_v54 = vld [vmem:[#allocation6 + $0x30] sm:$0xff]  ;;  %v2286_v26 = vld [vmem:[#allocation2 + $0x4] sm:$0x8] }
 0x2fe   :  { %19541 = vst [vmem:[#allocation43_spill] sm:$0xff] %v14382_v51  ;;  %v19555_v51 = vmax.f32 %v19554_v2, 0.0  ;;  %3370 = vmatpush.bf16.msrb.mxu2 %v10660_v54  ;;  %v19604_v54 = vld [vmem:[#allocation53_spill] sm:$0xff] }
 0x2ff   :  { %19544 = vst [vmem:[#allocation45_spill] sm:$0xff] %v14387_v11  ;;  %v14402_v61 = vmul.f32 %v19552_v31, %v19551_v6  ;;  %v19558_v11 = vmax.f32 %v19557_v41, 0.0  ;;  %v19564_v6 = vld [vmem:[#allocation30_spill] sm:$0xff]  ;;  %v10657_v38 = vld [vmem:[#allocation6 + $0x18] sm:$0xff] }
 0x300   :  { %19547 = vst [vmem:[#allocation47_spill] sm:$0xff] %v14392_v47  ;;  %v14407_v33 = vmul.f32 %v19556_v3, %v19555_v51  ;;  %v19561_v47 = vmax.f32 %v19560_v23, 0.0  ;;  %v19565_v31 = vmax.f32 %v19564_v6, 0.0  ;;  %v19568_v51 = vmax.f32 %v13958_v50, 0.0  ;;  %v19569_v3 = vld [vmem:[#allocation137_spill] sm:$0xff]  ;;  %v10684_v6 = vld [vmem:[#allocation6 + $0xf0] sm:$0xff] }
 0x301   :  { %19553 = vst [vmem:[#allocation49_spill] sm:$0xff] %v14402_v61  ;;  %v14412_v60 = vmul.f32 %v19559_v48, %v19558_v11  ;;  %v19566_v61 = vld [vmem:[#allocation136_spill] sm:$0xff]  ;;  %v19570_v11 = vmax.f32 %v13962_v36, 0.0  ;;  %v19571_v48 = vld [vmem:[#allocation138_spill] sm:$0xff]  ;;  %v19578_v50 = vmax.f32 %v13974_v35, 0.0  ;;  %v19588_v35 = vmax.f32 %v19369_v1, 0.0  ;;  %4942 = vmatpush.bf16.msrb.mxu0 %v10684_v6 }
 0x302   :  { %v14417_v21 = vmul.f32 %v19562_v44, %v19561_v47  ;;  %v14422_v2 = vmul.f32 %v19566_v61, %v19565_v31  ;;  %v14427_v41 = vmul.f32 %v19569_v3, %v19568_v51  ;;  %v19573_v47 = vld [vmem:[#allocation34_spill] sm:$0xff]  ;;  %v19576_v31 = vmax.f32 %v13970_v17, 0.0  ;;  %v19577_v61 = vld [vmem:[#allocation141_spill] sm:$0xff]  ;;  %v19581_v36 = vld [vmem:[#allocation36_spill] sm:$0xff]  ;;  %11388 = vst [vmem:[#allocation2 + $0x30] sm:$0xff] %v10994_v63   ;;  %3371 = vmatpush.bf16.msrb.mxu2 %v10659_v45 }
 0x303   :  { %v14432_v23 = vmul.f32 %v19571_v48, %v19570_v11  ;;  %v19574_v44 = vmax.f32 %v19573_v47, 0.0  ;;  %v19579_v51 = vld [vmem:[#allocation142_spill] sm:$0xff]  ;;  %v19582_v11 = vmax.f32 %v19581_v36, 0.0  ;;  %v19583_v48 = vld [vmem:[#allocation143_spill] sm:$0xff]  ;;  %v19585_v47 = vld [vmem:[#allocation144_spill] sm:$0xff]  ;;  %v19586_v17 = vmax.f32 %v19368_v43, 0.0 }
 0x304   :  { %19563 = vst [vmem:[#allocation51_spill] sm:$0xff] %v14417_v21  ;;  %v14447_v3 = vmul.f32 %v19579_v51, %v19578_v50  ;;  %v19589_v50 = vld [vmem:[#allocation146_spill] sm:$0xff]  ;;  %v19590_v36 = vmax.f32 %v19370_v55, 0.0  ;;  %v19596_v43 = vmax.f32 %v14002_v25, 0.0  ;;  %v10974_v1 = vpack.c.bf16 %v14092_v28, %v14087_v9  ;;  %v19600_v28 = vld [vmem:[#allocation35_spill] sm:$0xff]  ;;  %v19602_v9 = vld [vmem:[#allocation41_spill] sm:$0xff] }
 0x305   :  { %19567 = vst [vmem:[#allocation52_spill] sm:$0xff] %v14422_v2  ;;  %v14437_v21 = vmul.f32 %v19575_v10, %v19574_v44  ;;  %v14442_v2 = vmul.f32 %v19577_v61, %v19576_v31  ;;  %v19584_v44 = vmax.f32 %v19367_v30, 0.0  ;;  %v19587_v31 = vld [vmem:[#allocation145_spill] sm:$0xff]  ;;  %v14467_v51 = vmul.f32 %v19589_v50, %v19588_v35  ;;  %v19592_v30 = vld [vmem:[#allocation86_spill] sm:$0xff] }
 0x306   :  { %19572 = vst [vmem:[#allocation71_spill] sm:$0xff] %v14432_v23  ;;  %v14452_v23 = vmul.f32 %v19583_v48, %v19582_v11  ;;  %v14462_v61 = vmul.f32 %v19587_v31, %v19586_v17  ;;  %v19591_v11 = vld [vmem:[#allocation147_spill] sm:$0xff]  ;;  %v19593_v10 = vmax.f32 %v19592_v30, 0.0  ;;  %v19597_v17 = vld [vmem:[#allocation149_spill] sm:$0xff]  ;;  %v10979_v55 = vpack.c.bf16 %v14102_v39, %v14097_v20 }
 0x307   :  { %19580 = vst [vmem:[#allocation76_spill] sm:$0xff] %v14447_v3  ;;  %v14457_v40 = vmul.f32 %v19585_v47, %v19584_v44  ;;  %v14472_v48 = vmul.f32 %v19591_v11, %v19590_v36  ;;  %v19594_v44 = vld [vmem:[#allocation148_spill] sm:$0xff]  ;;  %v14482_v31 = vmul.f32 %v19597_v17, %v19596_v43  ;;  %v10984_v35 = vpack.c.bf16 %v14112_v62, %v14107_v8  ;;  %v19598_v36 = vld [vmem:[#allocation27_spill] sm:$0xff]  ;;  %v19599_v30 = vld [vmem:[#allocation29_spill] sm:$0xff] }
 0x308   :  { %v14477_v47 = vmul.f32 %v19594_v44, %v19593_v10  ;;  %v10989_v10 = vpack.c.bf16 %v14122_v14, %v14117_v37  ;;  %v10999_v25 = vpack.c.bf16 %v14142_v57, %v14137_v19  ;;  %v11004_v43 = vpack.c.bf16 %v19599_v30, %v19598_v36  ;;  %11384 = vst [vmem:[#allocation2 + $0x10] sm:$0xff] %v10974_v1   ;;  %v19601_v39 = vld [vmem:[#allocation37_spill] sm:$0xff]  ;;  %v19603_v8 = vld [vmem:[#allocation48_spill] sm:$0xff]  ;;  %v19605_v17 = vld [vmem:[#allocation94_spill] sm:$0xff] }
 0x309   :  { %v11009_v20 = vpack.c.bf16 %v19601_v39, %v19600_v28  ;;  %v11014_v62 = vpack.c.bf16 %v19603_v8, %v19602_v9  ;;  %v11019_v37 = vpack.c.bf16 %v19605_v17, %v19604_v54  ;;  %v19606_v14 = vld [vmem:[#allocation124_spill] sm:$0xff]  ;;  %v19607_v44 = vld [vmem:[#allocation135_spill] sm:$0xff]  ;;  %11385 = vst [vmem:[#allocation2 + $0x18] sm:$0xff] %v10979_v55   ;;  %v19611_v30 = vld [vmem:[#allocation26_spill] sm:$0xff] }
 0x30a   :  { %19595 = vst [vmem:[#allocation95_spill] sm:$0xff] %v14477_v47  ;;  %v11024_v59 = vpack.c.bf16 %v19607_v44, %v19606_v14  ;;  %v19608_v19 = vld [vmem:[#allocation100_spill] sm:$0xff]  ;;  %v19609_v57 = vld [vmem:[#allocation19_spill] sm:$0xff]  ;;  %v19613_v9 = vld [vmem:[#allocation33_spill] sm:$0xff]  ;;  %v2387_v47 = vunpack.c.l.b16 %v2286_v26 }
 0x30b   :  { %v11034_v6 = vpack.c.bf16 %v19609_v57, %v19608_v19  ;;  %v19610_v1 = vld [vmem:[#allocation20_spill] sm:$0xff]  ;;  %11386 = vst [vmem:[#allocation2 + $0x20] sm:$0xff] %v10984_v35   ;;  %v19614_v55 = vld [vmem:[#allocation39_spill] sm:$0xff]  ;;  %v19617_v57 = vld [vmem:[#allocation102_spill] sm:$0xff] }
 0x30c   :  { %v11039_v36 = vpack.c.bf16 %v14222_v24, %v19610_v1  ;;  %v19612_v39 = vld [vmem:[#allocation32_spill] sm:$0xff]  ;;  %11387 = vst [vmem:[#allocation2 + $0x28] sm:$0xff] %v10989_v10   ;;  %v19616_v14 = vld [vmem:[#allocation63_spill] sm:$0xff]  ;;  %v19618_v1 = vld [vmem:[#allocation13_spill] sm:$0xff] }
 0x30d   :  { %v19615_v54 = vld [vmem:[#allocation44_spill] sm:$0xff]  ;;  %v19620_v10 = vld [vmem:[#allocation38_spill] sm:$0xff]  ;;  %11389 = vst [vmem:[#allocation2 + $0x38] sm:$0xff] %v10999_v25   ;;  %v19621_v19 = vld [vmem:[#allocation139_spill] sm:$0xff] }
 0x30e   :  { %v10666_v24 = vld [vmem:[#allocation6 + $0x60] sm:$0xff]  ;;  %v19622_v28 = vld [vmem:[#allocation43_spill] sm:$0xff]  ;;  %v19623_v11 = vld [vmem:[#allocation45_spill] sm:$0xff]  ;;  %11390 = vst [vmem:[#allocation2 + $0x40] sm:$0xff] %v11004_v43  }
 0x30f   :  { %v19624_v50 = vld [vmem:[#allocation47_spill] sm:$0xff]  ;;  %v19625_v17 = vld [vmem:[#allocation49_spill] sm:$0xff]  ;;  %v19627_v35 = vld [vmem:[#allocation52_spill] sm:$0xff]  ;;  %11391 = vst [vmem:[#allocation2 + $0x48] sm:$0xff] %v11009_v20   ;;  %2688 = vmatpush.bf16.msra.mxu1 %v10666_v24  ;;  %11685 = vmatpush.bf16.msra.mxu3 %v10666_v24 }
 0x310   :  { %v10683_v44 = vld [vmem:[#allocation6 + $0xe8] sm:$0xff]  ;;  %11392 = vst [vmem:[#allocation2 + $0x50] sm:$0xff] %v11014_v62   ;;  %v10658_v20 = vld [vmem:[#allocation6 + $0x20] sm:$0xff]  ;;  %v2187_v43 = vld [vmem:[#allocation2 + $0x4] sm:$0xc] }
 0x311   :  { %v19626_v52 = vld [vmem:[#allocation51_spill] sm:$0xff]  ;;  %11393 = vst [vmem:[#allocation2 + $0x58] sm:$0xff] %v11019_v37   ;;  %4943 = vmatpush.bf16.msrb.mxu0 %v10683_v44  ;;  %v10682_v8 = vld [vmem:[#allocation6 + $0xe0] sm:$0xff]  ;;  %v10664_v62 = vld [vmem:[#allocation6 + $0x50] sm:$0xff]  ;;  %v2900_v24 = vunpack.c.l.b16 %v2187_v43  ;;  %3372 = vmatpush.bf16.msrb.mxu2 %v10658_v20 }
 0x312   :  { %v19628_v63 = vld [vmem:[#allocation71_spill] sm:$0xff]  ;;  %v2188_v25 = vld [vmem:[#allocation2 + $0x8] sm:$0xf]  ;;  %11394 = vst [vmem:[#allocation2 + $0x60] sm:$0xff] %v11024_v59   ;;  %v10681_v4 = vld [vmem:[#allocation6 + $0xd8] sm:$0xff]  ;;  %v19629_v59 = vpack.c.bf16 %v19611_v30, %v14227_v29  ;;  %v19632_v29 = vpack.c.bf16 %v14262_v22, %v19614_v55  ;;  %v19634_v22 = vpack.c.bf16 %v14282_v5, %v14277_v27  ;;  %v19635_v55 = vpack.c.bf16 %v14292_v53, %v14287_v46 }
 0x313   :  { %v2388_v3 = vunpack.c.l.b16 %v2188_v25  ;;  %11395 = vst [vmem:[#allocation2 + $0x68] sm:$0xff] %v11029_v56   ;;  %2689 = vmatpush.bf16.msra.mxu1 %v10665_v13  ;;  %11686 = vmatpush.bf16.msra.mxu3 %v10665_v13  ;;  %v14564_v45 = vld [vmem:[#allocation2 + $0xc] sm:$0xff]  ;;  %v19630_v13 = vpack.c.bf16 %v14242_v12, %v19612_v39  ;;  %v10656_v26 = vld [vmem:[#allocation6 + $0x10] sm:$0xff]  ;;  %v10693_v27 = vld [vmem:[#allocation6 + $0x138] sm:$0xff] }
 0x314   :  { %11396 = vst [vmem:[#allocation2 + $0x70] sm:$0xff] %v11034_v6   ;;  %v11472_v37 = vld [vmem:[#allocation2 + $0xc] sm:$0x8]  ;;  %v11691_v44 = vld [vmem:[#allocation2 + $0xc] sm:$0xf0]   ;;  %v11693_v6 = vld [vmem:[#allocation2 + $0x14] sm:$0xff]  }
 0x315   :  { %11397 = vst [vmem:[#allocation2 + $0x78] sm:$0xff] %v11039_v36   ;;  %4944 = vmatpush.bf16.msrb.mxu0 %v10682_v8  ;;  %v2901_v56 = vpack.c.b16 %v2388_v3, %v2900_v24  ;;  %v11473_v25 = vor.u32 %v11691_v44, %v11472_v37  ;;  %v19631_v36 = vpack.c.bf16 %v14252_v0, %v19613_v9  ;;  %v10663_v8 = vld [vmem:[#allocation6 + $0x48] sm:$0xff]  ;;  %v10680_v30 = vld [vmem:[#allocation6 + $0xd0] sm:$0xff]  ;;  %v18722_v39 = vshrl.u32 %v14564_v45, 16 }
 0x316   :  { %11398 = vst [vmem:[#allocation2 + $0x80] sm:$0xff] %v19629_v59   ;;  %v14575_v43 = vpack.c.b16 %v2388_v3, %v2387_v47  ;;  %3373 = vmatpush.bf16.msrb.mxu2 %v10657_v38  ;;  %v18721_v0 = vshll.u32 %v14564_v45, 16  ;;  %v19633_v9 = vpack.c.bf16 %v14272_v49, %v14267_v42  ;;  %v4484_v47 = vshrl.u32 %v11693_v6, 16  ;;  %v10655_v38 = vld [vmem:[#allocation6 + $0x8] sm:$0xff] }
 0x317   :  { %11399 = vst [vmem:[#allocation2 + $0x88] sm:$0xff] %v19630_v13   ;;  %2690 = vmatpush.bf16.msra.mxu1 %v10664_v62  ;;  %11687 = vmatpush.bf16.msra.mxu3 %v10664_v62  ;;  %v2904_v20 = vshrl.u32 %v2901_v56, 16  ;;  %v2907_v12 = vshll.u32 %v2901_v56, 16  ;;  %v4476_v62 = vshrl.u32 %v11473_v25, 16  ;;  %v4479_v3 = vshll.u32 %v11473_v25, 16  ;;  %v10679_v37 = vld [vmem:[#allocation6 + $0xc8] sm:$0xff] }
 0x318   :  { %11400 = vst [vmem:[#allocation2 + $0x90] sm:$0xff] %v19631_v36   ;;  %v4487_v24 = vshll.u32 %v11693_v6, 16  ;;  %v2513_v42 = vrot.slane %v14575_v43, 3  ;;  %v2514_v49 = vrot.slane %v14564_v45, 3  ;;  %v19636_v44 = vpack.c.bf16 %v14302_v16, %v14297_v34  ;;  %v10677_v34 = vld [vmem:[#allocation6 + $0xb8] sm:$0xff] }
 0x319   :  { %11401 = vst [vmem:[#allocation2 + $0x98] sm:$0xff] %v19632_v29   ;;  %4945 = vmatpush.bf16.msrb.mxu0 %v10681_v4  ;;  %v10662_v4 = vld [vmem:[#allocation6 + $0x40] sm:$0xff]  ;;  %v2906_v5 = vrot.slane %v2904_v20, 2  ;;  %v2909_v59 = vrot.slane %v2907_v12, 3  ;;  %v2914_v46 = vrot.slane %v18722_v39, 2  ;;  %v2917_v53 = vrot.slane %v18721_v0, 3 }
 0x31a   :  { %11402 = vst [vmem:[#allocation2 + $0xa0] sm:$0xff] %v19633_v9   ;;  %3374 = vmatpush.bf16.msrb.mxu2 %v10656_v26  ;;  %v19637_v56 = vpack.c.bf16 %v19616_v14, %v19615_v54  ;;  %v4478_v6 = vrot.slane %v4476_v62, 3  ;;  %v4481_v25 = vrot.slane %v4479_v3, 4  ;;  %v4486_v13 = vrot.slane %v4484_v47, 3  ;;  %v19640_v26 = vld [vmem:[#allocation15_spill] sm:$0xff]  ;;  %v10678_v20 = vld [vmem:[#allocation6 + $0xc0] sm:$0xff] }
 0x31b   :  { %11403 = vst [vmem:[#allocation2 + $0xa8] sm:$0xff] %v19634_v22   ;;  %2691 = vmatpush.bf16.msra.mxu1 %v10663_v8  ;;  %11688 = vmatpush.bf16.msra.mxu3 %v10663_v8  ;;  %v4489_v16 = vrot.slane %v4487_v24, 4  ;;  %v19638_v36 = vpack.c.bf16 %v19618_v1, %v19617_v57  ;;  %v19639_v8 = vld [vmem:[#allocation18_spill] sm:$0xff]  ;;  %v2515_v54 = vsel %vm2512_vm3, %v2513_v42, %v2514_v49  ;;  %v19647_v22 = vld [vmem:[#allocation81_spill] sm:$0xff] }
 0x31c   :  { %11405 = vst [vmem:[#allocation2 + $0xb8] sm:$0xff] %v19635_v55   ;;  %v19641_v29 = vpack.c.bf16 %v19639_v8, %v19640_v26  ;;  %v19642_v14 = vpack.c.bf16 %v14342_v18, %v19620_v10  ;;  %v2910_v57 = vor.u32 %v2909_v59, %v2906_v5  ;;  %v2918_v1 = vor.u32 %v2917_v53, %v2914_v46  ;;  %v19643_v12 = vld [vmem:[#allocation42_spill] sm:$0xff]  ;;  %v19645_v18 = vld [vmem:[#allocation65_spill] sm:$0xff] }
 0x31d   :  { %11406 = vst [vmem:[#allocation2 + $0xc0] sm:$0xff] %v19636_v44   ;;  %4946 = vmatpush.bf16.msrb.mxu0 %v10680_v30  ;;  %v10654_v30 = vld [vmem:[#allocation6] sm:$0xff]  ;;  %v19644_v9 = vpack.c.bf16 %v14352_v15, %v19643_v12  ;;  %v4482_v3 = vor.u32 %v4481_v25, %v4478_v6  ;;  %v4490_v47 = vor.u32 %v4489_v16, %v4486_v13 }
 0x31e   :  { %11407 = vst [vmem:[#allocation2 + $0xc8] sm:$0xff] %v19637_v56   ;;  %3375 = vmatpush.bf16.msrb.mxu2 %v10655_v38  ;;  %v19646_v10 = vpack.c.bf16 %v14362_v7, %v19645_v18  ;;  %v19649_v55 = vpack.c.bf16 %v19622_v28, %v19621_v19  ;;  %v19650_v7 = vpack.c.bf16 %v19624_v50, %v19623_v11  ;;  %v14641_v19 = vld [vmem:[#allocation2 + $0x14] sm:$0xff]  ;;  %v11695_v50 = vld [vmem:[#allocation2 + $0x1c] sm:$0xff]   ;;  %v11697_v8 = vld [vmem:[#allocation2 + $0x24] sm:$0xff]  }
 0x31f   :  { %11408 = vst [vmem:[#allocation2 + $0xd0] sm:$0xff] %v19638_v36   ;;  %2692 = vmatpush.bf16.msra.mxu1 %v10662_v4  ;;  %11689 = vmatpush.bf16.msra.mxu3 %v10662_v4  ;;  %v19648_v4 = vpack.c.bf16 %v14372_v32, %v19647_v22  ;;  %v4491_v42 = vsel %vm3604_vm5, %v4482_v3, %v4490_v47  ;;  %v4493_v59 = vshrl.u32 %v11695_v50, 16  ;;  %v4496_v46 = vshll.u32 %v11695_v50, 16  ;;  %v14692_v22 = vld [vmem:[#allocation2 + $0x24] sm:$0xff] }
 0x320   :  { %11409 = vst [vmem:[#allocation2 + $0xd8] sm:$0xff] %v19641_v29   ;;  %v19651_v32 = vpack.c.bf16 %v19625_v17, %v14397_v58  ;;  %v19652_v44 = vpack.c.bf16 %v14412_v60, %v14407_v33  ;;  %v19653_v11 = vpack.c.bf16 %v19627_v35, %v19626_v52  ;;  %v10692_v58 = vld [vmem:[#allocation6 + $0x130] sm:$0xff]  ;;  %v19655_v5 = vpack.c.bf16 %v14442_v2, %v14437_v21 }
 0x321   :  { %11410 = vst [vmem:[#allocation2 + $0xe0] sm:$0xff] %v19642_v14   ;;  %4947 = vmatpush.bf16.msrb.mxu0 %v10679_v37  ;;  %v2919_v37 = vsel %vm2902_vm4, %v2910_v57, %v2918_v1  ;;  %v10676_v17 = vld [vmem:[#allocation6 + $0xb0] sm:$0xff]  ;;  %v18719_v33 = vshrl.u32 %v14641_v19, 16  ;;  %v18718_v60 = vshll.u32 %v14641_v19, 16  ;;  %v19659_v21 = vpack.c.bf16 %v14472_v48, %v14467_v51 }
 0x322   :  { %11411 = vst [vmem:[#allocation2 + $0xe8] sm:$0xff] %v19644_v9   ;;  %v14618_v62 = vld [vmem:[#allocation2 + $0xac] sm:$0xff]  ;;  %2693 = vmatmul.bf16.vlgmr.msra.gmra.mxu1 %v2515_v54  ;;  %3376 = vmatpush.bf16.msrb.mxu2 %v10654_v30  ;;  %v19656_v52 = vld [vmem:[#allocation76_spill] sm:$0xff]  ;;  %v2516_v2 = vrot.slane %v14641_v19, 3  ;;  %v4495_v25 = vrot.slane %v4493_v59, 3  ;;  %v4502_v29 = vshrl.u32 %v11697_v8, 16 }
 0x323   :  { %5384 = vmatpush.bf16.msrb.mxu1 %v10693_v27  ;;  %3871 = vmatpush.bf16.msrb.mxu3 %v10677_v34  ;;  %11412 = vst [vmem:[#allocation2 + $0xf0] sm:$0xff] %v19646_v10   ;;  %v10635_v24 = vld [vmem:[#allocation2 + $0xb4] sm:$0xff]  ;;  %v18720_v15 = vrot.slane %v14618_v62, 3  ;;  %v19654_v27 = vpack.c.bf16 %v19628_v63, %v14427_v41  ;;  %v19657_v35 = vpack.c.bf16 %v14452_v23, %v19656_v52  ;;  %v2923_v23 = vrot.slane %v18719_v33, 2  ;;  %v14679_v34 = vld [vmem:[#allocation2 + $0x1c] sm:$0xff] }
 0x324   :  { %11413 = vst [vmem:[#allocation2 + $0xf8] sm:$0xff] %v19648_v4   ;;  %v2556_v38 = vrot.slane %v10635_v24, 3  ;;  %v19658_v41 = vpack.c.bf16 %v14462_v61, %v14457_v40  ;;  %v19660_v63 = vld [vmem:[#allocation95_spill] sm:$0xff]  ;;  %v10636_v56 = vld [vmem:[#allocation2 + $0xbc] sm:$0xff]  ;;  %v2926_v6 = vrot.slane %v18718_v60, 3  ;;  %v4498_v61 = vrot.slane %v4496_v46, 4 }
 0x325   :  { %11414 = vst [vmem:[#allocation2 + $0x100] sm:$0xff] %v19649_v55   ;;  %4948 = vmatpush.bf16.msrb.mxu0 %v10678_v20  ;;  %3377 = vmatmul.bf16.vlgmr.msrb.gmra.mxu2 %v2919_v37  ;;  %v19661_v53 = vpack.c.bf16 %v14482_v31, %v19660_v63  ;;  %v2517_v48 = vsel %vm2512_vm3, %v2514_v49, %v2516_v2  ;;  %v2558_v51 = vrot.slane %v10636_v56, 3  ;;  %v18715_v26 = vshrl.u32 %v14679_v34, 16  ;;  %v10637_v30 = vld [vmem:[#allocation2 + $0xc4] sm:$0xff]  ;;  %v11699_v55 = vld [vmem:[#allocation2 + $0x2c] sm:$0xff]  }
 0x326   :  { %11415 = vst [vmem:[#allocation2 + $0x108] sm:$0xff] %v19650_v7   ;;  %v2557_v28 = vsel %vm2512_vm3, %v18720_v15, %v2556_v38  ;;  %v2927_v40 = vor.u32 %v2926_v6, %v2923_v23  ;;  %v4499_v13 = vor.u32 %v4498_v61, %v4495_v25  ;;  %v18714_v49 = vshll.u32 %v14679_v34, 16  ;;  %v14705_v46 = vld [vmem:[#allocation2 + $0x2c] sm:$0xff] }
 0x327   :  { %11416 = vst [vmem:[#allocation2 + $0x110] sm:$0xff] %v19651_v32   ;;  %2798 = vmatmul.bf16.vlgmr.msra.gmra.mxu3 %v2557_v28  ;;  %5385 = vmatpush.bf16.msrb.mxu1 %v10692_v58  ;;  %v2559_v31 = vsel %vm2512_vm3, %v2556_v38, %v2558_v51  ;;  %v4505_v54 = vshll.u32 %v11697_v8, 16  ;;  %v2518_v14 = vrot.slane %v14679_v34, 3  ;;  %v2932_v20 = vrot.slane %v18715_v26, 2  ;;  %v10638_v28 = vld [vmem:[#allocation2 + $0xcc] sm:$0xff]  ;;  %v10639_v61 = vld [vmem:[#allocation2 + $0xd4] sm:$0xff] }
 0x328   :  { %11417 = vst [vmem:[#allocation2 + $0x118] sm:$0xff] %v19652_v44   ;;  %4949 = vmatmul.bf16.vlgmr.msrb.gmra.mxu0 %v4491_v42  ;;  %3872 = vmatpush.bf16.msrb.mxu3 %v10676_v17  ;;  %v2928_v16 = vsel %vm2902_vm4, %v2918_v1, %v2927_v40  ;;  %v4500_v36 = vsel %vm3604_vm5, %v4490_v47, %v4499_v13  ;;  %v2935_v57 = vrot.slane %v18714_v49, 3  ;;  %v4504_v1 = vrot.slane %v4502_v29, 3  ;;  %v10675_v63 = vld [vmem:[#allocation6 + $0xa8] sm:$0xff] }
 0x329   :  { %11418 = vst [vmem:[#allocation2 + $0x120] sm:$0xff] %v19653_v11   ;;  %v4507_v12 = vrot.slane %v4505_v54, 4  ;;  %v2519_v9 = vsel %vm2512_vm3, %v2516_v2, %v2518_v14  ;;  %v2560_v3 = vrot.slane %v10637_v30, 3  ;;  %v18713_v38 = vshrl.u32 %v14692_v22, 16  ;;  %v10691_v2 = vld [vmem:[#allocation6 + $0x128] sm:$0xff] }
 0x32a   :  { %11419 = vst [vmem:[#allocation2 + $0x128] sm:$0xff] %v19654_v27   ;;  %v2936_v47 = vor.u32 %v2935_v57, %v2932_v20  ;;  %v18712_v37 = vshll.u32 %v14692_v22, 16  ;;  %v4511_v7 = vshrl.u32 %v11699_v55, 16  ;;  %v4514_v42 = vshll.u32 %v11699_v55, 16  ;;  %v11703_v20 = vld [vmem:[#allocation2 + $0x3c] sm:$0xff]  }
 0x32b   :  { %11420 = vst [vmem:[#allocation2 + $0x130] sm:$0xff] %v19655_v5   ;;  %v4508_v18 = vor.u32 %v4507_v12, %v4504_v1  ;;  %v2561_v10 = vsel %vm2512_vm3, %v2558_v51, %v2560_v3  ;;  %v2520_v32 = vrot.slane %v14692_v22, 3  ;;  %v2941_v44 = vrot.slane %v18713_v38, 2  ;;  %5386 = vmatpush.bf16.msrb.mxu1 %v10691_v2 }
 0x32c   :  { %11421 = vst [vmem:[#allocation2 + $0x138] sm:$0xff] %v19657_v35   ;;  %v2937_v24 = vsel %vm2902_vm4, %v2927_v40, %v2936_v47  ;;  %v2944_v50 = vrot.slane %v18712_v37, 3  ;;  %v4513_v11 = vrot.slane %v4511_v7, 3  ;;  %v4516_v58 = vrot.slane %v4514_v42, 4  ;;  %3873 = vmatpush.bf16.msrb.mxu3 %v10675_v63 }
 0x32d   :  { %11422 = vst [vmem:[#allocation2 + $0x140] sm:$0xff] %v19658_v41   ;;  %v4509_v4 = vsel %vm3604_vm5, %v4499_v13, %v4508_v18  ;;  %v2521_v17 = vsel %vm2512_vm3, %v2518_v14, %v2520_v32  ;;  %v2562_v27 = vrot.slane %v10638_v28, 3  ;;  %v18708_v56 = vshll.u32 %v14705_v46, 16  ;;  %v14718_v14 = vld [vmem:[#allocation2 + $0x34] sm:$0xff] }
 0x32e   :  { %11423 = vst [vmem:[#allocation2 + $0x148] sm:$0xff] %v19659_v21   ;;  %v2945_v5 = vor.u32 %v2944_v50, %v2941_v44  ;;  %v4517_v52 = vor.u32 %v4516_v58, %v4513_v11  ;;  %v11701_v21 = vld [vmem:[#allocation2 + $0x34] sm:$0xff]   ;;  %v2522_v25 = vrot.slane %v14705_v46, 3  ;;  %v18707_v57 = vshrl.u32 %v14718_v14, 16  ;;  %v14731_v50 = vld [vmem:[#allocation2 + $0x3c] sm:$0xff]  ;;  %v11705_v58 = vld [vmem:[#allocation2 + $0x44] sm:$0xff]  }
 0x32f   :  { %11424 = vst [vmem:[#allocation2 + $0x150] sm:$0xff] %v19661_v53   ;;  %v2563_v35 = vsel %vm2512_vm3, %v2560_v3, %v2562_v27  ;;  %v18711_v53 = vshrl.u32 %v14705_v46, 16  ;;  %v4520_v23 = vshrl.u32 %v11701_v21, 16  ;;  %v4523_v6 = vshll.u32 %v11701_v21, 16 }
 0x330   :  { %v2946_v59 = vsel %vm2902_vm4, %v2936_v47, %v2945_v5  ;;  %v4518_v41 = vsel %vm3604_vm5, %v4508_v18, %v4517_v52  ;;  %v2953_v51 = vrot.slane %v18708_v56, 3  ;;  %v18706_v1 = vshll.u32 %v14718_v14, 16  ;;  %v10640_v47 = vld [vmem:[#allocation2 + $0xdc] sm:$0xff] }
 0x331   :  { %v4522_v40 = vrot.slane %v4520_v23, 3  ;;  %v4525_v13 = vrot.slane %v4523_v6, 4  ;;  %v4529_v12 = vshrl.u32 %v11703_v20, 16  ;;  %v2524_v3 = vrot.slane %v14718_v14, 3  ;;  %v10674_v23 = vld [vmem:[#allocation6 + $0xa0] sm:$0xff] }
 0x332   :  { %2698 = vmatmul.bf16.gmra.mxu1 %v2517_v48  ;;  %v2950_v48 = vrot.slane %v18711_v53, 2  ;;  %v2959_v18 = vrot.slane %v18707_v57, 2  ;;  %v2566_v7 = vrot.slane %v10640_v47, 3  ;;  %v10690_v6 = vld [vmem:[#allocation6 + $0x120] sm:$0xff]  ;;  %3874 = vmatpush.bf16.msrb.mxu3 %v10674_v23 }
 0x333   :  { %v4526_v8 = vor.u32 %v4525_v13, %v4522_v40  ;;  %v2525_v55 = vsel %vm2512_vm3, %v2522_v25, %v2524_v3  ;;  %5387 = vmatpush.bf16.msrb.mxu1 %v10690_v6  ;;  %v14865_v38 = vld [vmem:[#allocation2 + $0x124] sm:$0xff] }
 0x334   :  { %v18726_v60 = vshll.u32 %v14865_v38, 16 }
 0x335   :  { %3382 = vmatmul.bf16.gmra.mxu2 %v2928_v16  ;;  %v2564_v16 = vrot.slane %v10639_v61, 3  ;;  %v4527_v30 = vsel %vm3604_vm5, %v4517_v52, %v4526_v8  ;;  %v4541_v52 = vshll.u32 %v11705_v58, 16 }
 0x337   :  { %2803 = vmatmul.bf16.gmra.mxu3 %v2559_v31  ;;  %v2523_v31 = vsel %vm2512_vm3, %v2520_v32, %v2522_v25  ;;  %v2565_v29 = vsel %vm2512_vm3, %v2562_v27, %v2564_v16  ;;  %v2567_v28 = vsel %vm2512_vm3, %v2564_v16, %v2566_v7  ;;  %v18704_v27 = vshll.u32 %v14731_v50, 16 }
 0x338   :  { %4954 = vmatmul.bf16.gmra.mxu0 %v4500_v36  ;;  %v2954_v36 = vor.u32 %v2953_v51, %v2950_v48  ;;  %v4543_v63 = vrot.slane %v4541_v52, 4 }
 0x339   :  { %v2971_v21 = vrot.slane %v18704_v27, 3 }
 0x33a   :  { %v2955_v54 = vsel %vm2902_vm4, %v2945_v5, %v2954_v36  ;;  %v4538_v5 = vshrl.u32 %v11705_v58, 16 }
 0x33c   :  { %v4540_v2 = vrot.slane %v4538_v5, 3 }
 0x33e   :  { %v4544_v51 = vor.u32 %v4543_v63, %v4540_v2 }
 0x342   :  { %2703 = vmatmul.bf16.gmra.mxu1 %v2519_v9  ;;  %v4532_v9 = vshll.u32 %v11703_v20, 16 }
 0x345   :  { %3387 = vmatmul.bf16.gmra.mxu2 %v2937_v24  ;;  %v4531_v24 = vrot.slane %v4529_v12, 3  ;;  %v10642_v12 = vld [vmem:[#allocation2 + $0xec] sm:$0xff] }
 0x347   :  { %2808 = vmatmul.bf16.gmra.mxu3 %v2561_v10  ;;  %v2962_v10 = vrot.slane %v18706_v1, 3  ;;  %v10672_v1 = vld [vmem:[#allocation6 + $0x90] sm:$0xff] }
 0x348   :  { %4959 = vmatmul.bf16.gmra.mxu0 %v4509_v4  ;;  %v4534_v4 = vrot.slane %v4532_v9, 4 }
 0x349   :  { %v2963_v42 = vor.u32 %v2962_v10, %v2959_v18 }
 0x34a   :  { %v4535_v32 = vor.u32 %v4534_v4, %v4531_v24  ;;  %v2570_v24 = vrot.slane %v10642_v12, 3 }
 0x34b   :  { %v2964_v44 = vsel %vm2902_vm4, %v2954_v36, %v2963_v42  ;;  %v11707_v36 = vld [vmem:[#allocation2 + $0x4c] sm:$0xff]  }
 0x34c   :  { %v4536_v11 = vsel %vm3604_vm5, %v4526_v8, %v4535_v32  ;;  %v4545_v16 = vsel %vm3604_vm5, %v4535_v32, %v4544_v51  ;;  %v14757_v32 = vld [vmem:[#allocation2 + $0x4c] sm:$0xff] }
 0x34d   :  { %v18698_v58 = vshll.u32 %v14757_v32, 16 }
 0x352   :  { %2708 = vmatmul.bf16.gmra.mxu1 %v2521_v17  ;;  %v18705_v17 = vshrl.u32 %v14731_v50, 16 }
 0x355   :  { %3392 = vmatmul.bf16.gmra.mxu2 %v2946_v59  ;;  %v10641_v59 = vld [vmem:[#allocation2 + $0xe4] sm:$0xff] }
 0x356   :  { %v2568_v61 = vrot.slane %v10641_v59, 3  ;;  %v10643_v59 = vld [vmem:[#allocation2 + $0xf4] sm:$0xff] }
 0x357   :  { %2813 = vmatmul.bf16.gmra.mxu3 %v2563_v35  ;;  %v2526_v35 = vrot.slane %v14731_v50, 3 }
 0x358   :  { %4964 = vmatmul.bf16.gmra.mxu0 %v4518_v41  ;;  %v2968_v41 = vrot.slane %v18705_v17, 2  ;;  %v2569_v40 = vsel %vm2512_vm3, %v2566_v7, %v2568_v61  ;;  %v2571_v7 = vsel %vm2512_vm3, %v2568_v61, %v2570_v24 }
 0x359   :  { %v2527_v25 = vsel %vm2512_vm3, %v2524_v3, %v2526_v35 }
 0x35a   :  { %v2972_v48 = vor.u32 %v2971_v21, %v2968_v41  ;;  %v2989_v21 = vrot.slane %v18698_v58, 3 }
 0x35c   :  { %v2973_v13 = vsel %vm2902_vm4, %v2963_v42, %v2972_v48 }
 0x362   :  { %2713 = vmatmul.bf16.gmra.mxu1 %v2523_v31  ;;  %v14744_v31 = vld [vmem:[#allocation2 + $0x44] sm:$0xff] }
 0x363   :  { %v18703_v8 = vshrl.u32 %v14744_v31, 16  ;;  %v2528_v20 = vrot.slane %v14744_v31, 3 }
 0x365   :  { %3397 = vmatmul.bf16.gmra.mxu2 %v2955_v54  ;;  %v4547_v54 = vshrl.u32 %v11707_v36, 16  ;;  %v2977_v9 = vrot.slane %v18703_v8, 2  ;;  %v2529_v10 = vsel %vm2512_vm3, %v2526_v35, %v2528_v20  ;;  %v2530_v35 = vrot.slane %v14757_v32, 3 }
 0x367   :  { %2818 = vmatmul.bf16.gmra.mxu3 %v2565_v29  ;;  %v18702_v29 = vshll.u32 %v14744_v31, 16  ;;  %v4549_v47 = vrot.slane %v4547_v54, 3  ;;  %v2531_v6 = vsel %vm2512_vm3, %v2528_v20, %v2530_v35 }
 0x368   :  { %4969 = vmatmul.bf16.gmra.mxu0 %v4527_v30  ;;  %v4550_v30 = vshll.u32 %v11707_v36, 16 }
 0x369   :  { %v2980_v3 = vrot.slane %v18702_v29, 3  ;;  %v14822_v29 = vld [vmem:[#allocation2 + $0x64] sm:$0xff] }
 0x36a   :  { %v4552_v18 = vrot.slane %v4550_v30, 4  ;;  %v11711_v30 = vld [vmem:[#allocation2 + $0x5c] sm:$0xff]  }
 0x36b   :  { %v2981_v4 = vor.u32 %v2980_v3, %v2977_v9 }
 0x36d   :  { %v2982_v42 = vsel %vm2902_vm4, %v2972_v48, %v2981_v4 }
 0x372   :  { %2718 = vmatmul.bf16.gmra.mxu1 %v2525_v55  ;;  %v4553_v55 = vor.u32 %v4552_v18, %v4549_v47  ;;  %v10673_v47 = vld [vmem:[#allocation6 + $0x98] sm:$0xff] }
 0x373   :  { %3875 = vmatpush.bf16.msrb.mxu3 %v10673_v47 }
 0x375   :  { %3402 = vmatmul.bf16.gmra.mxu2 %v2964_v44  ;;  %v11709_v44 = vld [vmem:[#allocation2 + $0x54] sm:$0xff]  }
 0x376   :  { %v4556_v5 = vshrl.u32 %v11709_v44, 16  ;;  %v4559_v52 = vshll.u32 %v11709_v44, 16 }
 0x377   :  { %2823 = vmatmul.bf16.gmra.mxu3 %v2567_v28  ;;  %v4554_v28 = vsel %vm3604_vm5, %v4544_v51, %v4553_v55 }
 0x378   :  { %4974 = vmatmul.bf16.gmra.mxu0 %v4536_v11  ;;  %v18699_v11 = vshrl.u32 %v14757_v32, 16  ;;  %v4558_v63 = vrot.slane %v4556_v5, 3  ;;  %v4561_v23 = vrot.slane %v4559_v52, 4  ;;  %3876 = vmatpush.bf16.msrb.mxu3 %v10672_v1 }
 0x37a   :  { %v2986_v41 = vrot.slane %v18699_v11, 2  ;;  %v4562_v48 = vor.u32 %v4561_v23, %v4558_v63 }
 0x37c   :  { %v2990_v61 = vor.u32 %v2989_v21, %v2986_v41  ;;  %v4563_v36 = vsel %vm3604_vm5, %v4553_v55, %v4562_v48 }
 0x382   :  { %2723 = vmatmul.bf16.gmra.mxu1 %v2527_v25  ;;  %v2572_v25 = vrot.slane %v10643_v59, 3 }
 0x385   :  { %3407 = vmatmul.bf16.gmra.mxu2 %v2973_v13  ;;  %v2991_v13 = vsel %vm2902_vm4, %v2981_v4, %v2990_v61  ;;  %v10689_v4 = vld [vmem:[#allocation6 + $0x118] sm:$0xff] }
 0x386   :  { %5388 = vmatpush.bf16.msrb.mxu1 %v10689_v4 }
 0x387   :  { %2828 = vmatmul.bf16.gmra.mxu3 %v2569_v40  ;;  %v2573_v40 = vsel %vm2512_vm3, %v2570_v24, %v2572_v25  ;;  %v4568_v24 = vshll.u32 %v11711_v30, 16 }
 0x388   :  { %4979 = vmatmul.bf16.gmra.mxu0 %v4545_v16  ;;  %v14772_v16 = vld [vmem:[#allocation2 + $0x54] sm:$0xff] }
 0x389   :  { %v18697_v9 = vshrl.u32 %v14772_v16, 16  ;;  %v18696_v3 = vshll.u32 %v14772_v16, 16  ;;  %v2532_v55 = vrot.slane %v14772_v16, 3  ;;  %v4570_v59 = vrot.slane %v4568_v24, 4 }
 0x38b   :  { %v2998_v44 = vrot.slane %v18696_v3, 3  ;;  %v2533_v41 = vsel %vm2512_vm3, %v2530_v35, %v2532_v55 }
 0x392   :  { %2728 = vmatmul.bf16.gmra.mxu1 %v2529_v10  ;;  %v4565_v10 = vshrl.u32 %v11711_v30, 16 }
 0x394   :  { %v4567_v52 = vrot.slane %v4565_v10, 3  ;;  %v11713_v10 = vld [vmem:[#allocation2 + $0x64] sm:$0xff]  }
 0x395   :  { %3412 = vmatmul.bf16.gmra.mxu2 %v2982_v42  ;;  %v10644_v42 = vld [vmem:[#allocation2 + $0xfc] sm:$0xff] }
 0x396   :  { %v2574_v63 = vrot.slane %v10644_v42, 3 }
 0x397   :  { %2833 = vmatmul.bf16.gmra.mxu3 %v2571_v7 }
 0x398   :  { %4984 = vmatmul.bf16.gmra.mxu0 %v4554_v28  ;;  %v2995_v28 = vrot.slane %v18697_v9, 2 }
 0x39a   :  { %v2999_v23 = vor.u32 %v2998_v44, %v2995_v28 }
 0x39c   :  { %v3000_v30 = vsel %vm2902_vm4, %v2990_v61, %v2999_v23  ;;  %v4577_v61 = vshll.u32 %v11713_v10, 16 }
 0x39f   :  { %v2694_v2 = vpop.f32.mrf.mxu1 }
 0x3a2   :  { %2733 = vmatmul.bf16.gmra.mxu1 %v2531_v6 }
 0x3a5   :  { %v14768_v51 = vpop.f32.mrf.mxu0  ;;  %3417 = vmatmul.bf16.gmra.mxu2 %v2991_v13 }
 0x3a7   :  { %2838 = vmatmul.bf16.gmra.mxu3 %v2573_v40  ;;  %v2696_v54 = vpop.f32.mrf.mxu1  ;;  %v4571_v40 = vor.u32 %v4570_v59, %v4567_v52  ;;  %v10645_v59 = vld [vmem:[#allocation2 + $0x104] sm:$0xff] }
 0x3a8   :  { %4989 = vmatmul.bf16.gmra.mxu0 %v4563_v36  ;;  %v3378_v12 = vpop.f32.mrf.mxu2  ;;  %v2575_v36 = vsel %vm2512_vm3, %v2572_v25, %v2574_v63  ;;  %v4574_v25 = vshrl.u32 %v11713_v10, 16  ;;  %v2576_v10 = vrot.slane %v10645_v59, 3 }
 0x3a9   :  { %v14779_v18 = vadd.f32 %v3378_v12, %v2694_v2  ;;  %v14797_v12 = vld [vmem:[#allocation2 + $0x5c] sm:$0xff]  ;;  %v4572_v35 = vsel %vm3604_vm5, %v4562_v48, %v4571_v40 }
 0x3aa   :  { %v14775_v20 = vpop.f32.mrf.mxu3  ;;  %v18700_v4 = vshrl.u32 %v14797_v12, 16  ;;  %v18701_v42 = vshll.u32 %v14797_v12, 16  ;;  %v2534_v52 = vrot.slane %v14797_v12, 3 }
 0x3ab   :  { %19662 = vst [vmem:[#allocation14_spill] sm:$0xff] %v14775_v20 }
 0x3ac   :  { %v3004_v48 = vrot.slane %v18700_v4, 2  ;;  %v2577_v4 = vsel %vm2512_vm3, %v2574_v63, %v2576_v10 }
 0x3ad   :  { %v14781_v7 = vpop.f32.mrf.mxu0 }
 0x3af   :  { %v2699_v5 = vpop.f32.mrf.mxu1 }
 0x3b0   :  { %v3380_v2 = vpop.f32.mrf.mxu2 }
 0x3b1   :  { %v14791_v6 = vadd.f32 %v3380_v2, %v2696_v54 }
 0x3b2   :  { %v14789_v21 = vpop.f32.mrf.mxu3  ;;  %2738 = vmatmul.bf16.gmra.mxu1 %v2533_v41  ;;  %v3007_v41 = vrot.slane %v18701_v42, 3 }
 0x3b3   :  { %19663 = vst [vmem:[#allocation16_spill] sm:$0xff] %v14789_v21 }
 0x3b4   :  { %v3008_v3 = vor.u32 %v3007_v41, %v3004_v48  ;;  %v18709_v48 = vshrl.u32 %v14822_v29, 16  ;;  %v18710_v41 = vshll.u32 %v14822_v29, 16 }
 0x3b5   :  { %v14793_v13 = vpop.f32.mrf.mxu0  ;;  %3422 = vmatmul.bf16.gmra.mxu2 %v3000_v30  ;;  %v4579_v30 = vrot.slane %v4577_v61, 4  ;;  %v11715_v61 = vld [vmem:[#allocation2 + $0x6c] sm:$0xff]  }
 0x3b6   :  { %v3009_v42 = vsel %vm2902_vm4, %v2999_v23, %v3008_v3  ;;  %v4583_v63 = vshrl.u32 %v11715_v61, 16  ;;  %v4586_v23 = vshll.u32 %v11715_v61, 16 }
 0x3b7   :  { %2843 = vmatmul.bf16.gmra.mxu3 %v2575_v36  ;;  %v2701_v47 = vpop.f32.mrf.mxu1  ;;  %v4576_v36 = vrot.slane %v4574_v25, 3 }
 0x3b8   :  { %4994 = vmatmul.bf16.gmra.mxu0 %v4572_v35  ;;  %v3383_v54 = vpop.f32.mrf.mxu2  ;;  %v2535_v35 = vsel %vm2512_vm3, %v2532_v55, %v2534_v52  ;;  %v4588_v8 = vrot.slane %v4586_v23, 4  ;;  %v14847_v23 = vld [vmem:[#allocation2 + $0x6c] sm:$0xff] }
 0x3b9   :  { %v14804_v28 = vadd.f32 %v3383_v54, %v2699_v5  ;;  %v4580_v58 = vor.u32 %v4579_v30, %v4576_v36  ;;  %19670 = vst [vmem:[#allocation113_spill] sm:$0xff] %v14847_v23 }
 0x3ba   :  { %v14800_v24 = vpop.f32.mrf.mxu3 }
 0x3bb   :  { %19664 = vst [vmem:[#allocation17_spill] sm:$0xff] %v14800_v24  ;;  %v4581_v55 = vsel %vm3604_vm5, %v4571_v40, %v4580_v58  ;;  %v3013_v40 = vrot.slane %v18709_v48, 2 }
 0x3bd   :  { %v14806_v44 = vpop.f32.mrf.mxu0 }
 0x3bf   :  { %v2704_v2 = vpop.f32.mrf.mxu1 }
 0x3c0   :  { %v3385_v54 = vpop.f32.mrf.mxu2 }
 0x3c1   :  { %v14816_v9 = vadd.f32 %v3385_v54, %v2701_v47 }
 0x3c2   :  { %v14814_v5 = vpop.f32.mrf.mxu3  ;;  %2743 = vmatmul.bf16.gmra.mxu1 %v2535_v35  ;;  %v3016_v35 = vrot.slane %v18710_v41, 3 }
 0x3c3   :  { %19665 = vst [vmem:[#allocation22_spill] sm:$0xff] %v14814_v5 }
 0x3c4   :  { %v3017_v17 = vor.u32 %v3016_v35, %v3013_v40  ;;  %v10688_v40 = vld [vmem:[#allocation6 + $0x110] sm:$0xff] }
 0x3c5   :  { %v14818_v11 = vpop.f32.mrf.mxu0  ;;  %3427 = vmatmul.bf16.gmra.mxu2 %v3009_v42  ;;  %v10646_v42 = vld [vmem:[#allocation2 + $0x10c] sm:$0xff]  ;;  %5389 = vmatpush.bf16.msrb.mxu1 %v10688_v40 }
 0x3c6   :  { %v2578_v61 = vrot.slane %v10646_v42, 3  ;;  %v11717_v42 = vld [vmem:[#allocation2 + $0x74] sm:$0xff]  }
 0x3c7   :  { %2848 = vmatmul.bf16.gmra.mxu3 %v2577_v4  ;;  %v2706_v25 = vpop.f32.mrf.mxu1  ;;  %v2536_v4 = vrot.slane %v14822_v29, 3 }
 0x3c8   :  { %4999 = vmatmul.bf16.gmra.mxu0 %v4581_v55  ;;  %v3388_v47 = vpop.f32.mrf.mxu2  ;;  %v4585_v55 = vrot.slane %v4583_v63, 3  ;;  %v2579_v41 = vsel %vm2512_vm3, %v2576_v10, %v2578_v61  ;;  %v3018_v63 = vsel %vm2902_vm4, %v3008_v3, %v3017_v17  ;;  %v18717_v10 = vshll.u32 %v14847_v23, 16 }
 0x3c9   :  { %v14829_v36 = vadd.f32 %v3388_v47, %v2704_v2  ;;  %v2537_v27 = vsel %vm2512_vm3, %v2534_v52, %v2536_v4  ;;  %v4592_v3 = vshrl.u32 %v11717_v42, 16 }
 0x3ca   :  { %v14825_v59 = vpop.f32.mrf.mxu3  ;;  %v4589_v56 = vor.u32 %v4588_v8, %v4585_v55  ;;  %v18716_v8 = vshrl.u32 %v14847_v23, 16  ;;  %v4595_v55 = vshll.u32 %v11717_v42, 16 }
 0x3cb   :  { %19666 = vst [vmem:[#allocation25_spill] sm:$0xff] %v14825_v59  ;;  %v4594_v53 = vrot.slane %v4592_v3, 3 }
 0x3cc   :  { %v4590_v52 = vsel %vm3604_vm5, %v4580_v58, %v4589_v56  ;;  %v18724_v58 = vrot.slane %v14847_v23, 3  ;;  %v4597_v37 = vrot.slane %v4595_v55, 4  ;;  %v18725_v55 = vshrl.u32 %v14865_v38, 16 }
 0x3cd   :  { %v14831_v30 = vpop.f32.mrf.mxu0 }
 0x3ce   :  { %19667 = vst [vmem:[#allocation31_spill] sm:$0xff] %v14831_v30  ;;  %v14879_v3 = vor.u32 %v4597_v37, %v4594_v53  ;;  %v3753_v0 = vrot.slane %v18725_v55, 3  ;;  %v14912_v37 = vld [vmem:[#allocation2 + $0x144] sm:$0xff] }
 0x3cf   :  { %v2709_v54 = vpop.f32.mrf.mxu1  ;;  %19683 = vst [vmem:[#allocation35_spill] sm:$0xff] %v14912_v37 }
 0x3d0   :  { %v3390_v47 = vpop.f32.mrf.mxu2  ;;  %v4599_v53 = vsel %vm3604_vm5, %v4589_v56, %v14879_v3 }
 0x3d1   :  { %v14841_v57 = vadd.f32 %v3390_v47, %v2706_v25  ;;  %v14859_v47 = vld [vmem:[#allocation2 + $0x114] sm:$0xff] }
 0x3d2   :  { %v14839_v2 = vpop.f32.mrf.mxu3  ;;  %2748 = vmatmul.bf16.gmra.mxu1 %v2537_v27  ;;  %v18723_v49 = vrot.slane %v14859_v47, 3 }
 0x3d3   :  { %19668 = vst [vmem:[#allocation40_spill] sm:$0xff] %v14839_v2 }
 0x3d5   :  { %v14843_v48 = vpop.f32.mrf.mxu0  ;;  %3432 = vmatmul.bf16.gmra.mxu2 %v3018_v63  ;;  %v3022_v63 = vrot.slane %v18716_v8, 2  ;;  %v14875_v8 = vld [vmem:[#allocation2 + $0x12c] sm:$0xff] }
 0x3d6   :  { %19669 = vst [vmem:[#allocation107_spill] sm:$0xff] %v14843_v48 }
 0x3d7   :  { %2853 = vmatmul.bf16.gmra.mxu3 %v2579_v41  ;;  %v2711_v27 = vpop.f32.mrf.mxu1  ;;  %19675 = vst [vmem:[#allocation24_spill] sm:$0xff] %v14875_v8 }
 0x3d8   :  { %5004 = vmatmul.bf16.gmra.mxu0 %v4590_v52  ;;  %v3393_v1 = vpop.f32.mrf.mxu2  ;;  %v3025_v52 = vrot.slane %v18717_v10, 3 }
 0x3d9   :  { %v14854_v35 = vadd.f32 %v3393_v1, %v2709_v54  ;;  %v2539_v54 = vsel %vm2512_vm3, %v2536_v4, %v18724_v58  ;;  %v14885_v4 = vld [vmem:[#allocation2 + $0x134] sm:$0xff] }
 0x3da   :  { %v14850_v25 = vpop.f32.mrf.mxu3  ;;  %v14873_v26 = vor.u32 %v3025_v52, %v3022_v63  ;;  %19678 = vst [vmem:[#allocation34_spill] sm:$0xff] %v14885_v4  ;;  %v14892_v52 = vld [vmem:[#allocation2 + $0x74] sm:$0xff]  ;;  %v19688_v2 = vshrl.u32 %v14885_v4, 16 }
 0x3db   :  { %19671 = vst [vmem:[#allocation130_spill] sm:$0xff] %v14850_v25 }
 0x3dc   :  { %19672 = vst [vmem:[#allocation12_spill] sm:$0xff] %v14854_v35  ;;  %v3027_v63 = vsel %vm2902_vm4, %v3017_v17, %v14873_v26  ;;  %v14902_v17 = vld [vmem:[#allocation2 + $0x13c] sm:$0xff]  ;;  %v3761_v59 = vrot.slane %v19688_v2, 3 }
 0x3dd   :  { %v14856_v41 = vpop.f32.mrf.mxu0  ;;  %19679 = vst [vmem:[#allocation36_spill] sm:$0xff] %v14892_v52 }
 0x3de   :  { %19673 = vst [vmem:[#allocation21_spill] sm:$0xff] %v14856_v41  ;;  %v19715_v41 = vrot.slane %v14892_v52, 3 }
 0x3df   :  { %v2714_v40 = vpop.f32.mrf.mxu1  ;;  %19680 = vst [vmem:[#allocation86_spill] sm:$0xff] %v14902_v17 }
 0x3e0   :  { %v3395_v1 = vpop.f32.mrf.mxu2 }
 0x3e1   :  { %v14877_v10 = vadd.f32 %v3395_v1, %v2711_v27  ;;  %v11719_v27 = vld [vmem:[#allocation2 + $0x7c] sm:$0xff]  }
 0x3e2   :  { %v14870_v42 = vpop.f32.mrf.mxu3  ;;  %2753 = vmatmul.bf16.gmra.mxu1 %v2539_v54  ;;  %v2581_v54 = vsel %vm2512_vm3, %v2578_v61, %v18723_v49  ;;  %v3754_v61 = vrot.slane %v18726_v60, 4  ;;  %v4601_v55 = vshrl.u32 %v11719_v27, 16  ;;  %v4604_v39 = vshll.u32 %v11719_v27, 16 }
 0x3e3   :  { %19674 = vst [vmem:[#allocation23_spill] sm:$0xff] %v14870_v42  ;;  %v19690_v27 = vshrl.u32 %v14892_v52, 16 }
 0x3e4   :  { %19676 = vst [vmem:[#allocation28_spill] sm:$0xff] %v14877_v10  ;;  %v4606_v15 = vrot.slane %v4604_v39, 4 }
 0x3e5   :  { %v14883_v33 = vpop.f32.mrf.mxu0  ;;  %3437 = vmatmul.bf16.gmra.mxu2 %v3027_v63  ;;  %v14906_v63 = vor.u32 %v3754_v61, %v3753_v0  ;;  %v19691_v61 = vshll.u32 %v14892_v52, 16 }
 0x3e6   :  { %19677 = vst [vmem:[#allocation30_spill] sm:$0xff] %v14883_v33 }
 0x3e7   :  { %2858 = vmatmul.bf16.gmra.mxu3 %v2581_v54  ;;  %v2716_v1 = vpop.f32.mrf.mxu1  ;;  %19681 = vst [vmem:[#allocation27_spill] sm:$0xff] %v14906_v63  ;;  %v19686_v54 = vshll.u32 %v14875_v8, 16  ;;  %v3034_v5 = vrot.slane %v19691_v61, 3  ;;  %v19695_v61 = vrot.slane %v14892_v52, 3 }
 0x3e8   :  { %5009 = vmatmul.bf16.gmra.mxu0 %v4599_v53  ;;  %v3398_v56 = vpop.f32.mrf.mxu2  ;;  %v19684_v53 = vshrl.u32 %v14875_v8, 16 }
 0x3e9   :  { %v14916_v42 = vadd.f32 %v3398_v56, %v2714_v40  ;;  %v3758_v0 = vrot.slane %v19686_v54, 4  ;;  %v14929_v56 = vld [vmem:[#allocation2 + $0x11c] sm:$0xff]  ;;  %v3031_v54 = vrot.slane %v19690_v27, 2  ;;  %v19694_v27 = vshll.u32 %v14902_v17, 16 }
 0x3ea   :  { %v14908_v49 = vpop.f32.mrf.mxu3  ;;  %v3757_v60 = vrot.slane %v19684_v53, 3  ;;  %v19689_v53 = vshll.u32 %v14885_v4, 16 }
 0x3eb   :  { %19682 = vst [vmem:[#allocation29_spill] sm:$0xff] %v14908_v49  ;;  %v4603_v49 = vrot.slane %v4601_v55, 3  ;;  %v19696_v55 = vrot.slane %v14847_v23, 3 }
 0x3ec   :  { %19685 = vst [vmem:[#allocation37_spill] sm:$0xff] %v14916_v42  ;;  %v3759_v58 = vor.u32 %v3758_v0, %v3757_v60  ;;  %v3762_v40 = vrot.slane %v19689_v53, 4  ;;  %v19693_v53 = vshrl.u32 %v14902_v17, 16 }
 0x3ed   :  { %v14922_v25 = vpop.f32.mrf.mxu0  ;;  %v2541_v24 = vsel %vm2512_vm3, %v19696_v55, %v19695_v61  ;;  %v14962_v42 = vor.u32 %v4606_v15, %v4603_v49  ;;  %v19701_v61 = vshll.u32 %v14912_v37, 16  ;;  %v14981_v49 = vld [vmem:[#allocation2 + $0x7c] sm:$0xff] }
 0x3ee   :  { %19687 = vst [vmem:[#allocation41_spill] sm:$0xff] %v14922_v25  ;;  %v14939_v2 = vsel %vm3604_vm5, %v14906_v63, %v3759_v58  ;;  %v3763_v0 = vor.u32 %v3762_v40, %v3761_v59  ;;  %v3765_v20 = vrot.slane %v19693_v53, 3  ;;  %v3766_v25 = vrot.slane %v19694_v27, 4 }
 0x3ef   :  { %v2719_v21 = vpop.f32.mrf.mxu1  ;;  %19692 = vst [vmem:[#allocation48_spill] sm:$0xff] %v14939_v2  ;;  %v18728_v59 = vrot.slane %v14929_v56, 3  ;;  %v14956_v40 = vor.u32 %v3034_v5, %v3031_v54  ;;  %v19699_v27 = vshrl.u32 %v14912_v37, 16  ;;  %v11721_v54 = vld [vmem:[#allocation2 + $0x84] sm:$0xff]  }
 0x3f0   :  { %v14951_v39 = vsel %vm3604_vm5, %v3759_v58, %v3763_v0  ;;  %v3400_v63 = vpop.f32.mrf.mxu2  ;;  %v3767_v53 = vor.u32 %v3766_v25, %v3765_v20  ;;  %v3770_v58 = vrot.slane %v19701_v61, 4  ;;  %v19705_v20 = vrot.slane %v14859_v47, 3  ;;  %v10743_v25 = vld [vmem:[#allocation2 + $0x20] sm:$0xff] }
 0x3f1   :  { %19697 = vst [vmem:[#allocation53_spill] sm:$0xff] %v14951_v39  ;;  %v3769_v2 = vrot.slane %v19699_v27, 3  ;;  %v14960_v33 = vadd.f32 %v3400_v63, %v2716_v1  ;;  %v3036_v15 = vsel %vm2902_vm4, %v14873_v26, %v14956_v40  ;;  %v4608_v1 = vsel %vm3604_vm5, %v14879_v3, %v14962_v42  ;;  %v10744_v27 = vld [vmem:[#allocation2 + $0x28] sm:$0xff] }
 0x3f2   :  { %v14953_v60 = vpop.f32.mrf.mxu3  ;;  %2758 = vmatmul.bf16.gmra.mxu1 %v2541_v24  ;;  %v14967_v55 = vsel %vm3604_vm5, %v3763_v0, %v3767_v53  ;;  %v2583_v5 = vsel %vm2512_vm3, %v19705_v20, %v18728_v59  ;;  %v11468_v0 = vld [vmem:[#allocation2 + $0x18] sm:$0xe]  ;;  %v7022_v3 = vshll.u32 %v10743_v25, 16 }
 0x3f3   :  { %19698 = vst [vmem:[#allocation94_spill] sm:$0xff] %v14953_v60  ;;  %v14971_v24 = vor.u32 %v3770_v58, %v3769_v2  ;;  %v11467_v2 = vld [vmem:[#allocation2 + $0x18] sm:$0xf0]  ;;  %v18730_v58 = vshrl.u32 %v14981_v49, 16  ;;  %v4613_v60 = vshll.u32 %v11721_v54, 16 }
 0x3f4   :  { %19700 = vst [vmem:[#allocation124_spill] sm:$0xff] %v14960_v33 }
 0x3f5   :  { %19702 = vst [vmem:[#allocation135_spill] sm:$0xff] %v14967_v55  ;;  %v14969_v39 = vpop.f32.mrf.mxu0  ;;  %3442 = vmatmul.bf16.gmra.mxu2 %v3036_v15  ;;  %v14988_v47 = vsel %vm3604_vm5, %v3767_v53, %v14971_v24  ;;  %v14994_v15 = vor.u32 %v11468_v0, %v11467_v2  ;;  %v4610_v55 = vshrl.u32 %v11721_v54, 16  ;;  %v14998_v53 = vrot.slane %v7022_v3, 1 }
 0x3f6   :  { %19703 = vst [vmem:[#allocation100_spill] sm:$0xff] %v14969_v39  ;;  %v3040_v20 = vrot.slane %v18730_v58, 2  ;;  %v19712_v2 = vshll.u32 %v14981_v49, 16  ;;  %v4615_v39 = vrot.slane %v4613_v60, 4  ;;  %v19714_v58 = vrot.slane %v14981_v49, 3 }
 0x3f7   :  { %19704 = vst [vmem:[#allocation19_spill] sm:$0xff] %v14971_v24  ;;  %2863 = vmatmul.bf16.gmra.mxu3 %v2583_v5  ;;  %v2721_v63 = vpop.f32.mrf.mxu1  ;;  %v10671_v5 = vld [vmem:[#allocation6 + $0x88] sm:$0xff]  ;;  %v8244_v54 = vshrl.u32 %v14994_v15, 16  ;;  %v8247_v33 = vshll.u32 %v14994_v15, 16 }
 0x3f8   :  { %19706 = vst [vmem:[#allocation20_spill] sm:$0xff] %v14988_v47  ;;  %5014 = vmatmul.bf16.gmra.mxu0 %v4608_v1  ;;  %v3403_v61 = vpop.f32.mrf.mxu2  ;;  %3877 = vmatpush.bf16.msrb.mxu3 %v10671_v5  ;;  %v7026_v47 = vshrl.u32 %v10743_v25, 16  ;;  %v3043_v0 = vrot.slane %v19712_v2, 3  ;;  %v4612_v5 = vrot.slane %v4610_v55, 3  ;;  %v2543_v2 = vsel %vm2512_vm3, %v19715_v41, %v19714_v58 }
 0x3f9   :  { %19708 = vst [vmem:[#allocation32_spill] sm:$0xff] %v14994_v15  ;;  %v14996_v59 = vadd.f32 %v3403_v61, %v2719_v21  ;;  %v15007_v21 = vld [vmem:[#allocation2 + $0x30] sm:$0xff]  ;;  %v8246_v25 = vrot.slane %v8244_v54, 1  ;;  %v8252_v55 = vrot.slane %v7022_v3, 2  ;;  %v8249_v23 = vrot.slane %v8247_v33, 2 }
 0x3fa   :  { %v14990_v26 = vpop.f32.mrf.mxu3  ;;  %19710 = vst [vmem:[#allocation39_spill] sm:$0xff] %v14998_v53  ;;  %v8251_v24 = vrot.slane %v7026_v47, 1  ;;  %v10687_v54 = vld [vmem:[#allocation6 + $0x108] sm:$0xff]  ;;  %v7034_v15 = vshrl.u32 %v10744_v27, 16  ;;  %v7038_v35 = vshll.u32 %v15007_v21, 16  ;;  %v4616_v52 = vor.u32 %v4615_v39, %v4612_v5 }
 0x3fb   :  { %19707 = vst [vmem:[#allocation26_spill] sm:$0xff] %v14990_v26  ;;  %v7030_v26 = vshll.u32 %v10744_v27, 16  ;;  %5390 = vmatpush.bf16.msrb.mxu1 %v10687_v54  ;;  %v8250_v58 = vor.u32 %v8249_v23, %v8246_v25  ;;  %v19720_v33 = vrot.slane %v14929_v56, 3 }
 0x3fc   :  { %19709 = vst [vmem:[#allocation33_spill] sm:$0xff] %v14996_v59  ;;  %v8253_v41 = vor.u32 %v8252_v55, %v8251_v24  ;;  %v15026_v10 = vrot.slane %v7038_v35, 1  ;;  %v4617_v24 = vsel %vm3604_vm5, %v14962_v42, %v4616_v52 }
 0x3fd   :  { %v15000_v1 = vpop.f32.mrf.mxu0  ;;  %19713 = vst [vmem:[#allocation63_spill] sm:$0xff] %v15007_v21  ;;  %v7032_v59 = vrot.slane %v7030_v26, 1 }
 0x3fe   :  { %19711 = vst [vmem:[#allocation44_spill] sm:$0xff] %v15000_v1  ;;  %v7028_v1 = vor.u32 %v7026_v47, %v14998_v53  ;;  %v3044_v47 = vor.u32 %v3043_v0, %v3040_v20  ;;  %v19719_v20 = vrot.slane %v14865_v38, 3  ;;  %v15040_v23 = vsel %vm8242_vm7, %v8250_v58, %v8253_v41 }
 0x3ff   :  { %v2724_v61 = vpop.f32.mrf.mxu1  ;;  %19718 = vst [vmem:[#allocation38_spill] sm:$0xff] %v15026_v10 }
 0x400   :  { %v15019_v48 = vsel %vm5988_vm6, %v7028_v1, %v7032_v59  ;;  %v3405_v53 = vpop.f32.mrf.mxu2  ;;  %v7036_v1 = vor.u32 %v7034_v15, %v7032_v59  ;;  %v2585_v27 = vsel %vm2512_vm3, %v19720_v33, %v19719_v20  ;;  %v3045_v39 = vsel %vm2902_vm4, %v14956_v40, %v3044_v47  ;;  %19721 = vst [vmem:[#allocation139_spill] sm:$0xff] %v15040_v23 }
 0x401   :  { %19716 = vst [vmem:[#allocation102_spill] sm:$0xff] %v15019_v48  ;;  %v15024_v30 = vadd.f32 %v3405_v53, %v2721_v63  ;;  %v8255_v48 = vrot.slane %v7034_v15, 1  ;;  %v15037_v63 = vld [vmem:[#allocation2 + $0x84] sm:$0xff]  ;;  %v18737_v53 = vshrl.u32 %v15007_v21, 16  ;;  %v8260_v40 = vrot.slane %v7038_v35, 2  ;;  %v15087_v21 = vld [vmem:[#allocation2 + $0x8c] sm:$0xff] }
 0x402   :  { %v15021_v60 = vpop.f32.mrf.mxu3  ;;  %2763 = vmatmul.bf16.gmra.mxu1 %v2543_v2  ;;  %v8256_v2 = vrot.slane %v7030_v26, 2  ;;  %v15044_v59 = vsel %vm5988_vm6, %v7036_v1, %v15026_v10  ;;  %v11723_v26 = vld [vmem:[#allocation2 + $0x8c] sm:$0xff]   ;;  %v18739_v54 = vshrl.u32 %v15037_v63, 16  ;;  %v18740_v42 = vshll.u32 %v15037_v63, 16  ;;  %19733 = vst [vmem:[#allocation42_spill] sm:$0xff] %v15087_v21  ;;  %v11725_v10 = vld [vmem:[#allocation2 + $0x94] sm:$0xff]  }
 0x403   :  { %19717 = vst [vmem:[#allocation13_spill] sm:$0xff] %v15021_v60  ;;  %v8259_v5 = vrot.slane %v18737_v53, 1  ;;  %v4622_v1 = vshll.u32 %v11723_v26, 16 }
 0x404   :  { %19722 = vst [vmem:[#allocation43_spill] sm:$0xff] %v15044_v59  ;;  %v8257_v15 = vor.u32 %v8256_v2, %v8255_v48  ;;  %v4619_v48 = vshrl.u32 %v11723_v26, 16  ;;  %v3049_v33 = vrot.slane %v18739_v54, 2  ;;  %v19728_v26 = vrot.slane %v14981_v49, 3 }
 0x405   :  { %v15028_v3 = vpop.f32.mrf.mxu0  ;;  %3447 = vmatmul.bf16.gmra.mxu2 %v3045_v39  ;;  %v15060_v2 = vor.u32 %v8260_v40, %v8259_v5 }
 0x406   :  { %v15050_v0 = vsel %vm8242_vm7, %v8253_v41, %v8257_v15  ;;  %v2544_v41 = vrot.slane %v15037_v63, 3  ;;  %v4621_v39 = vrot.slane %v4619_v48, 3 }
 0x407   :  { %2868 = vmatmul.bf16.gmra.mxu3 %v2585_v27  ;;  %v2726_v56 = vpop.f32.mrf.mxu1  ;;  %19723 = vst [vmem:[#allocation45_spill] sm:$0xff] %v15050_v0  ;;  %v15067_v20 = vsel %vm8242_vm7, %v8257_v15, %v15060_v2  ;;  %v3052_v27 = vrot.slane %v18740_v42, 3  ;;  %v2586_v15 = vrot.slane %v14875_v8, 3  ;;  %v19732_v42 = vrot.slane %v14865_v38, 3  ;;  %v10774_v8 = vld [vmem:[#allocation2 + $0x118] sm:$0xff] }
 0x408   :  { %5019 = vmatmul.bf16.gmra.mxu0 %v4617_v24  ;;  %v3408_v55 = vpop.f32.mrf.mxu2  ;;  %19725 = vst [vmem:[#allocation49_spill] sm:$0xff] %v15060_v2  ;;  %v4624_v24 = vrot.slane %v4622_v1, 4  ;;  %v2545_v40 = vsel %vm2512_vm3, %v19728_v26, %v2544_v41 }
 0x409   :  { %v15058_v58 = vadd.f32 %v3408_v55, %v2724_v61  ;;  %19727 = vst [vmem:[#allocation52_spill] sm:$0xff] %v15067_v20  ;;  %v3053_v53 = vor.u32 %v3052_v27, %v3049_v33  ;;  %v2587_v48 = vsel %vm2512_vm3, %v19732_v42, %v2586_v15  ;;  %v18743_v27 = vshrl.u32 %v15087_v21, 16 }
 0x40a   :  { %v15054_v25 = vpop.f32.mrf.mxu3  ;;  %v4625_v54 = vor.u32 %v4624_v24, %v4621_v39  ;;  %v18744_v39 = vshll.u32 %v15087_v21, 16  ;;  %v4628_v42 = vshrl.u32 %v11725_v10, 16 }
 0x40b   :  { %19724 = vst [vmem:[#allocation47_spill] sm:$0xff] %v15054_v25  ;;  %v3054_v1 = vsel %vm2902_vm4, %v3044_v47, %v3053_v53  ;;  %v4631_v47 = vshll.u32 %v11725_v10, 16  ;;  %v2588_v10 = vrot.slane %v14885_v4, 3 }
 0x40c   :  { %v4626_v26 = vsel %vm3604_vm5, %v4616_v52, %v4625_v54  ;;  %v3058_v52 = vrot.slane %v18743_v27, 2  ;;  %v4630_v59 = vrot.slane %v4628_v42, 3 }
 0x40d   :  { %v15062_v35 = vpop.f32.mrf.mxu0  ;;  %v4633_v0 = vrot.slane %v4631_v47, 4  ;;  %v15113_v47 = vld [vmem:[#allocation2 + $0x94] sm:$0xff] }
 0x40e   :  { %19726 = vst [vmem:[#allocation51_spill] sm:$0xff] %v15062_v35 }
 0x40f   :  { %v2729_v61 = vpop.f32.mrf.mxu1  ;;  %v4634_v60 = vor.u32 %v4633_v0, %v4630_v59  ;;  %19740 = vst [vmem:[#allocation152_spill] sm:$0xff] %v15113_v47  ;;  %v18747_v59 = vshrl.u32 %v15113_v47, 16  ;;  %v18748_v0 = vshll.u32 %v15113_v47, 16 }
 0x410   :  { %v3410_v55 = vpop.f32.mrf.mxu2 }
 0x411   :  { %v15079_v2 = vadd.f32 %v3410_v55, %v2726_v56 }
 0x412   :  { %v15076_v5 = vpop.f32.mrf.mxu3  ;;  %2768 = vmatmul.bf16.gmra.mxu1 %v2545_v40 }
 0x413   :  { %19729 = vst [vmem:[#allocation71_spill] sm:$0xff] %v15076_v5  ;;  %v10670_v5 = vld [vmem:[#allocation6 + $0x80] sm:$0xff] }
 0x414   :  { %19730 = vst [vmem:[#allocation18_spill] sm:$0xff] %v15079_v2  ;;  %3878 = vmatpush.bf16.msrb.mxu3 %v10670_v5  ;;  %v10686_v5 = vld [vmem:[#allocation6 + $0x100] sm:$0xff] }
 0x415   :  { %v15081_v20 = vpop.f32.mrf.mxu0  ;;  %3452 = vmatmul.bf16.gmra.mxu2 %v3054_v1  ;;  %v3061_v1 = vrot.slane %v18744_v39, 3  ;;  %v2589_v39 = vsel %vm2512_vm3, %v2586_v15, %v2588_v10  ;;  %5391 = vmatpush.bf16.msrb.mxu1 %v10686_v5 }
 0x416   :  { %19731 = vst [vmem:[#allocation15_spill] sm:$0xff] %v15081_v20 }
 0x417   :  { %2873 = vmatmul.bf16.gmra.mxu3 %v2587_v48  ;;  %v2731_v40 = vpop.f32.mrf.mxu1  ;;  %v2546_v48 = vrot.slane %v15087_v21, 3 }
 0x418   :  { %5024 = vmatmul.bf16.gmra.mxu0 %v4626_v26  ;;  %v3413_v33 = vpop.f32.mrf.mxu2 }
 0x419   :  { %v15094_v24 = vadd.f32 %v3413_v33, %v2729_v61  ;;  %v2547_v23 = vsel %vm2512_vm3, %v2544_v41, %v2546_v48  ;;  %v3062_v33 = vor.u32 %v3061_v1, %v3058_v52 }
 0x41a   :  { %v15090_v56 = vpop.f32.mrf.mxu3 }
 0x41b   :  { %19734 = vst [vmem:[#allocation65_spill] sm:$0xff] %v15090_v56  ;;  %v3063_v42 = vsel %vm2902_vm4, %v3053_v53, %v3062_v33 }
 0x41c   :  { %19735 = vst [vmem:[#allocation81_spill] sm:$0xff] %v15094_v24  ;;  %v10779_v24 = vld [vmem:[#allocation2 + $0x140] sm:$0xff] }
 0x41d   :  { %v15096_v55 = vpop.f32.mrf.mxu0 }
 0x41e   :  { %19736 = vst [vmem:[#allocation76_spill] sm:$0xff] %v15096_v55 }
 0x41f   :  { %v2734_v26 = vpop.f32.mrf.mxu1 }
 0x420   :  { %v3415_v61 = vpop.f32.mrf.mxu2 }
 0x421   :  { %v15107_v25 = vadd.f32 %v3415_v61, %v2731_v40  ;;  %v3067_v61 = vrot.slane %v18747_v59, 2 }
 0x422   :  { %v15104_v56 = vpop.f32.mrf.mxu3  ;;  %2773 = vmatmul.bf16.gmra.mxu1 %v2547_v23  ;;  %v4635_v23 = vsel %vm3604_vm5, %v4625_v54, %v4634_v60  ;;  %v2548_v54 = vrot.slane %v15113_v47, 3 }
 0x423   :  { %19737 = vst [vmem:[#allocation95_spill] sm:$0xff] %v15104_v56  ;;  %v11727_v56 = vld [vmem:[#allocation2 + $0x9c] sm:$0xff]  }
 0x424   :  { %19738 = vst [vmem:[#allocation150_spill] sm:$0xff] %v15107_v25  ;;  %v4637_v53 = vshrl.u32 %v11727_v56, 16  ;;  %v4640_v1 = vshll.u32 %v11727_v56, 16  ;;  %v2590_v56 = vrot.slane %v14902_v17, 3 }
 0x425   :  { %v15109_v27 = vpop.f32.mrf.mxu0  ;;  %3457 = vmatmul.bf16.gmra.mxu2 %v3063_v42  ;;  %v3070_v42 = vrot.slane %v18748_v0, 3 }
 0x426   :  { %19739 = vst [vmem:[#allocation151_spill] sm:$0xff] %v15109_v27  ;;  %v4642_v4 = vrot.slane %v4640_v1, 4  ;;  %v2549_v27 = vsel %vm2512_vm3, %v2546_v48, %v2548_v54  ;;  %v2591_v59 = vsel %vm2512_vm3, %v2588_v10, %v2590_v56 }
 0x427   :  { %2878 = vmatmul.bf16.gmra.mxu3 %v2589_v39  ;;  %v2736_v41 = vpop.f32.mrf.mxu1  ;;  %v3071_v5 = vor.u32 %v3070_v42, %v3067_v61 }
 0x428   :  { %5029 = vmatmul.bf16.gmra.mxu0 %v4635_v23  ;;  %v3418_v40 = vpop.f32.mrf.mxu2 }
 0x429   :  { %v15120_v15 = vadd.f32 %v3418_v40, %v2734_v26  ;;  %v3072_v0 = vsel %vm2902_vm4, %v3062_v33, %v3071_v5 }
 0x42a   :  { %v15116_v52 = vpop.f32.mrf.mxu3 }
 0x42b   :  { %19741 = vst [vmem:[#allocation153_spill] sm:$0xff] %v15116_v52  ;;  %v4639_v52 = vrot.slane %v4637_v53, 3  ;;  %v15139_v53 = vld [vmem:[#allocation2 + $0x9c] sm:$0xff] }
 0x42c   :  { %19742 = vst [vmem:[#allocation154_spill] sm:$0xff] %v15120_v15 }
 0x42d   :  { %v15122_v39 = vpop.f32.mrf.mxu0  ;;  %v4643_v15 = vor.u32 %v4642_v4, %v4639_v52  ;;  %19747 = vst [vmem:[#allocation159_spill] sm:$0xff] %v15139_v53  ;;  %v18751_v4 = vshrl.u32 %v15139_v53, 16  ;;  %v18752_v52 = vshll.u32 %v15139_v53, 16 }
 0x42e   :  { %19743 = vst [vmem:[#allocation155_spill] sm:$0xff] %v15122_v39 }
 0x42f   :  { %v2739_v23 = vpop.f32.mrf.mxu1  ;;  %v4644_v48 = vsel %vm3604_vm5, %v4634_v60, %v4643_v15  ;;  %v3076_v60 = vrot.slane %v18751_v4, 2 }
 0x430   :  { %v3420_v40 = vpop.f32.mrf.mxu2 }
 0x431   :  { %v15133_v39 = vadd.f32 %v3420_v40, %v2736_v41 }
 0x432   :  { %v15130_v26 = vpop.f32.mrf.mxu3  ;;  %2778 = vmatmul.bf16.gmra.mxu1 %v2549_v27  ;;  %v11729_v27 = vld [vmem:[#allocation2 + $0xa4] sm:$0xff]  }
 0x433   :  { %19744 = vst [vmem:[#allocation156_spill] sm:$0xff] %v15130_v26  ;;  %v4646_v10 = vshrl.u32 %v11729_v27, 16  ;;  %v4649_v33 = vshll.u32 %v11729_v27, 16  ;;  %v2592_v27 = vrot.slane %v14912_v37, 3 }
 0x434   :  { %19745 = vst [vmem:[#allocation157_spill] sm:$0xff] %v15133_v39 }
 0x435   :  { %v15135_v55 = vpop.f32.mrf.mxu0  ;;  %3462 = vmatmul.bf16.gmra.mxu2 %v3072_v0  ;;  %v3079_v0 = vrot.slane %v18752_v52, 3  ;;  %v2593_v4 = vsel %vm2512_vm3, %v2590_v56, %v2592_v27 }
 0x436   :  { %19746 = vst [vmem:[#allocation158_spill] sm:$0xff] %v15135_v55 }
 0x437   :  { %2883 = vmatmul.bf16.gmra.mxu3 %v2591_v59  ;;  %v2741_v1 = vpop.f32.mrf.mxu1  ;;  %v2550_v59 = vrot.slane %v15139_v53, 3 }
 0x438   :  { %5034 = vmatmul.bf16.gmra.mxu0 %v4644_v48  ;;  %v3423_v41 = vpop.f32.mrf.mxu2  ;;  %v4648_v48 = vrot.slane %v4646_v10, 3  ;;  %v15165_v10 = vld [vmem:[#allocation2 + $0xa4] sm:$0xff] }
 0x439   :  { %v15146_v61 = vadd.f32 %v3423_v41, %v2739_v23  ;;  %v2551_v17 = vsel %vm2512_vm3, %v2548_v54, %v2550_v59  ;;  %v3080_v41 = vor.u32 %v3079_v0, %v3076_v60  ;;  %19754 = vst [vmem:[#allocation166_spill] sm:$0xff] %v15165_v10  ;;  %v18757_v0 = vshrl.u32 %v15165_v10, 16 }
 0x43a   :  { %v15142_v26 = vpop.f32.mrf.mxu3  ;;  %v18758_v56 = vshll.u32 %v15165_v10, 16 }
 0x43b   :  { %19748 = vst [vmem:[#allocation160_spill] sm:$0xff] %v15142_v26  ;;  %v4651_v26 = vrot.slane %v4649_v33, 4  ;;  %v3081_v52 = vsel %vm2902_vm4, %v3071_v5, %v3080_v41  ;;  %v10790_v5 = vld [vmem:[#allocation6 + $0x1b8] sm:$0xff] }
 0x43c   :  { %19749 = vst [vmem:[#allocation161_spill] sm:$0xff] %v15146_v61  ;;  %7435 = vmatpush.bf16.msra.mxu3 %v10790_v5 }
 0x43d   :  { %v15148_v42 = vpop.f32.mrf.mxu0  ;;  %v4652_v61 = vor.u32 %v4651_v26, %v4648_v48  ;;  %v10742_v48 = vld [vmem:[#allocation6 + $0x178] sm:$0xff] }
 0x43e   :  { %19750 = vst [vmem:[#allocation162_spill] sm:$0xff] %v15148_v42  ;;  %6410 = vmatpush.bf16.msra.mxu2 %v10742_v48 }
 0x43f   :  { %v2744_v40 = vpop.f32.mrf.mxu1  ;;  %v4653_v54 = vsel %vm3604_vm5, %v4643_v15, %v4652_v61 }
 0x440   :  { %v3425_v23 = vpop.f32.mrf.mxu2 }
 0x441   :  { %v15159_v42 = vadd.f32 %v3425_v23, %v2741_v1 }
 0x442   :  { %v15156_v55 = vpop.f32.mrf.mxu3  ;;  %2783 = vmatmul.bf16.gmra.mxu1 %v2551_v17  ;;  %v2269_v17 = vld [vmem:[#allocation2 + $0x14c] sm:$0x7] }
 0x443   :  { %19751 = vst [vmem:[#allocation163_spill] sm:$0xff] %v15156_v55  ;;  %v11731_v55 = vld [vmem:[#allocation2 + $0xac] sm:$0xff]   ;;  %v2469_v26 = vunpack.c.l.b16 %v2269_v17  ;;  %v3085_v17 = vrot.slane %v18757_v0, 2 }
 0x444   :  { %19752 = vst [vmem:[#allocation164_spill] sm:$0xff] %v15159_v42 }
 0x445   :  { %v15161_v39 = vpop.f32.mrf.mxu0  ;;  %3467 = vmatmul.bf16.gmra.mxu2 %v3081_v52  ;;  %v4658_v52 = vshll.u32 %v11731_v55, 16  ;;  %v15177_v37 = vpack.c.b16 %v2469_v26, %v2469_v26  ;;  %v10798_v26 = vld [vmem:[#allocation6 + $0x1f8] sm:$0xff] }
 0x446   :  { %19753 = vst [vmem:[#allocation165_spill] sm:$0xff] %v15161_v39  ;;  %7925 = vmatpush.bf16.msra.mxu0 %v10798_v26 }
 0x447   :  { %2888 = vmatmul.bf16.gmra.mxu3 %v2593_v4  ;;  %v2746_v33 = vpop.f32.mrf.mxu1  ;;  %v4655_v4 = vshrl.u32 %v11731_v55, 16  ;;  %19758 = vst [vmem:[#allocation170_spill] sm:$0xff] %v15177_v37  ;;  %v2594_v5 = vrot.slane %v15177_v37, 3 }
 0x448   :  { %5039 = vmatmul.bf16.gmra.mxu0 %v4653_v54  ;;  %v3428_v1 = vpop.f32.mrf.mxu2  ;;  %v2552_v54 = vrot.slane %v15165_v10, 3 }
 0x449   :  { %v15172_v23 = vadd.f32 %v3428_v1, %v2744_v40  ;;  %v4657_v42 = vrot.slane %v4655_v4, 3  ;;  %v4660_v40 = vrot.slane %v4658_v52, 4 }
 0x44a   :  { %v15168_v60 = vpop.f32.mrf.mxu3  ;;  %v2553_v1 = vsel %vm2512_vm3, %v2550_v59, %v2552_v54 }
 0x44b   :  { %19755 = vst [vmem:[#allocation167_spill] sm:$0xff] %v15168_v60  ;;  %v3088_v60 = vrot.slane %v18758_v56, 3  ;;  %v4661_v53 = vor.u32 %v4660_v40, %v4657_v42  ;;  %v2595_v56 = vsel %vm2512_vm3, %v2592_v27, %v2594_v5  ;;  %v15198_v40 = vld [vmem:[#allocation2 + $0xac] sm:$0xff] }
 0x44c   :  { %19756 = vst [vmem:[#allocation168_spill] sm:$0xff] %v15172_v23  ;;  %v18761_v27 = vshrl.u32 %v15198_v40, 16 }
 0x44d   :  { %v15174_v15 = vpop.f32.mrf.mxu0  ;;  %v4662_v59 = vsel %vm3604_vm5, %v4652_v61, %v4661_v53  ;;  %19763 = vst [vmem:[#allocation175_spill] sm:$0xff] %v15198_v40 }
 0x44e   :  { %19757 = vst [vmem:[#allocation169_spill] sm:$0xff] %v15174_v15  ;;  %v3089_v15 = vor.u32 %v3088_v60, %v3085_v17  ;;  %v3606_v60 = vshrl.u32 %v14575_v43, 16  ;;  %v3609_v17 = vshll.u32 %v14575_v43, 16 }
 0x44f   :  { %v2749_v39 = vpop.f32.mrf.mxu1 }
 0x450   :  { %v3430_v48 = vpop.f32.mrf.mxu2  ;;  %v3090_v4 = vsel %vm2902_vm4, %v3080_v41, %v3089_v15  ;;  %v18762_v41 = vshll.u32 %v15198_v40, 16  ;;  %v3608_v26 = vrot.slane %v3606_v60, 3 }
 0x451   :  { %v15187_v23 = vadd.f32 %v3430_v48, %v2746_v33 }
 0x452   :  { %v15184_v55 = vpop.f32.mrf.mxu3  ;;  %2788 = vmatmul.bf16.gmra.mxu1 %v2553_v1  ;;  %v11733_v1 = vld [vmem:[#allocation2 + $0xb4] sm:$0xff]   ;;  %v3097_v37 = vrot.slane %v18762_v41, 3 }
 0x453   :  { %19759 = vst [vmem:[#allocation171_spill] sm:$0xff] %v15184_v55  ;;  %v10806_v55 = vld [vmem:[#allocation6 + $0x238] sm:$0xff]  ;;  %v4664_v61 = vshrl.u32 %v11733_v1, 16  ;;  %v4667_v48 = vshll.u32 %v11733_v1, 16  ;;  %v19768_v1 = vrot.slane %v14618_v62, 3 }
 0x454   :  { %19760 = vst [vmem:[#allocation172_spill] sm:$0xff] %v15187_v23  ;;  %8509 = vmatpush.bf16.msra.mxu1 %v10806_v55  ;;  %v19766_v55 = vshrl.u32 %v14564_v45, 16  ;;  %v15221_v23 = vld [vmem:[#allocation2 + $0xb4] sm:$0xff] }
 0x455   :  { %v15189_v0 = vpop.f32.mrf.mxu0  ;;  %3472 = vmatmul.bf16.gmra.mxu2 %v3090_v4  ;;  %v2555_v60 = vsel %vm2512_vm3, %v2552_v54, %v19768_v1  ;;  %19771 = vst [vmem:[#allocation178_spill] sm:$0xff] %v15221_v23  ;;  %v18771_v41 = vshll.u32 %v15221_v23, 16 }
 0x456   :  { %19761 = vst [vmem:[#allocation173_spill] sm:$0xff] %v15189_v0  ;;  %v3613_v4 = vrot.slane %v19766_v55, 3  ;;  %v3094_v0 = vrot.slane %v18761_v27, 2  ;;  %v19769_v55 = vshrl.u32 %v14641_v19, 16  ;;  %v18772_v27 = vshrl.u32 %v15221_v23, 16 }
 0x457   :  { %2893 = vmatmul.bf16.gmra.mxu3 %v2595_v56  ;;  %v2751_v52 = vpop.f32.mrf.mxu1 }
 0x458   :  { %5044 = vmatmul.bf16.gmra.mxu0 %v4662_v59  ;;  %v3433_v42 = vpop.f32.mrf.mxu2  ;;  %v3611_v59 = vrot.slane %v3609_v17, 4  ;;  %v3617_v17 = vrot.slane %v19769_v55, 3  ;;  %v3098_v54 = vor.u32 %v3097_v37, %v3094_v0  ;;  %v3103_v25 = vrot.slane %v18772_v27, 2  ;;  %v10775_v0 = vld [vmem:[#allocation2 + $0x120] sm:$0xff] }
 0x459   :  { %v15202_v56 = vadd.f32 %v3433_v42, %v2749_v39  ;;  %v4666_v42 = vrot.slane %v4664_v61, 3 }
 0x45a   :  { %v15195_v33 = vpop.f32.mrf.mxu3  ;;  %v3612_v62 = vor.u32 %v3611_v59, %v3608_v26  ;;  %v3099_v37 = vsel %vm2902_vm4, %v3089_v15, %v3098_v54 }
 0x45b   :  { %19762 = vst [vmem:[#allocation174_spill] sm:$0xff] %v15195_v33  ;;  %v19767_v33 = vshll.u32 %v14564_v45, 16  ;;  %v19770_v45 = vshll.u32 %v14641_v19, 16 }
 0x45c   :  { %19764 = vst [vmem:[#allocation176_spill] sm:$0xff] %v15202_v56  ;;  %v4669_v56 = vrot.slane %v4667_v48, 4 }
 0x45d   :  { %v15204_v5 = vpop.f32.mrf.mxu0  ;;  %v3614_v43 = vrot.slane %v19767_v33, 4  ;;  %v3618_v33 = vrot.slane %v19770_v45, 4 }
 0x45e   :  { %19765 = vst [vmem:[#allocation177_spill] sm:$0xff] %v15204_v5  ;;  %v11735_v5 = vld [vmem:[#allocation2 + $0xbc] sm:$0xff]   ;;  %v4670_v10 = vor.u32 %v4669_v56, %v4666_v42 }
 0x45f   :  { %v2754_v39 = vpop.f32.mrf.mxu1  ;;  %v3615_v48 = vor.u32 %v3614_v43, %v3613_v4  ;;  %v4673_v55 = vshrl.u32 %v11735_v5, 16  ;;  %v4676_v47 = vshll.u32 %v11735_v5, 16  ;;  %v15231_v45 = vor.u32 %v3618_v33, %v3617_v17  ;;  %v15240_v5 = vld [vmem:[#allocation2 + $0xc4] sm:$0xff]  }
 0x460   :  { %v3435_v61 = vpop.f32.mrf.mxu2  ;;  %v7270_v17 = vshll.u32 %v10774_v8, 16 }
 0x461   :  { %v15227_v1 = vadd.f32 %v3435_v61, %v2751_v52  ;;  %v3616_v26 = vsel %vm3604_vm5, %v3612_v62, %v3615_v48  ;;  %v4671_v52 = vsel %vm3604_vm5, %v4661_v53, %v4670_v10  ;;  %v4675_v4 = vrot.slane %v4673_v55, 3  ;;  %v15258_v55 = vld [vmem:[#allocation2 + $0xbc] sm:$0xff] }
 0x462   :  { %v15225_v40 = vpop.f32.mrf.mxu3  ;;  %2793 = vmatmul.bf16.gmra.mxu1 %v2555_v60  ;;  %v4678_v59 = vrot.slane %v4676_v47, 4  ;;  %v15244_v43 = vsel %vm3604_vm5, %v3615_v48, %v15231_v45  ;;  %v19775_v60 = vshrl.u32 %v14679_v34, 16  ;;  %v19777_v61 = vshll.u32 %v14679_v34, 16  ;;  %v10776_v48 = vld [vmem:[#allocation2 + $0x128] sm:$0xff] }
 0x463   :  { %19772 = vst [vmem:[#allocation179_spill] sm:$0xff] %v15225_v40  ;;  %v3106_v40 = vrot.slane %v18771_v41, 3  ;;  %v7282_v47 = vshrl.u32 %v10775_v0, 16  ;;  %v7290_v34 = vshrl.u32 %v10776_v48, 16 }
 0x464   :  { %19773 = vst [vmem:[#allocation180_spill] sm:$0xff] %v15227_v1  ;;  %v15250_v15 = vrot.slane %v19775_v60, 3  ;;  %v15256_v62 = vrot.slane %v19777_v61, 4  ;;  %v15265_v60 = vrot.slane %v7270_v17, 1  ;;  %v15267_v41 = vor.u32 %v4678_v59, %v4675_v4  ;;  %v10777_v61 = vld [vmem:[#allocation2 + $0x130] sm:$0xff] }
 0x465   :  { %v15229_v19 = vpop.f32.mrf.mxu0  ;;  %3477 = vmatmul.bf16.gmra.mxu2 %v3099_v37  ;;  %v15246_v42 = vor.u32 %v3106_v40, %v3103_v25  ;;  %v7278_v25 = vshll.u32 %v10775_v0, 16  ;;  %v8376_v37 = vrot.slane %v7270_v17, 2  ;;  %v7286_v4 = vshll.u32 %v10776_v48, 16 }
 0x466   :  { %19774 = vst [vmem:[#allocation181_spill] sm:$0xff] %v15229_v19  ;;  %v8379_v20 = vrot.slane %v7282_v47, 1  ;;  %v8383_v17 = vrot.slane %v7290_v34, 1  ;;  %v7298_v48 = vshrl.u32 %v10777_v61, 16 }
 0x467   :  { %3879 = vmatmul.bf16.vlgmr.msrb.gmra.mxu3 %v3616_v26  ;;  %v2756_v56 = vpop.f32.mrf.mxu1  ;;  %v7274_v26 = vshrl.u32 %v10774_v8, 16  ;;  %19779 = vst [vmem:[#allocation184_spill] sm:$0xff] %v15265_v60  ;;  %v7280_v27 = vrot.slane %v7278_v25, 1  ;;  %v3108_v8 = vsel %vm2902_vm4, %v3098_v54, %v15246_v42  ;;  %v8380_v59 = vrot.slane %v7278_v25, 2 }
 0x468   :  { %5049 = vmatmul.bf16.gmra.mxu0 %v4671_v52  ;;  %v3438_v53 = vpop.f32.mrf.mxu2  ;;  %v19781_v52 = vshrl.u32 %v15258_v55, 16  ;;  %v7288_v21 = vrot.slane %v7286_v4, 1  ;;  %v8384_v0 = vrot.slane %v7286_v4, 2 }
 0x469   :  { %v15261_v40 = vadd.f32 %v3438_v53, %v2754_v39  ;;  %v10778_v39 = vld [vmem:[#allocation2 + $0x138] sm:$0xff]  ;;  %v7276_v53 = vor.u32 %v7274_v26, %v15265_v60  ;;  %v7284_v54 = vor.u32 %v7282_v47, %v7280_v27  ;;  %v11425_v60 = vld [vmem:[#allocation2 + $0x10] sm:$0xff]   ;;  %v8381_v25 = vor.u32 %v8380_v59, %v8379_v20 }
 0x46a   :  { %v15252_v33 = vpop.f32.mrf.mxu3  ;;  %v15277_v19 = vrot.slane %v19781_v52, 2  ;;  %v4680_v52 = vsel %vm3604_vm5, %v4670_v10, %v15267_v41  ;;  %v7302_v35 = vshll.u32 %v10778_v39, 16  ;;  %v7292_v47 = vor.u32 %v7290_v34, %v7288_v21  ;;  %v10781_v59 = vld [vmem:[#allocation2 + $0x150] sm:$0xff] }
 0x46b   :  { %19776 = vst [vmem:[#allocation182_spill] sm:$0xff] %v15252_v33  ;;  %v8375_v33 = vrot.slane %v7274_v26, 1  ;;  %v15282_v1 = vsel %vm5988_vm6, %v7276_v53, %v7280_v27  ;;  %v7294_v26 = vshll.u32 %v10777_v61, 16  ;;  %v15291_v27 = vsel %vm5988_vm6, %v7284_v54, %v7288_v21 }
 0x46c   :  { %19778 = vst [vmem:[#allocation183_spill] sm:$0xff] %v15261_v40  ;;  %v7304_v20 = vrot.slane %v7302_v35, 1  ;;  %v8387_v61 = vrot.slane %v7298_v48, 1  ;;  %v7306_v34 = vshrl.u32 %v10778_v39, 16 }
 0x46d   :  { %v15270_v23 = vpop.f32.mrf.mxu0  ;;  %19782 = vst [vmem:[#allocation186_spill] sm:$0xff] %v15282_v1  ;;  %v8385_v1 = vor.u32 %v8384_v0, %v8383_v17  ;;  %v8392_v17 = vrot.slane %v7302_v35, 2  ;;  %v7314_v0 = vshrl.u32 %v10779_v24, 16 }
 0x46e   :  { %19780 = vst [vmem:[#allocation185_spill] sm:$0xff] %v15270_v23  ;;  %v15284_v23 = vor.u32 %v8376_v37, %v8375_v33  ;;  %v10780_v33 = vld [vmem:[#allocation2 + $0x148] sm:$0xff]  ;;  %v7296_v37 = vrot.slane %v7294_v26, 1 }
 0x46f   :  { %v15279_v40 = vpop.f32.mrf.mxu1  ;;  %19785 = vst [vmem:[#allocation189_spill] sm:$0xff] %v15291_v27  ;;  %v8388_v27 = vrot.slane %v7294_v26, 2  ;;  %v8395_v26 = vrot.slane %v7314_v0, 1 }
 0x470   :  { %19783 = vst [vmem:[#allocation187_spill] sm:$0xff] %v15284_v23  ;;  %v3440_v53 = vpop.f32.mrf.mxu2  ;;  %v15297_v10 = vsel %vm8242_vm7, %v15284_v23, %v8381_v25  ;;  %v7300_v54 = vor.u32 %v7298_v48, %v7296_v37  ;;  %v7318_v23 = vshll.u32 %v10780_v33, 16  ;;  %v8391_v48 = vrot.slane %v7306_v34, 1 }
 0x471   :  { %v15293_v4 = vadd.f32 %v3440_v53, %v2756_v56  ;;  %19787 = vst [vmem:[#allocation191_spill] sm:$0xff] %v15297_v10  ;;  %v7310_v56 = vshll.u32 %v10779_v24, 16  ;;  %v8389_v10 = vor.u32 %v8388_v27, %v8387_v61 }
 0x472   :  { %v15288_v2 = vpop.f32.mrf.mxu3  ;;  %5392 = vmatmul.bf16.vlgmr.msrb.gmra.mxu1 %v11425_v60  ;;  %v15303_v60 = vsel %vm8242_vm7, %v8381_v25, %v8385_v1  ;;  %v15308_v53 = vsel %vm5988_vm6, %v7300_v54, %v7304_v20  ;;  %v7308_v25 = vor.u32 %v7306_v34, %v7304_v20  ;;  %v7320_v24 = vrot.slane %v7318_v23, 1 }
 0x473   :  { %19784 = vst [vmem:[#allocation188_spill] sm:$0xff] %v15288_v2  ;;  %v15300_v2 = vsel %vm5988_vm6, %v7292_v47, %v7296_v37  ;;  %v15311_v37 = vld [vmem:[#allocation2 + $0x158] sm:$0xff]  ;;  %v15314_v35 = vsel %vm8242_vm7, %v8385_v1, %v8389_v10  ;;  %v8396_v39 = vrot.slane %v7310_v56, 2  ;;  %v7326_v54 = vshll.u32 %v10781_v59, 16 }
 0x474   :  { %19786 = vst [vmem:[#allocation190_spill] sm:$0xff] %v15293_v4  ;;  %v7322_v4 = vshrl.u32 %v10780_v33, 16  ;;  %v8393_v33 = vor.u32 %v8392_v17, %v8391_v48 }
 0x475   :  { %19788 = vst [vmem:[#allocation192_spill] sm:$0xff] %v15300_v2  ;;  %v15305_v21 = vpop.f32.mrf.mxu0  ;;  %3482 = vmatmul.bf16.gmra.mxu2 %v3108_v8  ;;  %v7312_v2 = vrot.slane %v7310_v56, 1  ;;  %v8397_v34 = vor.u32 %v8396_v39, %v8395_v26  ;;  %v8404_v26 = vrot.slane %v7326_v54, 2 }
 0x476   :  { %19789 = vst [vmem:[#allocation193_spill] sm:$0xff] %v15303_v60  ;;  %v8399_v8 = vrot.slane %v7322_v4, 1  ;;  %v8400_v60 = vrot.slane %v7318_v23, 2  ;;  %v15325_v1 = vsel %vm8242_vm7, %v8389_v10, %v8393_v33  ;;  %v18779_v10 = vshrl.u32 %v15311_v37, 16 }
 0x477   :  { %19790 = vst [vmem:[#allocation194_spill] sm:$0xff] %v15305_v21  ;;  %3884 = vmatmul.bf16.gmra.mxu3 %v15244_v43  ;;  %v2761_v47 = vpop.f32.mrf.mxu1  ;;  %v15317_v27 = vsel %vm5988_vm6, %v7308_v25, %v7312_v2  ;;  %v7316_v43 = vor.u32 %v7314_v0, %v7312_v2  ;;  %v7330_v25 = vshrl.u32 %v10781_v59, 16  ;;  %v15331_v2 = vsel %vm8242_vm7, %v8393_v33, %v8397_v34 }
 0x478   :  { %19791 = vst [vmem:[#allocation195_spill] sm:$0xff] %v15308_v53  ;;  %5054 = vmatmul.bf16.gmra.mxu0 %v4680_v52  ;;  %v3443_v20 = vpop.f32.mrf.mxu2  ;;  %v7324_v53 = vor.u32 %v7322_v4, %v7320_v24  ;;  %v7328_v52 = vrot.slane %v7326_v54, 1  ;;  %v8401_v0 = vor.u32 %v8400_v60, %v8399_v8  ;;  %v7334_v4 = vshll.u32 %v15311_v37, 16 }
 0x479   :  { %19792 = vst [vmem:[#allocation196_spill] sm:$0xff] %v15311_v37  ;;  %v15322_v21 = vadd.f32 %v3443_v20, %v15279_v40  ;;  %v15328_v56 = vsel %vm5988_vm6, %v7316_v43, %v7320_v24  ;;  %v8403_v48 = vrot.slane %v7330_v25, 1  ;;  %v19800_v24 = vshll.u32 %v15258_v55, 16 }
 0x47a   :  { %19793 = vst [vmem:[#allocation197_spill] sm:$0xff] %v15314_v35  ;;  %v15319_v61 = vpop.f32.mrf.mxu3  ;;  %v15334_v17 = vsel %vm5988_vm6, %v7324_v53, %v7328_v52  ;;  %v7332_v40 = vor.u32 %v7330_v25, %v7328_v52  ;;  %v15343_v59 = vsel %vm8242_vm7, %v8397_v34, %v8401_v0  ;;  %v15345_v33 = vrot.slane %v7334_v4, 1  ;;  %v11426_v34 = vld [vmem:[#allocation2 + $0x18] sm:$0xff]  }
 0x47b   :  { %19794 = vst [vmem:[#allocation198_spill] sm:$0xff] %v15317_v27  ;;  %v3115_v39 = vrot.slane %v19800_v24, 3  ;;  %v8408_v53 = vrot.slane %v7334_v4, 2  ;;  %v19803_v60 = vshrl.u32 %v15240_v5, 16  ;;  %v19804_v20 = vshll.u32 %v15240_v5, 16 }
 0x47c   :  { %19795 = vst [vmem:[#allocation199_spill] sm:$0xff] %v15319_v61  ;;  %v8405_v25 = vor.u32 %v8404_v26, %v8403_v48  ;;  %v8407_v54 = vrot.slane %v18779_v10, 1  ;;  %v15355_v24 = vsel %vm5988_vm6, %v7332_v40, %v15345_v33  ;;  %v3623_v5 = vor.u32 %v15256_v62, %v15250_v15  ;;  %v11739_v62 = vld [vmem:[#allocation2 + $0xcc] sm:$0xff]  }
 0x47d   :  { %19796 = vst [vmem:[#allocation200_spill] sm:$0xff] %v15325_v1  ;;  %v15337_v23 = vpop.f32.mrf.mxu0  ;;  %v4684_v8 = vrot.slane %v19803_v60, 3  ;;  %v4687_v52 = vrot.slane %v19804_v20, 4  ;;  %v3116_v48 = vor.u32 %v3115_v39, %v15277_v19  ;;  %v11428_v1 = vld [vmem:[#allocation2 + $0x28] sm:$0xff]  }
 0x47e   :  { %19797 = vst [vmem:[#allocation201_spill] sm:$0xff] %v15328_v56  ;;  %v15360_v4 = vor.u32 %v8408_v53, %v8407_v54  ;;  %v3624_v53 = vsel %vm3604_vm5, %v15231_v45, %v3623_v5 }
 0x47f   :  { %19798 = vst [vmem:[#allocation202_spill] sm:$0xff] %v15331_v2  ;;  %v2764_v43 = vpop.f32.mrf.mxu1  ;;  %v4688_v20 = vor.u32 %v4687_v52, %v4684_v8  ;;  %v3117_v54 = vsel %vm2902_vm4, %v15246_v42, %v3116_v48  ;;  %v15383_v8 = vld [vmem:[#allocation2 + $0xc4] sm:$0xff]  ;;  %v4691_v42 = vshrl.u32 %v11739_v62, 16 }
 0x480   :  { %19799 = vst [vmem:[#allocation203_spill] sm:$0xff] %v15334_v17  ;;  %v15358_v17 = vsel %vm8242_vm7, %v8401_v0, %v8405_v25  ;;  %v3445_v60 = vpop.f32.mrf.mxu2  ;;  %v15371_v40 = vsel %vm8242_vm7, %v8405_v25, %v15360_v4  ;;  %v18783_v52 = vshrl.u32 %v15383_v8, 16  ;;  %v18784_v45 = vshll.u32 %v15383_v8, 16 }
 0x481   :  { %19801 = vst [vmem:[#allocation204_spill] sm:$0xff] %v15343_v59  ;;  %v15367_v26 = vadd.f32 %v3445_v60, %v2761_v47  ;;  %v4689_v19 = vsel %vm3604_vm5, %v15267_v41, %v4688_v20  ;;  %v19811_v41 = vshrl.u32 %v14692_v22, 16  ;;  %v4693_v37 = vrot.slane %v4691_v42, 3 }
 0x482   :  { %19802 = vst [vmem:[#allocation205_spill] sm:$0xff] %v15345_v33  ;;  %v15362_v59 = vpop.f32.mrf.mxu3  ;;  %5397 = vmatmul.bf16.gmra.mxu1 %v11426_v34  ;;  %v4694_v34 = vshll.u32 %v11739_v62, 16  ;;  %v3121_v10 = vrot.slane %v18783_v52, 2 }
 0x483   :  { %19805 = vst [vmem:[#allocation206_spill] sm:$0xff] %v15355_v24 }
 0x484   :  { %19806 = vst [vmem:[#allocation207_spill] sm:$0xff] %v15358_v17 }
 0x485   :  { %19807 = vst [vmem:[#allocation208_spill] sm:$0xff] %v15360_v4  ;;  %v15373_v0 = vpop.f32.mrf.mxu0  ;;  %3487 = vmatmul.bf16.gmra.mxu2 %v3117_v54  ;;  %v19812_v54 = vshll.u32 %v14692_v22, 16  ;;  %v3124_v4 = vrot.slane %v18784_v45, 3  ;;  %v11741_v45 = vld [vmem:[#allocation2 + $0xd4] sm:$0xff]  }
 0x486   :  { %19808 = vst [vmem:[#allocation209_spill] sm:$0xff] %v15362_v59 }
 0x487   :  { %19809 = vst [vmem:[#allocation210_spill] sm:$0xff] %v15371_v40  ;;  %3889 = vmatmul.bf16.gmra.mxu3 %v3624_v53  ;;  %v2766_v15 = vpop.f32.mrf.mxu1  ;;  %v3625_v53 = vrot.slane %v19811_v41, 3  ;;  %v3125_v17 = vor.u32 %v3124_v4, %v3121_v10  ;;  %v15410_v10 = vld [vmem:[#allocation2 + $0xcc] sm:$0xff] }
 0x488   :  { %5059 = vmatmul.bf16.gmra.mxu0 %v4689_v19  ;;  %v3448_v39 = vpop.f32.mrf.mxu2  ;;  %v3626_v19 = vrot.slane %v19812_v54, 4  ;;  %v18786_v4 = vshll.u32 %v15410_v10, 16 }
 0x489   :  { %v15387_v25 = vadd.f32 %v3448_v39, %v2764_v43  ;;  %v4696_v43 = vrot.slane %v4694_v34, 4  ;;  %v11427_v39 = vld [vmem:[#allocation2 + $0x20] sm:$0xff]   ;;  %v3126_v56 = vsel %vm2902_vm4, %v3116_v48, %v3125_v17  ;;  %v4700_v48 = vshrl.u32 %v11741_v45, 16 }
 0x48a   :  { %v15381_v47 = vpop.f32.mrf.mxu3  ;;  %v3627_v24 = vor.u32 %v3626_v19, %v3625_v53  ;;  %v19815_v19 = vshrl.u32 %v14705_v46, 16 }
 0x48b   :  { %19810 = vst [vmem:[#allocation211_spill] sm:$0xff] %v15381_v47  ;;  %v4697_v22 = vor.u32 %v4696_v43, %v4693_v37  ;;  %v18785_v37 = vshrl.u32 %v15410_v10, 16  ;;  %v4702_v27 = vrot.slane %v4700_v48, 3  ;;  %v10805_v47 = vld [vmem:[#allocation6 + $0x230] sm:$0xff] }
 0x48c   :  { %v3628_v52 = vsel %vm3604_vm5, %v3623_v5, %v3627_v24  ;;  %v3629_v43 = vrot.slane %v19815_v19, 3  ;;  %8510 = vmatpush.bf16.msra.mxu1 %v10805_v47  ;;  %v19821_v47 = vshll.u32 %v14718_v14, 16 }
 0x48d   :  { %v15389_v60 = vpop.f32.mrf.mxu0  ;;  %v4698_v42 = vsel %vm3604_vm5, %v4688_v20, %v4697_v22 }
 0x48f   :  { %v2769_v40 = vpop.f32.mrf.mxu1 }
 0x490   :  { %v3450_v62 = vpop.f32.mrf.mxu2 }
 0x491   :  { %v15401_v41 = vadd.f32 %v3450_v62, %v2766_v15  ;;  %v10741_v15 = vld [vmem:[#allocation6 + $0x170] sm:$0xff] }
 0x492   :  { %v15399_v33 = vpop.f32.mrf.mxu3  ;;  %5402 = vmatmul.bf16.gmra.mxu1 %v11427_v39  ;;  %6411 = vmatpush.bf16.msra.mxu2 %v10741_v15  ;;  %v19816_v39 = vshll.u32 %v14705_v46, 16 }
 0x493   :  { %19813 = vst [vmem:[#allocation212_spill] sm:$0xff] %v15399_v33 }
 0x494   :  { %v3630_v62 = vrot.slane %v19816_v39, 4 }
 0x495   :  { %v15403_v54 = vpop.f32.mrf.mxu0  ;;  %3492 = vmatmul.bf16.gmra.mxu2 %v3126_v56  ;;  %v10789_v56 = vld [vmem:[#allocation6 + $0x1b0] sm:$0xff] }
 0x496   :  { %7436 = vmatpush.bf16.msra.mxu3 %v10789_v56  ;;  %v3631_v56 = vor.u32 %v3630_v62, %v3629_v43  ;;  %v19820_v43 = vshrl.u32 %v14718_v14, 16 }
 0x497   :  { %3894 = vmatmul.bf16.gmra.mxu3 %v3628_v52  ;;  %v2771_v34 = vpop.f32.mrf.mxu1  ;;  %v4703_v52 = vshll.u32 %v11741_v45, 16 }
 0x498   :  { %5064 = vmatmul.bf16.gmra.mxu0 %v4698_v42  ;;  %v3453_v53 = vpop.f32.mrf.mxu2  ;;  %v3130_v42 = vrot.slane %v18785_v37, 2  ;;  %v3632_v37 = vsel %vm3604_vm5, %v3627_v24, %v3631_v56  ;;  %v3633_v62 = vrot.slane %v19820_v43, 3 }
 0x499   :  { %v15414_v5 = vadd.f32 %v3453_v53, %v2769_v40  ;;  %v3133_v40 = vrot.slane %v18786_v4, 3  ;;  %v4705_v45 = vrot.slane %v4703_v52, 4  ;;  %v11743_v4 = vld [vmem:[#allocation2 + $0xdc] sm:$0xff]  }
 0x49a   :  { %v15408_v2 = vpop.f32.mrf.mxu3 }
 0x49b   :  { %19814 = vst [vmem:[#allocation213_spill] sm:$0xff] %v15408_v2  ;;  %v3134_v2 = vor.u32 %v3133_v40, %v3130_v42  ;;  %v4706_v46 = vor.u32 %v4705_v45, %v4702_v27  ;;  %v3634_v42 = vrot.slane %v19821_v47, 4 }
 0x49d   :  { %v15416_v20 = vpop.f32.mrf.mxu0  ;;  %v3135_v33 = vsel %vm2902_vm4, %v3125_v17, %v3134_v2  ;;  %v4707_v48 = vsel %vm3604_vm5, %v4697_v22, %v4706_v46  ;;  %v4712_v22 = vshll.u32 %v11743_v4, 16  ;;  %v3635_v59 = vor.u32 %v3634_v42, %v3633_v62  ;;  %v15464_v42 = vld [vmem:[#allocation2 + $0xdc] sm:$0xff] }
 0x49e   :  { %19825 = vst [vmem:[#allocation220_spill] sm:$0xff] %v15464_v42 }
 0x49f   :  { %v2774_v53 = vpop.f32.mrf.mxu1 }
 0x4a0   :  { %v3455_v35 = vpop.f32.mrf.mxu2 }
 0x4a1   :  { %v15428_v19 = vadd.f32 %v3455_v35, %v2771_v34 }
 0x4a2   :  { %v15426_v15 = vpop.f32.mrf.mxu3  ;;  %5407 = vmatmul.bf16.gmra.mxu1 %v11428_v1  ;;  %v15437_v1 = vld [vmem:[#allocation2 + $0xd4] sm:$0xff] }
 0x4a3   :  { %19817 = vst [vmem:[#allocation214_spill] sm:$0xff] %v15426_v15  ;;  %v10797_v15 = vld [vmem:[#allocation6 + $0x1f0] sm:$0xff]  ;;  %v18787_v24 = vshrl.u32 %v15437_v1, 16  ;;  %v18788_v17 = vshll.u32 %v15437_v1, 16 }
 0x4a4   :  { %7926 = vmatpush.bf16.msra.mxu0 %v10797_v15 }
 0x4a5   :  { %v15430_v39 = vpop.f32.mrf.mxu0  ;;  %3497 = vmatmul.bf16.gmra.mxu2 %v3135_v33  ;;  %v4709_v33 = vshrl.u32 %v11743_v4, 16  ;;  %v3139_v40 = vrot.slane %v18787_v24, 2  ;;  %v3142_v45 = vrot.slane %v18788_v17, 3  ;;  %v3636_v24 = vsel %vm3604_vm5, %v3631_v56, %v3635_v59  ;;  %v11745_v17 = vld [vmem:[#allocation2 + $0xe4] sm:$0xff]  }
 0x4a6   :  { %v4718_v56 = vshrl.u32 %v11745_v17, 16 }
 0x4a7   :  { %3899 = vmatmul.bf16.gmra.mxu3 %v3632_v37  ;;  %v2776_v52 = vpop.f32.mrf.mxu1  ;;  %v3143_v61 = vor.u32 %v3142_v45, %v3139_v40  ;;  %v18792_v40 = vshll.u32 %v15464_v42, 16 }
 0x4a8   :  { %5069 = vmatmul.bf16.gmra.mxu0 %v4707_v48  ;;  %v3458_v27 = vpop.f32.mrf.mxu2  ;;  %v4711_v48 = vrot.slane %v4709_v33, 3 }
 0x4a9   :  { %v15441_v34 = vadd.f32 %v3458_v27, %v2774_v53  ;;  %v4714_v53 = vrot.slane %v4712_v22, 4  ;;  %v11429_v27 = vld [vmem:[#allocation2 + $0x30] sm:$0xff]  }
 0x4aa   :  { %v15435_v35 = vpop.f32.mrf.mxu3 }
 0x4ab   :  { %19818 = vst [vmem:[#allocation215_spill] sm:$0xff] %v15435_v35  ;;  %v4715_v14 = vor.u32 %v4714_v53, %v4711_v48  ;;  %v19829_v48 = vshll.u32 %v14731_v50, 16 }
 0x4ad   :  { %v15443_v37 = vpop.f32.mrf.mxu0  ;;  %v4716_v33 = vsel %vm3604_vm5, %v4706_v46, %v4715_v14  ;;  %v19828_v46 = vshrl.u32 %v14731_v50, 16  ;;  %v3638_v53 = vrot.slane %v19829_v48, 4 }
 0x4ae   :  { %19819 = vst [vmem:[#allocation216_spill] sm:$0xff] %v15443_v37  ;;  %v3144_v37 = vsel %vm2902_vm4, %v3134_v2, %v3143_v61  ;;  %v4721_v2 = vshll.u32 %v11745_v17, 16 }
 0x4af   :  { %v2779_v15 = vpop.f32.mrf.mxu1 }
 0x4b0   :  { %v3460_v4 = vpop.f32.mrf.mxu2 }
 0x4b1   :  { %v15455_v43 = vadd.f32 %v3460_v4, %v2776_v52  ;;  %v18789_v52 = vshrl.u32 %v15464_v42, 16  ;;  %v3151_v4 = vrot.slane %v18792_v40, 3  ;;  %v11747_v40 = vld [vmem:[#allocation2 + $0xec] sm:$0xff]  }
 0x4b2   :  { %v15453_v35 = vpop.f32.mrf.mxu3  ;;  %5412 = vmatmul.bf16.gmra.mxu1 %v11429_v27 }
 0x4b3   :  { %19822 = vst [vmem:[#allocation217_spill] sm:$0xff] %v15453_v35  ;;  %v3148_v27 = vrot.slane %v18789_v52, 2 }
 0x4b5   :  { %v15457_v47 = vpop.f32.mrf.mxu0  ;;  %3502 = vmatmul.bf16.gmra.mxu2 %v3144_v37  ;;  %v3637_v37 = vrot.slane %v19828_v46, 3 }
 0x4b6   :  { %19823 = vst [vmem:[#allocation218_spill] sm:$0xff] %v15457_v47 }
 0x4b7   :  { %3904 = vmatmul.bf16.gmra.mxu3 %v3636_v24  ;;  %v2781_v22 = vpop.f32.mrf.mxu1 }
 0x4b8   :  { %5074 = vmatmul.bf16.gmra.mxu0 %v4716_v33  ;;  %v3463_v62 = vpop.f32.mrf.mxu2 }
 0x4b9   :  { %v15468_v45 = vadd.f32 %v3463_v62, %v2779_v15  ;;  %v4723_v15 = vrot.slane %v4721_v2, 4  ;;  %v11430_v62 = vld [vmem:[#allocation2 + $0x38] sm:$0xff]  }
 0x4ba   :  { %v15462_v35 = vpop.f32.mrf.mxu3 }
 0x4bb   :  { %19824 = vst [vmem:[#allocation219_spill] sm:$0xff] %v15462_v35  ;;  %v4720_v35 = vrot.slane %v4718_v56, 3 }
 0x4bc   :  { %19826 = vst [vmem:[#allocation221_spill] sm:$0xff] %v15468_v45  ;;  %v3152_v45 = vor.u32 %v3151_v4, %v3148_v27  ;;  %v19837_v4 = vshll.u32 %v14744_v31, 16 }
 0x4bd   :  { %v15470_v24 = vpop.f32.mrf.mxu0  ;;  %v4724_v50 = vor.u32 %v4723_v15, %v4720_v35 }
 0x4be   :  { %19827 = vst [vmem:[#allocation222_spill] sm:$0xff] %v15470_v24  ;;  %v3639_v24 = vor.u32 %v3638_v53, %v3637_v37  ;;  %v3153_v42 = vsel %vm2902_vm4, %v3143_v61, %v3152_v45  ;;  %v15491_v53 = vld [vmem:[#allocation2 + $0xe4] sm:$0xff]  ;;  %v4730_v61 = vshll.u32 %v11747_v40, 16  ;;  %v3642_v15 = vrot.slane %v19837_v4, 4 }
 0x4bf   :  { %v2784_v33 = vpop.f32.mrf.mxu1  ;;  %v4725_v56 = vsel %vm3604_vm5, %v4715_v14, %v4724_v50  ;;  %19833 = vst [vmem:[#allocation226_spill] sm:$0xff] %v15491_v53  ;;  %v18793_v35 = vshrl.u32 %v15491_v53, 16  ;;  %v19836_v14 = vshrl.u32 %v14744_v31, 16 }
 0x4c0   :  { %v3465_v17 = vpop.f32.mrf.mxu2  ;;  %v3640_v52 = vsel %vm3604_vm5, %v3635_v59, %v3639_v24  ;;  %v4727_v59 = vshrl.u32 %v11747_v40, 16 }
 0x4c1   :  { %v15482_v46 = vadd.f32 %v3465_v17, %v2781_v22  ;;  %v18796_v22 = vshll.u32 %v15491_v53, 16 }
 0x4c2   :  { %v15480_v47 = vpop.f32.mrf.mxu3  ;;  %5417 = vmatmul.bf16.gmra.mxu1 %v11430_v62  ;;  %v3157_v62 = vrot.slane %v18793_v35, 2 }
 0x4c3   :  { %19830 = vst [vmem:[#allocation223_spill] sm:$0xff] %v15480_v47  ;;  %v3160_v17 = vrot.slane %v18796_v22, 3  ;;  %v11749_v22 = vld [vmem:[#allocation2 + $0xf4] sm:$0xff]  }
 0x4c5   :  { %v15484_v48 = vpop.f32.mrf.mxu0  ;;  %3507 = vmatmul.bf16.gmra.mxu2 %v3153_v42  ;;  %v3641_v42 = vrot.slane %v19836_v14, 3 }
 0x4c6   :  { %19831 = vst [vmem:[#allocation224_spill] sm:$0xff] %v15484_v48 }
 0x4c7   :  { %3909 = vmatmul.bf16.gmra.mxu3 %v3640_v52  ;;  %v2786_v2 = vpop.f32.mrf.mxu1 }
 0x4c8   :  { %5079 = vmatmul.bf16.gmra.mxu0 %v4725_v56  ;;  %v3468_v37 = vpop.f32.mrf.mxu2 }
 0x4c9   :  { %v15495_v27 = vadd.f32 %v3468_v37, %v2784_v33  ;;  %v4732_v33 = vrot.slane %v4730_v61, 4  ;;  %v11431_v37 = vld [vmem:[#allocation2 + $0x40] sm:$0xff]  }
 0x4ca   :  { %v15489_v47 = vpop.f32.mrf.mxu3 }
 0x4cb   :  { %19832 = vst [vmem:[#allocation225_spill] sm:$0xff] %v15489_v47  ;;  %v4729_v47 = vrot.slane %v4727_v59, 3 }
 0x4cc   :  { %19834 = vst [vmem:[#allocation227_spill] sm:$0xff] %v15495_v27  ;;  %v3161_v27 = vor.u32 %v3160_v17, %v3157_v62  ;;  %v19845_v17 = vshll.u32 %v14757_v32, 16 }
 0x4cd   :  { %v15497_v52 = vpop.f32.mrf.mxu0  ;;  %v4733_v31 = vor.u32 %v4732_v33, %v4729_v47 }
 0x4ce   :  { %19835 = vst [vmem:[#allocation228_spill] sm:$0xff] %v15497_v52  ;;  %v3643_v52 = vor.u32 %v3642_v15, %v3641_v42  ;;  %v3162_v53 = vsel %vm2902_vm4, %v3152_v45, %v3161_v27  ;;  %v15518_v15 = vld [vmem:[#allocation2 + $0xec] sm:$0xff]  ;;  %v4739_v45 = vshll.u32 %v11749_v22, 16  ;;  %v3646_v33 = vrot.slane %v19845_v17, 4 }
 0x4cf   :  { %v2789_v56 = vpop.f32.mrf.mxu1  ;;  %v4734_v59 = vsel %vm3604_vm5, %v4724_v50, %v4733_v31  ;;  %19841 = vst [vmem:[#allocation232_spill] sm:$0xff] %v15518_v15  ;;  %v18797_v47 = vshrl.u32 %v15518_v15, 16  ;;  %v19844_v50 = vshrl.u32 %v14757_v32, 16 }
 0x4d0   :  { %v3470_v40 = vpop.f32.mrf.mxu2  ;;  %v3644_v35 = vsel %vm3604_vm5, %v3639_v24, %v3643_v52  ;;  %v4736_v24 = vshrl.u32 %v11749_v22, 16 }
 0x4d1   :  { %v15509_v14 = vadd.f32 %v3470_v40, %v2786_v2  ;;  %v18800_v2 = vshll.u32 %v15518_v15, 16 }
 0x4d2   :  { %v15507_v48 = vpop.f32.mrf.mxu3  ;;  %5422 = vmatmul.bf16.gmra.mxu1 %v11431_v37  ;;  %v3166_v37 = vrot.slane %v18797_v47, 2 }
 0x4d3   :  { %19838 = vst [vmem:[#allocation229_spill] sm:$0xff] %v15507_v48  ;;  %v3169_v40 = vrot.slane %v18800_v2, 3  ;;  %v11751_v2 = vld [vmem:[#allocation2 + $0xfc] sm:$0xff]  }
 0x4d5   :  { %v15511_v4 = vpop.f32.mrf.mxu0  ;;  %3512 = vmatmul.bf16.gmra.mxu2 %v3162_v53  ;;  %v3645_v53 = vrot.slane %v19844_v50, 3 }
 0x4d6   :  { %19839 = vst [vmem:[#allocation230_spill] sm:$0xff] %v15511_v4 }
 0x4d7   :  { %3914 = vmatmul.bf16.gmra.mxu3 %v3644_v35  ;;  %v2791_v61 = vpop.f32.mrf.mxu1 }
 0x4d8   :  { %5084 = vmatmul.bf16.gmra.mxu0 %v4734_v59  ;;  %v3473_v42 = vpop.f32.mrf.mxu2 }
 0x4d9   :  { %v15522_v62 = vadd.f32 %v3473_v42, %v2789_v56  ;;  %v4741_v56 = vrot.slane %v4739_v45, 4  ;;  %v11432_v42 = vld [vmem:[#allocation2 + $0x48] sm:$0xff]  }
 0x4da   :  { %v15516_v48 = vpop.f32.mrf.mxu3 }
 0x4db   :  { %19840 = vst [vmem:[#allocation231_spill] sm:$0xff] %v15516_v48  ;;  %v4738_v48 = vrot.slane %v4736_v24, 3 }
 0x4dc   :  { %19842 = vst [vmem:[#allocation233_spill] sm:$0xff] %v15522_v62  ;;  %v3170_v62 = vor.u32 %v3169_v40, %v3166_v37 }
 0x4dd   :  { %v15524_v35 = vpop.f32.mrf.mxu0  ;;  %v4742_v32 = vor.u32 %v4741_v56, %v4738_v48 }
 0x4de   :  { %19843 = vst [vmem:[#allocation234_spill] sm:$0xff] %v15524_v35  ;;  %v3647_v35 = vor.u32 %v3646_v33, %v3645_v53  ;;  %v3171_v15 = vsel %vm2902_vm4, %v3161_v27, %v3170_v62  ;;  %v15543_v33 = vld [vmem:[#allocation2 + $0xf4] sm:$0xff]  ;;  %v4745_v27 = vshrl.u32 %v11751_v2, 16 }
 0x4df   :  { %v2794_v59 = vpop.f32.mrf.mxu1  ;;  %v4743_v24 = vsel %vm3604_vm5, %v4733_v31, %v4742_v32  ;;  %v19851_v31 = vshrl.u32 %v14772_v16, 16  ;;  %v19853_v48 = vshrl.u32 %v15543_v33, 16 }
 0x4e0   :  { %v3475_v22 = vpop.f32.mrf.mxu2  ;;  %v3648_v47 = vsel %vm3604_vm5, %v3643_v52, %v3647_v35 }
 0x4e1   :  { %v15536_v50 = vadd.f32 %v3475_v22, %v2791_v61  ;;  %v3649_v56 = vrot.slane %v19851_v31, 3  ;;  %v11433_v31 = vld [vmem:[#allocation2 + $0x50] sm:$0xff]  }
 0x4e2   :  { %v15534_v4 = vpop.f32.mrf.mxu3  ;;  %5427 = vmatmul.bf16.gmra.mxu1 %v11432_v42  ;;  %v10788_v42 = vld [vmem:[#allocation6 + $0x1a8] sm:$0xff] }
 0x4e3   :  { %19846 = vst [vmem:[#allocation235_spill] sm:$0xff] %v15534_v4  ;;  %7437 = vmatpush.bf16.msra.mxu3 %v10788_v42 }
 0x4e4   :  { %19847 = vst [vmem:[#allocation236_spill] sm:$0xff] %v15536_v50 }
 0x4e5   :  { %v15538_v17 = vpop.f32.mrf.mxu0  ;;  %3517 = vmatmul.bf16.gmra.mxu2 %v3171_v15  ;;  %v10740_v15 = vld [vmem:[#allocation6 + $0x168] sm:$0xff] }
 0x4e6   :  { %19848 = vst [vmem:[#allocation237_spill] sm:$0xff] %v15538_v17  ;;  %6412 = vmatpush.bf16.msra.mxu2 %v10740_v15 }
 0x4e7   :  { %3919 = vmatmul.bf16.gmra.mxu3 %v3648_v47  ;;  %v2796_v45 = vpop.f32.mrf.mxu1  ;;  %v4748_v47 = vshll.u32 %v11751_v2, 16 }
 0x4e8   :  { %5089 = vmatmul.bf16.gmra.mxu0 %v4743_v24  ;;  %v3478_v53 = vpop.f32.mrf.mxu2  ;;  %v19852_v24 = vshll.u32 %v14772_v16, 16 }
 0x4e9   :  { %v15548_v52 = vadd.f32 %v3478_v53, %v2794_v59  ;;  %v4747_v53 = vrot.slane %v4745_v27, 3  ;;  %v4750_v17 = vrot.slane %v4748_v47, 4 }
 0x4ea   :  { %v3880_v4 = vpop.f32.mrf.mxu3  ;;  %v3650_v61 = vrot.slane %v19852_v24, 4 }
 0x4eb   :  { %v4085_v37 = vadd.f32 %v3880_v4, %v14779_v18  ;;  %19849 = vst [vmem:[#allocation238_spill] sm:$0xff] %v15548_v52  ;;  %v3175_v18 = vrot.slane %v19853_v48, 2  ;;  %v19854_v4 = vshll.u32 %v15543_v33, 16  ;;  %v4751_v48 = vor.u32 %v4750_v17, %v4747_v53 }
 0x4ec   :  { %v3651_v50 = vor.u32 %v3650_v61, %v3649_v56  ;;  %v11753_v56 = vld [vmem:[#allocation2 + $0x104] sm:$0xff]   ;;  %v19855_v53 = vshrl.u32 %v14797_v12, 16 }
 0x4ed   :  { %v15550_v40 = vpop.f32.mrf.mxu0  ;;  %v5155_v22 = vadd.f32 %v14768_v51, %v4085_v37  ;;  %v3178_v59 = vrot.slane %v19854_v4, 3  ;;  %v4752_v42 = vsel %vm3604_vm5, %v4742_v32, %v4751_v48  ;;  %v4757_v32 = vshll.u32 %v11753_v56, 16 }
 0x4ee   :  { %19850 = vst [vmem:[#allocation239_spill] sm:$0xff] %v15550_v40  ;;  %v3652_v4 = vsel %vm3604_vm5, %v3647_v35, %v3651_v50 }
 0x4ef   :  { %v5393_v2 = vpop.f32.mrf.mxu1  ;;  %v3179_v51 = vor.u32 %v3178_v59, %v3175_v18  ;;  %v4754_v18 = vshrl.u32 %v11753_v56, 16  ;;  %v10804_v59 = vld [vmem:[#allocation6 + $0x228] sm:$0xff] }
 0x4f0   :  { %v15561_v40 = vadd.f32 %v5393_v2, %v5155_v22  ;;  %v3480_v52 = vpop.f32.mrf.mxu2  ;;  %v10796_v22 = vld [vmem:[#allocation6 + $0x1e8] sm:$0xff]  ;;  %8511 = vmatpush.bf16.msra.mxu1 %v10804_v59 }
 0x4f1   :  { %v15564_v37 = vadd.f32 %v3480_v52, %v2796_v45  ;;  %v3180_v27 = vsel %vm2902_vm4, %v3170_v62, %v3179_v51  ;;  %7927 = vmatpush.bf16.msra.mxu0 %v10796_v22  ;;  %v15576_v52 = vld [vmem:[#allocation2 + $0xfc] sm:$0xff] }
 0x4f2   :  { %v3882_v15 = vpop.f32.mrf.mxu3  ;;  %5432 = vmatmul.bf16.gmra.mxu1 %v11433_v31  ;;  %v18801_v62 = vshrl.u32 %v15576_v52, 16  ;;  %v3653_v31 = vrot.slane %v19855_v53, 3  ;;  %v11434_v22 = vld [vmem:[#allocation2 + $0x58] sm:$0xff]  }
 0x4f3   :  { %v4086_v16 = vadd.f32 %v3882_v15, %v14791_v6 }
 0x4f5   :  { %v15566_v24 = vpop.f32.mrf.mxu0  ;;  %v5156_v47 = vadd.f32 %v14781_v7, %v4086_v16  ;;  %3522 = vmatmul.bf16.gmra.mxu2 %v3180_v27  ;;  %v18802_v7 = vshll.u32 %v15576_v52, 16  ;;  %v19856_v16 = vshll.u32 %v14797_v12, 16  ;;  %v3184_v27 = vrot.slane %v18801_v62, 2 }
 0x4f7   :  { %3924 = vmatmul.bf16.gmra.mxu3 %v3652_v4  ;;  %v5395_v61 = vpop.f32.mrf.mxu1  ;;  %v3654_v4 = vrot.slane %v19856_v16, 4 }
 0x4f8   :  { %5094 = vmatmul.bf16.gmra.mxu0 %v4752_v42  ;;  %v15572_v6 = vadd.f32 %v5395_v61, %v5156_v47  ;;  %v15574_v45 = vpop.f32.mrf.mxu2  ;;  %v4756_v42 = vrot.slane %v4754_v18, 3  ;;  %v4759_v61 = vrot.slane %v4757_v32, 4 }
 0x4f9   :  { %v3655_v59 = vor.u32 %v3654_v4, %v3653_v31 }
 0x4fa   :  { %v3885_v17 = vpop.f32.mrf.mxu3 }
 0x4fb   :  { %v4087_v35 = vadd.f32 %v3885_v17, %v14804_v28  ;;  %v3187_v28 = vrot.slane %v18802_v7, 3  ;;  %v3656_v62 = vsel %vm3604_vm5, %v3651_v50, %v3655_v59 }
 0x4fd   :  { %v15581_v2 = vpop.f32.mrf.mxu0  ;;  %v5157_v15 = vadd.f32 %v14793_v13, %v4087_v35  ;;  %v3188_v13 = vor.u32 %v3187_v28, %v3184_v27  ;;  %v4760_v35 = vor.u32 %v4759_v61, %v4756_v42  ;;  %v15607_v27 = vld [vmem:[#allocation2 + $0x104] sm:$0xff] }
 0x4fe   :  { %19858 = vst [vmem:[#allocation241_spill] sm:$0xff] %v15607_v27  ;;  %v18803_v50 = vshrl.u32 %v15607_v27, 16 }
 0x4ff   :  { %v5398_v47 = vpop.f32.mrf.mxu1  ;;  %v3189_v7 = vsel %vm2902_vm4, %v3179_v51, %v3188_v13  ;;  %v4761_v32 = vsel %vm3604_vm5, %v4751_v48, %v4760_v35  ;;  %v18804_v51 = vshll.u32 %v15607_v27, 16  ;;  %v19860_v48 = vshrl.u32 %v14822_v29, 16 }
 0x500   :  { %v15592_v56 = vadd.f32 %v5398_v47, %v5157_v15  ;;  %v15594_v53 = vpop.f32.mrf.mxu2  ;;  %v11755_v47 = vld [vmem:[#allocation2 + $0x10c] sm:$0xff]  }
 0x501   :  { %v3657_v42 = vrot.slane %v19860_v48, 3 }
 0x502   :  { %v3887_v17 = vpop.f32.mrf.mxu3  ;;  %5437 = vmatmul.bf16.gmra.mxu1 %v11434_v22  ;;  %v19861_v22 = vshll.u32 %v14822_v29, 16 }
 0x503   :  { %v4088_v12 = vadd.f32 %v3887_v17, %v14816_v9 }
 0x504   :  { %v3658_v17 = vrot.slane %v19861_v22, 4 }
 0x505   :  { %v15597_v16 = vpop.f32.mrf.mxu0  ;;  %v5158_v18 = vadd.f32 %v14806_v44, %v4088_v12  ;;  %3527 = vmatmul.bf16.gmra.mxu2 %v3189_v7  ;;  %v4766_v7 = vshll.u32 %v11755_v47, 16  ;;  %v3193_v12 = vrot.slane %v18803_v50, 2 }
 0x506   :  { %v3659_v48 = vor.u32 %v3658_v17, %v3657_v42 }
 0x507   :  { %3929 = vmatmul.bf16.gmra.mxu3 %v3656_v62  ;;  %v5400_v15 = vpop.f32.mrf.mxu1  ;;  %v4763_v62 = vshrl.u32 %v11755_v47, 16 }
 0x508   :  { %5099 = vmatmul.bf16.gmra.mxu0 %v4761_v32  ;;  %v15603_v31 = vadd.f32 %v5400_v15, %v5158_v18  ;;  %v15605_v9 = vpop.f32.mrf.mxu2  ;;  %v3196_v18 = vrot.slane %v18804_v51, 3  ;;  %v4768_v15 = vrot.slane %v4766_v7, 4  ;;  %v3660_v50 = vsel %vm3604_vm5, %v3655_v59, %v3659_v48 }
 0x50a   :  { %19857 = vst [vmem:[#allocation240_spill] sm:$0xff] %v15603_v31  ;;  %v3890_v4 = vpop.f32.mrf.mxu3 }
 0x50b   :  { %v4089_v44 = vadd.f32 %v3890_v4, %v14829_v36  ;;  %v4765_v36 = vrot.slane %v4763_v62, 3  ;;  %v11435_v4 = vld [vmem:[#allocation2 + $0x60] sm:$0xff]   ;;  %v19865_v62 = vld [vmem:[#allocation31_spill] sm:$0xff] }
 0x50d   :  { %v15612_v28 = vpop.f32.mrf.mxu0  ;;  %v5159_v61 = vadd.f32 %v14818_v11, %v4089_v44  ;;  %v3197_v11 = vor.u32 %v3196_v18, %v3193_v12  ;;  %v4769_v44 = vor.u32 %v4768_v15, %v4765_v36  ;;  %v19869_v12 = vld [vmem:[#allocation12_spill] sm:$0xff] }
 0x50e   :  { %19859 = vst [vmem:[#allocation242_spill] sm:$0xff] %v15612_v28 }
 0x50f   :  { %v5403_v32 = vpop.f32.mrf.mxu1  ;;  %v3198_v51 = vsel %vm2902_vm4, %v3188_v13, %v3197_v11 }
 0x510   :  { %v15623_v47 = vadd.f32 %v5403_v32, %v5159_v61  ;;  %v15625_v31 = vpop.f32.mrf.mxu2  ;;  %v4770_v61 = vsel %vm3604_vm5, %v4760_v35, %v4769_v44  ;;  %v19871_v35 = vld [vmem:[#allocation113_spill] sm:$0xff] }
 0x511   :  { %19863 = vst [vmem:[#allocation244_spill] sm:$0xff] %v15625_v31  ;;  %v19872_v15 = vshrl.u32 %v19871_v35, 16 }
 0x512   :  { %19862 = vst [vmem:[#allocation243_spill] sm:$0xff] %v15623_v47  ;;  %v3892_v28 = vpop.f32.mrf.mxu3  ;;  %5442 = vmatmul.bf16.gmra.mxu1 %v11435_v4  ;;  %v11757_v47 = vld [vmem:[#allocation2 + $0x114] sm:$0xff]  }
 0x513   :  { %v4090_v29 = vadd.f32 %v3892_v28, %v14841_v57  ;;  %v15638_v28 = vld [vmem:[#allocation2 + $0x10c] sm:$0xff]  ;;  %v3661_v4 = vrot.slane %v19872_v15, 3 }
 0x514   :  { %19868 = vst [vmem:[#allocation247_spill] sm:$0xff] %v15638_v28  ;;  %v18807_v59 = vshrl.u32 %v15638_v28, 16  ;;  %v18808_v13 = vshll.u32 %v15638_v28, 16 }
 0x515   :  { %v15628_v22 = vpop.f32.mrf.mxu0  ;;  %v5160_v7 = vadd.f32 %v19865_v62, %v4090_v29  ;;  %3532 = vmatmul.bf16.gmra.mxu2 %v3198_v51  ;;  %v4775_v51 = vshll.u32 %v11757_v47, 16  ;;  %v19873_v29 = vld [vmem:[#allocation107_spill] sm:$0xff] }
 0x516   :  { %19864 = vst [vmem:[#allocation245_spill] sm:$0xff] %v15628_v22 }
 0x517   :  { %3934 = vmatmul.bf16.gmra.mxu3 %v3660_v50  ;;  %v5405_v32 = vpop.f32.mrf.mxu1  ;;  %v4772_v50 = vshrl.u32 %v11757_v47, 16 }
 0x518   :  { %5104 = vmatmul.bf16.gmra.mxu0 %v4770_v61  ;;  %v15634_v42 = vadd.f32 %v5405_v32, %v5160_v7  ;;  %v15636_v57 = vpop.f32.mrf.mxu2  ;;  %v19874_v7 = vshll.u32 %v19871_v35, 16  ;;  %v3202_v32 = vrot.slane %v18807_v59, 2  ;;  %v19877_v35 = vld [vmem:[#allocation28_spill] sm:$0xff] }
 0x519   :  { %19867 = vst [vmem:[#allocation246_spill] sm:$0xff] %v15636_v57 }
 0x51a   :  { %19866 = vst [vmem:[#allocation31_spill] sm:$0xff] %v15634_v42  ;;  %v3895_v17 = vpop.f32.mrf.mxu3  ;;  %v3662_v61 = vrot.slane %v19874_v7, 4  ;;  %v3205_v42 = vrot.slane %v18808_v13, 3 }
 0x51b   :  { %v4091_v18 = vadd.f32 %v3895_v17, %v19869_v12  ;;  %v4774_v17 = vrot.slane %v4772_v50, 3  ;;  %v4777_v12 = vrot.slane %v4775_v51, 4  ;;  %v19879_v50 = vld [vmem:[#allocation21_spill] sm:$0xff] }
 0x51c   :  { %v3663_v15 = vor.u32 %v3662_v61, %v3661_v4  ;;  %v15669_v4 = vld [vmem:[#allocation2 + $0x114] sm:$0xff]  ;;  %v19882_v61 = vld [vmem:[#allocation37_spill] sm:$0xff] }
 0x51d   :  { %v15643_v36 = vpop.f32.mrf.mxu0  ;;  %v5161_v62 = vadd.f32 %v19873_v29, %v4091_v18  ;;  %v3206_v18 = vor.u32 %v3205_v42, %v3202_v32  ;;  %v4778_v7 = vor.u32 %v4777_v12, %v4774_v17 }
 0x51e   :  { %19870 = vst [vmem:[#allocation12_spill] sm:$0xff] %v15643_v36  ;;  %v11436_v36 = vld [vmem:[#allocation2 + $0x68] sm:$0xff]   ;;  %v3664_v59 = vsel %vm3604_vm5, %v3659_v48, %v3663_v15  ;;  %v18811_v48 = vshrl.u32 %v15669_v4, 16 }
 0x51f   :  { %v5408_v22 = vpop.f32.mrf.mxu1  ;;  %v3207_v13 = vsel %vm2902_vm4, %v3197_v11, %v3206_v18  ;;  %v18812_v11 = vshll.u32 %v15669_v4, 16 }
 0x520   :  { %v15654_v47 = vadd.f32 %v5408_v22, %v5161_v62  ;;  %v15656_v31 = vpop.f32.mrf.mxu2  ;;  %v4779_v22 = vsel %vm3604_vm5, %v4769_v44, %v4778_v7  ;;  %v19884_v44 = vld [vmem:[#allocation36_spill] sm:$0xff] }
 0x521   :  { %19876 = vst [vmem:[#allocation107_spill] sm:$0xff] %v15656_v31  ;;  %v19885_v12 = vshrl.u32 %v19884_v44, 16 }
 0x522   :  { %19875 = vst [vmem:[#allocation113_spill] sm:$0xff] %v15654_v47  ;;  %v3897_v57 = vpop.f32.mrf.mxu3  ;;  %5447 = vmatmul.bf16.gmra.mxu1 %v11436_v36  ;;  %v11759_v47 = vld [vmem:[#allocation2 + $0x11c] sm:$0xff]  }
 0x523   :  { %v4092_v29 = vadd.f32 %v3897_v57, %v19877_v35  ;;  %v3665_v35 = vrot.slane %v19885_v12, 3 }
 0x525   :  { %v15659_v27 = vpop.f32.mrf.mxu0  ;;  %v5162_v51 = vadd.f32 %v19879_v50, %v4092_v29  ;;  %3537 = vmatmul.bf16.gmra.mxu2 %v3207_v13  ;;  %v4784_v13 = vshll.u32 %v11759_v47, 16  ;;  %v19886_v29 = vld [vmem:[#allocation30_spill] sm:$0xff] }
 0x526   :  { %19878 = vst [vmem:[#allocation28_spill] sm:$0xff] %v15659_v27 }
 0x527   :  { %3939 = vmatmul.bf16.gmra.mxu3 %v3664_v59  ;;  %v5410_v62 = vpop.f32.mrf.mxu1  ;;  %v4781_v59 = vshrl.u32 %v11759_v47, 16 }
 0x528   :  { %5109 = vmatmul.bf16.gmra.mxu0 %v4779_v22  ;;  %v15665_v36 = vadd.f32 %v5410_v62, %v5162_v51  ;;  %v15667_v57 = vpop.f32.mrf.mxu2  ;;  %v19887_v51 = vshll.u32 %v19884_v44, 16  ;;  %v3211_v62 = vrot.slane %v18811_v48, 2  ;;  %v19890_v44 = vld [vmem:[#allocation124_spill] sm:$0xff] }
 0x529   :  { %19881 = vst [vmem:[#allocation248_spill] sm:$0xff] %v15667_v57 }
 0x52a   :  { %19880 = vst [vmem:[#allocation21_spill] sm:$0xff] %v15665_v36  ;;  %v3900_v42 = vpop.f32.mrf.mxu3  ;;  %v3666_v22 = vrot.slane %v19887_v51, 4  ;;  %v3214_v36 = vrot.slane %v18812_v11, 3 }
 0x52b   :  { %v4093_v32 = vadd.f32 %v3900_v42, %v19882_v61  ;;  %v4783_v42 = vrot.slane %v4781_v59, 3  ;;  %v4786_v61 = vrot.slane %v4784_v13, 4  ;;  %v19892_v59 = vld [vmem:[#allocation41_spill] sm:$0xff] }
 0x52c   :  { %v3667_v12 = vor.u32 %v3666_v22, %v3665_v35  ;;  %v15700_v35 = vld [vmem:[#allocation2 + $0x11c] sm:$0xff] }
 0x52d   :  { %v15674_v17 = vpop.f32.mrf.mxu0  ;;  %v5163_v50 = vadd.f32 %v19886_v29, %v4093_v32  ;;  %v3215_v32 = vor.u32 %v3214_v36, %v3211_v62  ;;  %v4787_v51 = vor.u32 %v4786_v61, %v4783_v42  ;;  %v19895_v22 = vld [vmem:[#allocation33_spill] sm:$0xff] }
 0x52e   :  { %19883 = vst [vmem:[#allocation37_spill] sm:$0xff] %v15674_v17  ;;  %v11437_v17 = vld [vmem:[#allocation2 + $0x70] sm:$0xff]   ;;  %v3668_v48 = vsel %vm3604_vm5, %v3663_v15, %v3667_v12  ;;  %v18813_v15 = vshrl.u32 %v15700_v35, 16 }
 0x52f   :  { %v5413_v27 = vpop.f32.mrf.mxu1  ;;  %v3216_v11 = vsel %vm2902_vm4, %v3206_v18, %v3215_v32  ;;  %v18814_v18 = vshll.u32 %v15700_v35, 16 }
 0x530   :  { %v15685_v47 = vadd.f32 %v5413_v27, %v5163_v50  ;;  %v15687_v31 = vpop.f32.mrf.mxu2  ;;  %v4788_v27 = vsel %vm3604_vm5, %v4778_v7, %v4787_v51  ;;  %v19897_v7 = vshrl.u32 %v14981_v49, 16 }
 0x531   :  { %19889 = vst [vmem:[#allocation30_spill] sm:$0xff] %v15687_v31 }
 0x532   :  { %19888 = vst [vmem:[#allocation36_spill] sm:$0xff] %v15685_v47  ;;  %v3902_v57 = vpop.f32.mrf.mxu3  ;;  %5452 = vmatmul.bf16.gmra.mxu1 %v11437_v17  ;;  %v11761_v47 = vld [vmem:[#allocation2 + $0x124] sm:$0xff]   ;;  %v3669_v61 = vrot.slane %v19897_v7, 3 }
 0x533   :  { %v4094_v29 = vadd.f32 %v3902_v57, %v19890_v44  ;;  %v10739_v44 = vld [vmem:[#allocation6 + $0x160] sm:$0xff] }
 0x534   :  { %6413 = vmatpush.bf16.msra.mxu2 %v10739_v44  ;;  %v19902_v44 = vld [vmem:[#allocation44_spill] sm:$0xff] }
 0x535   :  { %v15690_v28 = vpop.f32.mrf.mxu0  ;;  %v5164_v13 = vadd.f32 %v19892_v59, %v4094_v29  ;;  %3542 = vmatmul.bf16.gmra.mxu2 %v3216_v11  ;;  %v4793_v11 = vshll.u32 %v11761_v47, 16  ;;  %v19898_v29 = vld [vmem:[#allocation100_spill] sm:$0xff] }
 0x536   :  { %19891 = vst [vmem:[#allocation124_spill] sm:$0xff] %v15690_v28  ;;  %v11438_v28 = vld [vmem:[#allocation2 + $0x78] sm:$0xff]  }
 0x537   :  { %3944 = vmatmul.bf16.gmra.mxu3 %v3668_v48  ;;  %v5415_v50 = vpop.f32.mrf.mxu1  ;;  %v4790_v48 = vshrl.u32 %v11761_v47, 16  ;;  %v4795_v47 = vrot.slane %v4793_v11, 4 }
 0x538   :  { %5114 = vmatmul.bf16.gmra.mxu0 %v4788_v27  ;;  %v15696_v17 = vadd.f32 %v5415_v50, %v5164_v13  ;;  %v15698_v57 = vpop.f32.mrf.mxu2  ;;  %v19899_v13 = vshll.u32 %v14981_v49, 16  ;;  %v3220_v50 = vrot.slane %v18813_v15, 2  ;;  %v10787_v15 = vld [vmem:[#allocation6 + $0x1a0] sm:$0xff] }
 0x539   :  { %19894 = vst [vmem:[#allocation249_spill] sm:$0xff] %v15698_v57  ;;  %7438 = vmatpush.bf16.msra.mxu3 %v10787_v15 }
 0x53a   :  { %19893 = vst [vmem:[#allocation41_spill] sm:$0xff] %v15696_v17  ;;  %v3905_v36 = vpop.f32.mrf.mxu3  ;;  %v3670_v27 = vrot.slane %v19899_v13, 4  ;;  %v3223_v17 = vrot.slane %v18814_v18, 3 }
 0x53b   :  { %v4095_v62 = vadd.f32 %v3905_v36, %v19895_v22  ;;  %v4792_v22 = vrot.slane %v4790_v48, 3 }
 0x53c   :  { %v3224_v49 = vor.u32 %v3223_v17, %v3220_v50 }
 0x53d   :  { %v15705_v42 = vpop.f32.mrf.mxu0  ;;  %v5165_v59 = vadd.f32 %v19898_v29, %v4095_v62  ;;  %v3671_v62 = vor.u32 %v3670_v27, %v3669_v61  ;;  %v4796_v13 = vor.u32 %v4795_v47, %v4792_v22  ;;  %v10795_v22 = vld [vmem:[#allocation6 + $0x1e0] sm:$0xff] }
 0x53e   :  { %19896 = vst [vmem:[#allocation33_spill] sm:$0xff] %v15705_v42  ;;  %v3225_v11 = vsel %vm2902_vm4, %v3215_v32, %v3224_v49  ;;  %v10803_v32 = vld [vmem:[#allocation6 + $0x220] sm:$0xff]  ;;  %7928 = vmatpush.bf16.msra.mxu0 %v10795_v22 }
 0x53f   :  { %v5418_v36 = vpop.f32.mrf.mxu1  ;;  %v3672_v48 = vsel %vm3604_vm5, %v3667_v12, %v3671_v62  ;;  %8512 = vmatpush.bf16.msra.mxu1 %v10803_v32 }
 0x540   :  { %v15716_v42 = vadd.f32 %v5418_v36, %v5165_v59  ;;  %v15718_v57 = vpop.f32.mrf.mxu2  ;;  %v4797_v36 = vsel %vm3604_vm5, %v4787_v51, %v4796_v13 }
 0x542   :  { %19900 = vst [vmem:[#allocation100_spill] sm:$0xff] %v15716_v42  ;;  %v3907_v7 = vpop.f32.mrf.mxu3  ;;  %5457 = vmatmul.bf16.gmra.mxu1 %v11438_v28  ;;  %v11763_v28 = vld [vmem:[#allocation2 + $0x12c] sm:$0xff]  }
 0x543   :  { %v4096_v29 = vadd.f32 %v3907_v7, %v15024_v30  ;;  %v4799_v50 = vshrl.u32 %v11763_v28, 16  ;;  %v4802_v12 = vshll.u32 %v11763_v28, 16  ;;  %v19905_v7 = vshrl.u32 %v15037_v63, 16  ;;  %v10792_v42 = vld [vmem:[#allocation6 + $0x1c8] sm:$0xff] }
 0x545   :  { %v15721_v31 = vpop.f32.mrf.mxu0  ;;  %v5166_v59 = vadd.f32 %v19902_v44, %v4096_v29  ;;  %3547 = vmatmul.bf16.gmra.mxu2 %v3225_v11  ;;  %v3673_v29 = vrot.slane %v19905_v7, 3  ;;  %v19907_v44 = vshrl.u32 %v14865_v38, 16  ;;  %v4801_v28 = vrot.slane %v4799_v50, 3  ;;  %v19913_v50 = vld [vmem:[#allocation51_spill] sm:$0xff] }
 0x546   :  { %19901 = vst [vmem:[#allocation250_spill] sm:$0xff] %v15721_v31 }
 0x547   :  { %3949 = vmatmul.bf16.gmra.mxu3 %v3672_v48  ;;  %v5420_v61 = vpop.f32.mrf.mxu1  ;;  %v19906_v48 = vshll.u32 %v15037_v63, 16  ;;  %v19911_v63 = vld [vmem:[#allocation18_spill] sm:$0xff] }
 0x548   :  { %5119 = vmatmul.bf16.gmra.mxu0 %v4797_v36  ;;  %v15727_v17 = vadd.f32 %v5420_v61, %v5166_v59  ;;  %v15729_v27 = vpop.f32.mrf.mxu2  ;;  %v3229_v59 = vrot.slane %v19907_v44, 2 }
 0x549   :  { %v3674_v11 = vrot.slane %v19906_v48, 4 }
 0x54a   :  { %19903 = vst [vmem:[#allocation44_spill] sm:$0xff] %v15727_v17  ;;  %v3910_v30 = vpop.f32.mrf.mxu3 }
 0x54b   :  { %v4097_v15 = vadd.f32 %v3910_v30, %v15058_v58  ;;  %v19908_v58 = vshll.u32 %v14865_v38, 16  ;;  %v4804_v30 = vrot.slane %v4802_v12, 4  ;;  %v3675_v32 = vor.u32 %v3674_v11, %v3673_v29 }
 0x54d   :  { %v15732_v47 = vpop.f32.mrf.mxu0  ;;  %v5167_v51 = vadd.f32 %v15028_v3, %v4097_v15  ;;  %v3232_v36 = vrot.slane %v19908_v58, 3  ;;  %v4805_v48 = vor.u32 %v4804_v30, %v4801_v28  ;;  %v3676_v38 = vsel %vm3604_vm5, %v3671_v62, %v3675_v32 }
 0x54e   :  { %19904 = vst [vmem:[#allocation251_spill] sm:$0xff] %v15732_v47  ;;  %v11439_v47 = vld [vmem:[#allocation2 + $0x80] sm:$0xff]  }
 0x54f   :  { %v5423_v61 = vpop.f32.mrf.mxu1  ;;  %v3233_v3 = vor.u32 %v3232_v36, %v3229_v59  ;;  %v19916_v59 = vld [vmem:[#allocation81_spill] sm:$0xff] }
 0x550   :  { %v15743_v18 = vadd.f32 %v5423_v61, %v5167_v51  ;;  %v15745_v22 = vpop.f32.mrf.mxu2  ;;  %v4806_v51 = vsel %vm3604_vm5, %v4796_v13, %v4805_v48  ;;  %v11765_v61 = vld [vmem:[#allocation2 + $0x134] sm:$0xff]  }
 0x551   :  { %19910 = vst [vmem:[#allocation253_spill] sm:$0xff] %v15745_v22  ;;  %v3234_v44 = vsel %vm2902_vm4, %v3224_v49, %v3233_v3  ;;  %v4808_v28 = vshrl.u32 %v11765_v61, 16  ;;  %v4811_v62 = vshll.u32 %v11765_v61, 16  ;;  %v19918_v49 = vld [vmem:[#allocation42_spill] sm:$0xff] }
 0x552   :  { %19909 = vst [vmem:[#allocation252_spill] sm:$0xff] %v15743_v18  ;;  %v3912_v7 = vpop.f32.mrf.mxu3  ;;  %5462 = vmatmul.bf16.gmra.mxu1 %v11439_v47  ;;  %v19921_v13 = vshll.u32 %v19918_v49, 16 }
 0x553   :  { %v4098_v15 = vadd.f32 %v3912_v7, %v19911_v63  ;;  %v19919_v7 = vshrl.u32 %v19918_v49, 16  ;;  %v19927_v49 = vld [vmem:[#allocation150_spill] sm:$0xff] }
 0x555   :  { %v15748_v17 = vpop.f32.mrf.mxu0  ;;  %v5168_v12 = vadd.f32 %v19913_v50, %v4098_v15  ;;  %3552 = vmatmul.bf16.gmra.mxu2 %v3234_v44  ;;  %v3677_v63 = vrot.slane %v19919_v7, 3  ;;  %v19920_v15 = vld [vmem:[#allocation15_spill] sm:$0xff]  ;;  %v3678_v44 = vrot.slane %v19921_v13, 4  ;;  %v19922_v50 = vld [vmem:[#allocation24_spill] sm:$0xff] }
 0x556   :  { %19912 = vst [vmem:[#allocation18_spill] sm:$0xff] %v15748_v17 }
 0x557   :  { %3954 = vmatmul.bf16.gmra.mxu3 %v3676_v38  ;;  %v5425_v58 = vpop.f32.mrf.mxu1  ;;  %v3679_v7 = vor.u32 %v3678_v44, %v3677_v63  ;;  %v19932_v63 = vld [vmem:[#allocation154_spill] sm:$0xff] }
 0x558   :  { %5124 = vmatmul.bf16.gmra.mxu0 %v4806_v51  ;;  %v15754_v47 = vadd.f32 %v5425_v58, %v5168_v12  ;;  %v15756_v11 = vpop.f32.mrf.mxu2  ;;  %v19923_v12 = vshrl.u32 %v19922_v50, 16  ;;  %v19924_v58 = vshll.u32 %v19922_v50, 16 }
 0x559   :  { %19915 = vst [vmem:[#allocation254_spill] sm:$0xff] %v15756_v11  ;;  %v3680_v50 = vsel %vm3604_vm5, %v3675_v32, %v3679_v7 }
 0x55a   :  { %19914 = vst [vmem:[#allocation51_spill] sm:$0xff] %v15754_v47  ;;  %v3915_v29 = vpop.f32.mrf.mxu3  ;;  %v3238_v51 = vrot.slane %v19923_v12, 2  ;;  %v3241_v47 = vrot.slane %v19924_v58, 3  ;;  %v11767_v58 = vld [vmem:[#allocation2 + $0x13c] sm:$0xff]  }
 0x55b   :  { %v4099_v36 = vadd.f32 %v3915_v29, %v19916_v59  ;;  %v4810_v29 = vrot.slane %v4808_v28, 3  ;;  %v4813_v59 = vrot.slane %v4811_v62, 4  ;;  %v19929_v28 = vld [vmem:[#allocation76_spill] sm:$0xff]  ;;  %v4820_v32 = vshll.u32 %v11767_v58, 16 }
 0x55d   :  { %v15759_v30 = vpop.f32.mrf.mxu0  ;;  %v5169_v38 = vadd.f32 %v19920_v15, %v4099_v36  ;;  %v3242_v36 = vor.u32 %v3241_v47, %v3238_v51  ;;  %v4814_v13 = vor.u32 %v4813_v59, %v4810_v29  ;;  %v4817_v51 = vshrl.u32 %v11767_v58, 16 }
 0x55e   :  { %19917 = vst [vmem:[#allocation81_spill] sm:$0xff] %v15759_v30  ;;  %v11440_v30 = vld [vmem:[#allocation2 + $0x88] sm:$0xff]  }
 0x55f   :  { %v5428_v17 = vpop.f32.mrf.mxu1  ;;  %v3243_v12 = vsel %vm2902_vm4, %v3233_v3, %v3242_v36  ;;  %v19934_v3 = vld [vmem:[#allocation152_spill] sm:$0xff] }
 0x560   :  { %v15770_v61 = vadd.f32 %v5428_v17, %v5169_v38  ;;  %v15772_v11 = vpop.f32.mrf.mxu2  ;;  %v4815_v17 = vsel %vm3604_vm5, %v4805_v48, %v4814_v13  ;;  %v19935_v59 = vshrl.u32 %v19934_v3, 16  ;;  %v19937_v48 = vshll.u32 %v19934_v3, 16  ;;  %v19943_v3 = vld [vmem:[#allocation157_spill] sm:$0xff] }
 0x561   :  { %19926 = vst [vmem:[#allocation15_spill] sm:$0xff] %v15772_v11 }
 0x562   :  { %19925 = vst [vmem:[#allocation42_spill] sm:$0xff] %v15770_v61  ;;  %v3917_v18 = vpop.f32.mrf.mxu3  ;;  %5467 = vmatmul.bf16.gmra.mxu1 %v11440_v30 }
 0x563   :  { %v4100_v15 = vadd.f32 %v3917_v18, %v19927_v49  ;;  %v3681_v49 = vrot.slane %v19935_v59, 3 }
 0x565   :  { %v15775_v22 = vpop.f32.mrf.mxu0  ;;  %v5170_v62 = vadd.f32 %v19929_v28, %v4100_v15  ;;  %3557 = vmatmul.bf16.gmra.mxu2 %v3243_v12  ;;  %v19936_v15 = vld [vmem:[#allocation151_spill] sm:$0xff]  ;;  %v3682_v12 = vrot.slane %v19937_v48, 4  ;;  %v19938_v28 = vld [vmem:[#allocation34_spill] sm:$0xff] }
 0x566   :  { %19928 = vst [vmem:[#allocation24_spill] sm:$0xff] %v15775_v22 }
 0x567   :  { %3959 = vmatmul.bf16.gmra.mxu3 %v3680_v50  ;;  %v5430_v38 = vpop.f32.mrf.mxu1  ;;  %v3683_v59 = vor.u32 %v3682_v12, %v3681_v49  ;;  %v19948_v49 = vld [vmem:[#allocation161_spill] sm:$0xff] }
 0x568   :  { %5129 = vmatmul.bf16.gmra.mxu0 %v4815_v17  ;;  %v15781_v30 = vadd.f32 %v5430_v38, %v5170_v62  ;;  %v15783_v18 = vpop.f32.mrf.mxu2  ;;  %v19939_v62 = vshrl.u32 %v19938_v28, 16  ;;  %v19940_v38 = vshll.u32 %v19938_v28, 16 }
 0x569   :  { %19931 = vst [vmem:[#allocation76_spill] sm:$0xff] %v15783_v18  ;;  %v3684_v28 = vsel %vm3604_vm5, %v3679_v7, %v3683_v59 }
 0x56a   :  { %19930 = vst [vmem:[#allocation150_spill] sm:$0xff] %v15781_v30  ;;  %v3920_v47 = vpop.f32.mrf.mxu3  ;;  %v3247_v17 = vrot.slane %v19939_v62, 2  ;;  %v3250_v30 = vrot.slane %v19940_v38, 3  ;;  %v11769_v38 = vld [vmem:[#allocation2 + $0x144] sm:$0xff]  }
 0x56b   :  { %v4101_v44 = vadd.f32 %v3920_v47, %v19932_v63  ;;  %v4819_v47 = vrot.slane %v4817_v51, 3  ;;  %v4822_v63 = vrot.slane %v4820_v32, 4  ;;  %v19945_v51 = vld [vmem:[#allocation155_spill] sm:$0xff]  ;;  %v4829_v7 = vshll.u32 %v11769_v38, 16 }
 0x56d   :  { %v15786_v29 = vpop.f32.mrf.mxu0  ;;  %v5171_v50 = vadd.f32 %v19936_v15, %v4101_v44  ;;  %v3251_v44 = vor.u32 %v3250_v30, %v3247_v17  ;;  %v4823_v48 = vor.u32 %v4822_v63, %v4819_v47  ;;  %v4826_v17 = vshrl.u32 %v11769_v38, 16 }
 0x56e   :  { %19933 = vst [vmem:[#allocation154_spill] sm:$0xff] %v15786_v29  ;;  %v11441_v29 = vld [vmem:[#allocation2 + $0x90] sm:$0xff]  }
 0x56f   :  { %v5433_v22 = vpop.f32.mrf.mxu1  ;;  %v3252_v62 = vsel %vm2902_vm4, %v3242_v36, %v3251_v44  ;;  %v19950_v36 = vld [vmem:[#allocation159_spill] sm:$0xff] }
 0x570   :  { %v15797_v58 = vadd.f32 %v5433_v22, %v5171_v50  ;;  %v15799_v18 = vpop.f32.mrf.mxu2  ;;  %v4824_v22 = vsel %vm3604_vm5, %v4814_v13, %v4823_v48  ;;  %v19951_v63 = vshrl.u32 %v19950_v36, 16  ;;  %v19953_v13 = vshll.u32 %v19950_v36, 16  ;;  %v19959_v36 = vld [vmem:[#allocation164_spill] sm:$0xff] }
 0x571   :  { %19942 = vst [vmem:[#allocation151_spill] sm:$0xff] %v15799_v18 }
 0x572   :  { %19941 = vst [vmem:[#allocation152_spill] sm:$0xff] %v15797_v58  ;;  %v3922_v61 = vpop.f32.mrf.mxu3  ;;  %5472 = vmatmul.bf16.gmra.mxu1 %v11441_v29 }
 0x573   :  { %v4102_v15 = vadd.f32 %v3922_v61, %v19943_v3  ;;  %v3685_v3 = vrot.slane %v19951_v63, 3 }
 0x575   :  { %v15802_v11 = vpop.f32.mrf.mxu0  ;;  %v5172_v32 = vadd.f32 %v19945_v51, %v4102_v15  ;;  %3562 = vmatmul.bf16.gmra.mxu2 %v3252_v62  ;;  %v19952_v15 = vld [vmem:[#allocation158_spill] sm:$0xff]  ;;  %v3686_v62 = vrot.slane %v19953_v13, 4 }
 0x576   :  { %19944 = vst [vmem:[#allocation34_spill] sm:$0xff] %v15802_v11  ;;  %v19954_v51 = vld [vmem:[#allocation86_spill] sm:$0xff] }
 0x577   :  { %3964 = vmatmul.bf16.gmra.mxu3 %v3684_v28  ;;  %v5435_v50 = vpop.f32.mrf.mxu1  ;;  %v3687_v63 = vor.u32 %v3686_v62, %v3685_v3  ;;  %v19964_v3 = vld [vmem:[#allocation168_spill] sm:$0xff] }
 0x578   :  { %5134 = vmatmul.bf16.gmra.mxu0 %v4824_v22  ;;  %v15808_v29 = vadd.f32 %v5435_v50, %v5172_v32  ;;  %v15810_v61 = vpop.f32.mrf.mxu2  ;;  %v19955_v32 = vshrl.u32 %v19954_v51, 16  ;;  %v19956_v50 = vshll.u32 %v19954_v51, 16 }
 0x579   :  { %19947 = vst [vmem:[#allocation155_spill] sm:$0xff] %v15810_v61  ;;  %v3688_v51 = vsel %vm3604_vm5, %v3683_v59, %v3687_v63 }
 0x57a   :  { %19946 = vst [vmem:[#allocation157_spill] sm:$0xff] %v15808_v29  ;;  %v3925_v30 = vpop.f32.mrf.mxu3  ;;  %v3256_v22 = vrot.slane %v19955_v32, 2  ;;  %v3259_v29 = vrot.slane %v19956_v50, 3  ;;  %v11770_v50 = vld [vmem:[#allocation2 + $0x14c] sm:$0xff]  }
 0x57b   :  { %v4103_v12 = vadd.f32 %v3925_v30, %v19948_v49  ;;  %v4828_v30 = vrot.slane %v4826_v17, 3  ;;  %v4831_v49 = vrot.slane %v4829_v7, 4  ;;  %v19961_v17 = vld [vmem:[#allocation162_spill] sm:$0xff]  ;;  %v4838_v59 = vshll.u32 %v11770_v50, 16 }
 0x57d   :  { %v15813_v47 = vpop.f32.mrf.mxu0  ;;  %v5173_v28 = vadd.f32 %v19952_v15, %v4103_v12  ;;  %v3260_v12 = vor.u32 %v3259_v29, %v3256_v22  ;;  %v4832_v13 = vor.u32 %v4831_v49, %v4828_v30  ;;  %v4835_v22 = vshrl.u32 %v11770_v50, 16  ;;  %v10738_v30 = vld [vmem:[#allocation6 + $0x158] sm:$0xff] }
 0x57e   :  { %19949 = vst [vmem:[#allocation161_spill] sm:$0xff] %v15813_v47  ;;  %v11442_v47 = vld [vmem:[#allocation2 + $0x98] sm:$0xff]   ;;  %6414 = vmatpush.bf16.msra.mxu2 %v10738_v30  ;;  %v11465_v30 = vld [vmem:[#allocation2 + $0x150] sm:$0xff]  }
 0x57f   :  { %v5438_v11 = vpop.f32.mrf.mxu1  ;;  %v3261_v32 = vsel %vm2902_vm4, %v3251_v44, %v3260_v12  ;;  %v10794_v44 = vld [vmem:[#allocation6 + $0x1d8] sm:$0xff] }
 0x580   :  { %v15824_v38 = vadd.f32 %v5438_v11, %v5173_v28  ;;  %v15826_v61 = vpop.f32.mrf.mxu2  ;;  %v4833_v11 = vsel %vm3604_vm5, %v4823_v48, %v4832_v13  ;;  %7929 = vmatpush.bf16.msra.mxu0 %v10794_v44  ;;  %v10737_v48 = vld [vmem:[#allocation6 + $0x150] sm:$0xff]  ;;  %v11443_v44 = vld [vmem:[#allocation2 + $0xa0] sm:$0xff]  }
 0x581   :  { %19958 = vst [vmem:[#allocation158_spill] sm:$0xff] %v15826_v61 }
 0x582   :  { %19957 = vst [vmem:[#allocation159_spill] sm:$0xff] %v15824_v38  ;;  %v3927_v58 = vpop.f32.mrf.mxu3  ;;  %5477 = vmatmul.bf16.gmra.mxu1 %v11442_v47  ;;  %6415 = vmatpush.bf16.msra.mxu2 %v10737_v48 }
 0x583   :  { %v4104_v15 = vadd.f32 %v3927_v58, %v19959_v36  ;;  %v19966_v36 = vld [vmem:[#allocation166_spill] sm:$0xff] }
 0x585   :  { %v15829_v18 = vpop.f32.mrf.mxu0  ;;  %v5174_v7 = vadd.f32 %v19961_v17, %v4104_v15  ;;  %3567 = vmatmul.bf16.gmra.mxu2 %v3261_v32  ;;  %v19967_v15 = vshrl.u32 %v19966_v36, 16  ;;  %v10793_v32 = vld [vmem:[#allocation6 + $0x1d0] sm:$0xff]  ;;  %v19968_v17 = vld [vmem:[#allocation165_spill] sm:$0xff] }
 0x586   :  { %19960 = vst [vmem:[#allocation86_spill] sm:$0xff] %v15829_v18  ;;  %7930 = vmatpush.bf16.msra.mxu0 %v10793_v32  ;;  %v19976_v32 = vld [vmem:[#allocation169_spill] sm:$0xff] }
 0x587   :  { %3969 = vmatmul.bf16.gmra.mxu3 %v3688_v51  ;;  %v5440_v28 = vpop.f32.mrf.mxu1  ;;  %v3689_v51 = vrot.slane %v19967_v15, 3 }
 0x588   :  { %5139 = vmatmul.bf16.gmra.mxu0 %v4833_v11  ;;  %v15835_v47 = vadd.f32 %v5440_v28, %v5174_v7  ;;  %v15837_v58 = vpop.f32.mrf.mxu2  ;;  %v19969_v11 = vshll.u32 %v19966_v36, 16 }
 0x589   :  { %19963 = vst [vmem:[#allocation162_spill] sm:$0xff] %v15837_v58  ;;  %v4840_v58 = vrot.slane %v4838_v59, 4 }
 0x58a   :  { %19962 = vst [vmem:[#allocation164_spill] sm:$0xff] %v15835_v47  ;;  %v3930_v29 = vpop.f32.mrf.mxu3  ;;  %v3690_v28 = vrot.slane %v19969_v11, 4  ;;  %v19970_v47 = vld [vmem:[#allocation35_spill] sm:$0xff]  ;;  %v19974_v11 = vld [vmem:[#allocation172_spill] sm:$0xff]  ;;  %7931 = vmatpush.bf16.msra.mxu0 %v10792_v42 }
 0x58b   :  { %v4105_v62 = vadd.f32 %v3930_v29, %v19964_v3  ;;  %v19971_v29 = vshrl.u32 %v19970_v47, 16  ;;  %v19972_v50 = vshll.u32 %v19970_v47, 16  ;;  %v11339_v47 = vunpack.c.h.b16 %v11465_v30 }
 0x58c   :  { %v3691_v36 = vor.u32 %v3690_v28, %v3689_v51  ;;  %v10735_v51 = vld [vmem:[#allocation6 + $0x140] sm:$0xff] }
 0x58d   :  { %v15840_v49 = vpop.f32.mrf.mxu0  ;;  %v5175_v7 = vadd.f32 %v19968_v17, %v4105_v62  ;;  %v3265_v3 = vrot.slane %v19971_v29, 2  ;;  %v3268_v18 = vrot.slane %v19972_v50, 3  ;;  %v10736_v50 = vld [vmem:[#allocation6 + $0x148] sm:$0xff]  ;;  %v10791_v28 = vld [vmem:[#allocation6 + $0x1c0] sm:$0xff] }
 0x58e   :  { %19965 = vst [vmem:[#allocation168_spill] sm:$0xff] %v15840_v49  ;;  %v4837_v49 = vrot.slane %v4835_v22, 3  ;;  %v10786_v22 = vld [vmem:[#allocation6 + $0x198] sm:$0xff]  ;;  %6416 = vmatpush.bf16.msra.mxu2 %v10736_v50  ;;  %7932 = vmatpush.bf16.msra.mxu0 %v10791_v28 }
 0x58f   :  { %v5443_v38 = vpop.f32.mrf.mxu1  ;;  %v3269_v17 = vor.u32 %v3268_v18, %v3265_v3  ;;  %7439 = vmatpush.bf16.msra.mxu3 %v10786_v22  ;;  %v10802_v50 = vld [vmem:[#allocation6 + $0x218] sm:$0xff]  ;;  %v19982_v22 = vld [vmem:[#allocation175_spill] sm:$0xff] }
 0x590   :  { %v15851_v61 = vadd.f32 %v5443_v38, %v5175_v7  ;;  %v15853_v62 = vpop.f32.mrf.mxu2  ;;  %v4841_v31 = vor.u32 %v4840_v58, %v4837_v49  ;;  %v3692_v38 = vsel %vm3604_vm5, %v3687_v63, %v3691_v36  ;;  %v4474_v49 = vpack.c.b16 %v11339_v47, %v11339_v47  ;;  %8513 = vmatpush.bf16.msra.mxu1 %v10802_v50  ;;  %v19986_v50 = vld [vmem:[#allocation180_spill] sm:$0xff] }
 0x591   :  { %v3270_v48 = vsel %vm2902_vm4, %v3260_v12, %v3269_v17  ;;  %v19979_v12 = vld [vmem:[#allocation170_spill] sm:$0xff] }
 0x592   :  { %19973 = vst [vmem:[#allocation166_spill] sm:$0xff] %v15851_v61  ;;  %v3932_v15 = vpop.f32.mrf.mxu3  ;;  %5482 = vmatmul.bf16.gmra.mxu1 %v11443_v44  ;;  %v4842_v18 = vsel %vm3604_vm5, %v4832_v13, %v4841_v31  ;;  %6417 = vmatpush.bf16.msra.mxu2 %v10735_v51  ;;  %v3272_v30 = vshrl.u32 %v19979_v12, 16  ;;  %v3275_v44 = vshll.u32 %v19979_v12, 16  ;;  %v4847_v13 = vshll.u32 %v4474_v49, 16 }
 0x593   :  { %v4106_v29 = vadd.f32 %v3932_v15, %v19974_v11  ;;  %v19980_v15 = vld [vmem:[#allocation176_spill] sm:$0xff] }
 0x594   :  { %v3274_v51 = vrot.slane %v3272_v30, 2  ;;  %v3277_v28 = vrot.slane %v3275_v44, 3 }
 0x595   :  { %v15856_v59 = vpop.f32.mrf.mxu0  ;;  %v5176_v7 = vadd.f32 %v19976_v32, %v4106_v29  ;;  %3572 = vmatmul.bf16.gmra.mxu2 %v3270_v48  ;;  %v4844_v29 = vshrl.u32 %v4474_v49, 16  ;;  %v19984_v32 = vld [vmem:[#allocation173_spill] sm:$0xff]  ;;  %v11444_v49 = vld [vmem:[#allocation2 + $0xa8] sm:$0xff]  }
 0x596   :  { %19975 = vst [vmem:[#allocation165_spill] sm:$0xff] %v15856_v59  ;;  %v4849_v59 = vrot.slane %v4847_v13, 4 }
 0x597   :  { %3974 = vmatmul.bf16.gmra.mxu3 %v3692_v38  ;;  %v5445_v58 = vpop.f32.mrf.mxu1  ;;  %v19983_v38 = vshrl.u32 %v19982_v22, 16  ;;  %v4846_v12 = vrot.slane %v4844_v29, 3  ;;  %v19988_v29 = vld [vmem:[#allocation177_spill] sm:$0xff] }
 0x598   :  { %5144 = vmatmul.bf16.gmra.mxu0 %v4842_v18  ;;  %v15862_v3 = vadd.f32 %v5445_v58, %v5176_v7  ;;  %v15864_v63 = vpop.f32.mrf.mxu2  ;;  %v19985_v18 = vshll.u32 %v19982_v22, 16 }
 0x599   :  { %19978 = vst [vmem:[#allocation172_spill] sm:$0xff] %v15864_v63  ;;  %v3693_v48 = vrot.slane %v19983_v38, 3  ;;  %v3278_v38 = vor.u32 %v3277_v28, %v3274_v51  ;;  %v19990_v51 = vld [vmem:[#allocation183_spill] sm:$0xff] }
 0x59a   :  { %19977 = vst [vmem:[#allocation35_spill] sm:$0xff] %v15862_v3  ;;  %v3935_v42 = vpop.f32.mrf.mxu3  ;;  %v3694_v58 = vrot.slane %v19985_v18, 4 }
 0x59b   :  { %v4107_v11 = vadd.f32 %v3935_v42, %v19980_v15  ;;  %v3279_v44 = vsel %vm2902_vm4, %v3269_v17, %v3278_v38  ;;  %v19992_v17 = vld [vmem:[#allocation181_spill] sm:$0xff] }
 0x59d   :  { %v15869_v47 = vpop.f32.mrf.mxu0  ;;  %v5177_v7 = vadd.f32 %v19984_v32, %v4107_v11  ;;  %v4850_v11 = vor.u32 %v4849_v59, %v4846_v12 }
 0x59e   :  { %19981 = vst [vmem:[#allocation169_spill] sm:$0xff] %v15869_v47  ;;  %v3695_v47 = vor.u32 %v3694_v58, %v3693_v48 }
 0x59f   :  { %v5448_v3 = vpop.f32.mrf.mxu1  ;;  %v4851_v22 = vsel %vm3604_vm5, %v4841_v31, %v4850_v11 }
 0x5a0   :  { %v15876_v42 = vadd.f32 %v5448_v3, %v5177_v7  ;;  %v15878_v61 = vpop.f32.mrf.mxu2  ;;  %v3696_v30 = vsel %vm3604_vm5, %v3691_v36, %v3695_v47  ;;  %v10694_v3 = vld [vmem:[#allocation2 + $0x10] sm:$0xff]  ;;  %v10695_v36 = vld [vmem:[#allocation2 + $0x18] sm:$0xff] }
 0x5a1   :  { %v5992_v59 = vshll.u32 %v10694_v3, 16 }
 0x5a2   :  { %v3937_v15 = vpop.f32.mrf.mxu3  ;;  %5487 = vmatmul.bf16.gmra.mxu1 %v11444_v49  ;;  %v19993_v49 = vld [vmem:[#allocation178_spill] sm:$0xff] }
 0x5a3   :  { %v4108_v63 = vadd.f32 %v3937_v15, %v19986_v50  ;;  %v19994_v15 = vshrl.u32 %v19993_v49, 16  ;;  %v19995_v31 = vshll.u32 %v19993_v49, 16  ;;  %v5994_v11 = vrot.slane %v5992_v59, 1 }
 0x5a5   :  { %v15881_v32 = vpop.f32.mrf.mxu0  ;;  %v5178_v13 = vadd.f32 %v19988_v29, %v4108_v63  ;;  %3577 = vmatmul.bf16.gmra.mxu2 %v3279_v44  ;;  %v3697_v38 = vrot.slane %v19994_v15, 3  ;;  %v3698_v50 = vrot.slane %v19995_v31, 4  ;;  %v5990_v29 = vshrl.u32 %v10694_v3, 16 }
 0x5a6   :  { %19987 = vst [vmem:[#allocation170_spill] sm:$0xff] %v15881_v32  ;;  %v12008_v32 = vld [vmem:[#allocation2 + $0x20] sm:$0xff] }
 0x5a7   :  { %3979 = vmatmul.bf16.gmra.mxu3 %v3696_v30  ;;  %v5450_v7 = vpop.f32.mrf.mxu1  ;;  %v7754_v49 = vrot.slane %v12008_v32, 1 }
 0x5a8   :  { %5149 = vmatmul.bf16.gmra.mxu0 %v4851_v22  ;;  %v15887_v48 = vadd.f32 %v5450_v7, %v5178_v13  ;;  %v15889_v58 = vpop.f32.mrf.mxu2  ;;  %v5997_v13 = vshll.u32 %v10695_v36, 16  ;;  %v11445_v22 = vld [vmem:[#allocation2 + $0xb0] sm:$0xff]  }
 0x5aa   :  { %19989 = vst [vmem:[#allocation176_spill] sm:$0xff] %v15887_v48  ;;  %v3940_v18 = vpop.f32.mrf.mxu3  ;;  %v19998_v48 = vld [vmem:[#allocation32_spill] sm:$0xff]  ;;  %v5999_v31 = vrot.slane %v5997_v13, 1  ;;  %v10696_v13 = vld [vmem:[#allocation2 + $0x20] sm:$0xff] }
 0x5ab   :  { %v4109_v28 = vadd.f32 %v3940_v18, %v19990_v51  ;;  %v3699_v51 = vor.u32 %v3698_v50, %v3697_v38  ;;  %v7753_v15 = vrot.slane %v19998_v48, 1 }
 0x5ad   :  { %v15892_v12 = vpop.f32.mrf.mxu0  ;;  %v5179_v63 = vadd.f32 %v19992_v17, %v4109_v28  ;;  %v19997_v28 = vld [vmem:[#allocation190_spill] sm:$0xff]  ;;  %v3700_v3 = vsel %vm3604_vm5, %v3695_v47, %v3699_v51  ;;  %v7755_v38 = vsel %vm7752_vm8, %v7753_v15, %v7754_v49 }
 0x5ae   :  { %19991 = vst [vmem:[#allocation175_spill] sm:$0xff] %v15892_v12  ;;  %v5995_v12 = vor.u32 %v5994_v11, %v5990_v29  ;;  %v20003_v47 = vld [vmem:[#allocation194_spill] sm:$0xff] }
 0x5af   :  { %v5453_v30 = vpop.f32.mrf.mxu1 }
 0x5b0   :  { %v15899_v44 = vadd.f32 %v5453_v30, %v5179_v63  ;;  %v15901_v18 = vpop.f32.mrf.mxu2  ;;  %v6000_v63 = vsel %vm5988_vm6, %v5995_v12, %v5999_v31  ;;  %v20000_v30 = vld [vmem:[#allocation185_spill] sm:$0xff] }
 0x5b2   :  { %19996 = vst [vmem:[#allocation173_spill] sm:$0xff] %v15899_v44  ;;  %v3942_v7 = vpop.f32.mrf.mxu3  ;;  %5492 = vmatmul.bf16.gmra.mxu1 %v11445_v22 }
 0x5b3   :  { %v4110_v17 = vadd.f32 %v3942_v7, %v19997_v28  ;;  %v20004_v7 = vshrl.u32 %v15258_v55, 16 }
 0x5b5   :  { %v15905_v59 = vpop.f32.mrf.mxu0  ;;  %v5180_v44 = vadd.f32 %v20000_v30, %v4110_v17  ;;  %6418 = vmatmul.bf16.vlgmr.msra.gmra.mxu2 %v6000_v63  ;;  %v3701_v28 = vrot.slane %v20004_v7, 3  ;;  %v20005_v17 = vshll.u32 %v15258_v55, 16  ;;  %v6005_v30 = vshll.u32 %v10696_v13, 16 }
 0x5b6   :  { %19999 = vst [vmem:[#allocation180_spill] sm:$0xff] %v15905_v59 }
 0x5b7   :  { %3984 = vmatmul.bf16.gmra.mxu3 %v3700_v3  ;;  %v5455_v50 = vpop.f32.mrf.mxu1  ;;  %v3702_v15 = vrot.slane %v20005_v17, 4  ;;  %v6007_v7 = vrot.slane %v6005_v30, 1 }
 0x5b8   :  { %7933 = vmatmul.bf16.vlgmr.msra.gmra.mxu0 %v7755_v38  ;;  %v15911_v11 = vadd.f32 %v5455_v50, %v5180_v44  ;;  %v15913_v32 = vpop.f32.mrf.mxu2  ;;  %v6001_v44 = vshrl.u32 %v10695_v36, 16  ;;  %v11446_v38 = vld [vmem:[#allocation2 + $0xb8] sm:$0xff]  }
 0x5ba   :  { %20001 = vst [vmem:[#allocation177_spill] sm:$0xff] %v15911_v11  ;;  %v3945_v48 = vpop.f32.mrf.mxu3 }
 0x5bb   :  { %v4111_v29 = vadd.f32 %v3945_v48, %v15322_v21  ;;  %v3703_v21 = vor.u32 %v3702_v15, %v3701_v28  ;;  %v6003_v48 = vor.u32 %v6001_v44, %v5999_v31  ;;  %v10697_v44 = vld [vmem:[#allocation2 + $0x28] sm:$0xff] }
 0x5bd   :  { %v15916_v22 = vpop.f32.mrf.mxu0  ;;  %v5181_v12 = vadd.f32 %v20003_v47, %v4111_v29  ;;  %v12009_v47 = vld [vmem:[#allocation2 + $0x28] sm:$0xff]  ;;  %v3704_v55 = vsel %vm3604_vm5, %v3699_v51, %v3703_v21 }
 0x5be   :  { %20002 = vst [vmem:[#allocation183_spill] sm:$0xff] %v15916_v22  ;;  %v7756_v22 = vrot.slane %v12009_v47, 1  ;;  %v6009_v47 = vshrl.u32 %v10696_v13, 16 }
 0x5bf   :  { %v5458_v3 = vpop.f32.mrf.mxu1 }
 0x5c0   :  { %v15923_v63 = vadd.f32 %v5458_v3, %v5181_v12  ;;  %v15925_v11 = vpop.f32.mrf.mxu2  ;;  %v6008_v12 = vsel %vm5988_vm6, %v6003_v48, %v6007_v7  ;;  %v7757_v17 = vsel %vm7752_vm8, %v7754_v49, %v7756_v22 }
 0x5c2   :  { %v3947_v50 = vpop.f32.mrf.mxu3  ;;  %5497 = vmatmul.bf16.gmra.mxu1 %v11446_v38 }
 0x5c3   :  { %v4112_v29 = vadd.f32 %v3947_v50, %v15367_v26  ;;  %v20008_v50 = vshll.u32 %v15383_v8, 16 }
 0x5c5   :  { %v15928_v59 = vpop.f32.mrf.mxu0  ;;  %v5182_v36 = vadd.f32 %v15337_v23, %v4112_v29  ;;  %6423 = vmatmul.bf16.gmra.mxu2 %v6008_v12  ;;  %v20007_v23 = vshrl.u32 %v15383_v8, 16  ;;  %v3706_v49 = vrot.slane %v20008_v50, 4  ;;  %v11447_v12 = vld [vmem:[#allocation2 + $0xc0] sm:$0xff]  }
 0x5c7   :  { %3989 = vmatmul.bf16.gmra.mxu3 %v3704_v55  ;;  %v5460_v28 = vpop.f32.mrf.mxu1  ;;  %v3705_v38 = vrot.slane %v20007_v23, 3  ;;  %v6013_v55 = vshll.u32 %v10697_v44, 16 }
 0x5c8   :  { %7938 = vmatmul.bf16.gmra.mxu0 %v7757_v17  ;;  %v15934_v31 = vadd.f32 %v5460_v28, %v5182_v36  ;;  %v15936_v15 = vpop.f32.mrf.mxu2  ;;  %v6011_v28 = vor.u32 %v6009_v47, %v6007_v7  ;;  %v10698_v47 = vld [vmem:[#allocation2 + $0x30] sm:$0xff] }
 0x5c9   :  { %v6015_v23 = vrot.slane %v6013_v55, 1 }
 0x5ca   :  { %v3950_v26 = vpop.f32.mrf.mxu3 }
 0x5cb   :  { %v4113_v3 = vadd.f32 %v3950_v26, %v15387_v25  ;;  %v3707_v25 = vor.u32 %v3706_v49, %v3705_v38  ;;  %v12010_v26 = vld [vmem:[#allocation2 + $0x30] sm:$0xff] }
 0x5cd   :  { %v15939_v30 = vpop.f32.mrf.mxu0  ;;  %v5183_v51 = vadd.f32 %v15373_v0, %v4113_v3  ;;  %v7758_v3 = vrot.slane %v12010_v26, 1  ;;  %v3708_v8 = vsel %vm3604_vm5, %v3703_v21, %v3707_v25 }
 0x5ce   :  { %20006 = vst [vmem:[#allocation181_spill] sm:$0xff] %v15939_v30 }
 0x5cf   :  { %v5463_v48 = vpop.f32.mrf.mxu1  ;;  %v7759_v50 = vsel %vm7752_vm8, %v7756_v22, %v7758_v3 }
 0x5d0   :  { %v15946_v29 = vadd.f32 %v5463_v48, %v5183_v51  ;;  %v15948_v17 = vpop.f32.mrf.mxu2  ;;  %v6016_v51 = vsel %vm5988_vm6, %v6011_v28, %v6015_v23 }
 0x5d2   :  { %v3952_v36 = vpop.f32.mrf.mxu3  ;;  %5502 = vmatmul.bf16.gmra.mxu1 %v11447_v12 }
 0x5d3   :  { %v4114_v0 = vadd.f32 %v3952_v36, %v15401_v41  ;;  %v20011_v36 = vshll.u32 %v15410_v10, 16 }
 0x5d5   :  { %v15951_v30 = vpop.f32.mrf.mxu0  ;;  %v5184_v13 = vadd.f32 %v15389_v60, %v4114_v0  ;;  %6428 = vmatmul.bf16.gmra.mxu2 %v6016_v51  ;;  %v20010_v60 = vshrl.u32 %v15410_v10, 16  ;;  %v3710_v22 = vrot.slane %v20011_v36, 4  ;;  %v10746_v0 = vld [vmem:[#allocation2 + $0x38] sm:$0xff]  ;;  %v6021_v51 = vshll.u32 %v10698_v47, 16 }
 0x5d7   :  { %3994 = vmatmul.bf16.gmra.mxu3 %v3708_v8  ;;  %v5465_v38 = vpop.f32.mrf.mxu1  ;;  %v3709_v12 = vrot.slane %v20010_v60, 3  ;;  %v6017_v8 = vshrl.u32 %v10697_v44, 16  ;;  %v6023_v60 = vrot.slane %v6021_v51, 1  ;;  %v10801_v51 = vld [vmem:[#allocation6 + $0x210] sm:$0xff] }
 0x5d8   :  { %7943 = vmatmul.bf16.gmra.mxu0 %v7759_v50  ;;  %v15957_v7 = vadd.f32 %v5465_v38, %v5184_v13  ;;  %v15959_v49 = vpop.f32.mrf.mxu2  ;;  %v11448_v13 = vld [vmem:[#allocation2 + $0xc8] sm:$0xff]   ;;  %8514 = vmatpush.bf16.msra.mxu1 %v10801_v51 }
 0x5d9   :  { %v3711_v38 = vor.u32 %v3710_v22, %v3709_v12  ;;  %v10785_v12 = vld [vmem:[#allocation6 + $0x190] sm:$0xff] }
 0x5da   :  { %v3955_v41 = vpop.f32.mrf.mxu3  ;;  %7440 = vmatpush.bf16.msra.mxu3 %v10785_v12 }
 0x5db   :  { %v4115_v48 = vadd.f32 %v3955_v41, %v15414_v5  ;;  %v6019_v41 = vor.u32 %v6017_v8, %v6015_v23  ;;  %v3712_v10 = vsel %vm3604_vm5, %v3707_v25, %v3711_v38  ;;  %v10699_v25 = vld [vmem:[#allocation2 + $0x38] sm:$0xff] }
 0x5dd   :  { %v15962_v55 = vpop.f32.mrf.mxu0  ;;  %v5185_v21 = vadd.f32 %v15403_v54, %v4115_v48  ;;  %v7760_v48 = vrot.slane %v10746_v0, 1 }
 0x5de   :  { %20009 = vst [vmem:[#allocation178_spill] sm:$0xff] %v15962_v55 }
 0x5df   :  { %v5468_v28 = vpop.f32.mrf.mxu1  ;;  %v7761_v36 = vsel %vm7752_vm8, %v7758_v3, %v7760_v48 }
 0x5e0   :  { %v15969_v26 = vadd.f32 %v5468_v28, %v5185_v21  ;;  %v15971_v5 = vpop.f32.mrf.mxu2  ;;  %v6024_v21 = vsel %vm5988_vm6, %v6019_v41, %v6023_v60 }
 0x5e2   :  { %v3957_v50 = vpop.f32.mrf.mxu3  ;;  %5507 = vmatmul.bf16.gmra.mxu1 %v11448_v13  ;;  %v20013_v13 = vshrl.u32 %v15437_v1, 16 }
 0x5e3   :  { %v4116_v54 = vadd.f32 %v3957_v50, %v15428_v19  ;;  %v20014_v50 = vshll.u32 %v15437_v1, 16 }
 0x5e4   :  { %v3713_v3 = vrot.slane %v20013_v13, 3 }
 0x5e5   :  { %v15974_v55 = vpop.f32.mrf.mxu0  ;;  %v5186_v44 = vadd.f32 %v15416_v20, %v4116_v54  ;;  %6433 = vmatmul.bf16.gmra.mxu2 %v6024_v21  ;;  %v3714_v41 = vrot.slane %v20014_v50, 4 }
 0x5e7   :  { %3999 = vmatmul.bf16.gmra.mxu3 %v3712_v10  ;;  %v5470_v28 = vpop.f32.mrf.mxu1  ;;  %v10747_v10 = vld [vmem:[#allocation2 + $0x40] sm:$0xff] }
 0x5e8   :  { %7948 = vmatmul.bf16.gmra.mxu0 %v7761_v36  ;;  %v15980_v23 = vadd.f32 %v5470_v28, %v5186_v44  ;;  %v15982_v22 = vpop.f32.mrf.mxu2  ;;  %v6025_v44 = vshrl.u32 %v10698_v47, 16  ;;  %v6029_v36 = vshll.u32 %v10699_v25, 16  ;;  %v7762_v13 = vrot.slane %v10747_v10, 1 }
 0x5ea   :  { %v3960_v19 = vpop.f32.mrf.mxu3 }
 0x5eb   :  { %v4117_v0 = vadd.f32 %v3960_v19, %v15441_v34  ;;  %v11449_v34 = vld [vmem:[#allocation2 + $0xd0] sm:$0xff]   ;;  %v3715_v19 = vor.u32 %v3714_v41, %v3713_v3  ;;  %v20020_v41 = vld [vmem:[#allocation221_spill] sm:$0xff] }
 0x5ed   :  { %v15985_v8 = vpop.f32.mrf.mxu0  ;;  %v5187_v20 = vadd.f32 %v15430_v39, %v4117_v0  ;;  %v6027_v39 = vor.u32 %v6025_v44, %v6023_v60  ;;  %v3716_v50 = vsel %vm3604_vm5, %v3711_v38, %v3715_v19  ;;  %v10700_v44 = vld [vmem:[#allocation2 + $0x40] sm:$0xff]  ;;  %v20022_v38 = vld [vmem:[#allocation218_spill] sm:$0xff] }
 0x5ee   :  { %20012 = vst [vmem:[#allocation190_spill] sm:$0xff] %v15985_v8  ;;  %v6031_v8 = vrot.slane %v6029_v36, 1 }
 0x5ef   :  { %v5473_v54 = vpop.f32.mrf.mxu1 }
 0x5f0   :  { %v15992_v21 = vadd.f32 %v5473_v54, %v5187_v20  ;;  %v15994_v12 = vpop.f32.mrf.mxu2  ;;  %v6032_v51 = vsel %vm5988_vm6, %v6027_v39, %v6031_v8  ;;  %v20017_v20 = vld [vmem:[#allocation216_spill] sm:$0xff]  ;;  %v7763_v54 = vsel %vm7752_vm8, %v7760_v48, %v7762_v13 }
 0x5f2   :  { %20015 = vst [vmem:[#allocation32_spill] sm:$0xff] %v15992_v21  ;;  %v3962_v28 = vpop.f32.mrf.mxu3  ;;  %5512 = vmatmul.bf16.gmra.mxu1 %v11449_v34 }
 0x5f3   :  { %v4118_v0 = vadd.f32 %v3962_v28, %v15455_v43  ;;  %v20023_v28 = vld [vmem:[#allocation220_spill] sm:$0xff] }
 0x5f4   :  { %v20024_v39 = vshrl.u32 %v20023_v28, 16 }
 0x5f5   :  { %v15997_v1 = vpop.f32.mrf.mxu0  ;;  %v5188_v47 = vadd.f32 %v20017_v20, %v4118_v0  ;;  %6438 = vmatmul.bf16.gmra.mxu2 %v6032_v51  ;;  %v10748_v20 = vld [vmem:[#allocation2 + $0x48] sm:$0xff] }
 0x5f6   :  { %20016 = vst [vmem:[#allocation185_spill] sm:$0xff] %v15997_v1  ;;  %v3717_v0 = vrot.slane %v20024_v39, 3 }
 0x5f7   :  { %4004 = vmatmul.bf16.gmra.mxu3 %v3716_v50  ;;  %v5475_v21 = vpop.f32.mrf.mxu1  ;;  %v20025_v50 = vshll.u32 %v20023_v28, 16 }
 0x5f8   :  { %7953 = vmatmul.bf16.gmra.mxu0 %v7763_v54  ;;  %v16003_v3 = vadd.f32 %v5475_v21, %v5188_v47  ;;  %v16005_v43 = vpop.f32.mrf.mxu2  ;;  %v6033_v47 = vshrl.u32 %v10699_v25, 16  ;;  %v6037_v54 = vshll.u32 %v10700_v44, 16 }
 0x5f9   :  { %20019 = vst [vmem:[#allocation216_spill] sm:$0xff] %v16005_v43  ;;  %v3718_v48 = vrot.slane %v20025_v50, 4  ;;  %v20028_v50 = vld [vmem:[#allocation222_spill] sm:$0xff] }
 0x5fa   :  { %20018 = vst [vmem:[#allocation194_spill] sm:$0xff] %v16003_v3  ;;  %v3965_v60 = vpop.f32.mrf.mxu3  ;;  %v11450_v3 = vld [vmem:[#allocation2 + $0xd8] sm:$0xff]   ;;  %v6039_v39 = vrot.slane %v6037_v54, 1 }
 0x5fb   :  { %v4119_v10 = vadd.f32 %v3965_v60, %v20020_v41  ;;  %v3719_v41 = vor.u32 %v3718_v48, %v3717_v0  ;;  %v10701_v48 = vld [vmem:[#allocation2 + $0x48] sm:$0xff] }
 0x5fd   :  { %v16008_v36 = vpop.f32.mrf.mxu0  ;;  %v5189_v34 = vadd.f32 %v20022_v38, %v4119_v10  ;;  %v7764_v38 = vrot.slane %v10748_v20, 1  ;;  %v3720_v28 = vsel %vm3604_vm5, %v3715_v19, %v3719_v41  ;;  %v20033_v19 = vld [vmem:[#allocation224_spill] sm:$0xff] }
 0x5fe   :  { %20021 = vst [vmem:[#allocation221_spill] sm:$0xff] %v16008_v36  ;;  %v6035_v36 = vor.u32 %v6033_v47, %v6031_v8  ;;  %v20034_v47 = vld [vmem:[#allocation226_spill] sm:$0xff] }
 0x5ff   :  { %v5478_v51 = vpop.f32.mrf.mxu1  ;;  %v20035_v54 = vshrl.u32 %v20034_v47, 16 }
 0x600   :  { %v16015_v21 = vadd.f32 %v5478_v51, %v5189_v34  ;;  %v16017_v60 = vpop.f32.mrf.mxu2  ;;  %v6040_v34 = vsel %vm5988_vm6, %v6035_v36, %v6039_v39  ;;  %v7765_v51 = vsel %vm7752_vm8, %v7762_v13, %v7764_v38 }
 0x602   :  { %20026 = vst [vmem:[#allocation218_spill] sm:$0xff] %v16015_v21  ;;  %v3967_v1 = vpop.f32.mrf.mxu3  ;;  %5517 = vmatmul.bf16.gmra.mxu1 %v11450_v3 }
 0x603   :  { %v4120_v10 = vadd.f32 %v3967_v1, %v15482_v46  ;;  %v20031_v1 = vld [vmem:[#allocation227_spill] sm:$0xff] }
 0x605   :  { %v16020_v43 = vpop.f32.mrf.mxu0  ;;  %v5190_v25 = vadd.f32 %v20028_v50, %v4120_v10  ;;  %6443 = vmatmul.bf16.gmra.mxu2 %v6040_v34  ;;  %v3721_v10 = vrot.slane %v20035_v54, 3  ;;  %v10749_v50 = vld [vmem:[#allocation2 + $0x50] sm:$0xff] }
 0x606   :  { %20027 = vst [vmem:[#allocation220_spill] sm:$0xff] %v16020_v43 }
 0x607   :  { %4009 = vmatmul.bf16.gmra.mxu3 %v3720_v28  ;;  %v5480_v21 = vpop.f32.mrf.mxu1  ;;  %v20036_v28 = vshll.u32 %v20034_v47, 16 }
 0x608   :  { %7958 = vmatmul.bf16.gmra.mxu0 %v7765_v51  ;;  %v16026_v3 = vadd.f32 %v5480_v21, %v5190_v25  ;;  %v16028_v46 = vpop.f32.mrf.mxu2  ;;  %v6041_v25 = vshrl.u32 %v10700_v44, 16  ;;  %v6045_v51 = vshll.u32 %v10701_v48, 16 }
 0x609   :  { %20030 = vst [vmem:[#allocation255_spill] sm:$0xff] %v16028_v46  ;;  %v3722_v13 = vrot.slane %v20036_v28, 4  ;;  %v20040_v28 = vld [vmem:[#allocation228_spill] sm:$0xff] }
 0x60a   :  { %20029 = vst [vmem:[#allocation222_spill] sm:$0xff] %v16026_v3  ;;  %v3970_v8 = vpop.f32.mrf.mxu3  ;;  %v11451_v3 = vld [vmem:[#allocation2 + $0xe0] sm:$0xff]   ;;  %v6047_v54 = vrot.slane %v6045_v51, 1 }
 0x60b   :  { %v4121_v0 = vadd.f32 %v3970_v8, %v20031_v1  ;;  %v3723_v1 = vor.u32 %v3722_v13, %v3721_v10  ;;  %v10702_v13 = vld [vmem:[#allocation2 + $0x50] sm:$0xff] }
 0x60d   :  { %v16031_v20 = vpop.f32.mrf.mxu0  ;;  %v5191_v36 = vadd.f32 %v20033_v19, %v4121_v0  ;;  %v7766_v19 = vrot.slane %v10749_v50, 1  ;;  %v3724_v47 = vsel %vm3604_vm5, %v3719_v41, %v3723_v1  ;;  %v20045_v41 = vld [vmem:[#allocation230_spill] sm:$0xff] }
 0x60e   :  { %20032 = vst [vmem:[#allocation227_spill] sm:$0xff] %v16031_v20  ;;  %v6043_v20 = vor.u32 %v6041_v25, %v6039_v39  ;;  %v20046_v25 = vld [vmem:[#allocation232_spill] sm:$0xff] }
 0x60f   :  { %v5483_v34 = vpop.f32.mrf.mxu1  ;;  %v20047_v51 = vshrl.u32 %v20046_v25, 16 }
 0x610   :  { %v16038_v21 = vadd.f32 %v5483_v34, %v5191_v36  ;;  %v16040_v8 = vpop.f32.mrf.mxu2  ;;  %v6048_v36 = vsel %vm5988_vm6, %v6043_v20, %v6047_v54  ;;  %v7767_v34 = vsel %vm7752_vm8, %v7764_v38, %v7766_v19 }
 0x611   :  { %20038 = vst [vmem:[#allocation226_spill] sm:$0xff] %v16040_v8 }
 0x612   :  { %20037 = vst [vmem:[#allocation224_spill] sm:$0xff] %v16038_v21  ;;  %v3972_v43 = vpop.f32.mrf.mxu3  ;;  %5522 = vmatmul.bf16.gmra.mxu1 %v11451_v3 }
 0x613   :  { %v4122_v0 = vadd.f32 %v3972_v43, %v15509_v14  ;;  %v20043_v43 = vld [vmem:[#allocation233_spill] sm:$0xff] }
 0x615   :  { %v16043_v46 = vpop.f32.mrf.mxu0  ;;  %v5192_v44 = vadd.f32 %v20040_v28, %v4122_v0  ;;  %6448 = vmatmul.bf16.gmra.mxu2 %v6048_v36  ;;  %v3725_v0 = vrot.slane %v20047_v51, 3  ;;  %v10750_v28 = vld [vmem:[#allocation2 + $0x58] sm:$0xff] }
 0x616   :  { %20039 = vst [vmem:[#allocation256_spill] sm:$0xff] %v16043_v46 }
 0x617   :  { %4014 = vmatmul.bf16.gmra.mxu3 %v3724_v47  ;;  %v5485_v21 = vpop.f32.mrf.mxu1  ;;  %v20048_v47 = vshll.u32 %v20046_v25, 16 }
 0x618   :  { %7963 = vmatmul.bf16.gmra.mxu0 %v7767_v34  ;;  %v16049_v3 = vadd.f32 %v5485_v21, %v5192_v44  ;;  %v16051_v14 = vpop.f32.mrf.mxu2  ;;  %v6049_v44 = vshrl.u32 %v10701_v48, 16  ;;  %v6053_v34 = vshll.u32 %v10702_v13, 16 }
 0x619   :  { %20042 = vst [vmem:[#allocation257_spill] sm:$0xff] %v16051_v14  ;;  %v3726_v38 = vrot.slane %v20048_v47, 4  ;;  %v7768_v14 = vrot.slane %v10750_v28, 1  ;;  %v20052_v47 = vld [vmem:[#allocation234_spill] sm:$0xff]  ;;  %v10703_v28 = vld [vmem:[#allocation2 + $0x58] sm:$0xff] }
 0x61a   :  { %20041 = vst [vmem:[#allocation228_spill] sm:$0xff] %v16049_v3  ;;  %v3975_v39 = vpop.f32.mrf.mxu3  ;;  %v11452_v3 = vld [vmem:[#allocation2 + $0xe8] sm:$0xff]   ;;  %v6055_v51 = vrot.slane %v6053_v34, 1  ;;  %v20057_v34 = vshrl.u32 %v15543_v33, 16 }
 0x61b   :  { %v4123_v10 = vadd.f32 %v3975_v39, %v20043_v43  ;;  %v3727_v43 = vor.u32 %v3726_v38, %v3725_v0  ;;  %v20054_v0 = vld [vmem:[#allocation238_spill] sm:$0xff] }
 0x61d   :  { %v16054_v50 = vpop.f32.mrf.mxu0  ;;  %v5193_v20 = vadd.f32 %v20045_v41, %v4123_v10  ;;  %v20050_v10 = vld [vmem:[#allocation236_spill] sm:$0xff]  ;;  %v3728_v25 = vsel %vm3604_vm5, %v3723_v1, %v3727_v43  ;;  %v20056_v1 = vld [vmem:[#allocation237_spill] sm:$0xff] }
 0x61e   :  { %20044 = vst [vmem:[#allocation233_spill] sm:$0xff] %v16054_v50  ;;  %v6051_v50 = vor.u32 %v6049_v44, %v6047_v54 }
 0x61f   :  { %v5488_v36 = vpop.f32.mrf.mxu1 }
 0x620   :  { %v16061_v21 = vadd.f32 %v5488_v36, %v5193_v20  ;;  %v16063_v39 = vpop.f32.mrf.mxu2  ;;  %v6056_v20 = vsel %vm5988_vm6, %v6051_v50, %v6055_v51  ;;  %v7769_v36 = vsel %vm7752_vm8, %v7766_v19, %v7768_v14 }
 0x622   :  { %20049 = vst [vmem:[#allocation230_spill] sm:$0xff] %v16061_v21  ;;  %v3977_v46 = vpop.f32.mrf.mxu3  ;;  %5527 = vmatmul.bf16.gmra.mxu1 %v11452_v3 }
 0x623   :  { %v4124_v41 = vadd.f32 %v3977_v46, %v20050_v10  ;;  %v3729_v10 = vrot.slane %v20057_v34, 3 }
 0x625   :  { %v16066_v8 = vpop.f32.mrf.mxu0  ;;  %v5194_v48 = vadd.f32 %v20052_v47, %v4124_v41  ;;  %6453 = vmatmul.bf16.gmra.mxu2 %v6056_v20  ;;  %v20058_v41 = vshll.u32 %v15543_v33, 16  ;;  %v10751_v20 = vld [vmem:[#allocation2 + $0x60] sm:$0xff]  ;;  %v6057_v47 = vshrl.u32 %v10702_v13, 16 }
 0x626   :  { %20051 = vst [vmem:[#allocation232_spill] sm:$0xff] %v16066_v8 }
 0x627   :  { %4019 = vmatmul.bf16.gmra.mxu3 %v3728_v25  ;;  %v5490_v21 = vpop.f32.mrf.mxu1  ;;  %v3730_v19 = vrot.slane %v20058_v41, 4  ;;  %v20060_v41 = vld [vmem:[#allocation239_spill] sm:$0xff] }
 0x628   :  { %7968 = vmatmul.bf16.gmra.mxu0 %v7769_v36  ;;  %v16072_v3 = vadd.f32 %v5490_v21, %v5194_v48  ;;  %v16074_v46 = vpop.f32.mrf.mxu2  ;;  %v6061_v48 = vshll.u32 %v10703_v28, 16  ;;  %v11453_v36 = vld [vmem:[#allocation2 + $0xf0] sm:$0xff]  }
 0x62a   :  { %20053 = vst [vmem:[#allocation236_spill] sm:$0xff] %v16072_v3  ;;  %v3980_v54 = vpop.f32.mrf.mxu3  ;;  %v6063_v34 = vrot.slane %v6061_v48, 1 }
 0x62b   :  { %v4125_v38 = vadd.f32 %v3980_v54, %v20054_v0  ;;  %v3731_v0 = vor.u32 %v3730_v19, %v3729_v10  ;;  %v10784_v10 = vld [vmem:[#allocation6 + $0x188] sm:$0xff] }
 0x62c   :  { %7441 = vmatpush.bf16.msra.mxu3 %v10784_v10  ;;  %v20065_v10 = vld [vmem:[#allocation16_spill] sm:$0xff] }
 0x62d   :  { %v16077_v44 = vpop.f32.mrf.mxu0  ;;  %v5195_v50 = vadd.f32 %v20056_v1, %v4125_v38  ;;  %v7770_v1 = vrot.slane %v10751_v20, 1  ;;  %v3732_v33 = vsel %vm3604_vm5, %v3727_v43, %v3731_v0 }
 0x62e   :  { %20055 = vst [vmem:[#allocation234_spill] sm:$0xff] %v16077_v44  ;;  %v6059_v44 = vor.u32 %v6057_v47, %v6055_v51  ;;  %v10704_v47 = vld [vmem:[#allocation2 + $0x60] sm:$0xff] }
 0x62f   :  { %v5493_v25 = vpop.f32.mrf.mxu1 }
 0x630   :  { %v16084_v21 = vadd.f32 %v5493_v25, %v5195_v50  ;;  %v16086_v54 = vpop.f32.mrf.mxu2  ;;  %v6064_v50 = vsel %vm5988_vm6, %v6059_v44, %v6063_v34  ;;  %v7771_v25 = vsel %vm7752_vm8, %v7768_v14, %v7770_v1 }
 0x632   :  { %20059 = vst [vmem:[#allocation238_spill] sm:$0xff] %v16084_v21  ;;  %v3982_v3 = vpop.f32.mrf.mxu3  ;;  %5532 = vmatmul.bf16.gmra.mxu1 %v11453_v36  ;;  %v20063_v36 = vshrl.u32 %v15576_v52, 16 }
 0x633   :  { %v4126_v38 = vadd.f32 %v3982_v3, %v15564_v37  ;;  %v20061_v37 = vld [vmem:[#allocation14_spill] sm:$0xff] }
 0x634   :  { %v3484_v3 = vadd.f32 %v15574_v45, %v20061_v37  ;;  %v10752_v45 = vld [vmem:[#allocation2 + $0x68] sm:$0xff]  ;;  %v11454_v37 = vld [vmem:[#allocation2 + $0xf8] sm:$0xff]  }
 0x635   :  { %v16089_v8 = vpop.f32.mrf.mxu0  ;;  %v5196_v13 = vadd.f32 %v20060_v41, %v4126_v38  ;;  %6458 = vmatmul.bf16.gmra.mxu2 %v6064_v50  ;;  %v3733_v38 = vrot.slane %v20063_v36, 3 }
 0x637   :  { %4024 = vmatmul.bf16.gmra.mxu3 %v3732_v33  ;;  %v5495_v21 = vpop.f32.mrf.mxu1 }
 0x638   :  { %7973 = vmatmul.bf16.gmra.mxu0 %v7771_v25  ;;  %v16095_v51 = vadd.f32 %v5495_v21, %v5196_v13  ;;  %v6419_v20 = vpop.f32.mrf.mxu2  ;;  %v20064_v21 = vshll.u32 %v15576_v52, 16  ;;  %v6065_v13 = vshrl.u32 %v10703_v28, 16  ;;  %v6069_v25 = vshll.u32 %v10704_v47, 16 }
 0x639   :  { %v16100_v44 = vadd.f32 %v6419_v20, %v15561_v40  ;;  %v3486_v40 = vadd.f32 %v15594_v53, %v20065_v10  ;;  %v7772_v52 = vrot.slane %v10752_v45, 1 }
 0x63a   :  { %v3985_v19 = vpop.f32.mrf.mxu3  ;;  %v3734_v33 = vrot.slane %v20064_v21, 4  ;;  %v10800_v21 = vld [vmem:[#allocation6 + $0x208] sm:$0xff] }
 0x63b   :  { %v4127_v43 = vadd.f32 %v3985_v19, %v3484_v3  ;;  %8515 = vmatpush.bf16.msra.mxu1 %v10800_v21 }
 0x63c   :  { %v3735_v20 = vor.u32 %v3734_v33, %v3733_v38  ;;  %v20067_v33 = vld [vmem:[#allocation17_spill] sm:$0xff] }
 0x63d   :  { %v16102_v48 = vpop.f32.mrf.mxu0  ;;  %v5197_v14 = vadd.f32 %v15566_v24, %v4127_v43  ;;  %v6067_v24 = vor.u32 %v6065_v13, %v6063_v34  ;;  %v7773_v34 = vsel %vm7752_vm8, %v7770_v1, %v7772_v52  ;;  %v3489_v45 = vadd.f32 %v15605_v9, %v20067_v33  ;;  %v11455_v33 = vld [vmem:[#allocation2 + $0x100] sm:$0xff]  }
 0x63e   :  { %20062 = vst [vmem:[#allocation237_spill] sm:$0xff] %v16102_v48  ;;  %v6071_v48 = vrot.slane %v6069_v25, 1  ;;  %v3736_v28 = vsel %vm3604_vm5, %v3731_v0, %v3735_v20 }
 0x63f   :  { %v5498_v50 = vpop.f32.mrf.mxu1 }
 0x640   :  { %v16109_v41 = vadd.f32 %v5498_v50, %v5197_v14  ;;  %v6421_v19 = vpop.f32.mrf.mxu2  ;;  %v6072_v53 = vsel %vm5988_vm6, %v6067_v24, %v6071_v48 }
 0x641   :  { %v16114_v36 = vadd.f32 %v6421_v19, %v15572_v6 }
 0x642   :  { %v3987_v3 = vpop.f32.mrf.mxu3  ;;  %5537 = vmatmul.bf16.gmra.mxu1 %v11454_v37 }
 0x643   :  { %v4128_v43 = vadd.f32 %v3987_v3, %v3486_v40  ;;  %v10705_v40 = vld [vmem:[#allocation2 + $0x68] sm:$0xff]  ;;  %v20069_v3 = vld [vmem:[#allocation241_spill] sm:$0xff] }
 0x644   :  { %v20070_v1 = vshrl.u32 %v20069_v3, 16  ;;  %v20071_v24 = vshll.u32 %v20069_v3, 16 }
 0x645   :  { %v16116_v14 = vpop.f32.mrf.mxu0  ;;  %v5198_v50 = vadd.f32 %v15581_v2, %v4128_v43  ;;  %6463 = vmatmul.bf16.gmra.mxu2 %v6072_v53  ;;  %v6073_v53 = vshrl.u32 %v10704_v47, 16 }
 0x646   :  { %v3737_v19 = vrot.slane %v20070_v1, 3  ;;  %v3738_v43 = vrot.slane %v20071_v24, 4  ;;  %v20075_v1 = vld [vmem:[#allocation240_spill] sm:$0xff] }
 0x647   :  { %4029 = vmatmul.bf16.gmra.mxu3 %v3736_v28  ;;  %v5500_v38 = vpop.f32.mrf.mxu1  ;;  %v10753_v28 = vld [vmem:[#allocation2 + $0x70] sm:$0xff] }
 0x648   :  { %7978 = vmatmul.bf16.gmra.mxu0 %v7773_v34  ;;  %v16122_v6 = vadd.f32 %v5500_v38, %v5198_v50  ;;  %v6424_v25 = vpop.f32.mrf.mxu2  ;;  %v6077_v50 = vshll.u32 %v10705_v40, 16  ;;  %v20073_v34 = vld [vmem:[#allocation22_spill] sm:$0xff]  ;;  %v7774_v3 = vrot.slane %v10753_v28, 1 }
 0x649   :  { %v16127_v0 = vadd.f32 %v6424_v25, %v15592_v56  ;;  %v20074_v56 = vld [vmem:[#allocation244_spill] sm:$0xff]  ;;  %v3739_v25 = vor.u32 %v3738_v43, %v3737_v19 }
 0x64a   :  { %20066 = vst [vmem:[#allocation239_spill] sm:$0xff] %v16122_v6  ;;  %v3990_v13 = vpop.f32.mrf.mxu3  ;;  %v3491_v38 = vadd.f32 %v20074_v56, %v20073_v34  ;;  %v6079_v24 = vrot.slane %v6077_v50, 1  ;;  %v7775_v19 = vsel %vm7752_vm8, %v7772_v52, %v7774_v3  ;;  %v20081_v56 = vld [vmem:[#allocation246_spill] sm:$0xff] }
 0x64b   :  { %v4129_v10 = vadd.f32 %v3990_v13, %v3489_v45  ;;  %v3740_v47 = vsel %vm3604_vm5, %v3735_v20, %v3739_v25 }
 0x64d   :  { %v16129_v37 = vpop.f32.mrf.mxu0  ;;  %v5199_v2 = vadd.f32 %v15597_v16, %v4129_v10  ;;  %v6075_v16 = vor.u32 %v6073_v53, %v6071_v48  ;;  %v20080_v53 = vld [vmem:[#allocation25_spill] sm:$0xff] }
 0x64e   :  { %20068 = vst [vmem:[#allocation14_spill] sm:$0xff] %v16129_v37  ;;  %v3494_v28 = vadd.f32 %v20081_v56, %v20080_v53  ;;  %v6081_v56 = vshrl.u32 %v10705_v40, 16 }
 0x64f   :  { %v5503_v21 = vpop.f32.mrf.mxu1 }
 0x650   :  { %v16136_v9 = vadd.f32 %v5503_v21, %v5199_v2  ;;  %v6426_v13 = vpop.f32.mrf.mxu2  ;;  %v6080_v2 = vsel %vm5988_vm6, %v6075_v16, %v6079_v24  ;;  %v20078_v21 = vld [vmem:[#allocation242_spill] sm:$0xff] }
 0x651   :  { %v16141_v37 = vadd.f32 %v6426_v13, %v20075_v1  ;;  %v10706_v13 = vld [vmem:[#allocation2 + $0x70] sm:$0xff] }
 0x652   :  { %20072 = vst [vmem:[#allocation16_spill] sm:$0xff] %v16136_v9  ;;  %v3992_v45 = vpop.f32.mrf.mxu3  ;;  %5542 = vmatmul.bf16.gmra.mxu1 %v11455_v33 }
 0x653   :  { %v4130_v10 = vadd.f32 %v3992_v45, %v3491_v38  ;;  %20076 = vst [vmem:[#allocation17_spill] sm:$0xff] %v16141_v37  ;;  %v20082_v45 = vld [vmem:[#allocation243_spill] sm:$0xff] }
 0x655   :  { %v16143_v6 = vpop.f32.mrf.mxu0  ;;  %v5200_v34 = vadd.f32 %v20078_v21, %v4130_v10  ;;  %6468 = vmatmul.bf16.gmra.mxu2 %v6080_v2  ;;  %v20085_v10 = vld [vmem:[#allocation245_spill] sm:$0xff] }
 0x656   :  { %20077 = vst [vmem:[#allocation241_spill] sm:$0xff] %v16143_v6 }
 0x657   :  { %4034 = vmatmul.bf16.gmra.mxu3 %v3740_v47  ;;  %v5505_v43 = vpop.f32.mrf.mxu1  ;;  %v20086_v47 = vld [vmem:[#allocation247_spill] sm:$0xff] }
 0x658   :  { %7983 = vmatmul.bf16.gmra.mxu0 %v7775_v19  ;;  %v16149_v48 = vadd.f32 %v5505_v43, %v5200_v34  ;;  %v6429_v38 = vpop.f32.mrf.mxu2  ;;  %v20087_v52 = vshrl.u32 %v20086_v47, 16  ;;  %v20088_v21 = vshll.u32 %v20086_v47, 16  ;;  %v10754_v43 = vld [vmem:[#allocation2 + $0x78] sm:$0xff] }
 0x659   :  { %v16154_v20 = vadd.f32 %v6429_v38, %v20082_v45  ;;  %v20091_v38 = vld [vmem:[#allocation107_spill] sm:$0xff]  ;;  %v7776_v47 = vrot.slane %v10754_v43, 1 }
 0x65a   :  { %20079 = vst [vmem:[#allocation22_spill] sm:$0xff] %v16149_v48  ;;  %v3995_v50 = vpop.f32.mrf.mxu3  ;;  %v3741_v2 = vrot.slane %v20087_v52, 3  ;;  %v3742_v34 = vrot.slane %v20088_v21, 4  ;;  %v11456_v48 = vld [vmem:[#allocation2 + $0x108] sm:$0xff]   ;;  %v20092_v52 = vld [vmem:[#allocation31_spill] sm:$0xff] }
 0x65b   :  { %v4131_v33 = vadd.f32 %v3995_v50, %v3494_v28  ;;  %20083 = vst [vmem:[#allocation244_spill] sm:$0xff] %v16154_v20  ;;  %v6085_v28 = vshll.u32 %v10706_v13, 16  ;;  %v20090_v50 = vld [vmem:[#allocation40_spill] sm:$0xff] }
 0x65c   :  { %v3496_v45 = vadd.f32 %v20091_v38, %v20090_v50  ;;  %v3743_v9 = vor.u32 %v3742_v34, %v3741_v2  ;;  %v7777_v2 = vsel %vm7752_vm8, %v7774_v3, %v7776_v47  ;;  %v20098_v38 = vld [vmem:[#allocation113_spill] sm:$0xff]  ;;  %v20102_v3 = vshrl.u32 %v15669_v4, 16 }
 0x65d   :  { %v16156_v16 = vpop.f32.mrf.mxu0  ;;  %v5201_v1 = vadd.f32 %v20085_v10, %v4131_v33  ;;  %v6083_v33 = vor.u32 %v6081_v56, %v6079_v24  ;;  %v6087_v21 = vrot.slane %v6085_v28, 1  ;;  %v20096_v24 = vld [vmem:[#allocation130_spill] sm:$0xff] }
 0x65e   :  { %20084 = vst [vmem:[#allocation240_spill] sm:$0xff] %v16156_v16  ;;  %v3744_v40 = vsel %vm3604_vm5, %v3739_v25, %v3743_v9 }
 0x65f   :  { %v5508_v19 = vpop.f32.mrf.mxu1 }
 0x660   :  { %v16163_v53 = vadd.f32 %v5508_v19, %v5201_v1  ;;  %v6431_v16 = vpop.f32.mrf.mxu2  ;;  %v6088_v1 = vsel %vm5988_vm6, %v6083_v33, %v6087_v21  ;;  %v20094_v19 = vld [vmem:[#allocation12_spill] sm:$0xff] }
 0x661   :  { %v16168_v20 = vadd.f32 %v6431_v16, %v20092_v52  ;;  %v20097_v16 = vld [vmem:[#allocation248_spill] sm:$0xff] }
 0x662   :  { %20089 = vst [vmem:[#allocation242_spill] sm:$0xff] %v16163_v53  ;;  %v3997_v6 = vpop.f32.mrf.mxu3  ;;  %5547 = vmatmul.bf16.gmra.mxu1 %v11456_v48  ;;  %v3499_v34 = vadd.f32 %v20097_v16, %v20096_v24  ;;  %v6089_v24 = vshrl.u32 %v10706_v13, 16 }
 0x663   :  { %v4132_v10 = vadd.f32 %v3997_v6, %v3496_v45  ;;  %v10707_v45 = vld [vmem:[#allocation2 + $0x78] sm:$0xff] }
 0x664   :  { %v6093_v16 = vshll.u32 %v10707_v45, 16 }
 0x665   :  { %v16170_v37 = vpop.f32.mrf.mxu0  ;;  %v5202_v50 = vadd.f32 %v20094_v19, %v4132_v10  ;;  %6473 = vmatmul.bf16.gmra.mxu2 %v6088_v1  ;;  %v20101_v10 = vld [vmem:[#allocation28_spill] sm:$0xff]  ;;  %v20103_v1 = vshll.u32 %v15669_v4, 16 }
 0x666   :  { %20093 = vst [vmem:[#allocation25_spill] sm:$0xff] %v16170_v37 }
 0x667   :  { %4039 = vmatmul.bf16.gmra.mxu3 %v3744_v40  ;;  %v5510_v48 = vpop.f32.mrf.mxu1  ;;  %v3745_v40 = vrot.slane %v20102_v3, 3  ;;  %v3746_v19 = vrot.slane %v20103_v1, 4  ;;  %v20107_v3 = vld [vmem:[#allocation21_spill] sm:$0xff]  ;;  %v6095_v1 = vrot.slane %v6093_v16, 1 }
 0x668   :  { %7988 = vmatmul.bf16.gmra.mxu0 %v7777_v2  ;;  %v16176_v6 = vadd.f32 %v5510_v48, %v5202_v50  ;;  %v6434_v56 = vpop.f32.mrf.mxu2  ;;  %v10755_v2 = vld [vmem:[#allocation2 + $0x80] sm:$0xff] }
 0x669   :  { %v16181_v25 = vadd.f32 %v6434_v56, %v20098_v38  ;;  %v11457_v38 = vld [vmem:[#allocation2 + $0x110] sm:$0xff]   ;;  %v3747_v37 = vor.u32 %v3746_v19, %v3745_v40  ;;  %v7778_v4 = vrot.slane %v10755_v2, 1 }
 0x66a   :  { %20095 = vst [vmem:[#allocation246_spill] sm:$0xff] %v16176_v6  ;;  %v4000_v43 = vpop.f32.mrf.mxu3 }
 0x66b   :  { %v4133_v28 = vadd.f32 %v4000_v43, %v3499_v34  ;;  %20099 = vst [vmem:[#allocation243_spill] sm:$0xff] %v16181_v25  ;;  %v20105_v34 = vld [vmem:[#allocation23_spill] sm:$0xff]  ;;  %v20106_v43 = vld [vmem:[#allocation30_spill] sm:$0xff]  ;;  %v3748_v13 = vsel %vm3604_vm5, %v3743_v9, %v3747_v37  ;;  %v7779_v40 = vsel %vm7752_vm8, %v7776_v47, %v7778_v4  ;;  %v20116_v47 = vshrl.u32 %v15700_v35, 16 }
 0x66c   :  { %v3501_v56 = vadd.f32 %v20106_v43, %v20105_v34 }
 0x66d   :  { %v16183_v33 = vpop.f32.mrf.mxu0  ;;  %v5203_v52 = vadd.f32 %v20101_v10, %v4133_v28  ;;  %v6091_v28 = vor.u32 %v6089_v24, %v6087_v21 }
 0x66e   :  { %20100 = vst [vmem:[#allocation245_spill] sm:$0xff] %v16183_v33 }
 0x66f   :  { %v5513_v50 = vpop.f32.mrf.mxu1 }
 0x670   :  { %v16190_v48 = vadd.f32 %v5513_v50, %v5203_v52  ;;  %v6436_v33 = vpop.f32.mrf.mxu2  ;;  %v6096_v52 = vsel %vm5988_vm6, %v6091_v28, %v6095_v1  ;;  %v20109_v50 = vld [vmem:[#allocation37_spill] sm:$0xff] }
 0x671   :  { %v16195_v53 = vadd.f32 %v6436_v33, %v20107_v3  ;;  %v20112_v33 = vld [vmem:[#allocation249_spill] sm:$0xff] }
 0x672   :  { %20104 = vst [vmem:[#allocation247_spill] sm:$0xff] %v16190_v48  ;;  %v4002_v6 = vpop.f32.mrf.mxu3  ;;  %5552 = vmatmul.bf16.gmra.mxu1 %v11457_v38  ;;  %v10708_v38 = vld [vmem:[#allocation2 + $0x80] sm:$0xff] }
 0x673   :  { %v4134_v10 = vadd.f32 %v4002_v6, %v3501_v56  ;;  %v20111_v6 = vld [vmem:[#allocation29_spill] sm:$0xff]  ;;  %v20113_v56 = vld [vmem:[#allocation36_spill] sm:$0xff] }
 0x674   :  { %v3504_v2 = vadd.f32 %v20112_v33, %v20111_v6  ;;  %v6097_v6 = vshrl.u32 %v10707_v45, 16  ;;  %v6101_v33 = vshll.u32 %v10708_v38, 16 }
 0x675   :  { %v16197_v25 = vpop.f32.mrf.mxu0  ;;  %v5204_v34 = vadd.f32 %v20109_v50, %v4134_v10  ;;  %6478 = vmatmul.bf16.gmra.mxu2 %v6096_v52  ;;  %v20115_v10 = vld [vmem:[#allocation124_spill] sm:$0xff]  ;;  %v20117_v52 = vshll.u32 %v15700_v35, 16 }
 0x676   :  { %20108 = vst [vmem:[#allocation40_spill] sm:$0xff] %v16197_v25 }
 0x677   :  { %4044 = vmatmul.bf16.gmra.mxu3 %v3748_v13  ;;  %v5515_v19 = vpop.f32.mrf.mxu1  ;;  %v3749_v13 = vrot.slane %v20116_v47, 3  ;;  %v3750_v50 = vrot.slane %v20117_v52, 4  ;;  %v20119_v47 = vld [vmem:[#allocation41_spill] sm:$0xff]  ;;  %v6103_v52 = vrot.slane %v6101_v33, 1 }
 0x678   :  { %7993 = vmatmul.bf16.gmra.mxu0 %v7779_v40  ;;  %v16203_v21 = vadd.f32 %v5515_v19, %v5204_v34  ;;  %v6439_v16 = vpop.f32.mrf.mxu2  ;;  %v10756_v40 = vld [vmem:[#allocation2 + $0x88] sm:$0xff] }
 0x679   :  { %v16208_v9 = vadd.f32 %v6439_v16, %v20113_v56  ;;  %v11458_v16 = vld [vmem:[#allocation2 + $0x118] sm:$0xff]   ;;  %v7780_v35 = vrot.slane %v10756_v40, 1 }
 0x67a   :  { %20110 = vst [vmem:[#allocation107_spill] sm:$0xff] %v16203_v21  ;;  %v4005_v24 = vpop.f32.mrf.mxu3  ;;  %v3751_v21 = vor.u32 %v3750_v50, %v3749_v13 }
 0x67b   :  { %v4135_v43 = vadd.f32 %v4005_v24, %v3504_v2  ;;  %v20118_v2 = vld [vmem:[#allocation94_spill] sm:$0xff]  ;;  %v7781_v13 = vsel %vm7752_vm8, %v7778_v4, %v7780_v35 }
 0x67c   :  { %v3506_v24 = vadd.f32 %v15718_v57, %v20118_v2  ;;  %v3752_v45 = vsel %vm3604_vm5, %v3747_v37, %v3751_v21 }
 0x67d   :  { %v16210_v28 = vpop.f32.mrf.mxu0  ;;  %v5205_v3 = vadd.f32 %v20115_v10, %v4135_v43  ;;  %v6099_v43 = vor.u32 %v6097_v6, %v6095_v1 }
 0x67e   :  { %20114 = vst [vmem:[#allocation31_spill] sm:$0xff] %v16210_v28 }
 0x67f   :  { %v5518_v34 = vpop.f32.mrf.mxu1 }
 0x680   :  { %v16217_v19 = vadd.f32 %v5518_v34, %v5205_v3  ;;  %v6441_v28 = vpop.f32.mrf.mxu2  ;;  %v6104_v3 = vsel %vm5988_vm6, %v6099_v43, %v6103_v52  ;;  %v20121_v34 = vld [vmem:[#allocation33_spill] sm:$0xff] }
 0x681   :  { %v16222_v25 = vadd.f32 %v6441_v28, %v20119_v47  ;;  %v20123_v28 = vld [vmem:[#allocation26_spill] sm:$0xff] }
 0x682   :  { %v4007_v56 = vpop.f32.mrf.mxu3  ;;  %5557 = vmatmul.bf16.gmra.mxu1 %v11458_v16  ;;  %v3509_v40 = vadd.f32 %v15729_v27, %v20123_v28  ;;  %v10783_v16 = vld [vmem:[#allocation6 + $0x180] sm:$0xff]  ;;  %v20128_v27 = vld [vmem:[#allocation13_spill] sm:$0xff] }
 0x683   :  { %v4136_v10 = vadd.f32 %v4007_v56, %v3506_v24  ;;  %v20124_v24 = vld [vmem:[#allocation100_spill] sm:$0xff]  ;;  %v10709_v56 = vld [vmem:[#allocation2 + $0x88] sm:$0xff]  ;;  %7442 = vmatpush.bf16.msra.mxu3 %v10783_v16  ;;  %v11459_v28 = vld [vmem:[#allocation2 + $0x120] sm:$0xff]  }
 0x685   :  { %v16224_v48 = vpop.f32.mrf.mxu0  ;;  %v5206_v57 = vadd.f32 %v20121_v34, %v4136_v10  ;;  %6483 = vmatmul.bf16.gmra.mxu2 %v6104_v3  ;;  %v20126_v10 = vld [vmem:[#allocation250_spill] sm:$0xff]  ;;  %v6105_v34 = vshrl.u32 %v10708_v38, 16  ;;  %v20132_v38 = vld [vmem:[#allocation27_spill] sm:$0xff] }
 0x686   :  { %20120 = vst [vmem:[#allocation12_spill] sm:$0xff] %v16224_v48 }
 0x687   :  { %4049 = vmatmul.bf16.gmra.mxu3 %v3752_v45  ;;  %v5520_v50 = vpop.f32.mrf.mxu1  ;;  %v10757_v45 = vld [vmem:[#allocation2 + $0x90] sm:$0xff] }
 0x688   :  { %7998 = vmatmul.bf16.gmra.mxu0 %v7781_v13  ;;  %v16230_v1 = vadd.f32 %v5520_v50, %v5206_v57  ;;  %v6444_v33 = vpop.f32.mrf.mxu2  ;;  %v6109_v57 = vshll.u32 %v10709_v56, 16  ;;  %v20129_v13 = vld [vmem:[#allocation253_spill] sm:$0xff]  ;;  %v7782_v16 = vrot.slane %v10757_v45, 1  ;;  %v20135_v45 = vld [vmem:[#allocation47_spill] sm:$0xff] }
 0x689   :  { %v16235_v37 = vadd.f32 %v6444_v33, %v20124_v24  ;;  %v3511_v50 = vadd.f32 %v20129_v13, %v20128_v27  ;;  %v6107_v33 = vor.u32 %v6105_v34, %v6103_v52  ;;  %v20133_v27 = vld [vmem:[#allocation251_spill] sm:$0xff] }
 0x68a   :  { %20122 = vst [vmem:[#allocation130_spill] sm:$0xff] %v16230_v1  ;;  %v4010_v6 = vpop.f32.mrf.mxu3  ;;  %v20130_v1 = vld [vmem:[#allocation44_spill] sm:$0xff]  ;;  %v7783_v52 = vsel %vm7752_vm8, %v7780_v35, %v7782_v16 }
 0x68b   :  { %v4137_v2 = vadd.f32 %v4010_v6, %v3509_v40  ;;  %v10758_v35 = vld [vmem:[#allocation2 + $0x98] sm:$0xff] }
 0x68d   :  { %v16237_v43 = vpop.f32.mrf.mxu0  ;;  %v5207_v4 = vadd.f32 %v20126_v10, %v4137_v2  ;;  %v10799_v2 = vld [vmem:[#allocation6 + $0x200] sm:$0xff]  ;;  %v6111_v10 = vrot.slane %v6109_v57, 1 }
 0x68e   :  { %20125 = vst [vmem:[#allocation248_spill] sm:$0xff] %v16237_v43  ;;  %8516 = vmatpush.bf16.msra.mxu1 %v10799_v2  ;;  %v20136_v57 = vld [vmem:[#allocation254_spill] sm:$0xff]  ;;  %v20137_v2 = vld [vmem:[#allocation252_spill] sm:$0xff] }
 0x68f   :  { %v5523_v47 = vpop.f32.mrf.mxu1 }
 0x690   :  { %v16240_v3 = vadd.f32 %v5523_v47, %v5207_v4  ;;  %v6446_v6 = vpop.f32.mrf.mxu2  ;;  %v3756_v4 = vsel %vm3604_vm5, %v3751_v21, %v20132_v38  ;;  %v6112_v47 = vsel %vm5988_vm6, %v6107_v33, %v6111_v10  ;;  %v10710_v33 = vld [vmem:[#allocation2 + $0x90] sm:$0xff] }
 0x691   :  { %v16245_v43 = vadd.f32 %v6446_v6, %v20130_v1 }
 0x692   :  { %20127 = vst [vmem:[#allocation113_spill] sm:$0xff] %v16240_v3  ;;  %v4012_v40 = vpop.f32.mrf.mxu3  ;;  %5562 = vmatmul.bf16.gmra.mxu1 %v11459_v28 }
 0x693   :  { %v4138_v24 = vadd.f32 %v4012_v40, %v3511_v50  ;;  %v3514_v50 = vadd.f32 %v20136_v57, %v20135_v45  ;;  %v11460_v57 = vld [vmem:[#allocation2 + $0x128] sm:$0xff]  }
 0x695   :  { %v16247_v48 = vpop.f32.mrf.mxu0  ;;  %v5208_v13 = vadd.f32 %v20133_v27, %v4138_v24  ;;  %6488 = vmatmul.bf16.gmra.mxu2 %v6112_v47  ;;  %v20140_v24 = vld [vmem:[#allocation18_spill] sm:$0xff] }
 0x696   :  { %20131 = vst [vmem:[#allocation28_spill] sm:$0xff] %v16247_v48 }
 0x697   :  { %4054 = vmatmul.bf16.gmra.mxu3 %v3756_v4  ;;  %v5525_v34 = vpop.f32.mrf.mxu1 }
 0x698   :  { %8003 = vmatmul.bf16.gmra.mxu0 %v7783_v52  ;;  %v16254_v1 = vadd.f32 %v5525_v34, %v5208_v13  ;;  %v6449_v40 = vpop.f32.mrf.mxu2  ;;  %v6113_v13 = vshrl.u32 %v10709_v56, 16  ;;  %v6117_v52 = vshll.u32 %v10710_v33, 16  ;;  %v20142_v34 = vld [vmem:[#allocation71_spill] sm:$0xff]  ;;  %v20147_v56 = vld [vmem:[#allocation81_spill] sm:$0xff] }
 0x699   :  { %v16259_v21 = vadd.f32 %v6449_v40, %v20137_v2  ;;  %v20144_v2 = vld [vmem:[#allocation51_spill] sm:$0xff] }
 0x69a   :  { %20134 = vst [vmem:[#allocation23_spill] sm:$0xff] %v16254_v1  ;;  %v4015_v28 = vpop.f32.mrf.mxu3  ;;  %v20143_v1 = vld [vmem:[#allocation15_spill] sm:$0xff] }
 0x69b   :  { %v4139_v6 = vadd.f32 %v4015_v28, %v3514_v50  ;;  %20138 = vst [vmem:[#allocation30_spill] sm:$0xff] %v16259_v21  ;;  %v3516_v45 = vadd.f32 %v20143_v1, %v20142_v34  ;;  %v6115_v28 = vor.u32 %v6113_v13, %v6111_v10  ;;  %v20151_v13 = vld [vmem:[#allocation76_spill] sm:$0xff] }
 0x69d   :  { %v16261_v38 = vpop.f32.mrf.mxu0  ;;  %v5209_v4 = vadd.f32 %v20140_v24, %v4139_v6  ;;  %v6119_v6 = vrot.slane %v6117_v52, 1 }
 0x69e   :  { %20139 = vst [vmem:[#allocation21_spill] sm:$0xff] %v16261_v38  ;;  %v7784_v38 = vrot.slane %v10758_v35, 1 }
 0x69f   :  { %v5528_v47 = vpop.f32.mrf.mxu1 }
 0x6a0   :  { %v16264_v27 = vadd.f32 %v5528_v47, %v5209_v4  ;;  %v6451_v50 = vpop.f32.mrf.mxu2  ;;  %v6120_v4 = vsel %vm5988_vm6, %v6115_v28, %v6119_v6  ;;  %v7785_v1 = vsel %vm7752_vm8, %v7782_v16, %v7784_v38  ;;  %v10711_v28 = vld [vmem:[#allocation2 + $0x98] sm:$0xff]  ;;  %v10759_v16 = vld [vmem:[#allocation2 + $0xa0] sm:$0xff] }
 0x6a1   :  { %v16269_v3 = vadd.f32 %v6451_v50, %v20144_v2  ;;  %v20152_v50 = vld [vmem:[#allocation42_spill] sm:$0xff] }
 0x6a2   :  { %20141 = vst [vmem:[#allocation37_spill] sm:$0xff] %v16264_v27  ;;  %v4017_v48 = vpop.f32.mrf.mxu3  ;;  %5567 = vmatmul.bf16.gmra.mxu1 %v11460_v57  ;;  %v20148_v27 = vld [vmem:[#allocation48_spill] sm:$0xff] }
 0x6a3   :  { %v4140_v40 = vadd.f32 %v4017_v48, %v3516_v45  ;;  %20145 = vst [vmem:[#allocation29_spill] sm:$0xff] %v16269_v3  ;;  %v20150_v48 = vld [vmem:[#allocation65_spill] sm:$0xff] }
 0x6a4   :  { %v3519_v45 = vadd.f32 %v20151_v13, %v20150_v48  ;;  %v11461_v13 = vld [vmem:[#allocation2 + $0x130] sm:$0xff]  }
 0x6a5   :  { %v16271_v24 = vpop.f32.mrf.mxu0  ;;  %v5210_v47 = vadd.f32 %v20147_v56, %v4140_v40  ;;  %6493 = vmatmul.bf16.gmra.mxu2 %v6120_v4 }
 0x6a6   :  { %20146 = vst [vmem:[#allocation249_spill] sm:$0xff] %v16271_v24 }
 0x6a7   :  { %4059 = vmatmul.bf16.gmra.mxu3 %v20148_v27  ;;  %v5530_v34 = vpop.f32.mrf.mxu1  ;;  %v20155_v27 = vld [vmem:[#allocation24_spill] sm:$0xff] }
 0x6a8   :  { %8008 = vmatmul.bf16.gmra.mxu0 %v7785_v1  ;;  %v16277_v10 = vadd.f32 %v5530_v34, %v5210_v47  ;;  %v6454_v52 = vpop.f32.mrf.mxu2  ;;  %v6121_v47 = vshrl.u32 %v10710_v33, 16  ;;  %v6125_v1 = vshll.u32 %v10711_v28, 16  ;;  %v20157_v34 = vld [vmem:[#allocation95_spill] sm:$0xff]  ;;  %v20162_v33 = vld [vmem:[#allocation154_spill] sm:$0xff] }
 0x6a9   :  { %v16282_v2 = vadd.f32 %v6454_v52, %v20152_v50  ;;  %v20159_v50 = vld [vmem:[#allocation150_spill] sm:$0xff] }
 0x6aa   :  { %20149 = vst [vmem:[#allocation36_spill] sm:$0xff] %v16277_v10  ;;  %v4020_v35 = vpop.f32.mrf.mxu3  ;;  %v20158_v10 = vld [vmem:[#allocation151_spill] sm:$0xff] }
 0x6ab   :  { %v4141_v57 = vadd.f32 %v4020_v35, %v3519_v45  ;;  %20153 = vst [vmem:[#allocation124_spill] sm:$0xff] %v16282_v2  ;;  %v3521_v48 = vadd.f32 %v20158_v10, %v20157_v34  ;;  %v6123_v35 = vor.u32 %v6121_v47, %v6119_v6  ;;  %v20166_v47 = vld [vmem:[#allocation155_spill] sm:$0xff] }
 0x6ad   :  { %v16284_v40 = vpop.f32.mrf.mxu0  ;;  %v5211_v4 = vadd.f32 %v20155_v27, %v4141_v57  ;;  %v6127_v57 = vrot.slane %v6125_v1, 1 }
 0x6ae   :  { %20154 = vst [vmem:[#allocation94_spill] sm:$0xff] %v16284_v40  ;;  %v7786_v40 = vrot.slane %v10759_v16, 1 }
 0x6af   :  { %v5533_v56 = vpop.f32.mrf.mxu1 }
 0x6b0   :  { %v16287_v24 = vadd.f32 %v5533_v56, %v5211_v4  ;;  %v6456_v45 = vpop.f32.mrf.mxu2  ;;  %v6128_v4 = vsel %vm5988_vm6, %v6123_v35, %v6127_v57  ;;  %v7787_v10 = vsel %vm7752_vm8, %v7784_v38, %v7786_v40  ;;  %v10712_v35 = vld [vmem:[#allocation2 + $0xa0] sm:$0xff]  ;;  %v10760_v38 = vld [vmem:[#allocation2 + $0xa8] sm:$0xff] }
 0x6b1   :  { %v16292_v2 = vadd.f32 %v6456_v45, %v20159_v50  ;;  %v20167_v45 = vld [vmem:[#allocation152_spill] sm:$0xff] }
 0x6b2   :  { %20156 = vst [vmem:[#allocation41_spill] sm:$0xff] %v16287_v24  ;;  %v4022_v3 = vpop.f32.mrf.mxu3  ;;  %5572 = vmatmul.bf16.gmra.mxu1 %v11461_v13  ;;  %v20163_v24 = vld [vmem:[#allocation53_spill] sm:$0xff] }
 0x6b3   :  { %v4142_v52 = vadd.f32 %v4022_v3, %v3521_v48  ;;  %20160 = vst [vmem:[#allocation33_spill] sm:$0xff] %v16292_v2  ;;  %v20165_v3 = vld [vmem:[#allocation153_spill] sm:$0xff] }
 0x6b4   :  { %v3524_v48 = vadd.f32 %v20166_v47, %v20165_v3  ;;  %v11462_v47 = vld [vmem:[#allocation2 + $0x138] sm:$0xff]  }
 0x6b5   :  { %v16294_v27 = vpop.f32.mrf.mxu0  ;;  %v5212_v56 = vadd.f32 %v20162_v33, %v4142_v52  ;;  %6498 = vmatmul.bf16.gmra.mxu2 %v6128_v4 }
 0x6b6   :  { %20161 = vst [vmem:[#allocation26_spill] sm:$0xff] %v16294_v27 }
 0x6b7   :  { %4064 = vmatmul.bf16.gmra.mxu3 %v20163_v24  ;;  %v5535_v34 = vpop.f32.mrf.mxu1  ;;  %v20170_v24 = vld [vmem:[#allocation34_spill] sm:$0xff] }
 0x6b8   :  { %8013 = vmatmul.bf16.gmra.mxu0 %v7787_v10  ;;  %v16300_v6 = vadd.f32 %v5535_v34, %v5212_v56  ;;  %v6459_v1 = vpop.f32.mrf.mxu2  ;;  %v6129_v56 = vshrl.u32 %v10711_v28, 16  ;;  %v6133_v10 = vshll.u32 %v10712_v35, 16  ;;  %v20172_v34 = vld [vmem:[#allocation156_spill] sm:$0xff]  ;;  %v20177_v28 = vld [vmem:[#allocation161_spill] sm:$0xff] }
 0x6b9   :  { %v16305_v50 = vadd.f32 %v6459_v1, %v20167_v45  ;;  %v20174_v45 = vld [vmem:[#allocation157_spill] sm:$0xff] }
 0x6ba   :  { %20164 = vst [vmem:[#allocation100_spill] sm:$0xff] %v16300_v6  ;;  %v4025_v16 = vpop.f32.mrf.mxu3  ;;  %v20173_v6 = vld [vmem:[#allocation158_spill] sm:$0xff] }
 0x6bb   :  { %v4143_v13 = vadd.f32 %v4025_v16, %v3524_v48  ;;  %20168 = vst [vmem:[#allocation250_spill] sm:$0xff] %v16305_v50  ;;  %v3526_v3 = vadd.f32 %v20173_v6, %v20172_v34  ;;  %v6131_v16 = vor.u32 %v6129_v56, %v6127_v57  ;;  %v20181_v56 = vld [vmem:[#allocation162_spill] sm:$0xff] }
 0x6bd   :  { %v16307_v52 = vpop.f32.mrf.mxu0  ;;  %v5213_v4 = vadd.f32 %v20170_v24, %v4143_v13  ;;  %v6135_v13 = vrot.slane %v6133_v10, 1 }
 0x6be   :  { %20169 = vst [vmem:[#allocation13_spill] sm:$0xff] %v16307_v52  ;;  %v7788_v52 = vrot.slane %v10760_v38, 1 }
 0x6bf   :  { %v5538_v33 = vpop.f32.mrf.mxu1 }
 0x6c0   :  { %v16310_v27 = vadd.f32 %v5538_v33, %v5213_v4  ;;  %v6461_v48 = vpop.f32.mrf.mxu2  ;;  %v6136_v4 = vsel %vm5988_vm6, %v6131_v16, %v6135_v13  ;;  %v7789_v6 = vsel %vm7752_vm8, %v7786_v40, %v7788_v52  ;;  %v10713_v16 = vld [vmem:[#allocation2 + $0xa8] sm:$0xff]  ;;  %v10761_v40 = vld [vmem:[#allocation2 + $0xb0] sm:$0xff] }
 0x6c1   :  { %v16315_v50 = vadd.f32 %v6461_v48, %v20174_v45  ;;  %v20182_v48 = vld [vmem:[#allocation159_spill] sm:$0xff] }
 0x6c2   :  { %20171 = vst [vmem:[#allocation253_spill] sm:$0xff] %v16310_v27  ;;  %v4027_v2 = vpop.f32.mrf.mxu3  ;;  %5577 = vmatmul.bf16.gmra.mxu1 %v11462_v47  ;;  %v20178_v27 = vld [vmem:[#allocation135_spill] sm:$0xff] }
 0x6c3   :  { %v4144_v1 = vadd.f32 %v4027_v2, %v3526_v3  ;;  %20175 = vst [vmem:[#allocation44_spill] sm:$0xff] %v16315_v50  ;;  %v20180_v2 = vld [vmem:[#allocation160_spill] sm:$0xff] }
 0x6c4   :  { %v3529_v3 = vadd.f32 %v20181_v56, %v20180_v2  ;;  %v11463_v56 = vld [vmem:[#allocation2 + $0x140] sm:$0xff]  }
 0x6c5   :  { %v16317_v24 = vpop.f32.mrf.mxu0  ;;  %v5214_v33 = vadd.f32 %v20177_v28, %v4144_v1  ;;  %6503 = vmatmul.bf16.gmra.mxu2 %v6136_v4 }
 0x6c6   :  { %20176 = vst [vmem:[#allocation27_spill] sm:$0xff] %v16317_v24  ;;  %v3583_v24 = vld [vmem:[#allocation2 + $0x14c] sm:$0xf] }
 0x6c7   :  { %4069 = vmatmul.bf16.gmra.mxu3 %v20178_v27  ;;  %v5540_v34 = vpop.f32.mrf.mxu1  ;;  %v20185_v27 = vld [vmem:[#allocation86_spill] sm:$0xff] }
 0x6c8   :  { %8018 = vmatmul.bf16.gmra.mxu0 %v7789_v6  ;;  %v16323_v57 = vadd.f32 %v5540_v34, %v5214_v33  ;;  %v6464_v10 = vpop.f32.mrf.mxu2  ;;  %v6137_v33 = vshrl.u32 %v10712_v35, 16  ;;  %v6141_v34 = vshll.u32 %v10713_v16, 16 }
 0x6c9   :  { %v16328_v45 = vadd.f32 %v6464_v10, %v20182_v48  ;;  %v3602_v48 = vunpack.c.l.b16 %v3583_v24 }
 0x6ca   :  { %20179 = vst [vmem:[#allocation251_spill] sm:$0xff] %v16323_v57  ;;  %v4030_v38 = vpop.f32.mrf.mxu3  ;;  %v20187_v57 = vld [vmem:[#allocation163_spill] sm:$0xff]  ;;  %v6139_v10 = vor.u32 %v6137_v33, %v6135_v13  ;;  %v20195_v33 = vld [vmem:[#allocation172_spill] sm:$0xff] }
 0x6cb   :  { %v4145_v47 = vadd.f32 %v4030_v38, %v3529_v3  ;;  %20183 = vst [vmem:[#allocation47_spill] sm:$0xff] %v16328_v45  ;;  %v3531_v2 = vadd.f32 %v15853_v62, %v20187_v57  ;;  %v20192_v62 = vld [vmem:[#allocation20_spill] sm:$0xff] }
 0x6cd   :  { %v16330_v1 = vpop.f32.mrf.mxu0  ;;  %v5215_v4 = vadd.f32 %v20185_v27, %v4145_v47  ;;  %v7790_v47 = vrot.slane %v10761_v40, 1  ;;  %v6143_v27 = vrot.slane %v6141_v34, 1 }
 0x6ce   :  { %20184 = vst [vmem:[#allocation254_spill] sm:$0xff] %v16330_v1  ;;  %v20188_v1 = vld [vmem:[#allocation164_spill] sm:$0xff] }
 0x6cf   :  { %v5543_v28 = vpop.f32.mrf.mxu1  ;;  %v6144_v35 = vsel %vm5988_vm6, %v6139_v10, %v6143_v27  ;;  %v7791_v57 = vsel %vm7752_vm8, %v7788_v52, %v7790_v47  ;;  %v20196_v10 = vld [vmem:[#allocation166_spill] sm:$0xff] }
 0x6d0   :  { %v16333_v6 = vadd.f32 %v5543_v28, %v5215_v4  ;;  %v6466_v38 = vpop.f32.mrf.mxu2  ;;  %v20191_v4 = vld [vmem:[#allocation168_spill] sm:$0xff] }
 0x6d1   :  { %v16338_v50 = vadd.f32 %v6466_v38, %v20188_v1  ;;  %v20194_v1 = vld [vmem:[#allocation167_spill] sm:$0xff] }
 0x6d2   :  { %20186 = vst [vmem:[#allocation252_spill] sm:$0xff] %v16333_v6  ;;  %v4032_v3 = vpop.f32.mrf.mxu3  ;;  %5582 = vmatmul.bf16.gmra.mxu1 %v11463_v56  ;;  %v3603_v6 = vpack.c.b16 %v3602_v48, %v3602_v48  ;;  %v3534_v40 = vadd.f32 %v20195_v33, %v20194_v1  ;;  %v10714_v48 = vld [vmem:[#allocation2 + $0xb0] sm:$0xff]  ;;  %v6145_v1 = vshrl.u32 %v10713_v16, 16 }
 0x6d3   :  { %v4146_v45 = vadd.f32 %v4032_v3, %v3531_v2  ;;  %20189 = vst [vmem:[#allocation18_spill] sm:$0xff] %v16338_v50  ;;  %v6149_v33 = vshll.u32 %v10714_v48, 16  ;;  %v20201_v50 = vld [vmem:[#allocation35_spill] sm:$0xff] }
 0x6d4   :  { %v3774_v56 = vshrl.u32 %v3603_v6, 16  ;;  %v3777_v3 = vshll.u32 %v3603_v6, 16 }
 0x6d5   :  { %v16340_v21 = vpop.f32.mrf.mxu0  ;;  %v5216_v28 = vadd.f32 %v20191_v4, %v4146_v45  ;;  %6508 = vmatmul.bf16.gmra.mxu2 %v6144_v35  ;;  %v20199_v35 = vld [vmem:[#allocation165_spill] sm:$0xff] }
 0x6d6   :  { %20190 = vst [vmem:[#allocation71_spill] sm:$0xff] %v16340_v21  ;;  %v20200_v21 = vld [vmem:[#allocation171_spill] sm:$0xff] }
 0x6d7   :  { %4074 = vmatmul.bf16.gmra.mxu3 %v20192_v62  ;;  %v5545_v13 = vpop.f32.mrf.mxu1  ;;  %v3776_v62 = vrot.slane %v3774_v56, 3  ;;  %v3536_v6 = vadd.f32 %v15878_v61, %v20200_v21  ;;  %v20204_v61 = vld [vmem:[#allocation169_spill] sm:$0xff] }
 0x6d8   :  { %8023 = vmatmul.bf16.gmra.mxu0 %v7791_v57  ;;  %v16346_v24 = vadd.f32 %v5545_v13, %v5216_v28  ;;  %v6469_v2 = vpop.f32.mrf.mxu2  ;;  %v3779_v57 = vrot.slane %v3777_v3, 4  ;;  %v10762_v13 = vld [vmem:[#allocation2 + $0xb8] sm:$0xff]  ;;  %v6151_v3 = vrot.slane %v6149_v33, 1 }
 0x6d9   :  { %v16351_v45 = vadd.f32 %v6469_v2, %v20196_v10  ;;  %v7792_v56 = vrot.slane %v10762_v13, 1  ;;  %v20206_v13 = vld [vmem:[#allocation174_spill] sm:$0xff] }
 0x6da   :  { %20193 = vst [vmem:[#allocation15_spill] sm:$0xff] %v16346_v24  ;;  %v4035_v34 = vpop.f32.mrf.mxu3  ;;  %v3780_v10 = vor.u32 %v3779_v57, %v3776_v62  ;;  %v11466_v57 = vld [vmem:[#allocation2 + $0x18] sm:$0xff]  }
 0x6db   :  { %v4147_v38 = vadd.f32 %v4035_v34, %v3534_v40  ;;  %20197 = vst [vmem:[#allocation51_spill] sm:$0xff] %v16351_v45  ;;  %v11464_v40 = vld [vmem:[#allocation2 + $0x148] sm:$0xff]   ;;  %v6147_v45 = vor.u32 %v6145_v1, %v6143_v27  ;;  %v7793_v62 = vsel %vm7752_vm8, %v7790_v47, %v7792_v56  ;;  %v3539_v1 = vadd.f32 %v15889_v58, %v20206_v13 }
 0x6dd   :  { %v16353_v4 = vpop.f32.mrf.mxu0  ;;  %v5217_v52 = vadd.f32 %v20199_v35, %v4147_v38 }
 0x6de   :  { %20198 = vst [vmem:[#allocation81_spill] sm:$0xff] %v16353_v4 }
 0x6df   :  { %v5548_v28 = vpop.f32.mrf.mxu1 }
 0x6e0   :  { %v16356_v24 = vadd.f32 %v5548_v28, %v5217_v52  ;;  %v6471_v2 = vpop.f32.mrf.mxu2  ;;  %v20203_v52 = vld [vmem:[#allocation19_spill] sm:$0xff]  ;;  %v6152_v28 = vsel %vm5988_vm6, %v6147_v45, %v6151_v3 }
 0x6e1   :  { %v16361_v38 = vadd.f32 %v6471_v2, %v20201_v50  ;;  %v3781_v16 = vsel %vm3604_vm5, %v20203_v52, %v3780_v10  ;;  %v20208_v10 = vld [vmem:[#allocation170_spill] sm:$0xff] }
 0x6e2   :  { %v4037_v34 = vpop.f32.mrf.mxu3  ;;  %5587 = vmatmul.bf16.gmra.mxu1 %v11464_v40  ;;  %v7017_v40 = vshll.u32 %v11466_v57, 16 }
 0x6e3   :  { %v4148_v4 = vadd.f32 %v4037_v34, %v3536_v6 }
 0x6e4   :  { %v7019_v52 = vrot.slane %v7017_v40, 1 }
 0x6e5   :  { %v16363_v35 = vpop.f32.mrf.mxu0  ;;  %v5218_v21 = vadd.f32 %v20204_v61, %v4148_v4  ;;  %6513 = vmatmul.bf16.gmra.mxu2 %v6152_v28  ;;  %v10715_v4 = vld [vmem:[#allocation2 + $0xb8] sm:$0xff]  ;;  %v10763_v28 = vld [vmem:[#allocation2 + $0xc0] sm:$0xff] }
 0x6e6   :  { %20202 = vst [vmem:[#allocation48_spill] sm:$0xff] %v16363_v35  ;;  %v6157_v58 = vshll.u32 %v10715_v4, 16  ;;  %v20210_v35 = vld [vmem:[#allocation176_spill] sm:$0xff]  ;;  %v7794_v40 = vrot.slane %v10763_v28, 1 }
 0x6e7   :  { %4079 = vmatmul.bf16.gmra.mxu3 %v3781_v16  ;;  %v5550_v27 = vpop.f32.mrf.mxu1 }
 0x6e8   :  { %8028 = vmatmul.bf16.gmra.mxu0 %v7793_v62  ;;  %v16370_v50 = vadd.f32 %v5550_v27, %v5218_v21  ;;  %v6474_v6 = vpop.f32.mrf.mxu2  ;;  %v7015_v21 = vshrl.u32 %v11466_v57, 16  ;;  %v6153_v62 = vshrl.u32 %v10714_v48, 16  ;;  %v20209_v27 = vld [vmem:[#allocation179_spill] sm:$0xff] }
 0x6e9   :  { %v16375_v45 = vadd.f32 %v6474_v6, %v15876_v42  ;;  %v3541_v13 = vadd.f32 %v15901_v18, %v20209_v27  ;;  %v12011_v42 = vld [vmem:[#allocation2 + $0x150] sm:$0xff]  }
 0x6ea   :  { %20205 = vst [vmem:[#allocation65_spill] sm:$0xff] %v16370_v50  ;;  %v4040_v33 = vpop.f32.mrf.mxu3  ;;  %v7020_v6 = vor.u32 %v7019_v52, %v7015_v21  ;;  %v6155_v50 = vor.u32 %v6153_v62, %v6151_v3  ;;  %v20211_v57 = vld [vmem:[#allocation39_spill] sm:$0xff]  ;;  %v7795_v52 = vsel %vm7752_vm8, %v7792_v56, %v7794_v40  ;;  %v10764_v56 = vld [vmem:[#allocation2 + $0xc8] sm:$0xff] }
 0x6eb   :  { %v4149_v34 = vadd.f32 %v4040_v33, %v3539_v1  ;;  %v20212_v18 = vld [vmem:[#allocation175_spill] sm:$0xff] }
 0x6ec   :  { %v7025_v48 = vsel %vm5988_vm6, %v7020_v6, %v20211_v57 }
 0x6ed   :  { %v16377_v2 = vpop.f32.mrf.mxu0  ;;  %v5219_v47 = vadd.f32 %v20208_v10, %v4149_v34  ;;  %v6159_v10 = vrot.slane %v6157_v58, 1 }
 0x6ee   :  { %20207 = vst [vmem:[#allocation76_spill] sm:$0xff] %v16377_v2 }
 0x6ef   :  { %v5553_v16 = vpop.f32.mrf.mxu1 }
 0x6f0   :  { %v16380_v61 = vadd.f32 %v5553_v16, %v5219_v47  ;;  %v6476_v33 = vpop.f32.mrf.mxu2  ;;  %v6160_v16 = vsel %vm5988_vm6, %v6155_v50, %v6159_v10  ;;  %v10716_v50 = vld [vmem:[#allocation2 + $0xc0] sm:$0xff] }
 0x6f1   :  { %v16385_v34 = vadd.f32 %v6476_v33, %v20210_v35  ;;  %v20213_v35 = vld [vmem:[#allocation182_spill] sm:$0xff] }
 0x6f2   :  { %v4042_v1 = vpop.f32.mrf.mxu3  ;;  %5592 = vmatmul.bf16.gmra.mxu1 %v12011_v42  ;;  %v3544_v28 = vadd.f32 %v15913_v32, %v20213_v35  ;;  %v20219_v35 = vld [vmem:[#allocation139_spill] sm:$0xff] }
 0x6f3   :  { %v4150_v2 = vadd.f32 %v4042_v1, %v3541_v13  ;;  %v20214_v1 = vld [vmem:[#allocation173_spill] sm:$0xff] }
 0x6f5   :  { %v16387_v47 = vpop.f32.mrf.mxu0  ;;  %v5220_v27 = vadd.f32 %v20212_v18, %v4150_v2  ;;  %6518 = vmatmul.bf16.gmra.mxu2 %v6160_v16  ;;  %v20216_v2 = vld [vmem:[#allocation180_spill] sm:$0xff]  ;;  %v6161_v16 = vshrl.u32 %v10715_v4, 16  ;;  %v6165_v18 = vshll.u32 %v10716_v50, 16  ;;  %v20221_v4 = vld [vmem:[#allocation183_spill] sm:$0xff] }
 0x6f7   :  { %7443 = vmatmul.bf16.vlgmr.msra.gmra.mxu3 %v7025_v48  ;;  %v5555_v3 = vpop.f32.mrf.mxu1 }
 0x6f8   :  { %8033 = vmatmul.bf16.gmra.mxu0 %v7795_v52  ;;  %v16394_v21 = vadd.f32 %v5555_v3, %v5220_v27  ;;  %v6479_v58 = vpop.f32.mrf.mxu2  ;;  %v20218_v27 = vld [vmem:[#allocation188_spill] sm:$0xff] }
 0x6f9   :  { %v16399_v33 = vadd.f32 %v6479_v58, %v20214_v1  ;;  %v3546_v32 = vadd.f32 %v15925_v11, %v20218_v27  ;;  %v20220_v58 = vld [vmem:[#allocation177_spill] sm:$0xff] }
 0x6fa   :  { %v4045_v62 = vpop.f32.mrf.mxu3 }
 0x6fb   :  { %v4151_v13 = vadd.f32 %v4045_v62, %v3544_v28  ;;  %v6163_v28 = vor.u32 %v6161_v16, %v6159_v10  ;;  %v20223_v16 = vld [vmem:[#allocation199_spill] sm:$0xff] }
 0x6fd   :  { %v16401_v42 = vpop.f32.mrf.mxu0  ;;  %v5221_v6 = vadd.f32 %v20216_v2, %v4151_v13  ;;  %v6167_v13 = vrot.slane %v6165_v18, 1 }
 0x6fe   :  { %20215 = vst [vmem:[#allocation42_spill] sm:$0xff] %v16401_v42  ;;  %v7796_v42 = vrot.slane %v10764_v56, 1 }
 0x6ff   :  { %v5558_v57 = vpop.f32.mrf.mxu1 }
 0x700   :  { %v16404_v48 = vadd.f32 %v5558_v57, %v5221_v6  ;;  %v6481_v3 = vpop.f32.mrf.mxu2  ;;  %v6168_v6 = vsel %vm5988_vm6, %v6163_v28, %v6167_v13  ;;  %v7797_v11 = vsel %vm7752_vm8, %v7794_v40, %v7796_v42  ;;  %v10765_v40 = vld [vmem:[#allocation2 + $0xd0] sm:$0xff] }
 0x701   :  { %v16410_v1 = vadd.f32 %v6481_v3, %v20220_v58 }
 0x702   :  { %20217 = vst [vmem:[#allocation24_spill] sm:$0xff] %v16404_v48  ;;  %v4047_v52 = vpop.f32.mrf.mxu3  ;;  %8517 = vmatmul.bf16.vlgmr.msra.gmra.mxu1 %v20219_v35  ;;  %v20222_v48 = vld [vmem:[#allocation102_spill] sm:$0xff] }
 0x703   :  { %v4152_v62 = vadd.f32 %v4047_v52, %v3546_v32  ;;  %v3549_v32 = vadd.f32 %v15936_v15, %v20223_v16  ;;  %v10717_v35 = vld [vmem:[#allocation2 + $0xc8] sm:$0xff]  ;;  %v20226_v16 = vld [vmem:[#allocation45_spill] sm:$0xff] }
 0x705   :  { %v16412_v2 = vpop.f32.mrf.mxu0  ;;  %v5222_v57 = vadd.f32 %v20221_v4, %v4152_v62  ;;  %6523 = vmatmul.bf16.gmra.mxu2 %v6168_v6  ;;  %v6169_v6 = vshrl.u32 %v10716_v50, 16  ;;  %v6173_v4 = vshll.u32 %v10717_v35, 16  ;;  %v20228_v50 = vld [vmem:[#allocation43_spill] sm:$0xff] }
 0x707   :  { %7448 = vmatmul.bf16.gmra.mxu3 %v20222_v48  ;;  %v5560_v27 = vpop.f32.mrf.mxu1 }
 0x708   :  { %8038 = vmatmul.bf16.gmra.mxu0 %v7797_v11  ;;  %v16418_v10 = vadd.f32 %v5560_v27, %v5222_v57  ;;  %v6484_v18 = vpop.f32.mrf.mxu2  ;;  %v20225_v57 = vld [vmem:[#allocation209_spill] sm:$0xff] }
 0x709   :  { %v16423_v3 = vadd.f32 %v6484_v18, %v15923_v63  ;;  %v3551_v15 = vadd.f32 %v15948_v17, %v20225_v57  ;;  %v6171_v63 = vor.u32 %v6169_v6, %v6167_v13  ;;  %v6175_v18 = vrot.slane %v6173_v4, 1  ;;  %v20230_v13 = vld [vmem:[#allocation211_spill] sm:$0xff] }
 0x70a   :  { %v4050_v56 = vpop.f32.mrf.mxu3  ;;  %v3554_v6 = vadd.f32 %v15959_v49, %v20230_v13 }
 0x70b   :  { %v4153_v52 = vadd.f32 %v4050_v56, %v3549_v32 }
 0x70d   :  { %v5223_v28 = vadd.f32 %v15928_v59, %v4153_v52  ;;  %v16426_v48 = vpop.f32.mrf.mxu0  ;;  %v7798_v59 = vrot.slane %v10765_v40, 1  ;;  %v6176_v52 = vsel %vm5988_vm6, %v6171_v63, %v6175_v18 }
 0x70f   :  { %v5563_v62 = vpop.f32.mrf.mxu1  ;;  %v7799_v17 = vsel %vm7752_vm8, %v7796_v42, %v7798_v59  ;;  %v16450_v42 = vld [vmem:[#allocation2 + $0xd8] sm:$0xff] }
 0x710   :  { %v16428_v58 = vadd.f32 %v5563_v62, %v5223_v28  ;;  %v6486_v27 = vpop.f32.mrf.mxu2  ;;  %v20227_v28 = vld [vmem:[#allocation181_spill] sm:$0xff] }
 0x711   :  { %v16434_v56 = vadd.f32 %v6486_v27, %v15934_v31  ;;  %v10718_v27 = vld [vmem:[#allocation2 + $0xd0] sm:$0xff] }
 0x712   :  { %20224 = vst [vmem:[#allocation95_spill] sm:$0xff] %v16428_v58  ;;  %v4052_v11 = vpop.f32.mrf.mxu3  ;;  %8522 = vmatmul.bf16.gmra.mxu1 %v20226_v16  ;;  %v6181_v49 = vshll.u32 %v10718_v27, 16 }
 0x713   :  { %v4154_v32 = vadd.f32 %v4052_v11, %v3551_v15 }
 0x715   :  { %v5224_v62 = vadd.f32 %v20227_v28, %v4154_v32  ;;  %6528 = vmatmul.bf16.gmra.mxu2 %v6176_v52  ;;  %v16444_v31 = vpop.f32.mrf.mxu0  ;;  %v12012_v52 = vld [vmem:[#allocation2 + $0x38] sm:$0xff] }
 0x716   :  { %20231 = vst [vmem:[#allocation150_spill] sm:$0xff] %v16444_v31  ;;  %v7046_v28 = vshll.u32 %v12012_v52, 16  ;;  %v6183_v31 = vrot.slane %v6181_v49, 1 }
 0x717   :  { %7453 = vmatmul.bf16.gmra.mxu3 %v20228_v50  ;;  %v5565_v57 = vpop.f32.mrf.mxu1  ;;  %v20234_v50 = vld [vmem:[#allocation212_spill] sm:$0xff] }
 0x718   :  { %8043 = vmatmul.bf16.gmra.mxu0 %v7799_v17  ;;  %v16440_v58 = vadd.f32 %v5565_v57, %v5224_v62  ;;  %v6489_v4 = vpop.f32.mrf.mxu2  ;;  %v6177_v62 = vshrl.u32 %v10717_v35, 16  ;;  %v3556_v17 = vadd.f32 %v15971_v5, %v20234_v50  ;;  %v7800_v35 = vrot.slane %v16450_v42, 1 }
 0x719   :  { %v16447_v11 = vadd.f32 %v6489_v4, %v15946_v29  ;;  %v20236_v29 = vld [vmem:[#allocation63_spill] sm:$0xff]  ;;  %v7050_v5 = vshrl.u32 %v12012_v52, 16  ;;  %v8264_v49 = vrot.slane %v7046_v28, 2 }
 0x71a   :  { %20229 = vst [vmem:[#allocation151_spill] sm:$0xff] %v16440_v58  ;;  %v4055_v40 = vpop.f32.mrf.mxu3  ;;  %v20238_v58 = vld [vmem:[#allocation52_spill] sm:$0xff] }
 0x71b   :  { %v4155_v15 = vadd.f32 %v4055_v40, %v3554_v6  ;;  %20232 = vst [vmem:[#allocation154_spill] sm:$0xff] %v16447_v11  ;;  %v20235_v6 = vld [vmem:[#allocation38_spill] sm:$0xff]  ;;  %v20237_v40 = vshrl.u32 %v20236_v29, 16 }
 0x71c   :  { %v20239_v29 = vld [vmem:[#allocation178_spill] sm:$0xff] }
 0x71d   :  { %v5225_v16 = vadd.f32 %v15951_v30, %v4155_v15  ;;  %v7044_v4 = vor.u32 %v20237_v40, %v20235_v6  ;;  %v6179_v30 = vor.u32 %v6177_v62, %v6175_v18  ;;  %v16460_v15 = vpop.f32.mrf.mxu0 }
 0x71f   :  { %v5568_v63 = vpop.f32.mrf.mxu1  ;;  %v6184_v11 = vsel %vm5988_vm6, %v6179_v30, %v6183_v31 }
 0x720   :  { %v16452_v32 = vadd.f32 %v5568_v63, %v5225_v16  ;;  %v6491_v13 = vpop.f32.mrf.mxu2 }
 0x721   :  { %v16463_v63 = vadd.f32 %v6491_v13, %v15957_v7  ;;  %v20241_v7 = vld [vmem:[#allocation213_spill] sm:$0xff] }
 0x722   :  { %20233 = vst [vmem:[#allocation53_spill] sm:$0xff] %v16452_v32  ;;  %v4057_v57 = vpop.f32.mrf.mxu3  ;;  %8527 = vmatmul.bf16.gmra.mxu1 %v20238_v58  ;;  %v7048_v32 = vrot.slane %v7046_v28, 1  ;;  %v7801_v58 = vsel %vm7752_vm8, %v7798_v59, %v7800_v35  ;;  %v3559_v42 = vadd.f32 %v15982_v22, %v20241_v7  ;;  %v12013_v22 = vld [vmem:[#allocation2 + $0x40] sm:$0xff]  ;;  %v6185_v28 = vshrl.u32 %v10718_v27, 16 }
 0x723   :  { %v4156_v16 = vadd.f32 %v4057_v57, %v3556_v17  ;;  %v8263_v17 = vrot.slane %v7050_v5, 1 }
 0x724   :  { %v7049_v50 = vsel %vm5988_vm6, %v7044_v4, %v7048_v32  ;;  %v10719_v4 = vld [vmem:[#allocation2 + $0xd8] sm:$0xff] }
 0x725   :  { %v5226_v6 = vadd.f32 %v20239_v29, %v4156_v16  ;;  %6533 = vmatmul.bf16.gmra.mxu2 %v6184_v11  ;;  %v16477_v30 = vpop.f32.mrf.mxu0  ;;  %v8265_v11 = vor.u32 %v8264_v49, %v8263_v17  ;;  %v7052_v17 = vor.u32 %v7050_v5, %v7048_v32  ;;  %v20249_v5 = vld [vmem:[#allocation215_spill] sm:$0xff] }
 0x726   :  { %20242 = vst [vmem:[#allocation155_spill] sm:$0xff] %v16477_v30 }
 0x727   :  { %7458 = vmatmul.bf16.gmra.mxu3 %v7049_v50  ;;  %v5570_v18 = vpop.f32.mrf.mxu1  ;;  %v16480_v50 = vld [vmem:[#allocation2 + $0xe0] sm:$0xff] }
 0x728   :  { %8048 = vmatmul.bf16.gmra.mxu0 %v7801_v58  ;;  %v16470_v62 = vadd.f32 %v5570_v18, %v5226_v6  ;;  %v6494_v57 = vpop.f32.mrf.mxu2  ;;  %v7054_v6 = vshll.u32 %v12013_v22, 16  ;;  %v6189_v58 = vshll.u32 %v10719_v4, 16  ;;  %v20244_v18 = vld [vmem:[#allocation214_spill] sm:$0xff] }
 0x729   :  { %v16475_v40 = vadd.f32 %v6494_v57, %v15969_v26  ;;  %v3561_v7 = vadd.f32 %v15994_v12, %v20244_v18  ;;  %v20245_v26 = vld [vmem:[#allocation49_spill] sm:$0xff]  ;;  %v20246_v18 = vld [vmem:[#allocation190_spill] sm:$0xff] }
 0x72a   :  { %20240 = vst [vmem:[#allocation153_spill] sm:$0xff] %v16470_v62  ;;  %v4060_v52 = vpop.f32.mrf.mxu3  ;;  %v6191_v27 = vrot.slane %v6189_v58, 1  ;;  %v8268_v58 = vrot.slane %v7054_v6, 2 }
 0x72b   :  { %v4157_v13 = vadd.f32 %v4060_v52, %v3559_v42  ;;  %v8266_v42 = vsel %vm8242_vm7, %v20245_v26, %v8265_v11 }
 0x72d   :  { %v5227_v59 = vadd.f32 %v15974_v55, %v4157_v13  ;;  %v6187_v55 = vor.u32 %v6185_v28, %v6183_v31  ;;  %v16495_v30 = vpop.f32.mrf.mxu0 }
 0x72e   :  { %20247 = vst [vmem:[#allocation34_spill] sm:$0xff] %v16495_v30 }
 0x72f   :  { %v5573_v16 = vpop.f32.mrf.mxu1  ;;  %v6192_v12 = vsel %vm5988_vm6, %v6187_v55, %v6191_v27  ;;  %v10720_v55 = vld [vmem:[#allocation2 + $0xe0] sm:$0xff] }
 0x730   :  { %v16482_v29 = vadd.f32 %v5573_v16, %v5227_v59  ;;  %v6496_v57 = vpop.f32.mrf.mxu2  ;;  %v7802_v59 = vrot.slane %v16480_v50, 1  ;;  %v7056_v16 = vrot.slane %v7054_v6, 1  ;;  %v20250_v50 = vld [vmem:[#allocation216_spill] sm:$0xff]  ;;  %v20255_v6 = vld [vmem:[#allocation217_spill] sm:$0xff] }
 0x731   :  { %v16489_v13 = vadd.f32 %v6496_v57, %v15980_v23  ;;  %v3564_v28 = vadd.f32 %v20250_v50, %v20249_v5  ;;  %v20251_v57 = vld [vmem:[#allocation32_spill] sm:$0xff]  ;;  %v6193_v5 = vshrl.u32 %v10719_v4, 16  ;;  %v6197_v50 = vshll.u32 %v10720_v55, 16 }
 0x732   :  { %20243 = vst [vmem:[#allocation152_spill] sm:$0xff] %v16482_v29  ;;  %v4062_v52 = vpop.f32.mrf.mxu3  ;;  %8532 = vmatmul.bf16.gmra.mxu1 %v8266_v42  ;;  %v7058_v29 = vshrl.u32 %v12013_v22, 16  ;;  %v7057_v62 = vsel %vm5988_vm6, %v7052_v17, %v7056_v16  ;;  %v7803_v31 = vsel %vm7752_vm8, %v7800_v35, %v7802_v59 }
 0x733   :  { %v4158_v49 = vadd.f32 %v4062_v52, %v3561_v7 }
 0x734   :  { %v8267_v22 = vrot.slane %v7058_v29, 1 }
 0x735   :  { %v5228_v26 = vadd.f32 %v20246_v18, %v4158_v49  ;;  %6538 = vmatmul.bf16.gmra.mxu2 %v6192_v12  ;;  %v20253_v49 = vld [vmem:[#allocation185_spill] sm:$0xff]  ;;  %v16506_v18 = vld [vmem:[#allocation2 + $0xe8] sm:$0xff] }
 0x737   :  { %7463 = vmatmul.bf16.gmra.mxu3 %v7057_v62  ;;  %v5575_v32 = vpop.f32.mrf.mxu1  ;;  %v8269_v62 = vor.u32 %v8268_v58, %v8267_v22  ;;  %v7060_v58 = vor.u32 %v7058_v29, %v7056_v16 }
 0x738   :  { %8053 = vmatmul.bf16.gmra.mxu0 %v7803_v31  ;;  %v16498_v23 = vadd.f32 %v5575_v32, %v5228_v26  ;;  %v6499_v42 = vpop.f32.mrf.mxu2  ;;  %v12014_v31 = vld [vmem:[#allocation2 + $0x48] sm:$0xff] }
 0x739   :  { %v16503_v17 = vadd.f32 %v6499_v42, %v20251_v57  ;;  %v7062_v32 = vshll.u32 %v12014_v31, 16 }
 0x73a   :  { %20248 = vst [vmem:[#allocation156_spill] sm:$0xff] %v16498_v23  ;;  %v4065_v7 = vpop.f32.mrf.mxu3  ;;  %v3566_v23 = vadd.f32 %v16017_v60, %v20255_v6 }
 0x73b   :  { %v4159_v52 = vadd.f32 %v4065_v7, %v3564_v28  ;;  %20252 = vst [vmem:[#allocation158_spill] sm:$0xff] %v16503_v17  ;;  %v16512_v28 = vpop.f32.mrf.mxu0  ;;  %v8270_v7 = vsel %vm8242_vm7, %v8265_v11, %v8269_v62  ;;  %v7064_v4 = vrot.slane %v7062_v32, 1  ;;  %v7066_v17 = vshrl.u32 %v12014_v31, 16 }
 0x73c   :  { %20256 = vst [vmem:[#allocation161_spill] sm:$0xff] %v16512_v28  ;;  %v20259_v28 = vld [vmem:[#allocation221_spill] sm:$0xff] }
 0x73d   :  { %v5229_v12 = vadd.f32 %v20253_v49, %v4159_v52  ;;  %v6195_v52 = vor.u32 %v6193_v5, %v6191_v27  ;;  %v20257_v49 = vld [vmem:[#allocation194_spill] sm:$0xff]  ;;  %v7065_v60 = vsel %vm5988_vm6, %v7060_v58, %v7064_v4  ;;  %v20262_v5 = vld [vmem:[#allocation255_spill] sm:$0xff] }
 0x73f   :  { %v5578_v35 = vpop.f32.mrf.mxu1 }
 0x740   :  { %v16508_v26 = vadd.f32 %v5578_v35, %v5229_v12  ;;  %v6501_v22 = vpop.f32.mrf.mxu2  ;;  %v7804_v35 = vrot.slane %v16506_v18, 1 }
 0x741   :  { %v16516_v12 = vadd.f32 %v6501_v22, %v20257_v49 }
 0x742   :  { %20254 = vst [vmem:[#allocation157_spill] sm:$0xff] %v16508_v26  ;;  %v4067_v42 = vpop.f32.mrf.mxu3  ;;  %8537 = vmatmul.bf16.gmra.mxu1 %v8270_v7  ;;  %v6199_v26 = vrot.slane %v6197_v50, 1  ;;  %v7805_v29 = vsel %vm7752_vm8, %v7802_v59, %v7804_v35  ;;  %v8271_v7 = vrot.slane %v7066_v17, 1  ;;  %v8272_v50 = vrot.slane %v7062_v32, 2  ;;  %v20266_v59 = vld [vmem:[#allocation220_spill] sm:$0xff] }
 0x743   :  { %v4160_v57 = vadd.f32 %v4067_v42, %v3566_v23  ;;  %20258 = vst [vmem:[#allocation135_spill] sm:$0xff] %v16516_v12  ;;  %v20261_v23 = vld [vmem:[#allocation219_spill] sm:$0xff]  ;;  %v16527_v22 = vpop.f32.mrf.mxu0  ;;  %v6201_v32 = vshrl.u32 %v10720_v55, 16  ;;  %v20269_v12 = vld [vmem:[#allocation226_spill] sm:$0xff] }
 0x744   :  { %v6200_v6 = vsel %vm5988_vm6, %v6195_v52, %v6199_v26  ;;  %v3569_v18 = vadd.f32 %v20262_v5, %v20261_v23  ;;  %20263 = vst [vmem:[#allocation162_spill] sm:$0xff] %v16527_v22  ;;  %v20264_v52 = vld [vmem:[#allocation218_spill] sm:$0xff]  ;;  %v8273_v49 = vor.u32 %v8272_v50, %v8271_v7 }
 0x745   :  { %v5230_v11 = vadd.f32 %v20259_v28, %v4160_v57  ;;  %6543 = vmatmul.bf16.gmra.mxu2 %v6200_v6  ;;  %v10721_v57 = vld [vmem:[#allocation2 + $0xe8] sm:$0xff]  ;;  %v6203_v7 = vor.u32 %v6201_v32, %v6199_v26 }
 0x746   :  { %v6205_v5 = vshll.u32 %v10721_v57, 16 }
 0x747   :  { %7468 = vmatmul.bf16.gmra.mxu3 %v7065_v60  ;;  %v5580_v16 = vpop.f32.mrf.mxu1 }
 0x748   :  { %8058 = vmatmul.bf16.gmra.mxu0 %v7805_v29  ;;  %v16523_v27 = vadd.f32 %v5580_v16, %v5230_v11  ;;  %v6504_v42 = vpop.f32.mrf.mxu2  ;;  %v16533_v11 = vld [vmem:[#allocation2 + $0xf0] sm:$0xff] }
 0x749   :  { %v16530_v28 = vadd.f32 %v6504_v42, %v20264_v52  ;;  %v12015_v16 = vld [vmem:[#allocation2 + $0x50] sm:$0xff]  ;;  %v7068_v52 = vor.u32 %v7066_v17, %v7064_v4 }
 0x74a   :  { %20260 = vst [vmem:[#allocation160_spill] sm:$0xff] %v16523_v27  ;;  %v4070_v31 = vpop.f32.mrf.mxu3  ;;  %v7070_v23 = vshll.u32 %v12015_v16, 16  ;;  %v20268_v27 = vld [vmem:[#allocation223_spill] sm:$0xff] }
 0x74b   :  { %v4161_v58 = vadd.f32 %v4070_v31, %v3569_v18  ;;  %20265 = vst [vmem:[#allocation159_spill] sm:$0xff] %v16530_v28  ;;  %v3571_v22 = vadd.f32 %v20269_v12, %v20268_v27  ;;  %v8274_v18 = vsel %vm8242_vm7, %v8269_v62, %v8273_v49  ;;  %v16544_v55 = vpop.f32.mrf.mxu0  ;;  %v7074_v28 = vshrl.u32 %v12015_v16, 16  ;;  %v20271_v27 = vld [vmem:[#allocation227_spill] sm:$0xff] }
 0x74d   :  { %v5231_v60 = vadd.f32 %v20266_v59, %v4161_v58  ;;  %v20270_v58 = vld [vmem:[#allocation222_spill] sm:$0xff] }
 0x74f   :  { %v5583_v6 = vpop.f32.mrf.mxu1 }
 0x750   :  { %v16535_v29 = vadd.f32 %v5583_v6, %v5231_v60  ;;  %v6506_v42 = vpop.f32.mrf.mxu2  ;;  %v7806_v60 = vrot.slane %v16533_v11, 1  ;;  %v7072_v6 = vrot.slane %v7070_v23, 1  ;;  %v20274_v11 = vld [vmem:[#allocation257_spill] sm:$0xff] }
 0x751   :  { %v16541_v59 = vadd.f32 %v6506_v42, %v20270_v58 }
 0x752   :  { %20267 = vst [vmem:[#allocation86_spill] sm:$0xff] %v16535_v29  ;;  %v4072_v31 = vpop.f32.mrf.mxu3  ;;  %8542 = vmatmul.bf16.gmra.mxu1 %v8274_v18  ;;  %v6207_v29 = vrot.slane %v6205_v5, 1  ;;  %v7073_v12 = vsel %vm5988_vm6, %v7068_v52, %v7072_v6  ;;  %v7807_v17 = vsel %vm7752_vm8, %v7804_v35, %v7806_v60  ;;  %v8275_v5 = vrot.slane %v7074_v28, 1  ;;  %v20275_v52 = vld [vmem:[#allocation224_spill] sm:$0xff] }
 0x753   :  { %v4162_v50 = vadd.f32 %v4072_v31, %v3571_v22  ;;  %v20273_v22 = vld [vmem:[#allocation225_spill] sm:$0xff]  ;;  %v8276_v18 = vrot.slane %v7070_v23, 2  ;;  %v16558_v35 = vpop.f32.mrf.mxu0  ;;  %v6209_v23 = vshrl.u32 %v10721_v57, 16 }
 0x754   :  { %v6208_v62 = vsel %vm5988_vm6, %v6203_v7, %v6207_v29  ;;  %v3574_v32 = vadd.f32 %v20274_v11, %v20273_v22  ;;  %20278 = vst [vmem:[#allocation168_spill] sm:$0xff] %v16558_v35 }
 0x755   :  { %v5232_v30 = vadd.f32 %v20271_v27, %v4162_v50  ;;  %6548 = vmatmul.bf16.gmra.mxu2 %v6208_v62  ;;  %v10722_v50 = vld [vmem:[#allocation2 + $0xf0] sm:$0xff]  ;;  %v8277_v58 = vor.u32 %v8276_v18, %v8275_v5  ;;  %v7076_v18 = vor.u32 %v7074_v28, %v7072_v6 }
 0x756   :  { %v6213_v11 = vshll.u32 %v10722_v50, 16 }
 0x757   :  { %7473 = vmatmul.bf16.gmra.mxu3 %v7073_v12  ;;  %v5585_v26 = vpop.f32.mrf.mxu1  ;;  %v20277_v12 = vld [vmem:[#allocation256_spill] sm:$0xff] }
 0x758   :  { %8063 = vmatmul.bf16.gmra.mxu0 %v7807_v17  ;;  %v16550_v4 = vadd.f32 %v5585_v26, %v5232_v30  ;;  %v6509_v31 = vpop.f32.mrf.mxu2  ;;  %v16560_v30 = vld [vmem:[#allocation2 + $0xf8] sm:$0xff] }
 0x759   :  { %v16555_v7 = vadd.f32 %v6509_v31, %v20275_v52  ;;  %v12016_v26 = vld [vmem:[#allocation2 + $0x58] sm:$0xff] }
 0x75a   :  { %20272 = vst [vmem:[#allocation163_spill] sm:$0xff] %v16550_v4  ;;  %v4075_v16 = vpop.f32.mrf.mxu3  ;;  %v7078_v22 = vshll.u32 %v12016_v26, 16  ;;  %v20280_v4 = vld [vmem:[#allocation229_spill] sm:$0xff]  ;;  %v7082_v57 = vshrl.u32 %v12016_v26, 16 }
 0x75b   :  { %v4163_v42 = vadd.f32 %v4075_v16, %v3574_v32  ;;  %20276 = vst [vmem:[#allocation164_spill] sm:$0xff] %v16555_v7  ;;  %v3576_v32 = vadd.f32 %v16063_v39, %v20280_v4  ;;  %v8278_v16 = vsel %vm8242_vm7, %v8273_v49, %v8277_v58  ;;  %v20283_v4 = vld [vmem:[#allocation233_spill] sm:$0xff] }
 0x75c   :  { %v8279_v26 = vrot.slane %v7082_v57, 1 }
 0x75d   :  { %v5233_v62 = vadd.f32 %v20277_v12, %v4163_v42  ;;  %v6211_v42 = vor.u32 %v6209_v23, %v6207_v29  ;;  %v20281_v12 = vld [vmem:[#allocation228_spill] sm:$0xff]  ;;  %v20285_v23 = vld [vmem:[#allocation231_spill] sm:$0xff] }
 0x75f   :  { %v5588_v27 = vpop.f32.mrf.mxu1 }
 0x760   :  { %v16562_v17 = vadd.f32 %v5588_v27, %v5233_v62  ;;  %v6511_v5 = vpop.f32.mrf.mxu2  ;;  %v7808_v62 = vrot.slane %v16560_v30, 1  ;;  %v7080_v27 = vrot.slane %v7078_v22, 1  ;;  %v3579_v30 = vadd.f32 %v16074_v46, %v20285_v23  ;;  %v12017_v46 = vld [vmem:[#allocation2 + $0x60] sm:$0xff] }
 0x761   :  { %v16568_v7 = vadd.f32 %v6511_v5, %v20281_v12 }
 0x762   :  { %20279 = vst [vmem:[#allocation20_spill] sm:$0xff] %v16562_v17  ;;  %v4077_v31 = vpop.f32.mrf.mxu3  ;;  %8547 = vmatmul.bf16.gmra.mxu1 %v8278_v16  ;;  %v6215_v17 = vrot.slane %v6213_v11, 1  ;;  %v7081_v35 = vsel %vm5988_vm6, %v7076_v18, %v7080_v27  ;;  %v7809_v28 = vsel %vm7752_vm8, %v7806_v60, %v7808_v62  ;;  %v8280_v11 = vrot.slane %v7078_v22, 2  ;;  %v20286_v18 = vld [vmem:[#allocation230_spill] sm:$0xff]  ;;  %v20288_v60 = vld [vmem:[#allocation232_spill] sm:$0xff]  ;;  %v20290_v22 = vld [vmem:[#allocation235_spill] sm:$0xff] }
 0x763   :  { %v4164_v52 = vadd.f32 %v4077_v31, %v3576_v32  ;;  %20282 = vst [vmem:[#allocation167_spill] sm:$0xff] %v16568_v7  ;;  %v16579_v32 = vpop.f32.mrf.mxu0 }
 0x764   :  { %v6216_v39 = vsel %vm5988_vm6, %v6211_v42, %v6215_v17 }
 0x765   :  { %v5234_v49 = vadd.f32 %v20283_v4, %v4164_v52  ;;  %6553 = vmatmul.bf16.gmra.mxu2 %v6216_v39  ;;  %v8281_v52 = vor.u32 %v8280_v11, %v8279_v26  ;;  %v16585_v4 = vld [vmem:[#allocation2 + $0x100] sm:$0xff] }
 0x767   :  { %7478 = vmatmul.bf16.gmra.mxu3 %v7081_v35  ;;  %v5590_v29 = vpop.f32.mrf.mxu1  ;;  %v10723_v35 = vld [vmem:[#allocation2 + $0xf8] sm:$0xff] }
 0x768   :  { %8068 = vmatmul.bf16.gmra.mxu0 %v7809_v28  ;;  %v16575_v6 = vadd.f32 %v5590_v29, %v5234_v49  ;;  %v6514_v31 = vpop.f32.mrf.mxu2  ;;  %v7086_v28 = vshll.u32 %v12017_v46, 16  ;;  %v6217_v29 = vshrl.u32 %v10722_v50, 16  ;;  %v6221_v23 = vshll.u32 %v10723_v35, 16 }
 0x769   :  { %v16582_v42 = vadd.f32 %v6514_v31, %v20286_v18  ;;  %v7084_v18 = vor.u32 %v7082_v57, %v7080_v27 }
 0x76a   :  { %20284 = vst [vmem:[#allocation172_spill] sm:$0xff] %v16575_v6  ;;  %v4080_v16 = vpop.f32.mrf.mxu3  ;;  %v3581_v6 = vadd.f32 %v16086_v54, %v20290_v22  ;;  %v6219_v26 = vor.u32 %v6217_v29, %v6215_v17  ;;  %v7088_v50 = vrot.slane %v7086_v28, 1  ;;  %v20292_v22 = vld [vmem:[#allocation234_spill] sm:$0xff]  ;;  %v8284_v29 = vrot.slane %v7086_v28, 2 }
 0x76b   :  { %v4165_v5 = vadd.f32 %v4080_v16, %v3579_v30  ;;  %20287 = vst [vmem:[#allocation166_spill] sm:$0xff] %v16582_v42  ;;  %v8282_v30 = vsel %vm8242_vm7, %v8277_v58, %v8281_v52  ;;  %v16592_v11 = vpop.f32.mrf.mxu0  ;;  %v7090_v42 = vshrl.u32 %v12017_v46, 16 }
 0x76c   :  { %v7089_v54 = vsel %vm5988_vm6, %v7084_v18, %v7088_v50 }
 0x76d   :  { %v5235_v12 = vadd.f32 %v20288_v60, %v4165_v5  ;;  %v20291_v60 = vld [vmem:[#allocation236_spill] sm:$0xff] }
 0x76f   :  { %v5593_v39 = vpop.f32.mrf.mxu1 }
 0x770   :  { %v16587_v49 = vadd.f32 %v5593_v39, %v5235_v12  ;;  %v6516_v31 = vpop.f32.mrf.mxu2  ;;  %v7810_v39 = vrot.slane %v16585_v4, 1 }
 0x771   :  { %v16595_v12 = vadd.f32 %v6516_v31, %v20291_v60  ;;  %v10724_v31 = vld [vmem:[#allocation2 + $0x100] sm:$0xff]  ;;  %v16611_v60 = vld [vmem:[#allocation2 + $0x108] sm:$0xff] }
 0x772   :  { %20289 = vst [vmem:[#allocation165_spill] sm:$0xff] %v16587_v49  ;;  %v4082_v16 = vpop.f32.mrf.mxu3  ;;  %8552 = vmatmul.bf16.gmra.mxu1 %v8282_v30  ;;  %v6223_v49 = vrot.slane %v6221_v23, 1  ;;  %v7811_v17 = vsel %vm7752_vm8, %v7808_v62, %v7810_v39  ;;  %v20294_v23 = vld [vmem:[#allocation238_spill] sm:$0xff] }
 0x773   :  { %v4166_v5 = vadd.f32 %v4082_v16, %v3581_v6  ;;  %v8283_v6 = vrot.slane %v7090_v42, 1  ;;  %v16608_v18 = vpop.f32.mrf.mxu0 }
 0x774   :  { %v6224_v58 = vsel %vm5988_vm6, %v6219_v26, %v6223_v49 }
 0x775   :  { %v5236_v7 = vadd.f32 %v20292_v22, %v4166_v5  ;;  %6558 = vmatmul.bf16.gmra.mxu2 %v6224_v58  ;;  %v8285_v26 = vor.u32 %v8284_v29, %v8283_v6  ;;  %v6225_v58 = vshrl.u32 %v10723_v35, 16  ;;  %v6229_v22 = vshll.u32 %v10724_v31, 16 }
 0x776   :  { %v7812_v29 = vrot.slane %v16611_v60, 1 }
 0x777   :  { %7483 = vmatmul.bf16.gmra.mxu3 %v7089_v54  ;;  %v5595_v27 = vpop.f32.mrf.mxu1  ;;  %v12018_v54 = vld [vmem:[#allocation2 + $0x68] sm:$0xff] }
 0x778   :  { %8073 = vmatmul.bf16.gmra.mxu0 %v7811_v17  ;;  %v16602_v57 = vadd.f32 %v5595_v27, %v5236_v7  ;;  %v6519_v30 = vpop.f32.mrf.mxu2  ;;  %v7094_v28 = vshll.u32 %v12018_v54, 16 }
 0x779   :  { %v16606_v16 = vadd.f32 %v6519_v30, %v20294_v23  ;;  %v6227_v30 = vor.u32 %v6225_v58, %v6223_v49  ;;  %v6231_v23 = vrot.slane %v6229_v22, 1 }
 0x77a   :  { %20293 = vst [vmem:[#allocation171_spill] sm:$0xff] %v16602_v57  ;;  %v7444_v4 = vpop.f32.mrf.mxu3 }
 0x77b   :  { %v7649_v46 = vadd.f32 %v7444_v4, %v16100_v44  ;;  %v8286_v44 = vsel %vm8242_vm7, %v8281_v52, %v8285_v26  ;;  %v7092_v4 = vor.u32 %v7090_v42, %v7088_v50  ;;  %v20296_v52 = vld [vmem:[#allocation237_spill] sm:$0xff]  ;;  %v8288_v50 = vrot.slane %v7094_v28, 2 }
 0x77d   :  { %v8139_v5 = vadd.f32 %v16089_v8, %v7649_v46  ;;  %v7096_v46 = vrot.slane %v7094_v28, 1 }
 0x77f   :  { %v8518_v62 = vpop.f32.mrf.mxu1  ;;  %v7097_v35 = vsel %vm5988_vm6, %v7092_v4, %v7096_v46 }
 0x780   :  { %v16613_v7 = vadd.f32 %v8518_v62, %v8139_v5  ;;  %v6521_v27 = vpop.f32.mrf.mxu2  ;;  %v7098_v5 = vshrl.u32 %v12018_v54, 16  ;;  %v6232_v62 = vsel %vm5988_vm6, %v6227_v30, %v6231_v23  ;;  %v16634_v30 = vld [vmem:[#allocation2 + $0x110] sm:$0xff] }
 0x781   :  { %v16618_v8 = vadd.f32 %v6521_v27, %v16095_v51 }
 0x782   :  { %20295 = vst [vmem:[#allocation35_spill] sm:$0xff] %v16613_v7  ;;  %v7446_v17 = vpop.f32.mrf.mxu3  ;;  %8557 = vmatmul.bf16.gmra.mxu1 %v8286_v44  ;;  %v16624_v7 = vpop.f32.mrf.mxu0  ;;  %v8287_v49 = vrot.slane %v7098_v5, 1  ;;  %v10725_v44 = vld [vmem:[#allocation2 + $0x108] sm:$0xff] }
 0x783   :  { %v7650_v6 = vadd.f32 %v7446_v17, %v16114_v36  ;;  %v7813_v36 = vsel %vm7752_vm8, %v7810_v39, %v7812_v29  ;;  %v6237_v28 = vshll.u32 %v10725_v44, 16 }
 0x784   :  { %v8289_v17 = vor.u32 %v8288_v50, %v8287_v49  ;;  %v20300_v49 = vld [vmem:[#allocation17_spill] sm:$0xff]  ;;  %v20301_v50 = vld [vmem:[#allocation239_spill] sm:$0xff] }
 0x785   :  { %v8140_v57 = vadd.f32 %v20296_v52, %v7650_v6  ;;  %6563 = vmatmul.bf16.gmra.mxu2 %v6232_v62 }
 0x787   :  { %7488 = vmatmul.bf16.gmra.mxu3 %v7097_v35  ;;  %v8520_v42 = vpop.f32.mrf.mxu1  ;;  %v6233_v35 = vshrl.u32 %v10724_v31, 16 }
 0x788   :  { %8078 = vmatmul.bf16.gmra.mxu0 %v7813_v36  ;;  %v16627_v51 = vadd.f32 %v8520_v42, %v8140_v57  ;;  %v6524_v54 = vpop.f32.mrf.mxu2  ;;  %v12019_v57 = vld [vmem:[#allocation2 + $0x70] sm:$0xff]  ;;  %v7100_v36 = vor.u32 %v7098_v5, %v7096_v46 }
 0x789   :  { %v16631_v22 = vadd.f32 %v6524_v54, %v16109_v41  ;;  %v7102_v6 = vshll.u32 %v12019_v57, 16  ;;  %v6235_v42 = vor.u32 %v6233_v35, %v6231_v23  ;;  %v7814_v54 = vrot.slane %v16634_v30, 1 }
 0x78a   :  { %20297 = vst [vmem:[#allocation19_spill] sm:$0xff] %v16627_v51  ;;  %v7449_v60 = vpop.f32.mrf.mxu3  ;;  %v16638_v62 = vpop.f32.mrf.mxu0  ;;  %v7106_v31 = vshrl.u32 %v12019_v57, 16  ;;  %v20305_v57 = vld [vmem:[#allocation244_spill] sm:$0xff] }
 0x78b   :  { %v7651_v58 = vadd.f32 %v7449_v60, %v16127_v0  ;;  %20298 = vst [vmem:[#allocation169_spill] sm:$0xff] %v16631_v22  ;;  %v8290_v0 = vsel %vm8242_vm7, %v8285_v26, %v8289_v17  ;;  %v20303_v26 = vld [vmem:[#allocation14_spill] sm:$0xff]  ;;  %v7815_v46 = vsel %vm7752_vm8, %v7812_v29, %v7814_v54 }
 0x78c   :  { %v8291_v35 = vrot.slane %v7106_v31, 1 }
 0x78d   :  { %v8141_v27 = vadd.f32 %v16116_v14, %v7651_v58  ;;  %v7104_v58 = vrot.slane %v7102_v6, 1 }
 0x78f   :  { %v8523_v4 = vpop.f32.mrf.mxu1  ;;  %v7108_v22 = vor.u32 %v7106_v31, %v7104_v58 }
 0x790   :  { %v16636_v39 = vadd.f32 %v8523_v4, %v8141_v27  ;;  %v6526_v41 = vpop.f32.mrf.mxu2  ;;  %v6239_v27 = vrot.slane %v6237_v28, 1  ;;  %v7105_v4 = vsel %vm5988_vm6, %v7100_v36, %v7104_v58  ;;  %v20306_v36 = vld [vmem:[#allocation16_spill] sm:$0xff] }
 0x791   :  { %v16643_v60 = vadd.f32 %v6526_v41, %v20301_v50 }
 0x792   :  { %20299 = vst [vmem:[#allocation174_spill] sm:$0xff] %v16636_v39  ;;  %v7451_v52 = vpop.f32.mrf.mxu3  ;;  %8562 = vmatmul.bf16.gmra.mxu1 %v8290_v0  ;;  %v6240_v39 = vsel %vm5988_vm6, %v6235_v42, %v6239_v27  ;;  %v8292_v0 = vrot.slane %v7102_v6, 2  ;;  %v16652_v28 = vpop.f32.mrf.mxu0 }
 0x793   :  { %v7652_v14 = vadd.f32 %v7451_v52, %v20300_v49  ;;  %20302 = vst [vmem:[#allocation170_spill] sm:$0xff] %v16643_v60  ;;  %v10726_v49 = vld [vmem:[#allocation2 + $0x110] sm:$0xff] }
 0x794   :  { %v6245_v6 = vshll.u32 %v10726_v49, 16 }
 0x795   :  { %v8142_v51 = vadd.f32 %v20303_v26, %v7652_v14  ;;  %6568 = vmatmul.bf16.gmra.mxu2 %v6240_v39  ;;  %v8293_v14 = vor.u32 %v8292_v0, %v8291_v35  ;;  %v20308_v39 = vld [vmem:[#allocation241_spill] sm:$0xff]  ;;  %v12021_v0 = vld [vmem:[#allocation2 + $0x118] sm:$0xff] }
 0x797   :  { %7493 = vmatmul.bf16.gmra.mxu3 %v7105_v4  ;;  %v8525_v23 = vpop.f32.mrf.mxu1 }
 0x798   :  { %8083 = vmatmul.bf16.gmra.mxu0 %v7815_v46  ;;  %v16650_v5 = vadd.f32 %v8525_v23, %v8142_v51  ;;  %v6529_v52 = vpop.f32.mrf.mxu2  ;;  %v12020_v51 = vld [vmem:[#allocation2 + $0x78] sm:$0xff]  ;;  %v6241_v46 = vshrl.u32 %v10725_v44, 16  ;;  %v8294_v23 = vsel %vm8242_vm7, %v8289_v17, %v8293_v14 }
 0x799   :  { %v16656_v42 = vadd.f32 %v6529_v52, %v20306_v36  ;;  %v7110_v26 = vshll.u32 %v12020_v51, 16  ;;  %v7114_v44 = vshrl.u32 %v12020_v51, 16 }
 0x79a   :  { %20304 = vst [vmem:[#allocation179_spill] sm:$0xff] %v16650_v5  ;;  %v7454_v30 = vpop.f32.mrf.mxu3 }
 0x79b   :  { %v7653_v41 = vadd.f32 %v7454_v30, %v20305_v57  ;;  %20307 = vst [vmem:[#allocation176_spill] sm:$0xff] %v16656_v42  ;;  %v6243_v30 = vor.u32 %v6241_v46, %v6239_v27  ;;  %v20310_v57 = vld [vmem:[#allocation22_spill] sm:$0xff]  ;;  %v7112_v36 = vrot.slane %v7110_v26, 1  ;;  %v8295_v31 = vrot.slane %v7114_v44, 1 }
 0x79d   :  { %v8143_v50 = vadd.f32 %v20308_v39, %v7653_v41  ;;  %v7816_v41 = vrot.slane %v12021_v0, 1  ;;  %v6247_v39 = vrot.slane %v6245_v6, 1 }
 0x79f   :  { %v8528_v29 = vpop.f32.mrf.mxu1  ;;  %v6248_v17 = vsel %vm5988_vm6, %v6243_v30, %v6247_v39  ;;  %v10727_v30 = vld [vmem:[#allocation2 + $0x118] sm:$0xff] }
 0x7a0   :  { %v16659_v4 = vadd.f32 %v8528_v29, %v8143_v50  ;;  %v6531_v60 = vpop.f32.mrf.mxu2  ;;  %v16666_v50 = vpop.f32.mrf.mxu0  ;;  %v7113_v29 = vsel %vm5988_vm6, %v7108_v22, %v7112_v36 }
 0x7a1   :  { %v16664_v35 = vadd.f32 %v6531_v60, %v20310_v57  ;;  %v20315_v57 = vld [vmem:[#allocation242_spill] sm:$0xff] }
 0x7a2   :  { %20309 = vst [vmem:[#allocation39_spill] sm:$0xff] %v16659_v4  ;;  %v7456_v5 = vpop.f32.mrf.mxu3  ;;  %8567 = vmatmul.bf16.gmra.mxu1 %v8294_v23  ;;  %v20312_v4 = vld [vmem:[#allocation240_spill] sm:$0xff]  ;;  %v20314_v23 = vld [vmem:[#allocation243_spill] sm:$0xff] }
 0x7a3   :  { %v7654_v52 = vadd.f32 %v7456_v5, %v16168_v20  ;;  %20311 = vst [vmem:[#allocation175_spill] sm:$0xff] %v16664_v35  ;;  %v7817_v20 = vsel %vm7752_vm8, %v7814_v54, %v7816_v41  ;;  %v8296_v5 = vrot.slane %v7110_v26, 2  ;;  %v6253_v26 = vshll.u32 %v10727_v30, 16 }
 0x7a5   :  { %v8144_v58 = vadd.f32 %v20312_v4, %v7654_v52  ;;  %6573 = vmatmul.bf16.gmra.mxu2 %v6248_v17  ;;  %v8297_v0 = vor.u32 %v8296_v5, %v8295_v31  ;;  %v20317_v4 = vld [vmem:[#allocation25_spill] sm:$0xff]  ;;  %v20319_v5 = vld [vmem:[#allocation246_spill] sm:$0xff] }
 0x7a7   :  { %7498 = vmatmul.bf16.gmra.mxu3 %v7113_v29  ;;  %v8530_v27 = vpop.f32.mrf.mxu1 }
 0x7a8   :  { %8088 = vmatmul.bf16.gmra.mxu0 %v7817_v20  ;;  %v16672_v60 = vadd.f32 %v8530_v27, %v8144_v58  ;;  %v6534_v6 = vpop.f32.mrf.mxu2  ;;  %v16679_v29 = vpop.f32.mrf.mxu0  ;;  %v12022_v58 = vld [vmem:[#allocation2 + $0x80] sm:$0xff]  ;;  %v6249_v27 = vshrl.u32 %v10726_v49, 16 }
 0x7a9   :  { %v16676_v22 = vadd.f32 %v6534_v6, %v20315_v57  ;;  %v7118_v20 = vshll.u32 %v12022_v58, 16  ;;  %v12023_v57 = vld [vmem:[#allocation2 + $0x120] sm:$0xff] }
 0x7aa   :  { %20313 = vst [vmem:[#allocation182_spill] sm:$0xff] %v16672_v60  ;;  %v7459_v46 = vpop.f32.mrf.mxu3  ;;  %v8298_v60 = vsel %vm8242_vm7, %v8293_v14, %v8297_v0  ;;  %v6251_v6 = vor.u32 %v6249_v27, %v6247_v39  ;;  %v20321_v14 = vld [vmem:[#allocation245_spill] sm:$0xff] }
 0x7ab   :  { %v7655_v51 = vadd.f32 %v7459_v46, %v20314_v23  ;;  %20316 = vst [vmem:[#allocation173_spill] sm:$0xff] %v16676_v22  ;;  %v7116_v23 = vor.u32 %v7114_v44, %v7112_v36 }
 0x7ad   :  { %v8145_v52 = vadd.f32 %v20317_v4, %v7655_v51  ;;  %v7818_v4 = vrot.slane %v12023_v57, 1 }
 0x7af   :  { %v8533_v54 = vpop.f32.mrf.mxu1  ;;  %v7819_v36 = vsel %vm7752_vm8, %v7816_v41, %v7818_v4 }
 0x7b0   :  { %v16681_v17 = vadd.f32 %v8533_v54, %v8145_v52  ;;  %v6536_v46 = vpop.f32.mrf.mxu2  ;;  %v7120_v52 = vrot.slane %v7118_v20, 1  ;;  %v6255_v54 = vrot.slane %v6253_v26, 1 }
 0x7b1   :  { %v16686_v51 = vadd.f32 %v6536_v46, %v20319_v5  ;;  %v20323_v46 = vld [vmem:[#allocation247_spill] sm:$0xff] }
 0x7b2   :  { %20318 = vst [vmem:[#allocation180_spill] sm:$0xff] %v16681_v17  ;;  %v7461_v35 = vpop.f32.mrf.mxu3  ;;  %8572 = vmatmul.bf16.gmra.mxu1 %v8298_v60  ;;  %v7122_v17 = vshrl.u32 %v12022_v58, 16  ;;  %v7121_v49 = vsel %vm5988_vm6, %v7116_v23, %v7120_v52  ;;  %v6256_v22 = vsel %vm5988_vm6, %v6251_v6, %v6255_v54  ;;  %v8300_v60 = vrot.slane %v7118_v20, 2  ;;  %v10728_v6 = vld [vmem:[#allocation2 + $0x120] sm:$0xff] }
 0x7b3   :  { %v7656_v31 = vadd.f32 %v7461_v35, %v16195_v53  ;;  %20320 = vst [vmem:[#allocation188_spill] sm:$0xff] %v16686_v51  ;;  %v16694_v35 = vpop.f32.mrf.mxu0 }
 0x7b4   :  { %v8299_v44 = vrot.slane %v7122_v17, 1  ;;  %v7124_v51 = vor.u32 %v7122_v17, %v7120_v52 }
 0x7b5   :  { %v8146_v42 = vadd.f32 %v20321_v14, %v7656_v31  ;;  %6578 = vmatmul.bf16.gmra.mxu2 %v6256_v22  ;;  %v20324_v22 = vld [vmem:[#allocation40_spill] sm:$0xff]  ;;  %v6257_v14 = vshrl.u32 %v10727_v30, 16 }
 0x7b6   :  { %v8301_v31 = vor.u32 %v8300_v60, %v8299_v44  ;;  %v20326_v60 = vld [vmem:[#allocation107_spill] sm:$0xff] }
 0x7b7   :  { %7503 = vmatmul.bf16.gmra.mxu3 %v7121_v49  ;;  %v8535_v39 = vpop.f32.mrf.mxu1 }
 0x7b8   :  { %8093 = vmatmul.bf16.gmra.mxu0 %v7819_v36  ;;  %v16692_v53 = vadd.f32 %v8535_v39, %v8146_v42  ;;  %v6539_v58 = vpop.f32.mrf.mxu2  ;;  %v12024_v42 = vld [vmem:[#allocation2 + $0x88] sm:$0xff]  ;;  %v6261_v36 = vshll.u32 %v10728_v6, 16  ;;  %v8302_v20 = vsel %vm8242_vm7, %v8297_v0, %v8301_v31 }
 0x7b9   :  { %v16698_v23 = vadd.f32 %v6539_v58, %v20323_v46  ;;  %v7126_v49 = vshll.u32 %v12024_v42, 16  ;;  %v7130_v30 = vshrl.u32 %v12024_v42, 16 }
 0x7ba   :  { %20322 = vst [vmem:[#allocation139_spill] sm:$0xff] %v16692_v53  ;;  %v7464_v27 = vpop.f32.mrf.mxu3 }
 0x7bb   :  { %v7657_v26 = vadd.f32 %v7464_v27, %v16208_v9  ;;  %v6259_v9 = vor.u32 %v6257_v14, %v6255_v54  ;;  %v16704_v27 = vpop.f32.mrf.mxu0  ;;  %v8304_v14 = vrot.slane %v7126_v49, 2 }
 0x7bd   :  { %v8147_v5 = vadd.f32 %v20324_v22, %v7657_v26  ;;  %v12025_v26 = vld [vmem:[#allocation2 + $0x128] sm:$0xff]  ;;  %v7128_v22 = vrot.slane %v7126_v49, 1 }
 0x7be   :  { %v7820_v46 = vrot.slane %v12025_v26, 1 }
 0x7bf   :  { %v8538_v41 = vpop.f32.mrf.mxu1 }
 0x7c0   :  { %v16701_v57 = vadd.f32 %v8538_v41, %v8147_v5  ;;  %v6541_v53 = vpop.f32.mrf.mxu2  ;;  %v6263_v5 = vrot.slane %v6261_v36, 1  ;;  %v7129_v41 = vsel %vm5988_vm6, %v7124_v51, %v7128_v22  ;;  %v7821_v52 = vsel %vm7752_vm8, %v7818_v4, %v7820_v46  ;;  %v10729_v36 = vld [vmem:[#allocation2 + $0x128] sm:$0xff] }
 0x7c1   :  { %v16708_v58 = vadd.f32 %v6541_v53, %v20326_v60  ;;  %v8303_v53 = vrot.slane %v7130_v30, 1  ;;  %v6269_v49 = vshll.u32 %v10729_v36, 16 }
 0x7c2   :  { %20325 = vst [vmem:[#allocation177_spill] sm:$0xff] %v16701_v57  ;;  %v7466_v39 = vpop.f32.mrf.mxu3  ;;  %8577 = vmatmul.bf16.gmra.mxu1 %v8302_v20  ;;  %v6264_v0 = vsel %vm5988_vm6, %v6259_v9, %v6263_v5  ;;  %v20328_v57 = vld [vmem:[#allocation31_spill] sm:$0xff] }
 0x7c3   :  { %v7658_v44 = vadd.f32 %v7466_v39, %v16222_v25  ;;  %20327 = vst [vmem:[#allocation183_spill] sm:$0xff] %v16708_v58  ;;  %v16720_v9 = vpop.f32.mrf.mxu0 }
 0x7c5   :  { %v8148_v17 = vadd.f32 %v20328_v57, %v7658_v44  ;;  %6583 = vmatmul.bf16.gmra.mxu2 %v6264_v0  ;;  %v8305_v57 = vor.u32 %v8304_v14, %v8303_v53  ;;  %v20331_v44 = vld [vmem:[#allocation12_spill] sm:$0xff]  ;;  %v12027_v14 = vld [vmem:[#allocation2 + $0x130] sm:$0xff] }
 0x7c7   :  { %7508 = vmatmul.bf16.gmra.mxu3 %v7129_v41  ;;  %v8540_v54 = vpop.f32.mrf.mxu1  ;;  %v12026_v41 = vld [vmem:[#allocation2 + $0x90] sm:$0xff] }
 0x7c8   :  { %8098 = vmatmul.bf16.gmra.mxu0 %v7821_v52  ;;  %v16714_v25 = vadd.f32 %v8540_v54, %v8148_v17  ;;  %v6544_v39 = vpop.f32.mrf.mxu2  ;;  %v7134_v0 = vshll.u32 %v12026_v41, 16  ;;  %v6265_v17 = vshrl.u32 %v10728_v6, 16  ;;  %v8306_v52 = vsel %vm8242_vm7, %v8301_v31, %v8305_v57  ;;  %v20335_v31 = vld [vmem:[#allocation248_spill] sm:$0xff] }
 0x7c9   :  { %v16718_v51 = vadd.f32 %v6544_v39, %v16217_v19 }
 0x7ca   :  { %20329 = vst [vmem:[#allocation102_spill] sm:$0xff] %v16714_v25  ;;  %v7469_v20 = vpop.f32.mrf.mxu3  ;;  %v6267_v19 = vor.u32 %v6265_v17, %v6263_v5  ;;  %v20333_v25 = vld [vmem:[#allocation130_spill] sm:$0xff] }
 0x7cb   :  { %v7659_v42 = vadd.f32 %v7469_v20, %v16235_v37  ;;  %20330 = vst [vmem:[#allocation199_spill] sm:$0xff] %v16718_v51  ;;  %v7132_v20 = vor.u32 %v7130_v30, %v7128_v22  ;;  %v16733_v58 = vpop.f32.mrf.mxu0 }
 0x7cd   :  { %v8149_v60 = vadd.f32 %v20331_v44, %v7659_v42  ;;  %v7822_v42 = vrot.slane %v12027_v14, 1  ;;  %v7136_v44 = vrot.slane %v7134_v0, 1 }
 0x7cf   :  { %v8543_v4 = vpop.f32.mrf.mxu1  ;;  %v7137_v6 = vsel %vm5988_vm6, %v7132_v20, %v7136_v44  ;;  %v10730_v20 = vld [vmem:[#allocation2 + $0x130] sm:$0xff] }
 0x7d0   :  { %v16723_v26 = vadd.f32 %v8543_v4, %v8149_v60  ;;  %v6546_v37 = vpop.f32.mrf.mxu2  ;;  %v6271_v60 = vrot.slane %v6269_v49, 1  ;;  %v7138_v4 = vshrl.u32 %v12026_v41, 16  ;;  %v20337_v49 = vld [vmem:[#allocation30_spill] sm:$0xff] }
 0x7d1   :  { %v16728_v53 = vadd.f32 %v6546_v37, %v20333_v25  ;;  %v8308_v25 = vrot.slane %v7134_v0, 2 }
 0x7d2   :  { %20332 = vst [vmem:[#allocation209_spill] sm:$0xff] %v16723_v26  ;;  %v7471_v54 = vpop.f32.mrf.mxu3  ;;  %8582 = vmatmul.bf16.gmra.mxu1 %v8306_v52  ;;  %v6272_v26 = vsel %vm5988_vm6, %v6267_v19, %v6271_v60  ;;  %v8307_v30 = vrot.slane %v7138_v4, 1 }
 0x7d3   :  { %v7660_v39 = vadd.f32 %v7471_v54, %v16245_v43  ;;  %20334 = vst [vmem:[#allocation45_spill] sm:$0xff] %v16728_v53  ;;  %v7823_v43 = vsel %vm7752_vm8, %v7820_v46, %v7822_v42  ;;  %v20338_v54 = vld [vmem:[#allocation113_spill] sm:$0xff]  ;;  %v12028_v46 = vld [vmem:[#allocation2 + $0x98] sm:$0xff] }
 0x7d4   :  { %v8309_v19 = vor.u32 %v8308_v25, %v8307_v30  ;;  %v20344_v25 = vld [vmem:[#allocation23_spill] sm:$0xff] }
 0x7d5   :  { %v8150_v51 = vadd.f32 %v20335_v31, %v7660_v39  ;;  %6588 = vmatmul.bf16.gmra.mxu2 %v6272_v26  ;;  %v20340_v39 = vld [vmem:[#allocation28_spill] sm:$0xff]  ;;  %v7142_v31 = vshll.u32 %v12028_v46, 16 }
 0x7d6   :  { %v8310_v0 = vsel %vm8242_vm7, %v8305_v57, %v8309_v19  ;;  %v20346_v57 = vld [vmem:[#allocation21_spill] sm:$0xff] }
 0x7d7   :  { %7513 = vmatmul.bf16.gmra.mxu3 %v7137_v6  ;;  %v8545_v22 = vpop.f32.mrf.mxu1 }
 0x7d8   :  { %8103 = vmatmul.bf16.gmra.mxu0 %v7823_v43  ;;  %v16736_v5 = vadd.f32 %v8545_v22, %v8150_v51  ;;  %v6549_v41 = vpop.f32.mrf.mxu2  ;;  %v6273_v51 = vshrl.u32 %v10729_v36, 16  ;;  %v6277_v43 = vshll.u32 %v10730_v20, 16  ;;  %v16745_v22 = vpop.f32.mrf.mxu0  ;;  %v7146_v36 = vshrl.u32 %v12028_v46, 16  ;;  %v20349_v46 = vld [vmem:[#allocation124_spill] sm:$0xff] }
 0x7d9   :  { %v16740_v37 = vadd.f32 %v6549_v41, %v20338_v54  ;;  %20342 = vst [vmem:[#allocation212_spill] sm:$0xff] %v16745_v22  ;;  %v20343_v54 = vld [vmem:[#allocation29_spill] sm:$0xff] }
 0x7da   :  { %20336 = vst [vmem:[#allocation181_spill] sm:$0xff] %v16736_v5  ;;  %v7474_v17 = vpop.f32.mrf.mxu3  ;;  %v6275_v41 = vor.u32 %v6273_v51, %v6271_v60  ;;  %v8312_v51 = vrot.slane %v7142_v31, 2 }
 0x7db   :  { %v7661_v52 = vadd.f32 %v7474_v17, %v20337_v49  ;;  %20339 = vst [vmem:[#allocation43_spill] sm:$0xff] %v16740_v37  ;;  %v7140_v49 = vor.u32 %v7138_v4, %v7136_v44 }
 0x7dd   :  { %v8151_v14 = vadd.f32 %v20340_v39, %v7661_v52  ;;  %v12029_v39 = vld [vmem:[#allocation2 + $0x138] sm:$0xff] }
 0x7df   :  { %v8548_v26 = vpop.f32.mrf.mxu1 }
 0x7e0   :  { %v16743_v6 = vadd.f32 %v8548_v26, %v8151_v14  ;;  %v6551_v17 = vpop.f32.mrf.mxu2  ;;  %v7824_v14 = vrot.slane %v12029_v39, 1  ;;  %v7144_v26 = vrot.slane %v7142_v31, 1 }
 0x7e1   :  { %v16750_v52 = vadd.f32 %v6551_v17, %v20344_v25 }
 0x7e2   :  { %20341 = vst [vmem:[#allocation211_spill] sm:$0xff] %v16743_v6  ;;  %v7476_v5 = vpop.f32.mrf.mxu3  ;;  %8587 = vmatmul.bf16.gmra.mxu1 %v8310_v0  ;;  %v6279_v6 = vrot.slane %v6277_v43, 1  ;;  %v7145_v37 = vsel %vm5988_vm6, %v7140_v49, %v7144_v26  ;;  %v7825_v44 = vsel %vm7752_vm8, %v7822_v42, %v7824_v14  ;;  %v16758_v43 = vpop.f32.mrf.mxu0 }
 0x7e3   :  { %v7662_v30 = vadd.f32 %v7476_v5, %v20343_v54  ;;  %20345 = vst [vmem:[#allocation38_spill] sm:$0xff] %v16750_v52  ;;  %v8311_v5 = vrot.slane %v7146_v36, 1  ;;  %v20350_v54 = vld [vmem:[#allocation37_spill] sm:$0xff] }
 0x7e4   :  { %v6280_v53 = vsel %vm5988_vm6, %v6275_v41, %v6279_v6  ;;  %20348 = vst [vmem:[#allocation52_spill] sm:$0xff] %v16758_v43  ;;  %v7148_v43 = vor.u32 %v7146_v36, %v7144_v26 }
 0x7e5   :  { %v8152_v22 = vadd.f32 %v20346_v57, %v7662_v30  ;;  %6593 = vmatmul.bf16.gmra.mxu2 %v6280_v53  ;;  %v10731_v30 = vld [vmem:[#allocation2 + $0x138] sm:$0xff]  ;;  %v20352_v53 = vld [vmem:[#allocation249_spill] sm:$0xff] }
 0x7e6   :  { %v6285_v31 = vshll.u32 %v10731_v30, 16 }
 0x7e7   :  { %7518 = vmatmul.bf16.gmra.mxu3 %v7145_v37  ;;  %v8550_v60 = vpop.f32.mrf.mxu1  ;;  %v8313_v37 = vor.u32 %v8312_v51, %v8311_v5  ;;  %v12031_v51 = vld [vmem:[#allocation2 + $0x140] sm:$0xff] }
 0x7e8   :  { %8108 = vmatmul.bf16.gmra.mxu0 %v7825_v44  ;;  %v16756_v4 = vadd.f32 %v8550_v60, %v8152_v22  ;;  %v6554_v17 = vpop.f32.mrf.mxu2  ;;  %v12030_v22 = vld [vmem:[#allocation2 + $0xa0] sm:$0xff]  ;;  %v6281_v44 = vshrl.u32 %v10730_v20, 16 }
 0x7e9   :  { %v16762_v41 = vadd.f32 %v6554_v17, %v20350_v54  ;;  %v7150_v57 = vshll.u32 %v12030_v22, 16  ;;  %v8314_v60 = vsel %vm8242_vm7, %v8309_v19, %v8313_v37  ;;  %v20354_v17 = vld [vmem:[#allocation33_spill] sm:$0xff]  ;;  %v20355_v54 = vld [vmem:[#allocation36_spill] sm:$0xff]  ;;  %v7154_v20 = vshrl.u32 %v12030_v22, 16 }
 0x7ea   :  { %20347 = vst [vmem:[#allocation63_spill] sm:$0xff] %v16756_v4  ;;  %v7479_v0 = vpop.f32.mrf.mxu3 }
 0x7eb   :  { %v7663_v49 = vadd.f32 %v7479_v0, %v20349_v46  ;;  %20351 = vst [vmem:[#allocation178_spill] sm:$0xff] %v16762_v41  ;;  %v6283_v0 = vor.u32 %v6281_v44, %v6279_v6  ;;  %v20358_v41 = vld [vmem:[#allocation94_spill] sm:$0xff]  ;;  %v8316_v44 = vrot.slane %v7150_v57, 2 }
 0x7ed   :  { %v8153_v25 = vadd.f32 %v20352_v53, %v7663_v49  ;;  %v7826_v49 = vrot.slane %v12031_v51, 1  ;;  %v7152_v53 = vrot.slane %v7150_v57, 1 }
 0x7ef   :  { %v8553_v42 = vpop.f32.mrf.mxu1  ;;  %v7827_v6 = vsel %vm7752_vm8, %v7824_v14, %v7826_v49 }
 0x7f0   :  { %v16765_v39 = vadd.f32 %v8553_v42, %v8153_v25  ;;  %v6556_v52 = vpop.f32.mrf.mxu2  ;;  %v6287_v25 = vrot.slane %v6285_v31, 1  ;;  %v16772_v42 = vpop.f32.mrf.mxu0 }
 0x7f1   :  { %v16770_v5 = vadd.f32 %v6556_v52, %v20355_v54  ;;  %20357 = vst [vmem:[#allocation49_spill] sm:$0xff] %v16772_v42  ;;  %v20361_v54 = vld [vmem:[#allocation41_spill] sm:$0xff] }
 0x7f2   :  { %20353 = vst [vmem:[#allocation213_spill] sm:$0xff] %v16765_v39  ;;  %v7481_v4 = vpop.f32.mrf.mxu3  ;;  %8592 = vmatmul.bf16.gmra.mxu1 %v8314_v60  ;;  %v7153_v39 = vsel %vm5988_vm6, %v7148_v43, %v7152_v53  ;;  %v6288_v19 = vsel %vm5988_vm6, %v6283_v0, %v6287_v25  ;;  %v10732_v0 = vld [vmem:[#allocation2 + $0x140] sm:$0xff] }
 0x7f3   :  { %v7664_v46 = vadd.f32 %v7481_v4, %v20354_v17  ;;  %20356 = vst [vmem:[#allocation214_spill] sm:$0xff] %v16770_v5  ;;  %v8315_v4 = vrot.slane %v7154_v20, 1  ;;  %v20360_v17 = vld [vmem:[#allocation250_spill] sm:$0xff]  ;;  %v6293_v57 = vshll.u32 %v10732_v0, 16 }
 0x7f5   :  { %v8154_v26 = vadd.f32 %v20358_v41, %v7664_v46  ;;  %6598 = vmatmul.bf16.gmra.mxu2 %v6288_v19  ;;  %v8317_v51 = vor.u32 %v8316_v44, %v8315_v4  ;;  %v20363_v41 = vld [vmem:[#allocation26_spill] sm:$0xff]  ;;  %v20367_v44 = vld [vmem:[#allocation100_spill] sm:$0xff] }
 0x7f7   :  { %7523 = vmatmul.bf16.gmra.mxu3 %v7153_v39  ;;  %v8555_v36 = vpop.f32.mrf.mxu1 }
 0x7f8   :  { %8113 = vmatmul.bf16.gmra.mxu0 %v7827_v6  ;;  %v16778_v52 = vadd.f32 %v8555_v36, %v8154_v26  ;;  %v6559_v60 = vpop.f32.mrf.mxu2  ;;  %v16785_v46 = vpop.f32.mrf.mxu0  ;;  %v12032_v26 = vld [vmem:[#allocation2 + $0xa8] sm:$0xff]  ;;  %v6289_v36 = vshrl.u32 %v10731_v30, 16 }
 0x7f9   :  { %v16782_v43 = vadd.f32 %v6559_v60, %v20361_v54  ;;  %20364 = vst [vmem:[#allocation216_spill] sm:$0xff] %v16785_v46  ;;  %v7158_v6 = vshll.u32 %v12032_v26, 16  ;;  %v20366_v54 = vld [vmem:[#allocation44_spill] sm:$0xff] }
 0x7fa   :  { %20359 = vst [vmem:[#allocation190_spill] sm:$0xff] %v16778_v52  ;;  %v7484_v31 = vpop.f32.mrf.mxu3  ;;  %v8318_v52 = vsel %vm8242_vm7, %v8313_v37, %v8317_v51  ;;  %v6291_v60 = vor.u32 %v6289_v36, %v6287_v25  ;;  %v20369_v37 = vld [vmem:[#allocation13_spill] sm:$0xff] }
 0x7fb   :  { %v7665_v22 = vadd.f32 %v7484_v31, %v20360_v17  ;;  %20362 = vst [vmem:[#allocation215_spill] sm:$0xff] %v16782_v43  ;;  %v7156_v17 = vor.u32 %v7154_v20, %v7152_v53  ;;  %v8320_v36 = vrot.slane %v7158_v6, 2 }
 0x7fd   :  { %v8155_v39 = vadd.f32 %v20363_v41, %v7665_v22  ;;  %v12033_v41 = vld [vmem:[#allocation2 + $0x148] sm:$0xff] }
 0x7fe   :  { %v7828_v43 = vrot.slane %v12033_v41, 1 }
 0x7ff   :  { %v8558_v14 = vpop.f32.mrf.mxu1 }
 0x800   :  { %v16787_v19 = vadd.f32 %v8558_v14, %v8155_v39  ;;  %v6561_v31 = vpop.f32.mrf.mxu2  ;;  %v7160_v39 = vrot.slane %v7158_v6, 1  ;;  %v6295_v14 = vrot.slane %v6293_v57, 1  ;;  %v7829_v53 = vsel %vm7752_vm8, %v7826_v49, %v7828_v43  ;;  %v16800_v20 = vpop.f32.mrf.mxu0 }
 0x801   :  { %v16792_v22 = vadd.f32 %v6561_v31, %v20367_v44  ;;  %20371 = vst [vmem:[#allocation194_spill] sm:$0xff] %v16800_v20  ;;  %v20372_v31 = vld [vmem:[#allocation47_spill] sm:$0xff] }
 0x802   :  { %20365 = vst [vmem:[#allocation32_spill] sm:$0xff] %v16787_v19  ;;  %v7486_v5 = vpop.f32.mrf.mxu3  ;;  %8597 = vmatmul.bf16.gmra.mxu1 %v8318_v52  ;;  %v7162_v19 = vshrl.u32 %v12032_v26, 16  ;;  %v7161_v30 = vsel %vm5988_vm6, %v7156_v17, %v7160_v39  ;;  %v6296_v46 = vsel %vm5988_vm6, %v6291_v60, %v6295_v14 }
 0x803   :  { %v7666_v4 = vadd.f32 %v7486_v5, %v20366_v54  ;;  %20368 = vst [vmem:[#allocation185_spill] sm:$0xff] %v16792_v22  ;;  %v20373_v54 = vld [vmem:[#allocation253_spill] sm:$0xff] }
 0x804   :  { %v8319_v52 = vrot.slane %v7162_v19, 1  ;;  %v7164_v20 = vor.u32 %v7162_v19, %v7160_v39 }
 0x805   :  { %v8156_v42 = vadd.f32 %v20369_v37, %v7666_v4  ;;  %6603 = vmatmul.bf16.gmra.mxu2 %v6296_v46  ;;  %v10733_v4 = vld [vmem:[#allocation2 + $0x148] sm:$0xff]  ;;  %v20375_v46 = vld [vmem:[#allocation27_spill] sm:$0xff] }
 0x806   :  { %v8321_v44 = vor.u32 %v8320_v36, %v8319_v52  ;;  %v12035_v36 = vld [vmem:[#allocation2 + $0x150] sm:$0xff] }
 0x807   :  { %7528 = vmatmul.bf16.gmra.mxu3 %v7161_v30  ;;  %v8560_v25 = vpop.f32.mrf.mxu1 }
 0x808   :  { %8118 = vmatmul.bf16.gmra.mxu0 %v7829_v53  ;;  %v16798_v5 = vadd.f32 %v8560_v25, %v8156_v42  ;;  %v6564_v26 = vpop.f32.mrf.mxu2  ;;  %v12034_v42 = vld [vmem:[#allocation2 + $0xb0] sm:$0xff]  ;;  %v6297_v53 = vshrl.u32 %v10732_v0, 16  ;;  %v6301_v25 = vshll.u32 %v10733_v4, 16  ;;  %v8322_v6 = vsel %vm8242_vm7, %v8317_v51, %v8321_v44 }
 0x809   :  { %v16804_v60 = vadd.f32 %v6564_v26, %v20373_v54  ;;  %v7166_v37 = vshll.u32 %v12034_v42, 16  ;;  %v20377_v26 = vld [vmem:[#allocation18_spill] sm:$0xff]  ;;  %v20378_v54 = vld [vmem:[#allocation251_spill] sm:$0xff]  ;;  %v7170_v0 = vshrl.u32 %v12034_v42, 16 }
 0x80a   :  { %20370 = vst [vmem:[#allocation217_spill] sm:$0xff] %v16798_v5  ;;  %v7489_v57 = vpop.f32.mrf.mxu3 }
 0x80b   :  { %v7667_v17 = vadd.f32 %v7489_v57, %v20372_v31  ;;  %20374 = vst [vmem:[#allocation221_spill] sm:$0xff] %v16804_v60  ;;  %v6299_v57 = vor.u32 %v6297_v53, %v6295_v14  ;;  %v20380_v60 = vld [vmem:[#allocation254_spill] sm:$0xff]  ;;  %v8324_v53 = vrot.slane %v7166_v37, 2 }
 0x80d   :  { %v8157_v41 = vadd.f32 %v20375_v46, %v7667_v17  ;;  %v7830_v17 = vrot.slane %v12035_v36, 1  ;;  %v16814_v46 = vpop.f32.mrf.mxu0 }
 0x80f   :  { %v8563_v49 = vpop.f32.mrf.mxu1  ;;  %v7831_v39 = vsel %vm7752_vm8, %v7828_v43, %v7830_v17 }
 0x810   :  { %v16807_v30 = vadd.f32 %v8563_v49, %v8157_v41  ;;  %v6566_v22 = vpop.f32.mrf.mxu2  ;;  %v7168_v41 = vrot.slane %v7166_v37, 1  ;;  %v6303_v49 = vrot.slane %v6301_v25, 1  ;;  %v20382_v25 = vld [vmem:[#allocation51_spill] sm:$0xff] }
 0x811   :  { %v16812_v52 = vadd.f32 %v6566_v22, %v20378_v54  ;;  %v20383_v54 = vld [vmem:[#allocation252_spill] sm:$0xff] }
 0x812   :  { %20376 = vst [vmem:[#allocation219_spill] sm:$0xff] %v16807_v30  ;;  %v7491_v5 = vpop.f32.mrf.mxu3  ;;  %8602 = vmatmul.bf16.gmra.mxu1 %v8322_v6  ;;  %v7169_v30 = vsel %vm5988_vm6, %v7164_v20, %v7168_v41  ;;  %v6304_v51 = vsel %vm5988_vm6, %v6299_v57, %v6303_v49  ;;  %v10734_v57 = vld [vmem:[#allocation2 + $0x150] sm:$0xff] }
 0x813   :  { %v7668_v31 = vadd.f32 %v7491_v5, %v20377_v26  ;;  %20379 = vst [vmem:[#allocation255_spill] sm:$0xff] %v16812_v52  ;;  %v8323_v5 = vrot.slane %v7170_v0, 1  ;;  %v6309_v37 = vshll.u32 %v10734_v57, 16 }
 0x815   :  { %v8158_v19 = vadd.f32 %v20380_v60, %v7668_v31  ;;  %6608 = vmatmul.bf16.gmra.mxu2 %v6304_v51  ;;  %v8325_v36 = vor.u32 %v8324_v53, %v8323_v5  ;;  %v16826_v60 = vpop.f32.mrf.mxu0  ;;  %v20387_v53 = vld [vmem:[#allocation15_spill] sm:$0xff] }
 0x817   :  { %7533 = vmatmul.bf16.gmra.mxu3 %v7169_v30  ;;  %v8565_v14 = vpop.f32.mrf.mxu1  ;;  %v20385_v30 = vld [vmem:[#allocation71_spill] sm:$0xff] }
 0x818   :  { %8123 = vmatmul.bf16.gmra.mxu0 %v7831_v39  ;;  %v16820_v22 = vadd.f32 %v8565_v14, %v8158_v19  ;;  %v6569_v26 = vpop.f32.mrf.mxu2  ;;  %v12036_v19 = vld [vmem:[#allocation2 + $0xb8] sm:$0xff]  ;;  %v6305_v14 = vshrl.u32 %v10733_v4, 16  ;;  %v6311_v4 = vrot.slane %v6309_v37, 1 }
 0x819   :  { %v16824_v20 = vadd.f32 %v6569_v26, %v20383_v54  ;;  %v7174_v39 = vshll.u32 %v12036_v19, 16 }
 0x81a   :  { %20381 = vst [vmem:[#allocation218_spill] sm:$0xff] %v16820_v22  ;;  %v7494_v6 = vpop.f32.mrf.mxu3  ;;  %v8326_v22 = vsel %vm8242_vm7, %v8321_v44, %v8325_v36  ;;  %v6307_v26 = vor.u32 %v6305_v14, %v6303_v49 }
 0x81b   :  { %v7669_v42 = vadd.f32 %v7494_v6, %v20382_v25  ;;  %20384 = vst [vmem:[#allocation220_spill] sm:$0xff] %v16824_v20  ;;  %v7172_v25 = vor.u32 %v7170_v0, %v7168_v41  ;;  %v20389_v41 = vld [vmem:[#allocation81_spill] sm:$0xff]  ;;  %v8328_v37 = vrot.slane %v7174_v39, 2 }
 0x81c   :  { %v6312_v20 = vsel %vm5988_vm6, %v6307_v26, %v6311_v4 }
 0x81d   :  { %v8159_v31 = vadd.f32 %v20385_v30, %v7669_v42  ;;  %v16836_v42 = vld [vmem:[#allocation2 + $0x158] sm:$0xff] }
 0x81e   :  { %v18836_v30 = vrot.slane %v16836_v42, 1 }
 0x81f   :  { %v8568_v43 = vpop.f32.mrf.mxu1 }
 0x820   :  { %v16829_v51 = vadd.f32 %v8568_v43, %v8159_v31  ;;  %v6571_v6 = vpop.f32.mrf.mxu2  ;;  %v5762_v31 = vld [vmem:[#allocation2 + $0x158] sm:$0x1]  ;;  %v7176_v43 = vrot.slane %v7174_v39, 1 }
 0x821   :  { %v16834_v54 = vadd.f32 %v6571_v6, %v20387_v53  ;;  %v5945_v49 = vunpack.c.l.b16 %v5762_v31  ;;  %v20391_v31 = vld [vmem:[#allocation48_spill] sm:$0xff] }
 0x822   :  { %20386 = vst [vmem:[#allocation223_spill] sm:$0xff] %v16829_v51  ;;  %v7496_v52 = vpop.f32.mrf.mxu3  ;;  %8607 = vmatmul.bf16.gmra.mxu1 %v8326_v22  ;;  %v7178_v51 = vshrl.u32 %v12036_v19, 16  ;;  %v7177_v44 = vsel %vm5988_vm6, %v7172_v25, %v7176_v43  ;;  %v16845_v22 = vpop.f32.mrf.mxu0 }
 0x823   :  { %v7670_v5 = vadd.f32 %v7496_v52, %v16361_v38  ;;  %20388 = vst [vmem:[#allocation226_spill] sm:$0xff] %v16834_v54  ;;  %v7833_v38 = vsel %vm7752_vm8, %v7830_v17, %v18836_v30  ;;  %v5987_v26 = vpack.c.b16 %v5945_v49, %v5945_v49 }
 0x824   :  { %v8327_v19 = vrot.slane %v7178_v51, 1  ;;  %v7180_v49 = vor.u32 %v7178_v51, %v7176_v43 }
 0x825   :  { %v8160_v0 = vadd.f32 %v20389_v41, %v7670_v5  ;;  %6613 = vmatmul.bf16.gmra.mxu2 %v6312_v20  ;;  %v6317_v17 = vshll.u32 %v5987_v26, 16 }
 0x826   :  { %v8329_v20 = vor.u32 %v8328_v37, %v8327_v19  ;;  %v20392_v19 = vld [vmem:[#allocation65_spill] sm:$0xff] }
 0x827   :  { %7538 = vmatmul.bf16.gmra.mxu3 %v7177_v44  ;;  %v8570_v52 = vpop.f32.mrf.mxu1 }
 0x828   :  { %8128 = vmatmul.bf16.gmra.mxu0 %v7833_v38  ;;  %v16847_v14 = vadd.f32 %v8570_v52, %v8160_v0  ;;  %v6574_v25 = vpop.f32.mrf.mxu2  ;;  %v12038_v38 = vld [vmem:[#allocation2 + $0xc0] sm:$0xff]  ;;  %v6313_v52 = vshrl.u32 %v10734_v57, 16  ;;  %v8330_v39 = vsel %vm8242_vm7, %v8325_v36, %v8329_v20  ;;  %v20393_v57 = vld [vmem:[#allocation76_spill] sm:$0xff] }
 0x829   :  { %v16851_v53 = vadd.f32 %v6574_v25, %v16356_v24  ;;  %v7182_v0 = vshll.u32 %v12038_v38, 16  ;;  %v7186_v26 = vshrl.u32 %v12038_v38, 16 }
 0x82a   :  { %20390 = vst [vmem:[#allocation222_spill] sm:$0xff] %v16847_v14  ;;  %v7499_v6 = vpop.f32.mrf.mxu3 }
 0x82b   :  { %v7671_v5 = vadd.f32 %v7499_v6, %v16375_v45  ;;  %v6315_v45 = vor.u32 %v6313_v52, %v6311_v4  ;;  %v6319_v6 = vrot.slane %v6317_v17, 1  ;;  %v7184_v25 = vrot.slane %v7182_v0, 1 }
 0x82c   :  { %v8331_v43 = vrot.slane %v7186_v26, 1  ;;  %v8332_v4 = vrot.slane %v7182_v0, 2 }
 0x82d   :  { %v8161_v44 = vadd.f32 %v20391_v31, %v7671_v5  ;;  %v7185_v5 = vsel %vm5988_vm6, %v7180_v49, %v7184_v25  ;;  %v6320_v31 = vsel %vm5988_vm6, %v6315_v45, %v6319_v6  ;;  %v12039_v49 = vld [vmem:[#allocation2 + $0xc8] sm:$0xff]  ;;  %v7188_v0 = vor.u32 %v7186_v26, %v7184_v25 }
 0x82e   :  { %v7190_v45 = vshll.u32 %v12039_v49, 16 }
 0x82f   :  { %v8573_v41 = vpop.f32.mrf.mxu1 }
 0x830   :  { %v16854_v30 = vadd.f32 %v8573_v41, %v8161_v44  ;;  %v6576_v54 = vpop.f32.mrf.mxu2  ;;  %v8333_v41 = vor.u32 %v8332_v4, %v8331_v43  ;;  %v8336_v4 = vrot.slane %v7190_v45, 2 }
 0x831   :  { %v16859_v37 = vadd.f32 %v6576_v54, %v20392_v19 }
 0x832   :  { %v7501_v14 = vpop.f32.mrf.mxu3  ;;  %8612 = vmatmul.bf16.gmra.mxu1 %v8330_v39  ;;  %v8334_v6 = vsel %vm8242_vm7, %v8329_v20, %v8333_v41 }
 0x833   :  { %v7672_v24 = vadd.f32 %v7501_v14, %v16385_v34 }
 0x835   :  { %v8162_v44 = vadd.f32 %v20393_v57, %v7672_v24  ;;  %6618 = vmatmul.bf16.gmra.mxu2 %v6320_v31  ;;  %v7194_v31 = vshrl.u32 %v12039_v49, 16  ;;  %v20395_v57 = vld [vmem:[#allocation42_spill] sm:$0xff]  ;;  %v12040_v49 = vld [vmem:[#allocation2 + $0xd0] sm:$0xff] }
 0x837   :  { %7543 = vmatmul.bf16.gmra.mxu3 %v7185_v5  ;;  %v8575_v36 = vpop.f32.mrf.mxu1  ;;  %v8335_v20 = vrot.slane %v7194_v31, 1 }
 0x838   :  { %v16864_v51 = vadd.f32 %v8575_v36, %v8162_v44  ;;  %v6579_v34 = vpop.f32.mrf.mxu2 }
 0x839   :  { %v16868_v14 = vadd.f32 %v6579_v34, %v16380_v61  ;;  %v7192_v61 = vrot.slane %v7190_v45, 1 }
 0x83a   :  { %v7504_v17 = vpop.f32.mrf.mxu3 }
 0x83b   :  { %v7673_v54 = vadd.f32 %v7504_v17, %v16399_v33  ;;  %v7196_v45 = vor.u32 %v7194_v31, %v7192_v61  ;;  %v20400_v31 = vld [vmem:[#allocation154_spill] sm:$0xff] }
 0x83d   :  { %v8163_v38 = vadd.f32 %v16387_v47, %v7673_v54  ;;  %v7193_v47 = vsel %vm5988_vm6, %v7188_v0, %v7192_v61 }
 0x83f   :  { %v8578_v52 = vpop.f32.mrf.mxu1 }
 0x840   :  { %v16871_v39 = vadd.f32 %v8578_v52, %v8163_v38  ;;  %v6581_v19 = vpop.f32.mrf.mxu2 }
 0x841   :  { %v16876_v33 = vadd.f32 %v6581_v19, %v16394_v21  ;;  %v8337_v21 = vor.u32 %v8336_v4, %v8335_v20 }
 0x842   :  { %20394 = vst [vmem:[#allocation227_spill] sm:$0xff] %v16871_v39  ;;  %v7506_v24 = vpop.f32.mrf.mxu3  ;;  %8617 = vmatmul.bf16.gmra.mxu1 %v8334_v6  ;;  %v7198_v6 = vshll.u32 %v12040_v49, 16 }
 0x843   :  { %v7674_v5 = vadd.f32 %v7506_v24, %v16410_v1  ;;  %v20397_v1 = vld [vmem:[#allocation24_spill] sm:$0xff]  ;;  %v8338_v24 = vsel %vm8242_vm7, %v8333_v41, %v8337_v21 }
 0x844   :  { %v8340_v4 = vrot.slane %v7198_v6, 2 }
 0x845   :  { %v8164_v44 = vadd.f32 %v20395_v57, %v7674_v5  ;;  %v7202_v57 = vshrl.u32 %v12040_v49, 16 }
 0x847   :  { %7548 = vmatmul.bf16.gmra.mxu3 %v7193_v47  ;;  %v8580_v36 = vpop.f32.mrf.mxu1  ;;  %v7200_v47 = vrot.slane %v7198_v6, 1  ;;  %v8339_v41 = vrot.slane %v7202_v57, 1 }
 0x848   :  { %v16880_v43 = vadd.f32 %v8580_v36, %v8164_v44  ;;  %v6584_v25 = vpop.f32.mrf.mxu2 }
 0x849   :  { %v16884_v34 = vadd.f32 %v6584_v25, %v20397_v1  ;;  %v20402_v1 = vld [vmem:[#allocation150_spill] sm:$0xff]  ;;  %v7204_v6 = vor.u32 %v7202_v57, %v7200_v47 }
 0x84a   :  { %20396 = vst [vmem:[#allocation225_spill] sm:$0xff] %v16880_v43  ;;  %v7509_v17 = vpop.f32.mrf.mxu3 }
 0x84b   :  { %v7675_v26 = vadd.f32 %v7509_v17, %v16423_v3 }
 0x84d   :  { %v8165_v54 = vadd.f32 %v16412_v2, %v7675_v26  ;;  %v7201_v2 = vsel %vm5988_vm6, %v7196_v45, %v7200_v47 }
 0x84f   :  { %v8583_v38 = vpop.f32.mrf.mxu1 }
 0x850   :  { %v16887_v52 = vadd.f32 %v8583_v38, %v8165_v54  ;;  %v6586_v0 = vpop.f32.mrf.mxu2 }
 0x851   :  { %v16892_v3 = vadd.f32 %v6586_v0, %v16418_v10  ;;  %v8341_v10 = vor.u32 %v8340_v4, %v8339_v41 }
 0x852   :  { %20398 = vst [vmem:[#allocation257_spill] sm:$0xff] %v16887_v52  ;;  %v7511_v19 = vpop.f32.mrf.mxu3  ;;  %8622 = vmatmul.bf16.gmra.mxu1 %v8338_v24 }
 0x853   :  { %v7676_v5 = vadd.f32 %v7511_v19, %v16434_v56  ;;  %v20401_v56 = vld [vmem:[#allocation95_spill] sm:$0xff]  ;;  %v8342_v19 = vsel %vm8242_vm7, %v8337_v21, %v8341_v10 }
 0x855   :  { %v8166_v44 = vadd.f32 %v16426_v48, %v7676_v5  ;;  %v12041_v48 = vld [vmem:[#allocation2 + $0xd8] sm:$0xff] }
 0x856   :  { %v7206_v24 = vshll.u32 %v12041_v48, 16  ;;  %v7210_v41 = vshrl.u32 %v12041_v48, 16 }
 0x857   :  { %7553 = vmatmul.bf16.gmra.mxu3 %v7201_v2  ;;  %v8585_v36 = vpop.f32.mrf.mxu1  ;;  %v20404_v2 = vld [vmem:[#allocation151_spill] sm:$0xff] }
 0x858   :  { %v16896_v20 = vadd.f32 %v8585_v36, %v8166_v44  ;;  %v6589_v61 = vpop.f32.mrf.mxu2  ;;  %v7208_v36 = vrot.slane %v7206_v24, 1  ;;  %v8343_v21 = vrot.slane %v7210_v41, 1 }
 0x859   :  { %v16900_v26 = vadd.f32 %v6589_v61, %v20401_v56 }
 0x85a   :  { %20399 = vst [vmem:[#allocation224_spill] sm:$0xff] %v16896_v20  ;;  %v7514_v17 = vpop.f32.mrf.mxu3  ;;  %v7209_v4 = vsel %vm5988_vm6, %v7204_v6, %v7208_v36 }
 0x85b   :  { %v7677_v25 = vadd.f32 %v7514_v17, %v20400_v31 }
 0x85d   :  { %v8167_v54 = vadd.f32 %v20402_v1, %v7677_v25  ;;  %v8344_v25 = vrot.slane %v7206_v24, 2 }
 0x85f   :  { %v8588_v38 = vpop.f32.mrf.mxu1 }
 0x860   :  { %v16903_v49 = vadd.f32 %v8588_v38, %v8167_v54  ;;  %v6591_v45 = vpop.f32.mrf.mxu2  ;;  %v8345_v54 = vor.u32 %v8344_v25, %v8343_v21  ;;  %v20408_v38 = vld [vmem:[#allocation155_spill] sm:$0xff] }
 0x861   :  { %v16908_v44 = vadd.f32 %v6591_v45, %v20404_v2  ;;  %v7212_v2 = vor.u32 %v7210_v41, %v7208_v36  ;;  %v20413_v36 = vld [vmem:[#allocation161_spill] sm:$0xff] }
 0x862   :  { %20403 = vst [vmem:[#allocation256_spill] sm:$0xff] %v16903_v49  ;;  %v7516_v0 = vpop.f32.mrf.mxu3  ;;  %8627 = vmatmul.bf16.gmra.mxu1 %v8342_v19  ;;  %v8346_v6 = vsel %vm8242_vm7, %v8341_v10, %v8345_v54 }
 0x863   :  { %v7678_v5 = vadd.f32 %v7516_v0, %v16463_v63  ;;  %v20406_v63 = vld [vmem:[#allocation53_spill] sm:$0xff] }
 0x865   :  { %v8168_v17 = vadd.f32 %v16460_v15, %v7678_v5  ;;  %v12042_v15 = vld [vmem:[#allocation2 + $0xe0] sm:$0xff] }
 0x866   :  { %v7214_v45 = vshll.u32 %v12042_v15, 16 }
 0x867   :  { %7558 = vmatmul.bf16.gmra.mxu3 %v7209_v4  ;;  %v8590_v61 = vpop.f32.mrf.mxu1 }
 0x868   :  { %v16912_v31 = vadd.f32 %v8590_v61, %v8168_v17  ;;  %v6594_v47 = vpop.f32.mrf.mxu2  ;;  %v7216_v4 = vrot.slane %v7214_v45, 1  ;;  %v20410_v61 = vld [vmem:[#allocation34_spill] sm:$0xff] }
 0x869   :  { %v16916_v1 = vadd.f32 %v6594_v47, %v20406_v63 }
 0x86a   :  { %20405 = vst [vmem:[#allocation229_spill] sm:$0xff] %v16912_v31  ;;  %v7519_v56 = vpop.f32.mrf.mxu3  ;;  %v7217_v17 = vsel %vm5988_vm6, %v7212_v2, %v7216_v4 }
 0x86b   :  { %v7679_v57 = vadd.f32 %v7519_v56, %v16475_v40  ;;  %20407 = vst [vmem:[#allocation228_spill] sm:$0xff] %v16916_v1  ;;  %v7218_v40 = vshrl.u32 %v12042_v15, 16  ;;  %v12043_v15 = vld [vmem:[#allocation2 + $0xe8] sm:$0xff] }
 0x86d   :  { %v8169_v48 = vadd.f32 %v20408_v38, %v7679_v57  ;;  %v8347_v47 = vrot.slane %v7218_v40, 1  ;;  %v8348_v57 = vrot.slane %v7214_v45, 2  ;;  %v20412_v38 = vld [vmem:[#allocation158_spill] sm:$0xff]  ;;  %v7226_v45 = vshrl.u32 %v12043_v15, 16 }
 0x86f   :  { %v8593_v19 = vpop.f32.mrf.mxu1 }
 0x870   :  { %v16919_v0 = vadd.f32 %v8593_v19, %v8169_v48  ;;  %v8349_v48 = vor.u32 %v8348_v57, %v8347_v47 }
 0x872   :  { %20409 = vst [vmem:[#allocation233_spill] sm:$0xff] %v16919_v0  ;;  %v7521_v5 = vpop.f32.mrf.mxu3  ;;  %8632 = vmatmul.bf16.gmra.mxu1 %v8346_v6  ;;  %v7222_v6 = vshll.u32 %v12043_v15, 16  ;;  %v12044_v15 = vld [vmem:[#allocation2 + $0xf0] sm:$0xff] }
 0x873   :  { %v7680_v24 = vadd.f32 %v7521_v5, %v16489_v13  ;;  %v8350_v5 = vsel %vm8242_vm7, %v8345_v54, %v8349_v48 }
 0x875   :  { %v8170_v21 = vadd.f32 %v20410_v61, %v7680_v24  ;;  %v7220_v24 = vor.u32 %v7218_v40, %v7216_v4 }
 0x877   :  { %7563 = vmatmul.bf16.gmra.mxu3 %v7217_v17  ;;  %v8595_v25 = vpop.f32.mrf.mxu1  ;;  %v20415_v17 = vld [vmem:[#allocation135_spill] sm:$0xff] }
 0x878   :  { %v16925_v56 = vadd.f32 %v8595_v25, %v8170_v21  ;;  %v7224_v21 = vrot.slane %v7222_v6, 1 }
 0x87a   :  { %20411 = vst [vmem:[#allocation231_spill] sm:$0xff] %v16925_v56  ;;  %v7524_v63 = vpop.f32.mrf.mxu3  ;;  %v7225_v25 = vsel %vm5988_vm6, %v7220_v24, %v7224_v21 }
 0x87b   :  { %v7681_v10 = vadd.f32 %v7524_v63, %v20412_v38  ;;  %v20416_v63 = vld [vmem:[#allocation162_spill] sm:$0xff] }
 0x87d   :  { %v8171_v41 = vadd.f32 %v20413_v36, %v7681_v10  ;;  %v8351_v10 = vrot.slane %v7226_v45, 1  ;;  %v8352_v36 = vrot.slane %v7222_v6, 2  ;;  %v7234_v6 = vshrl.u32 %v12044_v15, 16 }
 0x87f   :  { %v8598_v19 = vpop.f32.mrf.mxu1  ;;  %v8353_v1 = vor.u32 %v8352_v36, %v8351_v10 }
 0x880   :  { %v16929_v13 = vadd.f32 %v8598_v19, %v8171_v41  ;;  %v20418_v19 = vld [vmem:[#allocation159_spill] sm:$0xff] }
 0x881   :  { %v8354_v24 = vsel %vm8242_vm7, %v8349_v48, %v8353_v1 }
 0x882   :  { %20414 = vst [vmem:[#allocation230_spill] sm:$0xff] %v16929_v13  ;;  %v7526_v2 = vpop.f32.mrf.mxu3  ;;  %8637 = vmatmul.bf16.gmra.mxu1 %v8350_v5 }
 0x883   :  { %v7682_v61 = vadd.f32 %v7526_v2, %v20415_v17  ;;  %v7230_v2 = vshll.u32 %v12044_v15, 16  ;;  %v12045_v15 = vld [vmem:[#allocation2 + $0xf8] sm:$0xff] }
 0x885   :  { %v8172_v47 = vadd.f32 %v20416_v63, %v7682_v61  ;;  %v7228_v61 = vor.u32 %v7226_v45, %v7224_v21  ;;  %v7232_v63 = vrot.slane %v7230_v2, 1 }
 0x887   :  { %7568 = vmatmul.bf16.gmra.mxu3 %v7225_v25  ;;  %v8600_v57 = vpop.f32.mrf.mxu1 }
 0x888   :  { %v16935_v38 = vadd.f32 %v8600_v57, %v8172_v47  ;;  %v7233_v47 = vsel %vm5988_vm6, %v7228_v61, %v7232_v63  ;;  %v20420_v57 = vld [vmem:[#allocation168_spill] sm:$0xff] }
 0x88a   :  { %20417 = vst [vmem:[#allocation232_spill] sm:$0xff] %v16935_v38  ;;  %v7529_v41 = vpop.f32.mrf.mxu3 }
 0x88b   :  { %v7683_v54 = vadd.f32 %v7529_v41, %v20418_v19  ;;  %v8355_v41 = vrot.slane %v7234_v6, 1  ;;  %v8356_v19 = vrot.slane %v7230_v2, 2  ;;  %v7242_v2 = vshrl.u32 %v12045_v15, 16 }
 0x88d   :  { %v8173_v4 = vadd.f32 %v16544_v55, %v7683_v54 }
 0x88f   :  { %v8603_v40 = vpop.f32.mrf.mxu1 }
 0x890   :  { %v16939_v5 = vadd.f32 %v8603_v40, %v8173_v4  ;;  %v20422_v4 = vld [vmem:[#allocation164_spill] sm:$0xff]  ;;  %v8357_v40 = vor.u32 %v8356_v19, %v8355_v41 }
 0x892   :  { %20419 = vst [vmem:[#allocation235_spill] sm:$0xff] %v16939_v5  ;;  %v7531_v17 = vpop.f32.mrf.mxu3  ;;  %8642 = vmatmul.bf16.gmra.mxu1 %v8354_v24  ;;  %v7238_v24 = vshll.u32 %v12045_v15, 16  ;;  %v12046_v15 = vld [vmem:[#allocation2 + $0x100] sm:$0xff] }
 0x893   :  { %v7684_v25 = vadd.f32 %v7531_v17, %v16541_v59  ;;  %v8358_v17 = vsel %vm8242_vm7, %v8353_v1, %v8357_v40 }
 0x895   :  { %v8174_v10 = vadd.f32 %v20420_v57, %v7684_v25  ;;  %v7236_v25 = vor.u32 %v7234_v6, %v7232_v63 }
 0x897   :  { %7573 = vmatmul.bf16.gmra.mxu3 %v7233_v47  ;;  %v8605_v55 = vpop.f32.mrf.mxu1  ;;  %v20424_v47 = vld [vmem:[#allocation167_spill] sm:$0xff] }
 0x898   :  { %v16945_v36 = vadd.f32 %v8605_v55, %v8174_v10  ;;  %v7240_v10 = vrot.slane %v7238_v24, 1 }
 0x89a   :  { %20421 = vst [vmem:[#allocation236_spill] sm:$0xff] %v16945_v36  ;;  %v7534_v54 = vpop.f32.mrf.mxu3  ;;  %v7241_v55 = vsel %vm5988_vm6, %v7236_v25, %v7240_v10 }
 0x89b   :  { %v7685_v48 = vadd.f32 %v7534_v54, %v20422_v4  ;;  %v8359_v54 = vrot.slane %v7242_v2, 1  ;;  %v8360_v4 = vrot.slane %v7238_v24, 2  ;;  %v7250_v24 = vshrl.u32 %v12046_v15, 16 }
 0x89d   :  { %v8175_v21 = vadd.f32 %v16579_v32, %v7685_v48 }
 0x89f   :  { %v8608_v45 = vpop.f32.mrf.mxu1 }
 0x8a0   :  { %v16949_v59 = vadd.f32 %v8608_v45, %v8175_v21  ;;  %v20426_v21 = vld [vmem:[#allocation166_spill] sm:$0xff]  ;;  %v8361_v45 = vor.u32 %v8360_v4, %v8359_v54  ;;  %v8363_v4 = vrot.slane %v7250_v24, 1 }
 0x8a2   :  { %20423 = vst [vmem:[#allocation234_spill] sm:$0xff] %v16949_v59  ;;  %v7536_v61 = vpop.f32.mrf.mxu3  ;;  %8647 = vmatmul.bf16.gmra.mxu1 %v8358_v17  ;;  %v8362_v25 = vsel %vm8242_vm7, %v8357_v40, %v8361_v45 }
 0x8a3   :  { %v7686_v57 = vadd.f32 %v7536_v61, %v20424_v47  ;;  %v7246_v61 = vshll.u32 %v12046_v15, 16  ;;  %v7244_v47 = vor.u32 %v7242_v2, %v7240_v10 }
 0x8a5   :  { %v8176_v41 = vadd.f32 %v16592_v11, %v7686_v57 }
 0x8a7   :  { %7578 = vmatmul.bf16.gmra.mxu3 %v7241_v55  ;;  %v8610_v32 = vpop.f32.mrf.mxu1  ;;  %v7248_v55 = vrot.slane %v7246_v61, 1 }
 0x8a8   :  { %v16955_v19 = vadd.f32 %v8610_v32, %v8176_v41 }
 0x8a9   :  { %v7249_v41 = vsel %vm5988_vm6, %v7244_v47, %v7248_v55 }
 0x8aa   :  { %20425 = vst [vmem:[#allocation238_spill] sm:$0xff] %v16955_v19  ;;  %v7539_v48 = vpop.f32.mrf.mxu3 }
 0x8ab   :  { %v7687_v1 = vadd.f32 %v7539_v48, %v20426_v21  ;;  %v8364_v48 = vrot.slane %v7246_v61, 2 }
 0x8ad   :  { %v8177_v63 = vadd.f32 %v16608_v18, %v7687_v1  ;;  %v8365_v1 = vor.u32 %v8364_v48, %v8363_v4  ;;  %v20431_v48 = vld [vmem:[#allocation169_spill] sm:$0xff] }
 0x8af   :  { %v8613_v6 = vpop.f32.mrf.mxu1  ;;  %v8366_v15 = vsel %vm8242_vm7, %v8361_v45, %v8365_v1 }
 0x8b0   :  { %v16959_v17 = vadd.f32 %v8613_v6, %v8177_v63  ;;  %v12047_v63 = vld [vmem:[#allocation2 + $0x108] sm:$0xff] }
 0x8b1   :  { %v7254_v6 = vshll.u32 %v12047_v63, 16  ;;  %v7258_v61 = vshrl.u32 %v12047_v63, 16 }
 0x8b2   :  { %20427 = vst [vmem:[#allocation237_spill] sm:$0xff] %v16959_v17  ;;  %v7541_v11 = vpop.f32.mrf.mxu3  ;;  %8652 = vmatmul.bf16.gmra.mxu1 %v8362_v25  ;;  %v7252_v25 = vor.u32 %v7250_v24, %v7248_v55 }
 0x8b3   :  { %v7688_v57 = vadd.f32 %v7541_v11, %v16595_v12  ;;  %v7256_v47 = vrot.slane %v7254_v6, 1 }
 0x8b5   :  { %v8178_v32 = vadd.f32 %v16624_v7, %v7688_v57  ;;  %v7257_v57 = vsel %vm5988_vm6, %v7252_v25, %v7256_v47  ;;  %v7260_v63 = vor.u32 %v7258_v61, %v7256_v47 }
 0x8b7   :  { %7583 = vmatmul.bf16.gmra.mxu3 %v7249_v41  ;;  %v8615_v18 = vpop.f32.mrf.mxu1 }
 0x8b8   :  { %v16965_v54 = vadd.f32 %v8615_v18, %v8178_v32  ;;  %v8367_v32 = vrot.slane %v7258_v61, 1  ;;  %v8368_v18 = vrot.slane %v7254_v6, 2 }
 0x8ba   :  { %20428 = vst [vmem:[#allocation17_spill] sm:$0xff] %v16965_v54  ;;  %v7544_v21 = vpop.f32.mrf.mxu3 }
 0x8bb   :  { %v7689_v40 = vadd.f32 %v7544_v21, %v16606_v16  ;;  %v8369_v21 = vor.u32 %v8368_v18, %v8367_v32 }
 0x8bd   :  { %v8179_v10 = vadd.f32 %v16638_v62, %v7689_v40  ;;  %v12048_v40 = vld [vmem:[#allocation2 + $0x110] sm:$0xff] }
 0x8be   :  { %v7266_v6 = vshrl.u32 %v12048_v40, 16 }
 0x8bf   :  { %v8618_v2 = vpop.f32.mrf.mxu1 }
 0x8c0   :  { %v16969_v12 = vadd.f32 %v8618_v2, %v8179_v10  ;;  %v7262_v10 = vshll.u32 %v12048_v40, 16  ;;  %v8370_v2 = vsel %vm8242_vm7, %v8365_v1, %v8369_v21 }
 0x8c2   :  { %20429 = vst [vmem:[#allocation239_spill] sm:$0xff] %v16969_v12  ;;  %v7546_v7 = vpop.f32.mrf.mxu3  ;;  %8657 = vmatmul.bf16.gmra.mxu1 %v8366_v15  ;;  %v20433_v15 = vld [vmem:[#allocation170_spill] sm:$0xff]  ;;  %v7264_v25 = vrot.slane %v7262_v10, 1  ;;  %v8372_v32 = vrot.slane %v7262_v10, 2 }
 0x8c3   :  { %v7690_v11 = vadd.f32 %v7546_v7, %v16618_v8 }
 0x8c4   :  { %v7268_v40 = vor.u32 %v7266_v6, %v7264_v25 }
 0x8c5   :  { %v8180_v16 = vadd.f32 %v16652_v28, %v7690_v11  ;;  %v7265_v11 = vsel %vm5988_vm6, %v7260_v63, %v7264_v25  ;;  %v20442_v25 = vld [vmem:[#allocation187_spill] sm:$0xff] }
 0x8c7   :  { %7588 = vmatmul.bf16.gmra.mxu3 %v7257_v57  ;;  %v8620_v62 = vpop.f32.mrf.mxu1 }
 0x8c8   :  { %v16975_v41 = vadd.f32 %v8620_v62, %v8180_v16  ;;  %v8371_v62 = vrot.slane %v7266_v6, 1 }
 0x8ca   :  { %20430 = vst [vmem:[#allocation14_spill] sm:$0xff] %v16975_v41  ;;  %v7549_v4 = vpop.f32.mrf.mxu3 }
 0x8cb   :  { %v7691_v45 = vadd.f32 %v7549_v4, %v20431_v48  ;;  %v20435_v4 = vld [vmem:[#allocation176_spill] sm:$0xff]  ;;  %v8373_v48 = vor.u32 %v8372_v32, %v8371_v62 }
 0x8cd   :  { %v8181_v55 = vadd.f32 %v16666_v50, %v7691_v45  ;;  %v8378_v6 = vsel %vm8242_vm7, %v8373_v48, %v20442_v25  ;;  %v8074_v25 = vpop.f32.mrf.mxu0 }
 0x8cf   :  { %v8623_v24 = vpop.f32.mrf.mxu1 }
 0x8d0   :  { %v16979_v8 = vadd.f32 %v8623_v24, %v8181_v55  ;;  %v8374_v55 = vsel %vm8242_vm7, %v8369_v21, %v8373_v48 }
 0x8d2   :  { %20432 = vst [vmem:[#allocation244_spill] sm:$0xff] %v16979_v8  ;;  %v7551_v28 = vpop.f32.mrf.mxu3  ;;  %8662 = vmatmul.bf16.gmra.mxu1 %v8370_v2 }
 0x8d3   :  { %v7692_v7 = vadd.f32 %v7551_v28, %v20433_v15  ;;  %v20438_v28 = vld [vmem:[#allocation184_spill] sm:$0xff] }
 0x8d4   :  { %v7273_v63 = vsel %vm5988_vm6, %v7268_v40, %v20438_v28  ;;  %v20448_v28 = vld [vmem:[#allocation191_spill] sm:$0xff] }
 0x8d5   :  { %v8182_v57 = vadd.f32 %v16679_v29, %v7692_v7  ;;  %v20437_v29 = vld [vmem:[#allocation175_spill] sm:$0xff] }
 0x8d7   :  { %7593 = vmatmul.bf16.gmra.mxu3 %v7265_v11  ;;  %v8625_v50 = vpop.f32.mrf.mxu1  ;;  %v20440_v11 = vld [vmem:[#allocation173_spill] sm:$0xff] }
 0x8d8   :  { %v16985_v16 = vadd.f32 %v8625_v50, %v8182_v57 }
 0x8da   :  { %20434 = vst [vmem:[#allocation16_spill] sm:$0xff] %v16985_v16  ;;  %v7554_v18 = vpop.f32.mrf.mxu3 }
 0x8db   :  { %v7693_v1 = vadd.f32 %v7554_v18, %v20435_v4  ;;  %v20443_v18 = vld [vmem:[#allocation188_spill] sm:$0xff] }
 0x8dd   :  { %v8183_v47 = vadd.f32 %v16694_v35, %v7693_v1  ;;  %v20444_v1 = vld [vmem:[#allocation186_spill] sm:$0xff] }
 0x8df   :  { %v8628_v61 = vpop.f32.mrf.mxu1 }
 0x8e0   :  { %v16989_v45 = vadd.f32 %v8628_v61, %v8183_v47 }
 0x8e2   :  { %20436 = vst [vmem:[#allocation241_spill] sm:$0xff] %v16989_v45  ;;  %v7556_v24 = vpop.f32.mrf.mxu3  ;;  %8667 = vmatmul.bf16.gmra.mxu1 %v8374_v55  ;;  %v20516_v45 = vld [vmem:[#allocation68_spill] sm:$0xff] }
 0x8e3   :  { %v7694_v2 = vadd.f32 %v7556_v24, %v20437_v29  ;;  %v20446_v24 = vld [vmem:[#allocation212_spill] sm:$0xff] }
 0x8e5   :  { %v8184_v10 = vadd.f32 %v16704_v27, %v7694_v2 }
 0x8e7   :  { %7598 = vmatmul.bf16.gmra.mxu3 %v7273_v63  ;;  %v8630_v15 = vpop.f32.mrf.mxu1  ;;  %v20449_v63 = vld [vmem:[#allocation183_spill] sm:$0xff] }
 0x8e8   :  { %v16996_v7 = vadd.f32 %v8630_v15, %v8184_v10  ;;  %v20450_v15 = vld [vmem:[#allocation52_spill] sm:$0xff] }
 0x8ea   :  { %20439 = vst [vmem:[#allocation22_spill] sm:$0xff] %v16996_v7  ;;  %v7559_v35 = vpop.f32.mrf.mxu3 }
 0x8eb   :  { %v7695_v57 = vadd.f32 %v7559_v35, %v20440_v11  ;;  %v20451_v35 = vld [vmem:[#allocation189_spill] sm:$0xff] }
 0x8ed   :  { %v8185_v50 = vadd.f32 %v16720_v9, %v7695_v57 }
 0x8ef   :  { %v8633_v21 = vpop.f32.mrf.mxu1 }
 0x8f0   :  { %v17000_v62 = vadd.f32 %v8633_v21, %v8185_v50  ;;  %v20453_v21 = vld [vmem:[#allocation199_spill] sm:$0xff] }
 0x8f2   :  { %20441 = vst [vmem:[#allocation240_spill] sm:$0xff] %v17000_v62  ;;  %v7561_v32 = vpop.f32.mrf.mxu3  ;;  %8672 = vmatmul.bf16.gmra.mxu1 %v8378_v6  ;;  %v20454_v6 = vld [vmem:[#allocation49_spill] sm:$0xff]  ;;  %v20501_v62 = vld [vmem:[#allocation207_spill] sm:$0xff] }
 0x8f3   :  { %v7696_v4 = vadd.f32 %v7561_v32, %v20443_v18 }
 0x8f5   :  { %v8186_v27 = vadd.f32 %v16733_v58, %v7696_v4 }
 0x8f7   :  { %7603 = vmatmul.bf16.gmra.mxu3 %v20444_v1  ;;  %v8635_v47 = vpop.f32.mrf.mxu1  ;;  %v20456_v1 = vld [vmem:[#allocation193_spill] sm:$0xff] }
 0x8f8   :  { %v17007_v61 = vadd.f32 %v8635_v47, %v8186_v27  ;;  %v20457_v47 = vld [vmem:[#allocation45_spill] sm:$0xff] }
 0x8fa   :  { %20445 = vst [vmem:[#allocation243_spill] sm:$0xff] %v17007_v61  ;;  %v7564_v55 = vpop.f32.mrf.mxu3 }
 0x8fb   :  { %v7697_v9 = vadd.f32 %v7564_v55, %v16698_v23 }
 0x8fd   :  { %v8187_v40 = vadd.f32 %v20446_v24, %v7697_v9  ;;  %v20458_v9 = vld [vmem:[#allocation216_spill] sm:$0xff] }
 0x8ff   :  { %v8638_v29 = vpop.f32.mrf.mxu1 }
 0x900   :  { %v17011_v2 = vadd.f32 %v8638_v29, %v8187_v40  ;;  %v8076_v40 = vpop.f32.mrf.mxu0  ;;  %v20459_v29 = vld [vmem:[#allocation192_spill] sm:$0xff] }
 0x902   :  { %20447 = vst [vmem:[#allocation242_spill] sm:$0xff] %v17011_v2  ;;  %v7566_v48 = vpop.f32.mrf.mxu3  ;;  %8677 = vmatmul.bf16.gmra.mxu1 %v20448_v28 }
 0x903   :  { %v7698_v10 = vadd.f32 %v7566_v48, %v20449_v63 }
 0x905   :  { %v8188_v58 = vadd.f32 %v20450_v15, %v7698_v10  ;;  %v20461_v10 = vld [vmem:[#allocation43_spill] sm:$0xff] }
 0x907   :  { %7608 = vmatmul.bf16.gmra.mxu3 %v20451_v35  ;;  %v8640_v11 = vpop.f32.mrf.mxu1 }
 0x908   :  { %v17017_v57 = vadd.f32 %v8640_v11, %v8188_v58  ;;  %v20462_v58 = vld [vmem:[#allocation194_spill] sm:$0xff] }
 0x90a   :  { %20452 = vst [vmem:[#allocation25_spill] sm:$0xff] %v17017_v57  ;;  %v7569_v50 = vpop.f32.mrf.mxu3 }
 0x90b   :  { %v7699_v23 = vadd.f32 %v7569_v50, %v20453_v21  ;;  %v8079_v21 = vpop.f32.mrf.mxu0 }
 0x90d   :  { %v8189_v32 = vadd.f32 %v20454_v6, %v7699_v23  ;;  %v20464_v6 = vld [vmem:[#allocation197_spill] sm:$0xff] }
 0x90f   :  { %v8643_v18 = vpop.f32.mrf.mxu1 }
 0x910   :  { %v17021_v4 = vadd.f32 %v8643_v18, %v8189_v32  ;;  %v20465_v32 = vld [vmem:[#allocation38_spill] sm:$0xff] }
 0x912   :  { %20455 = vst [vmem:[#allocation246_spill] sm:$0xff] %v17021_v4  ;;  %v7571_v27 = vpop.f32.mrf.mxu3  ;;  %8682 = vmatmul.bf16.gmra.mxu1 %v20456_v1  ;;  %v20466_v1 = vld [vmem:[#allocation195_spill] sm:$0xff] }
 0x913   :  { %v7700_v55 = vadd.f32 %v7571_v27, %v20457_v47  ;;  %v20495_v4 = vld [vmem:[#allocation39_spill] sm:$0xff] }
 0x915   :  { %v8190_v24 = vadd.f32 %v20458_v9, %v7700_v55 }
 0x917   :  { %7613 = vmatmul.bf16.gmra.mxu3 %v20459_v29  ;;  %v8645_v48 = vpop.f32.mrf.mxu1  ;;  %v20468_v29 = vld [vmem:[#allocation178_spill] sm:$0xff] }
 0x918   :  { %v17027_v28 = vadd.f32 %v8645_v48, %v8190_v24  ;;  %v8081_v24 = vpop.f32.mrf.mxu0 }
 0x91a   :  { %20460 = vst [vmem:[#allocation245_spill] sm:$0xff] %v17027_v28  ;;  %v7574_v63 = vpop.f32.mrf.mxu3 }
 0x91b   :  { %v7701_v15 = vadd.f32 %v7574_v63, %v20461_v10 }
 0x91d   :  { %v8191_v35 = vadd.f32 %v20462_v58, %v7701_v15 }
 0x91f   :  { %v8648_v11 = vpop.f32.mrf.mxu1 }
 0x920   :  { %v17031_v50 = vadd.f32 %v8648_v11, %v8191_v35  ;;  %v20470_v35 = vld [vmem:[#allocation200_spill] sm:$0xff]  ;;  %v20471_v11 = vld [vmem:[#allocation214_spill] sm:$0xff] }
 0x922   :  { %20463 = vst [vmem:[#allocation247_spill] sm:$0xff] %v17031_v50  ;;  %v7576_v23 = vpop.f32.mrf.mxu3  ;;  %8687 = vmatmul.bf16.gmra.mxu1 %v20464_v6  ;;  %v20492_v50 = vld [vmem:[#allocation56_spill] sm:$0xff] }
 0x923   :  { %v7702_v18 = vadd.f32 %v7576_v23, %v20465_v32  ;;  %v20472_v32 = vld [vmem:[#allocation198_spill] sm:$0xff] }
 0x925   :  { %v8192_v27 = vadd.f32 %v16814_v46, %v7702_v18  ;;  %v8084_v46 = vpop.f32.mrf.mxu0 }
 0x927   :  { %7618 = vmatmul.bf16.gmra.mxu3 %v20466_v1  ;;  %v8650_v47 = vpop.f32.mrf.mxu1 }
 0x928   :  { %v17037_v55 = vadd.f32 %v8650_v47, %v8192_v27  ;;  %v20474_v47 = vld [vmem:[#allocation215_spill] sm:$0xff] }
 0x92a   :  { %20467 = vst [vmem:[#allocation40_spill] sm:$0xff] %v17037_v55  ;;  %v7579_v9 = vpop.f32.mrf.mxu3  ;;  %v20491_v55 = vld [vmem:[#allocation174_spill] sm:$0xff] }
 0x92b   :  { %v7703_v48 = vadd.f32 %v7579_v9, %v20468_v29 }
 0x92d   :  { %v8193_v63 = vadd.f32 %v16826_v60, %v7703_v48  ;;  %v8086_v29 = vpop.f32.mrf.mxu0 }
 0x92f   :  { %v8653_v10 = vpop.f32.mrf.mxu1 }
 0x930   :  { %v17041_v15 = vadd.f32 %v8653_v10, %v8193_v63 }
 0x932   :  { %20469 = vst [vmem:[#allocation107_spill] sm:$0xff] %v17041_v15  ;;  %v7581_v58 = vpop.f32.mrf.mxu3  ;;  %8692 = vmatmul.bf16.gmra.mxu1 %v20470_v35  ;;  %v20476_v35 = vld [vmem:[#allocation202_spill] sm:$0xff] }
 0x933   :  { %v7704_v23 = vadd.f32 %v7581_v58, %v20471_v11  ;;  %v20477_v58 = vld [vmem:[#allocation185_spill] sm:$0xff] }
 0x935   :  { %v8194_v6 = vadd.f32 %v16845_v22, %v7704_v23  ;;  %v20478_v22 = vld [vmem:[#allocation201_spill] sm:$0xff] }
 0x937   :  { %7623 = vmatmul.bf16.gmra.mxu3 %v20472_v32  ;;  %v8655_v18 = vpop.f32.mrf.mxu1 }
 0x938   :  { %v17047_v27 = vadd.f32 %v8655_v18, %v8194_v6  ;;  %v17057_v6 = vpop.f32.mrf.mxu0 }
 0x93a   :  { %20473 = vst [vmem:[#allocation31_spill] sm:$0xff] %v17047_v27  ;;  %v7584_v1 = vpop.f32.mrf.mxu3 }
 0x93b   :  { %v7705_v9 = vadd.f32 %v7584_v1, %v20474_v47  ;;  %v20480_v1 = vld [vmem:[#allocation221_spill] sm:$0xff] }
 0x93d   :  { %v8195_v60 = vadd.f32 %v8074_v25, %v7705_v9 }
 0x93f   :  { %v8658_v48 = vpop.f32.mrf.mxu1 }
 0x940   :  { %v17050_v63 = vadd.f32 %v8658_v48, %v8195_v60 }
 0x942   :  { %20475 = vst [vmem:[#allocation12_spill] sm:$0xff] %v17050_v63  ;;  %v7586_v10 = vpop.f32.mrf.mxu3  ;;  %8697 = vmatmul.bf16.gmra.mxu1 %v20476_v35  ;;  %v20482_v63 = vld [vmem:[#allocation204_spill] sm:$0xff]  ;;  %v17063_v35 = vpop.f32.mrf.mxu0 }
 0x943   :  { %v7706_v11 = vadd.f32 %v7586_v10, %v20477_v58 }
 0x945   :  { %v8196_v15 = vadd.f32 %v8076_v40, %v7706_v11  ;;  %v20483_v40 = vld [vmem:[#allocation255_spill] sm:$0xff]  ;;  %v6788_v11 = vld [vmem:[#allocation2 + $0x160] sm:$0x1] }
 0x947   :  { %7628 = vmatmul.bf16.gmra.mxu3 %v20478_v22  ;;  %v8660_v23 = vpop.f32.mrf.mxu1 }
 0x948   :  { %v17055_v32 = vadd.f32 %v8660_v23, %v8196_v15  ;;  %v20484_v15 = vld [vmem:[#allocation203_spill] sm:$0xff] }
 0x94a   :  { %20479 = vst [vmem:[#allocation130_spill] sm:$0xff] %v17055_v32  ;;  %v7589_v18 = vpop.f32.mrf.mxu3  ;;  %v6971_v32 = vunpack.c.l.b16 %v6788_v11 }
 0x94b   :  { %v7707_v25 = vadd.f32 %v7589_v18, %v20480_v1  ;;  %v20486_v18 = vld [vmem:[#allocation19_spill] sm:$0xff] }
 0x94d   :  { %v8197_v47 = vadd.f32 %v8079_v21, %v7707_v25  ;;  %v20487_v21 = vld [vmem:[#allocation54_spill] sm:$0xff] }
 0x94e   :  { %v8806_v1 = vmul.f32 %v20487_v21, %v20486_v18 }
 0x94f   :  { %v8663_v9 = vpop.f32.mrf.mxu1 }
 0x950   :  { %v17060_v60 = vadd.f32 %v8663_v9, %v8197_v47  ;;  %v20488_v47 = vld [vmem:[#allocation35_spill] sm:$0xff] }
 0x951   :  { %v20489_v9 = vld [vmem:[#allocation55_spill] sm:$0xff] }
 0x952   :  { %20481 = vst [vmem:[#allocation248_spill] sm:$0xff] %v17060_v60  ;;  %v7591_v48 = vpop.f32.mrf.mxu3  ;;  %8702 = vmatmul.bf16.gmra.mxu1 %v20482_v63  ;;  %v8805_v60 = vmul.f32 %v20489_v9, %v20488_v47  ;;  %v20490_v63 = vld [vmem:[#allocation220_spill] sm:$0xff] }
 0x953   :  { %v7708_v10 = vadd.f32 %v7591_v48, %v20483_v40  ;;  %v8807_v48 = vmul.f32 %v20492_v50, %v20491_v55  ;;  %v17076_v40 = vpop.f32.mrf.mxu0  ;;  %v20498_v50 = vrot.slane %v16836_v42, 1  ;;  %v20503_v42 = vld [vmem:[#allocation180_spill] sm:$0xff] }
 0x954   :  { %v8974_v21 = vmul.f32 %v8805_v60, %v20488_v47 }
 0x955   :  { %v8198_v58 = vadd.f32 %v8081_v24, %v7708_v10  ;;  %v7013_v24 = vpack.c.b16 %v6971_v32, %v6971_v32  ;;  %v8975_v10 = vmul.f32 %v8806_v1, %v20486_v18  ;;  %v8976_v9 = vmul.f32 %v8807_v48, %v20491_v55  ;;  %v20502_v55 = vld [vmem:[#allocation226_spill] sm:$0xff] }
 0x956   :  { %v8887_v18 = vadd.f32 %v8806_v1, %v8805_v60 }
 0x957   :  { %7633 = vmatmul.bf16.gmra.mxu3 %v20484_v15  ;;  %v8665_v22 = vpop.f32.mrf.mxu1  ;;  %v20494_v15 = vld [vmem:[#allocation57_spill] sm:$0xff]  ;;  %v9056_v2 = vadd.f32 %v8975_v10, %v8974_v21  ;;  %v20505_v21 = vld [vmem:[#allocation139_spill] sm:$0xff] }
 0x958   :  { %v17067_v23 = vadd.f32 %v8665_v22, %v8198_v58  ;;  %v20493_v58 = vld [vmem:[#allocation179_spill] sm:$0xff] }
 0x959   :  { %v8808_v11 = vmul.f32 %v20494_v15, %v20493_v58  ;;  %v20500_v15 = vld [vmem:[#allocation60_spill] sm:$0xff] }
 0x95a   :  { %20485 = vst [vmem:[#allocation30_spill] sm:$0xff] %v17067_v23  ;;  %v7594_v25 = vpop.f32.mrf.mxu3  ;;  %v7834_v23 = vrot.slane %v7013_v24, 1 }
 0x95b   :  { %v7709_v27 = vadd.f32 %v7594_v25, %v20490_v63  ;;  %v20496_v25 = vld [vmem:[#allocation59_spill] sm:$0xff] }
 0x95c   :  { %v8809_v63 = vmul.f32 %v20496_v25, %v20495_v4  ;;  %v7835_v32 = vsel %vm7752_vm8, %v20498_v50, %v7834_v23  ;;  %v8888_v25 = vadd.f32 %v8887_v18, %v8807_v48  ;;  %v8221_v48 = vld [vmem:[#allocation2 + $0x160] sm:$0x3] }
 0x95d   :  { %v8199_v22 = vadd.f32 %v8084_v46, %v7709_v27  ;;  %8133 = vmatmul.bf16.gmra.mxu0 %v7835_v32  ;;  %v8977_v46 = vmul.f32 %v8808_v11, %v20493_v58  ;;  %v20499_v27 = vld [vmem:[#allocation182_spill] sm:$0xff]  ;;  %v17101_v58 = vpop.f32.mrf.mxu0 }
 0x95e   :  { %v8810_v47 = vmul.f32 %v20500_v15, %v20499_v27  ;;  %v8889_v50 = vadd.f32 %v8888_v25, %v8808_v11  ;;  %v20506_v32 = vld [vmem:[#allocation62_spill] sm:$0xff]  ;;  %v20510_v25 = vld [vmem:[#allocation64_spill] sm:$0xff] }
 0x95f   :  { %v8668_v28 = vpop.f32.mrf.mxu1  ;;  %v8812_v15 = vmul.f32 %v20506_v32, %v20505_v21  ;;  %v20511_v32 = vld [vmem:[#allocation102_spill] sm:$0xff] }
 0x960   :  { %v17085_v57 = vadd.f32 %v8668_v28, %v8199_v22  ;;  %v9057_v28 = vadd.f32 %v9056_v2, %v8976_v9  ;;  %v8978_v22 = vmul.f32 %v8809_v63, %v20495_v4  ;;  %v8979_v1 = vmul.f32 %v8810_v47, %v20499_v27  ;;  %v20512_v27 = vld [vmem:[#allocation66_spill] sm:$0xff] }
 0x961   :  { %v8814_v4 = vmul.f32 %v20512_v27, %v20511_v32  ;;  %v20515_v27 = vld [vmem:[#allocation181_spill] sm:$0xff] }
 0x962   :  { %20497 = vst [vmem:[#allocation113_spill] sm:$0xff] %v17085_v57  ;;  %v7596_v61 = vpop.f32.mrf.mxu3  ;;  %8707 = vmatmul.bf16.gmra.mxu1 %v20501_v62  ;;  %v20504_v57 = vld [vmem:[#allocation61_spill] sm:$0xff]  ;;  %v9058_v60 = vadd.f32 %v9057_v28, %v8977_v46  ;;  %v20507_v62 = vld [vmem:[#allocation206_spill] sm:$0xff]  ;;  %v8981_v28 = vmul.f32 %v8812_v15, %v20505_v21 }
 0x963   :  { %v7710_v7 = vadd.f32 %v7596_v61, %v20502_v55  ;;  %v8811_v23 = vmul.f32 %v20504_v57, %v20503_v42  ;;  %v8890_v55 = vadd.f32 %v8889_v50, %v8809_v63  ;;  %v20509_v46 = vld [vmem:[#allocation177_spill] sm:$0xff]  ;;  %v8240_v63 = vunpack.c.l.b16 %v8221_v48 }
 0x964   :  { %v9059_v2 = vadd.f32 %v9058_v60, %v8978_v22  ;;  %v7342_v22 = vshll.u32 %v7013_v24, 16  ;;  %v8983_v21 = vmul.f32 %v8814_v4, %v20511_v32  ;;  %v20518_v24 = vld [vmem:[#allocation205_spill] sm:$0xff] }
 0x965   :  { %v8200_v10 = vadd.f32 %v8086_v29, %v7710_v7  ;;  %v8980_v57 = vmul.f32 %v8811_v23, %v20503_v42  ;;  %v8891_v11 = vadd.f32 %v8890_v55, %v8810_v47  ;;  %v8813_v7 = vmul.f32 %v20510_v25, %v20509_v46  ;;  %v20514_v47 = vld [vmem:[#allocation67_spill] sm:$0xff] }
 0x966   :  { %v9060_v9 = vadd.f32 %v9059_v2, %v8979_v1 }
 0x967   :  { %7638 = vmatmul.bf16.gmra.mxu3 %v20507_v62  ;;  %v8670_v61 = vpop.f32.mrf.mxu1  ;;  %v8892_v50 = vadd.f32 %v8891_v11, %v8811_v23  ;;  %v20519_v23 = vld [vmem:[#allocation196_spill] sm:$0xff] }
 0x968   :  { %v17104_v18 = vadd.f32 %v8670_v61, %v8200_v10  ;;  %v9061_v60 = vadd.f32 %v9060_v9, %v8980_v57  ;;  %v8982_v10 = vmul.f32 %v8813_v7, %v20509_v46  ;;  %v20513_v61 = vld [vmem:[#allocation209_spill] sm:$0xff]  ;;  %v20520_v57 = vshrl.u32 %v20519_v23, 16  ;;  %v20527_v46 = vld [vmem:[#allocation72_spill] sm:$0xff] }
 0x969   :  { %v8815_v1 = vmul.f32 %v20514_v47, %v20513_v61  ;;  %v8893_v2 = vadd.f32 %v8892_v50, %v8812_v15  ;;  %v7344_v9 = vrot.slane %v7342_v22, 1 }
 0x96a   :  { %20508 = vst [vmem:[#allocation28_spill] sm:$0xff] %v17104_v18  ;;  %v7599_v29 = vpop.f32.mrf.mxu3  ;;  %v9062_v25 = vadd.f32 %v9061_v60, %v8981_v28  ;;  %v8241_v18 = vpack.c.b16 %v8240_v63, %v8240_v63  ;;  %v7340_v11 = vor.u32 %v20520_v57, %v20518_v24  ;;  %v20521_v28 = vld [vmem:[#allocation211_spill] sm:$0xff]  ;;  %v20523_v60 = vld [vmem:[#allocation210_spill] sm:$0xff] }
 0x96b   :  { %v7711_v62 = vadd.f32 %v7599_v29, %v16851_v53  ;;  %v8816_v53 = vmul.f32 %v20516_v45, %v20515_v27  ;;  %v17125_v29 = vpop.f32.mrf.mxu0  ;;  %v8894_v47 = vadd.f32 %v8893_v2, %v8813_v7  ;;  %v8984_v15 = vmul.f32 %v8815_v1, %v20513_v61  ;;  %v20524_v7 = vld [vmem:[#allocation63_spill] sm:$0xff] }
 0x96c   :  { %v7345_v24 = vsel %vm5988_vm6, %v7340_v11, %v7344_v9  ;;  %v20529_v9 = vld [vmem:[#allocation190_spill] sm:$0xff] }
 0x96d   :  { %v8201_v55 = vadd.f32 %v17057_v6, %v7711_v62  ;;  %v9063_v6 = vadd.f32 %v9062_v25, %v8982_v10  ;;  %v20522_v62 = vld [vmem:[#allocation69_spill] sm:$0xff]  ;;  %v8895_v32 = vadd.f32 %v8894_v47, %v8814_v4  ;;  %v8985_v22 = vmul.f32 %v8816_v53, %v20515_v27  ;;  %v20525_v10 = vld [vmem:[#allocation70_spill] sm:$0xff]  ;;  %v20537_v27 = vld [vmem:[#allocation208_spill] sm:$0xff] }
 0x96e   :  { %v8817_v50 = vmul.f32 %v20522_v62, %v20521_v28  ;;  %v8818_v2 = vmul.f32 %v20525_v10, %v20524_v7 }
 0x96f   :  { %v8673_v42 = vpop.f32.mrf.mxu1  ;;  %v9064_v23 = vadd.f32 %v9063_v6, %v8983_v21  ;;  %v8896_v25 = vadd.f32 %v8895_v32, %v8815_v1  ;;  %v20530_v32 = vld [vmem:[#allocation73_spill] sm:$0xff] }
 0x970   :  { %v17120_v48 = vadd.f32 %v8673_v42, %v8201_v55  ;;  %v8412_v42 = vshrl.u32 %v8241_v18, 16  ;;  %v8415_v55 = vshll.u32 %v8241_v18, 16  ;;  %v8986_v62 = vmul.f32 %v8817_v50, %v20521_v28 }
 0x971   :  { %v9065_v57 = vadd.f32 %v9064_v23, %v8984_v15  ;;  %v8897_v47 = vadd.f32 %v8896_v25, %v8816_v53  ;;  %v8987_v11 = vmul.f32 %v8818_v2, %v20524_v7  ;;  %v8820_v1 = vmul.f32 %v20530_v32, %v20529_v9  ;;  %v20533_v25 = vld [vmem:[#allocation217_spill] sm:$0xff]  ;;  %v20535_v32 = vld [vmem:[#allocation219_spill] sm:$0xff] }
 0x972   :  { %20517 = vst [vmem:[#allocation29_spill] sm:$0xff] %v17120_v48  ;;  %v7601_v63 = vpop.f32.mrf.mxu3  ;;  %8712 = vmatmul.bf16.gmra.mxu1 %v20523_v60  ;;  %v20526_v60 = vld [vmem:[#allocation213_spill] sm:$0xff]  ;;  %v8414_v4 = vrot.slane %v8412_v42, 1  ;;  %v8417_v21 = vrot.slane %v8415_v55, 2 }
 0x973   :  { %v7712_v45 = vadd.f32 %v7601_v63, %v16859_v37  ;;  %v8819_v37 = vmul.f32 %v20527_v46, %v20526_v60  ;;  %v9066_v6 = vadd.f32 %v9065_v57, %v8985_v22  ;;  %v8898_v15 = vadd.f32 %v8897_v47, %v8817_v50  ;;  %v20532_v46 = vld [vmem:[#allocation74_spill] sm:$0xff]  ;;  %v17148_v28 = vpop.f32.mrf.mxu0  ;;  %v20534_v57 = vld [vmem:[#allocation75_spill] sm:$0xff] }
 0x974   :  { %v8418_v42 = vor.u32 %v8417_v21, %v8414_v4  ;;  %v8989_v22 = vmul.f32 %v8820_v1, %v20529_v9 }
 0x975   :  { %v8202_v61 = vadd.f32 %v17063_v35, %v7712_v45  ;;  %v9067_v23 = vadd.f32 %v9066_v6, %v8986_v62  ;;  %v8988_v35 = vmul.f32 %v8819_v37, %v20526_v60  ;;  %v20531_v45 = vld [vmem:[#allocation32_spill] sm:$0xff] }
 0x977   :  { %7643 = vmatmul.bf16.gmra.mxu3 %v7345_v24  ;;  %v8675_v18 = vpop.f32.mrf.mxu1  ;;  %v8821_v24 = vmul.f32 %v20532_v46, %v20531_v45  ;;  %v9068_v55 = vadd.f32 %v9067_v23, %v8987_v11  ;;  %v20536_v46 = vld [vmem:[#allocation77_spill] sm:$0xff] }
 0x978   :  { %v17140_v63 = vadd.f32 %v8675_v18, %v8202_v61  ;;  %v8899_v61 = vadd.f32 %v8898_v15, %v8818_v2  ;;  %v8822_v18 = vmul.f32 %v20534_v57, %v20533_v25  ;;  %v8823_v60 = vmul.f32 %v20536_v46, %v20535_v32  ;;  %v20539_v15 = vld [vmem:[#allocation218_spill] sm:$0xff] }
 0x979   :  { %v9069_v47 = vadd.f32 %v9068_v55, %v8988_v35  ;;  %v8990_v6 = vmul.f32 %v8821_v24, %v20531_v45  ;;  %v20542_v55 = vld [vmem:[#allocation79_spill] sm:$0xff] }
 0x97a   :  { %20528 = vst [vmem:[#allocation23_spill] sm:$0xff] %v17140_v63  ;;  %v7604_v10 = vpop.f32.mrf.mxu3  ;;  %v8900_v50 = vadd.f32 %v8899_v61, %v8819_v37  ;;  %v8991_v11 = vmul.f32 %v8822_v18, %v20533_v25  ;;  %v20540_v37 = vld [vmem:[#allocation78_spill] sm:$0xff]  ;;  %v20541_v61 = vld [vmem:[#allocation223_spill] sm:$0xff] }
 0x97b   :  { %v7713_v53 = vadd.f32 %v7604_v10, %v16868_v14  ;;  %v8419_v14 = vsel %vm8242_vm7, %v20537_v27, %v8418_v42  ;;  %v9070_v21 = vadd.f32 %v9069_v47, %v8989_v22  ;;  %v8824_v23 = vmul.f32 %v20540_v37, %v20539_v15  ;;  %v20543_v22 = vld [vmem:[#allocation222_spill] sm:$0xff]  ;;  %v17172_v47 = vpop.f32.mrf.mxu0 }
 0x97c   :  { %v8901_v2 = vadd.f32 %v8900_v50, %v8820_v1  ;;  %v8825_v57 = vmul.f32 %v20542_v55, %v20541_v61  ;;  %v20544_v50 = vld [vmem:[#allocation80_spill] sm:$0xff] }
 0x97d   :  { %v8203_v62 = vadd.f32 %v17076_v40, %v7713_v53  ;;  %v9071_v35 = vadd.f32 %v9070_v21, %v8990_v6  ;;  %v8992_v53 = vmul.f32 %v8823_v60, %v20535_v32  ;;  %v8993_v42 = vmul.f32 %v8824_v23, %v20539_v15 }
 0x97e   :  { %v8902_v40 = vadd.f32 %v8901_v2, %v8821_v24  ;;  %v20545_v2 = vld [vmem:[#allocation82_spill] sm:$0xff] }
 0x97f   :  { %v8678_v7 = vpop.f32.mrf.mxu1  ;;  %v8827_v21 = vmul.f32 %v20545_v2, %v16854_v30 }
 0x980   :  { %v17160_v4 = vadd.f32 %v8678_v7, %v8203_v62  ;;  %v8903_v1 = vadd.f32 %v8902_v40, %v8822_v18  ;;  %v9072_v7 = vadd.f32 %v9071_v35, %v8991_v11  ;;  %v8826_v62 = vmul.f32 %v20544_v50, %v20543_v22 }
 0x982   :  { %20538 = vst [vmem:[#allocation21_spill] sm:$0xff] %v17160_v4  ;;  %v7606_v10 = vpop.f32.mrf.mxu3  ;;  %8717 = vmatmul.bf16.gmra.mxu1 %v8419_v14  ;;  %v8904_v24 = vadd.f32 %v8903_v1, %v8823_v60  ;;  %v9073_v6 = vadd.f32 %v9072_v7, %v8992_v53  ;;  %v8994_v14 = vmul.f32 %v8825_v57, %v20541_v61  ;;  %v20547_v53 = vld [vmem:[#allocation84_spill] sm:$0xff] }
 0x983   :  { %v7714_v27 = vadd.f32 %v7606_v10, %v16876_v33  ;;  %v8995_v40 = vmul.f32 %v8826_v62, %v20543_v22  ;;  %v20546_v10 = vld [vmem:[#allocation83_spill] sm:$0xff] }
 0x984   :  { %v8905_v33 = vadd.f32 %v8904_v24, %v8824_v23  ;;  %v9074_v11 = vadd.f32 %v9073_v6, %v8993_v42  ;;  %v8828_v35 = vmul.f32 %v20546_v10, %v16864_v51  ;;  %v20548_v42 = vld [vmem:[#allocation85_spill] sm:$0xff] }
 0x985   :  { %v8204_v46 = vadd.f32 %v17101_v58, %v7714_v27  ;;  %v8996_v58 = vmul.f32 %v8827_v21, %v16854_v30  ;;  %v8829_v27 = vmul.f32 %v20547_v53, %v16871_v39 }
 0x986   :  { %v8906_v55 = vadd.f32 %v8905_v33, %v8825_v57  ;;  %v9075_v1 = vadd.f32 %v9074_v11, %v8994_v14  ;;  %v8997_v24 = vmul.f32 %v8828_v35, %v16864_v51  ;;  %v17194_v11 = vpop.f32.mrf.mxu0 }
 0x987   :  { %v8680_v37 = vpop.f32.mrf.mxu1  ;;  %v8998_v14 = vmul.f32 %v8829_v27, %v16871_v39 }
 0x988   :  { %v17178_v18 = vadd.f32 %v8680_v37, %v8204_v46  ;;  %v8907_v50 = vadd.f32 %v8906_v55, %v8826_v62  ;;  %v9076_v23 = vadd.f32 %v9075_v1, %v8995_v40  ;;  %v8830_v46 = vmul.f32 %v20548_v42, %v16880_v43  ;;  %v20549_v37 = vld [vmem:[#allocation87_spill] sm:$0xff] }
 0x989   :  { %v8831_v33 = vmul.f32 %v20549_v37, %v16887_v52 }
 0x98a   :  { %v7609_v60 = vpop.f32.mrf.mxu3  ;;  %v8908_v6 = vadd.f32 %v8907_v50, %v8827_v21  ;;  %v9077_v57 = vadd.f32 %v9076_v23, %v8996_v58  ;;  %v8999_v55 = vmul.f32 %v8830_v46, %v16880_v43 }
 0x98b   :  { %v7715_v7 = vadd.f32 %v7609_v60, %v16884_v34  ;;  %v20550_v60 = vld [vmem:[#allocation88_spill] sm:$0xff]  ;;  %v9000_v53 = vmul.f32 %v8831_v33, %v16887_v52 }
 0x98c   :  { %v8909_v34 = vadd.f32 %v8908_v6, %v8828_v35  ;;  %v9078_v40 = vadd.f32 %v9077_v57, %v8997_v24  ;;  %v8832_v21 = vmul.f32 %v20550_v60, %v16896_v20  ;;  %v20552_v24 = vld [vmem:[#allocation90_spill] sm:$0xff] }
 0x98d   :  { %v8205_v2 = vadd.f32 %v17125_v29, %v7715_v7  ;;  %v20551_v7 = vld [vmem:[#allocation89_spill] sm:$0xff] }
 0x98e   :  { %v8910_v1 = vadd.f32 %v8909_v34, %v8829_v27  ;;  %v9079_v58 = vadd.f32 %v9078_v40, %v8998_v14  ;;  %v8833_v50 = vmul.f32 %v20551_v7, %v16903_v49  ;;  %v9001_v6 = vmul.f32 %v8832_v21, %v16896_v20 }
 0x98f   :  { %v8683_v10 = vpop.f32.mrf.mxu1 }
 0x990   :  { %v17196_v62 = vadd.f32 %v8683_v10, %v8205_v2  ;;  %v8911_v42 = vadd.f32 %v8910_v1, %v8830_v46  ;;  %v9080_v35 = vadd.f32 %v9079_v58, %v8999_v55  ;;  %v8834_v2 = vmul.f32 %v20552_v24, %v16912_v31  ;;  %v20553_v10 = vld [vmem:[#allocation91_spill] sm:$0xff]  ;;  %v8109_v46 = vpop.f32.mrf.mxu0  ;;  %v20554_v1 = vld [vmem:[#allocation92_spill] sm:$0xff]  ;;  %v17217_v58 = vpop.f32.mrf.mxu2 }
 0x991   :  { %v9002_v14 = vmul.f32 %v8833_v50, %v16903_v49  ;;  %v8835_v34 = vmul.f32 %v20553_v10, %v16919_v0 }
 0x992   :  { %v7611_v29 = vpop.f32.mrf.mxu3  ;;  %v8912_v57 = vadd.f32 %v8911_v42, %v8831_v33  ;;  %v9081_v27 = vadd.f32 %v9080_v35, %v9000_v53  ;;  %v9003_v55 = vmul.f32 %v8834_v2, %v16912_v31  ;;  %v20555_v42 = vld [vmem:[#allocation93_spill] sm:$0xff] }
 0x993   :  { %v7716_v23 = vadd.f32 %v7611_v29, %v16892_v3  ;;  %v8836_v29 = vmul.f32 %v20554_v1, %v16925_v56  ;;  %v8837_v35 = vmul.f32 %v20555_v42, %v16929_v13 }
 0x994   :  { %v8913_v60 = vadd.f32 %v8912_v57, %v8832_v21  ;;  %v9082_v3 = vadd.f32 %v9081_v27, %v9001_v6 }
 0x995   :  { %v8206_v37 = vadd.f32 %v17148_v28, %v7716_v23  ;;  %v9004_v23 = vmul.f32 %v8835_v34, %v16919_v0  ;;  %v9005_v57 = vmul.f32 %v8836_v29, %v16925_v56 }
 0x996   :  { %v8914_v33 = vadd.f32 %v8913_v60, %v8833_v50  ;;  %v9083_v53 = vadd.f32 %v9082_v3, %v9002_v14  ;;  %v9006_v14 = vmul.f32 %v8837_v35, %v16929_v13  ;;  %v20557_v60 = vld [vmem:[#allocation97_spill] sm:$0xff] }
 0x997   :  { %v8685_v40 = vpop.f32.mrf.mxu1  ;;  %v8839_v3 = vmul.f32 %v20557_v60, %v16939_v5 }
 0x998   :  { %v17212_v7 = vadd.f32 %v8685_v40, %v8206_v37  ;;  %v8915_v24 = vadd.f32 %v8914_v33, %v8834_v2  ;;  %v9084_v6 = vadd.f32 %v9083_v53, %v9003_v55  ;;  %v20556_v37 = vld [vmem:[#allocation96_spill] sm:$0xff]  ;;  %v20558_v55 = vld [vmem:[#allocation98_spill] sm:$0xff]  ;;  %v17235_v53 = vpop.f32.mrf.mxu0 }
 0x999   :  { %v8838_v27 = vmul.f32 %v20556_v37, %v16935_v38  ;;  %v8840_v33 = vmul.f32 %v20558_v55, %v16945_v36 }
 0x99a   :  { %v7614_v28 = vpop.f32.mrf.mxu3  ;;  %v8916_v10 = vadd.f32 %v8915_v24, %v8835_v34  ;;  %v9085_v40 = vadd.f32 %v9084_v6, %v9004_v23  ;;  %v9008_v23 = vmul.f32 %v8839_v3, %v16939_v5  ;;  %v17241_v6 = vpop.f32.mrf.mxu2 }
 0x99b   :  { %v7717_v21 = vadd.f32 %v7614_v28, %v16900_v26  ;;  %v9007_v2 = vmul.f32 %v8838_v27, %v16935_v38 }
 0x99c   :  { %v8917_v42 = vadd.f32 %v8916_v10, %v8836_v29  ;;  %v9086_v26 = vadd.f32 %v9085_v40, %v9005_v57  ;;  %v9009_v10 = vmul.f32 %v8840_v33, %v16945_v36 }
 0x99d   :  { %v8207_v50 = vadd.f32 %v17172_v47, %v7717_v21  ;;  %v20559_v21 = vld [vmem:[#allocation99_spill] sm:$0xff] }
 0x99e   :  { %v8918_v28 = vadd.f32 %v8917_v42, %v8837_v35  ;;  %v9087_v47 = vadd.f32 %v9086_v26, %v9006_v14  ;;  %v8841_v24 = vmul.f32 %v20559_v21, %v16949_v59  ;;  %v20561_v42 = vld [vmem:[#allocation103_spill] sm:$0xff] }
 0x99f   :  { %v8688_v1 = vpop.f32.mrf.mxu1  ;;  %v8843_v26 = vmul.f32 %v20561_v42, %v16959_v17 }
 0x9a0   :  { %v17230_v0 = vadd.f32 %v8688_v1, %v8207_v50  ;;  %v8919_v57 = vadd.f32 %v8918_v28, %v8838_v27  ;;  %v9088_v37 = vadd.f32 %v9087_v47, %v9007_v2  ;;  %v20560_v50 = vld [vmem:[#allocation101_spill] sm:$0xff]  ;;  %v9010_v1 = vmul.f32 %v8841_v24, %v16949_v59  ;;  %v20562_v47 = vld [vmem:[#allocation104_spill] sm:$0xff] }
 0x9a1   :  { %v8842_v35 = vmul.f32 %v20560_v50, %v16955_v19  ;;  %v8844_v21 = vmul.f32 %v20562_v47, %v16965_v54  ;;  %v20564_v50 = vld [vmem:[#allocation105_spill] sm:$0xff] }
 0x9a2   :  { %v7616_v34 = vpop.f32.mrf.mxu3  ;;  %v8920_v40 = vadd.f32 %v8919_v57, %v8839_v3  ;;  %v9089_v14 = vadd.f32 %v9088_v37, %v9008_v23  ;;  %v20563_v23 = vld [vmem:[#allocation228_spill] sm:$0xff]  ;;  %v8845_v42 = vmul.f32 %v20564_v50, %v16969_v12 }
 0x9a3   :  { %v7718_v29 = vadd.f32 %v7616_v34, %v16908_v44  ;;  %v9011_v2 = vmul.f32 %v8842_v35, %v16955_v19 }
 0x9a4   :  { %v8921_v44 = vadd.f32 %v8920_v40, %v8840_v33  ;;  %v9090_v27 = vadd.f32 %v9089_v14, %v9009_v10  ;;  %v17259_v33 = vpop.f32.mrf.mxu0  ;;  %v9013_v14 = vmul.f32 %v8844_v21, %v16965_v54 }
 0x9a5   :  { %v8208_v60 = vadd.f32 %v17194_v11, %v7718_v29  ;;  %v9012_v11 = vmul.f32 %v8843_v26, %v16959_v17 }
 0x9a6   :  { %v8922_v28 = vadd.f32 %v8921_v44, %v8841_v24  ;;  %v9091_v57 = vadd.f32 %v9090_v27, %v9010_v1 }
 0x9a7   :  { %v8690_v55 = vpop.f32.mrf.mxu1 }
 0x9a8   :  { %v17250_v34 = vadd.f32 %v8690_v55, %v8208_v60  ;;  %v8923_v37 = vadd.f32 %v8922_v28, %v8842_v35  ;;  %v9092_v40 = vadd.f32 %v9091_v57, %v9011_v2  ;;  %v17261_v60 = vpop.f32.mrf.mxu2  ;;  %v20565_v55 = vld [vmem:[#allocation109_spill] sm:$0xff]  ;;  %v9014_v35 = vmul.f32 %v8845_v42, %v16969_v12  ;;  %v20566_v28 = vld [vmem:[#allocation106_spill] sm:$0xff] }
 0x9a9   :  { %v8846_v1 = vmul.f32 %v20565_v55, %v16975_v41 }
 0x9aa   :  { %v7619_v3 = vpop.f32.mrf.mxu3  ;;  %v8924_v24 = vadd.f32 %v8923_v37, %v8843_v26  ;;  %v9093_v44 = vadd.f32 %v9092_v40, %v9012_v11  ;;  %v20567_v26 = vld [vmem:[#allocation108_spill] sm:$0xff]  ;;  %v20568_v40 = vld [vmem:[#allocation241_spill] sm:$0xff] }
 0x9ab   :  { %v7719_v29 = vadd.f32 %v7619_v3, %v20563_v23  ;;  %v8847_v3 = vmul.f32 %v20566_v28, %v16979_v8  ;;  %v9015_v57 = vmul.f32 %v8846_v1, %v16975_v41 }
 0x9ac   :  { %v8925_v47 = vadd.f32 %v8924_v24, %v8844_v21  ;;  %v9094_v2 = vadd.f32 %v9093_v44, %v9013_v14  ;;  %v20569_v24 = vld [vmem:[#allocation110_spill] sm:$0xff] }
 0x9ad   :  { %v8209_v10 = vadd.f32 %v8109_v46, %v7719_v29  ;;  %v8848_v29 = vmul.f32 %v20567_v26, %v16985_v16  ;;  %v9016_v21 = vmul.f32 %v8847_v3, %v16979_v8  ;;  %v8849_v55 = vmul.f32 %v20569_v24, %v20568_v40  ;;  %v20570_v14 = vld [vmem:[#allocation22_spill] sm:$0xff]  ;;  %v20573_v8 = vld [vmem:[#allocation112_spill] sm:$0xff] }
 0x9ae   :  { %v8926_v46 = vadd.f32 %v8925_v47, %v8845_v42  ;;  %v9095_v50 = vadd.f32 %v9094_v2, %v9014_v35  ;;  %v20571_v42 = vld [vmem:[#allocation111_spill] sm:$0xff] }
 0x9af   :  { %v8693_v27 = vpop.f32.mrf.mxu1  ;;  %v8850_v44 = vmul.f32 %v20571_v42, %v20570_v14  ;;  %v9018_v2 = vmul.f32 %v8849_v55, %v20568_v40 }
 0x9b0   :  { %v17269_v23 = vadd.f32 %v8693_v27, %v8209_v10  ;;  %v8927_v11 = vadd.f32 %v8926_v46, %v8846_v1  ;;  %v9096_v12 = vadd.f32 %v9095_v50, %v9015_v57  ;;  %v9017_v10 = vmul.f32 %v8848_v29, %v16985_v16  ;;  %v17282_v27 = vpop.f32.mrf.mxu0  ;;  %v17286_v26 = vpop.f32.mrf.mxu2  ;;  %v20572_v46 = vld [vmem:[#allocation240_spill] sm:$0xff]  ;;  %v20575_v16 = vld [vmem:[#allocation114_spill] sm:$0xff] }
 0x9b1   :  { %v8851_v24 = vmul.f32 %v20573_v8, %v20572_v46  ;;  %v9019_v50 = vmul.f32 %v8850_v44, %v20570_v14 }
 0x9b2   :  { %v17274_v37 = vpop.f32.mrf.mxu3  ;;  %v8928_v28 = vadd.f32 %v8927_v11, %v8847_v3  ;;  %v9097_v35 = vadd.f32 %v9096_v12, %v9016_v21  ;;  %v20574_v11 = vld [vmem:[#allocation243_spill] sm:$0xff]  ;;  %v20576_v12 = vld [vmem:[#allocation242_spill] sm:$0xff] }
 0x9b3   :  { %v8852_v42 = vmul.f32 %v20575_v16, %v20574_v11  ;;  %v9020_v19 = vmul.f32 %v8851_v24, %v20572_v46 }
 0x9b4   :  { %v8929_v1 = vadd.f32 %v8928_v28, %v8848_v29  ;;  %v9098_v57 = vadd.f32 %v9097_v35, %v9017_v10  ;;  %v20577_v29 = vld [vmem:[#allocation115_spill] sm:$0xff]  ;;  %v20578_v10 = vld [vmem:[#allocation25_spill] sm:$0xff] }
 0x9b5   :  { %v8853_v21 = vmul.f32 %v20577_v29, %v20576_v12  ;;  %v9021_v8 = vmul.f32 %v8852_v42, %v20574_v11  ;;  %v20583_v29 = vld [vmem:[#allocation118_spill] sm:$0xff] }
 0x9b6   :  { %v8930_v3 = vadd.f32 %v8929_v1, %v8849_v55  ;;  %v9099_v54 = vadd.f32 %v9098_v57, %v9018_v2  ;;  %v20579_v55 = vld [vmem:[#allocation116_spill] sm:$0xff]  ;;  %v20580_v2 = vld [vmem:[#allocation246_spill] sm:$0xff] }
 0x9b7   :  { %v17284_v47 = vpop.f32.mrf.mxu1  ;;  %v8854_v35 = vmul.f32 %v20579_v55, %v20578_v10  ;;  %v9022_v59 = vmul.f32 %v8853_v21, %v20576_v12  ;;  %v20585_v12 = vld [vmem:[#allocation119_spill] sm:$0xff] }
 0x9b8   :  { %v8931_v17 = vadd.f32 %v8930_v3, %v8850_v44  ;;  %v9100_v28 = vadd.f32 %v9099_v54, %v9019_v50  ;;  %v20581_v44 = vld [vmem:[#allocation117_spill] sm:$0xff]  ;;  %v17307_v3 = vpop.f32.mrf.mxu0  ;;  %v17309_v46 = vpop.f32.mrf.mxu2 }
 0x9b9   :  { %v8855_v57 = vmul.f32 %v20581_v44, %v20580_v2  ;;  %v20582_v50 = vld [vmem:[#allocation245_spill] sm:$0xff] }
 0x9ba   :  { %v17294_v41 = vpop.f32.mrf.mxu3  ;;  %v8932_v40 = vadd.f32 %v8931_v17, %v8851_v24  ;;  %v9101_v14 = vadd.f32 %v9100_v28, %v9020_v19  ;;  %v9023_v24 = vmul.f32 %v8854_v35, %v20578_v10  ;;  %v8856_v55 = vmul.f32 %v20583_v29, %v20582_v50  ;;  %v20584_v28 = vld [vmem:[#allocation247_spill] sm:$0xff] }
 0x9bb   :  { %v8857_v44 = vmul.f32 %v20585_v12, %v20584_v28 }
 0x9bc   :  { %v8933_v16 = vadd.f32 %v8932_v40, %v8852_v42  ;;  %v9102_v54 = vadd.f32 %v9101_v14, %v9021_v8  ;;  %v9024_v42 = vmul.f32 %v8855_v57, %v20580_v2  ;;  %v9025_v38 = vmul.f32 %v8856_v55, %v20582_v50  ;;  %v20586_v14 = vld [vmem:[#allocation40_spill] sm:$0xff] }
 0x9bd   :  { %v9026_v13 = vmul.f32 %v8857_v44, %v20584_v28  ;;  %v20593_v28 = vld [vmem:[#allocation123_spill] sm:$0xff] }
 0x9be   :  { %v8934_v17 = vadd.f32 %v8933_v16, %v8853_v21  ;;  %v9103_v19 = vadd.f32 %v9102_v54, %v9022_v59  ;;  %v20587_v21 = vld [vmem:[#allocation120_spill] sm:$0xff]  ;;  %v20588_v59 = vld [vmem:[#allocation107_spill] sm:$0xff] }
 0x9bf   :  { %v17302_v1 = vpop.f32.mrf.mxu1  ;;  %v8858_v8 = vmul.f32 %v20587_v21, %v20586_v14 }
 0x9c0   :  { %v8935_v40 = vadd.f32 %v8934_v17, %v8854_v35  ;;  %v9104_v36 = vadd.f32 %v9103_v19, %v9023_v24  ;;  %v20589_v35 = vld [vmem:[#allocation121_spill] sm:$0xff]  ;;  %v20590_v24 = vld [vmem:[#allocation31_spill] sm:$0xff]  ;;  %v17332_v50 = vpop.f32.mrf.mxu0  ;;  %v17334_v21 = vpop.f32.mrf.mxu2 }
 0x9c1   :  { %v8859_v54 = vmul.f32 %v20589_v35, %v20588_v59  ;;  %v9027_v12 = vmul.f32 %v8858_v8, %v20586_v14  ;;  %v20595_v14 = vld [vmem:[#allocation125_spill] sm:$0xff] }
 0x9c2   :  { %v17314_v11 = vpop.f32.mrf.mxu3  ;;  %v8936_v5 = vadd.f32 %v8935_v40, %v8855_v57  ;;  %v9105_v10 = vadd.f32 %v9104_v36, %v9024_v42  ;;  %v20591_v57 = vld [vmem:[#allocation122_spill] sm:$0xff]  ;;  %v20592_v42 = vld [vmem:[#allocation12_spill] sm:$0xff] }
 0x9c3   :  { %v8860_v19 = vmul.f32 %v20591_v57, %v20590_v24  ;;  %v8861_v35 = vmul.f32 %v20593_v28, %v20592_v42 }
 0x9c4   :  { %v8937_v29 = vadd.f32 %v8936_v5, %v8856_v55  ;;  %v9106_v17 = vadd.f32 %v9105_v10, %v9025_v38  ;;  %v9028_v55 = vmul.f32 %v8859_v54, %v20588_v59 }
 0x9c5   :  { %v9030_v20 = vmul.f32 %v8861_v35, %v20592_v42 }
 0x9c6   :  { %v8938_v2 = vadd.f32 %v8937_v29, %v8857_v44  ;;  %v9107_v36 = vadd.f32 %v9106_v17, %v9026_v13  ;;  %v9029_v44 = vmul.f32 %v8860_v19, %v20590_v24  ;;  %v20594_v29 = vld [vmem:[#allocation130_spill] sm:$0xff]  ;;  %v20596_v13 = vld [vmem:[#allocation248_spill] sm:$0xff] }
 0x9c7   :  { %v17322_v16 = vpop.f32.mrf.mxu1  ;;  %v8862_v57 = vmul.f32 %v20595_v14, %v20594_v29 }
 0x9c8   :  { %v8939_v5 = vadd.f32 %v8938_v2, %v8858_v8  ;;  %v9108_v38 = vadd.f32 %v9107_v36, %v9027_v12  ;;  %v20597_v2 = vld [vmem:[#allocation126_spill] sm:$0xff]  ;;  %v17357_v42 = vpop.f32.mrf.mxu2 }
 0x9c9   :  { %v8863_v8 = vmul.f32 %v20597_v2, %v20596_v13  ;;  %v9031_v28 = vmul.f32 %v8862_v57, %v20594_v29  ;;  %v20598_v12 = vld [vmem:[#allocation30_spill] sm:$0xff]  ;;  %v20603_v2 = vld [vmem:[#allocation129_spill] sm:$0xff] }
 0x9ca   :  { %v17330_v40 = vpop.f32.mrf.mxu3  ;;  %v8940_v10 = vadd.f32 %v8939_v5, %v8859_v54  ;;  %v9109_v31 = vadd.f32 %v9108_v38, %v9028_v55  ;;  %v20599_v54 = vld [vmem:[#allocation127_spill] sm:$0xff]  ;;  %v20600_v55 = vld [vmem:[#allocation113_spill] sm:$0xff] }
 0x9cb   :  { %v8864_v36 = vmul.f32 %v20599_v54, %v20598_v12  ;;  %v9032_v52 = vmul.f32 %v8863_v8, %v20596_v13 }
 0x9cc   :  { %v8941_v49 = vadd.f32 %v8940_v10, %v8860_v19  ;;  %v9110_v17 = vadd.f32 %v9109_v31, %v9029_v44  ;;  %v20601_v19 = vld [vmem:[#allocation128_spill] sm:$0xff]  ;;  %v17355_v10 = vpop.f32.mrf.mxu0 }
 0x9cd   :  { %v8865_v38 = vmul.f32 %v20601_v19, %v20600_v55  ;;  %v20602_v44 = vld [vmem:[#allocation28_spill] sm:$0xff] }
 0x9ce   :  { %v8942_v59 = vadd.f32 %v8941_v49, %v8861_v35  ;;  %v9111_v24 = vadd.f32 %v9110_v17, %v9030_v20  ;;  %v9033_v35 = vmul.f32 %v8864_v36, %v20598_v12  ;;  %v8866_v54 = vmul.f32 %v20603_v2, %v20602_v44  ;;  %v20604_v17 = vld [vmem:[#allocation131_spill] sm:$0xff] }
 0x9cf   :  { %v17342_v56 = vpop.f32.mrf.mxu1  ;;  %v8867_v19 = vmul.f32 %v20604_v17, %v17120_v48 }
 0x9d0   :  { %v8943_v14 = vadd.f32 %v8942_v59, %v8862_v57  ;;  %v9112_v31 = vadd.f32 %v9111_v24, %v9031_v28  ;;  %v9034_v57 = vmul.f32 %v8865_v38, %v20600_v55  ;;  %v9035_v39 = vmul.f32 %v8866_v54, %v20602_v44  ;;  %v20605_v24 = vld [vmem:[#allocation46_spill] sm:$0xff] }
 0x9d1   :  { %v9036_v2 = vmul.f32 %v8867_v19, %v17120_v48 }
 0x9d2   :  { %v17350_v5 = vpop.f32.mrf.mxu3  ;;  %v8944_v49 = vadd.f32 %v8943_v14, %v8863_v8  ;;  %v9113_v20 = vadd.f32 %v9112_v31, %v9032_v52  ;;  %v8868_v8 = vmul.f32 %v20605_v24, %v17140_v63  ;;  %v20606_v52 = vld [vmem:[#allocation132_spill] sm:$0xff] }
 0x9d4   :  { %v8945_v59 = vadd.f32 %v8944_v49, %v8864_v36  ;;  %v9114_v13 = vadd.f32 %v9113_v20, %v9033_v35  ;;  %v8869_v36 = vmul.f32 %v20606_v52, %v17160_v4  ;;  %v9037_v55 = vmul.f32 %v8868_v8, %v17140_v63  ;;  %v20607_v35 = vld [vmem:[#allocation50_spill] sm:$0xff]  ;;  %v20608_v20 = vld [vmem:[#allocation153_spill] sm:$0xff]  ;;  %v17378_v17 = vpop.f32.mrf.mxu0 }
 0x9d6   :  { %v8946_v43 = vadd.f32 %v8945_v59, %v8865_v38  ;;  %v9115_v14 = vadd.f32 %v9114_v13, %v9034_v57  ;;  %v8870_v38 = vmul.f32 %v20607_v35, %v17178_v18  ;;  %v6695_v59 = vadd.f32 %v17217_v58, %v20608_v20  ;;  %v20611_v20 = vld [vmem:[#allocation134_spill] sm:$0xff] }
 0x9d7   :  { %v17362_v29 = vpop.f32.mrf.mxu1  ;;  %v9038_v57 = vmul.f32 %v8869_v36, %v17160_v4  ;;  %v8872_v48 = vmul.f32 %v20611_v20, %v17212_v7  ;;  %v20617_v20 = vld [vmem:[#allocation137_spill] sm:$0xff] }
 0x9d8   :  { %v8947_v12 = vadd.f32 %v8946_v43, %v8866_v54  ;;  %v9116_v31 = vadd.f32 %v9115_v14, %v9035_v39  ;;  %v6614_v43 = vpop.f32.mrf.mxu2  ;;  %v20609_v39 = vld [vmem:[#allocation133_spill] sm:$0xff]  ;;  %v7720_v52 = vadd.f32 %v17274_v37, %v6695_v59  ;;  %v9039_v58 = vmul.f32 %v8870_v38, %v17178_v18 }
 0x9d9   :  { %v20614_v59 = vld [vmem:[#allocation157_spill] sm:$0xff] }
 0x9da   :  { %v7634_v28 = vpop.f32.mrf.mxu3  ;;  %v8948_v49 = vadd.f32 %v8947_v12, %v8867_v19  ;;  %v9117_v13 = vadd.f32 %v9116_v31, %v9036_v2  ;;  %v8871_v12 = vmul.f32 %v20609_v39, %v17196_v62  ;;  %v20610_v19 = vld [vmem:[#allocation152_spill] sm:$0xff] }
 0x9db   :  { %v6696_v14 = vadd.f32 %v17241_v6, %v20610_v19  ;;  %v20612_v2 = vld [vmem:[#allocation156_spill] sm:$0xff]  ;;  %v20613_v6 = vld [vmem:[#allocation58_spill] sm:$0xff] }
 0x9dc   :  { %v8949_v54 = vadd.f32 %v8948_v49, %v8868_v8  ;;  %v9118_v35 = vadd.f32 %v9117_v13, %v9037_v55  ;;  %v6697_v8 = vadd.f32 %v17261_v60, %v20612_v2  ;;  %v9040_v4 = vmul.f32 %v8871_v12, %v17196_v62 }
 0x9dd   :  { %v7721_v31 = vadd.f32 %v17294_v41, %v6696_v14  ;;  %v8873_v37 = vmul.f32 %v20613_v6, %v17230_v0  ;;  %v8210_v55 = vadd.f32 %v17235_v53, %v7720_v52  ;;  %v6698_v13 = vadd.f32 %v17286_v26, %v20614_v59  ;;  %v20615_v41 = vld [vmem:[#allocation136_spill] sm:$0xff]  ;;  %v20619_v6 = vld [vmem:[#allocation138_spill] sm:$0xff] }
 0x9de   :  { %v8950_v63 = vadd.f32 %v8949_v54, %v8869_v36  ;;  %v9119_v49 = vadd.f32 %v9118_v35, %v9038_v57  ;;  %v7722_v36 = vadd.f32 %v17314_v11, %v6697_v8  ;;  %v9041_v60 = vmul.f32 %v8872_v48, %v17212_v7  ;;  %v20616_v35 = vld [vmem:[#allocation160_spill] sm:$0xff] }
 0x9df   :  { %v17380_v24 = vpop.f32.mrf.mxu1  ;;  %v8874_v57 = vmul.f32 %v20615_v41, %v17250_v34  ;;  %v6699_v53 = vadd.f32 %v17309_v46, %v20616_v35  ;;  %v7723_v26 = vadd.f32 %v17330_v40, %v6698_v13  ;;  %v8875_v2 = vmul.f32 %v20617_v20, %v17269_v23 }
 0x9e0   :  { %v8951_v39 = vadd.f32 %v8950_v63, %v8870_v38  ;;  %v9120_v54 = vadd.f32 %v9119_v49, %v9039_v58  ;;  %v17405_v63 = vadd.f32 %v17284_v47, %v8210_v55  ;;  %v8211_v38 = vadd.f32 %v17259_v33, %v7721_v31  ;;  %v8129_v58 = vpop.f32.mrf.mxu0  ;;  %v20618_v33 = vld [vmem:[#allocation86_spill] sm:$0xff]  ;;  %v6616_v49 = vpop.f32.mrf.mxu2 }
 0x9e1   :  { %v8212_v47 = vadd.f32 %v17282_v27, %v7722_v36  ;;  %v6700_v31 = vadd.f32 %v17334_v21, %v20618_v33  ;;  %v8213_v36 = vadd.f32 %v17307_v3, %v7723_v26 }
 0x9e2   :  { %v7636_v44 = vpop.f32.mrf.mxu3  ;;  %v8952_v19 = vadd.f32 %v8951_v39, %v8871_v12  ;;  %v9121_v11 = vadd.f32 %v9120_v54, %v9040_v4  ;;  %v9042_v12 = vmul.f32 %v8873_v37, %v17230_v0  ;;  %v17415_v8 = vadd.f32 %v17302_v1, %v8211_v38  ;;  %v20620_v1 = vld [vmem:[#allocation163_spill] sm:$0xff] }
 0x9e3   :  { %v9043_v39 = vmul.f32 %v8874_v57, %v17250_v34  ;;  %v8876_v55 = vmul.f32 %v20619_v6, %v17405_v63  ;;  %v17425_v59 = vadd.f32 %v17322_v16, %v8212_v47  ;;  %v6701_v27 = vadd.f32 %v17357_v42, %v20620_v1 }
 0x9e4   :  { %v8953_v52 = vadd.f32 %v8952_v19, %v8872_v48  ;;  %v9122_v46 = vadd.f32 %v9121_v11, %v9041_v60  ;;  %v7724_v48 = vadd.f32 %v17350_v5, %v6699_v53  ;;  %v7725_v21 = vadd.f32 %v7634_v28, %v6700_v31  ;;  %v20622_v60 = vld [vmem:[#allocation20_spill] sm:$0xff]  ;;  %v20623_v28 = vld [vmem:[#allocation141_spill] sm:$0xff] }
 0x9e5   :  { %v9044_v5 = vmul.f32 %v8875_v2, %v17269_v23  ;;  %v6702_v41 = vadd.f32 %v6614_v43, %v20622_v60  ;;  %v17435_v38 = vadd.f32 %v17342_v56, %v8213_v36  ;;  %v7726_v35 = vadd.f32 %v7636_v44, %v6701_v27  ;;  %v20625_v44 = vld [vmem:[#allocation142_spill] sm:$0xff] }
 0x9e6   :  { %v8954_v40 = vadd.f32 %v8953_v52, %v8873_v37  ;;  %v9123_v13 = vadd.f32 %v9122_v46, %v9042_v12  ;;  %v20621_v37 = vld [vmem:[#allocation140_spill] sm:$0xff]  ;;  %v8214_v16 = vadd.f32 %v17332_v50, %v7724_v48  ;;  %v9045_v3 = vmul.f32 %v8876_v55, %v17405_v63 }
 0x9e7   :  { %v8710_v14 = vpop.f32.mrf.mxu1  ;;  %v8877_v19 = vmul.f32 %v20621_v37, %v17415_v8  ;;  %v8215_v26 = vadd.f32 %v17355_v10, %v7725_v21  ;;  %v20624_v12 = vld [vmem:[#allocation172_spill] sm:$0xff]  ;;  %v8216_v31 = vadd.f32 %v17378_v17, %v7726_v35 }
 0x9e8   :  { %v8955_v54 = vadd.f32 %v8954_v40, %v8874_v57  ;;  %v9124_v53 = vadd.f32 %v9123_v13, %v9043_v39  ;;  %v8878_v57 = vmul.f32 %v20623_v28, %v17425_v59  ;;  %v17442_v52 = vadd.f32 %v17362_v29, %v8214_v16  ;;  %v8131_v29 = vpop.f32.mrf.mxu0  ;;  %v20626_v39 = vld [vmem:[#allocation143_spill] sm:$0xff]  ;;  %v20627_v17 = vld [vmem:[#allocation144_spill] sm:$0xff]  ;;  %v20630_v28 = vld [vmem:[#allocation146_spill] sm:$0xff] }
 0x9e9   :  { %v6703_v56 = vadd.f32 %v6616_v49, %v20624_v12  ;;  %v9046_v50 = vmul.f32 %v8877_v19, %v17415_v8  ;;  %v17450_v33 = vadd.f32 %v17380_v24, %v8215_v26  ;;  %v6619_v49 = vpop.f32.mrf.mxu2 }
 0x9ea   :  { %v7639_v4 = vpop.f32.mrf.mxu3  ;;  %v8956_v42 = vadd.f32 %v8955_v54, %v8875_v2  ;;  %v9125_v20 = vadd.f32 %v9124_v53, %v9044_v5  ;;  %v8879_v2 = vmul.f32 %v20625_v44, %v17435_v38  ;;  %v9047_v10 = vmul.f32 %v8878_v57, %v17425_v59 }
 0x9eb   :  { %v7727_v43 = vadd.f32 %v7639_v4, %v6702_v41  ;;  %v8880_v6 = vmul.f32 %v20626_v39, %v17442_v52  ;;  %v8881_v21 = vmul.f32 %v20627_v17, %v17450_v33  ;;  %v20628_v41 = vld [vmem:[#allocation145_spill] sm:$0xff]  ;;  %v20633_v39 = vld [vmem:[#allocation171_spill] sm:$0xff] }
 0x9ec   :  { %v8957_v47 = vadd.f32 %v8956_v42, %v8876_v55  ;;  %v9126_v48 = vadd.f32 %v9125_v20, %v9045_v3  ;;  %v17456_v55 = vadd.f32 %v8710_v14, %v8216_v31  ;;  %v9048_v24 = vmul.f32 %v8879_v2, %v17435_v38 }
 0x9ed   :  { %v8217_v1 = vadd.f32 %v8129_v58, %v7727_v43  ;;  %v9049_v60 = vmul.f32 %v8880_v6, %v17442_v52  ;;  %v20629_v58 = vld [vmem:[#allocation165_spill] sm:$0xff]  ;;  %v9050_v3 = vmul.f32 %v8881_v21, %v17450_v33 }
 0x9ee   :  { %v8958_v40 = vadd.f32 %v8957_v47, %v8877_v19  ;;  %v9127_v27 = vadd.f32 %v9126_v48, %v9046_v50  ;;  %v8882_v14 = vmul.f32 %v20628_v41, %v17456_v55  ;;  %v6704_v35 = vadd.f32 %v6619_v49, %v20629_v58  ;;  %v20631_v47 = vld [vmem:[#allocation147_spill] sm:$0xff] }
 0x9ef   :  { %v8713_v11 = vpop.f32.mrf.mxu1 }
 0x9f0   :  { %v8959_v36 = vadd.f32 %v8958_v40, %v8878_v57  ;;  %v17461_v13 = vadd.f32 %v8713_v11, %v8217_v1  ;;  %v9128_v5 = vadd.f32 %v9127_v27, %v9047_v10  ;;  %v8134_v43 = vpop.f32.mrf.mxu0  ;;  %v9051_v20 = vmul.f32 %v8882_v14, %v17456_v55 }
 0x9f1   :  { %v6621_v44 = vpop.f32.mrf.mxu2 }
 0x9f2   :  { %v7641_v46 = vpop.f32.mrf.mxu3  ;;  %v8960_v19 = vadd.f32 %v8959_v36, %v8879_v2  ;;  %v9129_v53 = vadd.f32 %v9128_v5, %v9048_v24  ;;  %v8883_v57 = vmul.f32 %v20630_v28, %v17461_v13  ;;  %v20634_v24 = vld [vmem:[#allocation148_spill] sm:$0xff] }
 0x9f3   :  { %v7728_v4 = vadd.f32 %v7641_v46, %v6703_v56 }
 0x9f4   :  { %v8961_v42 = vadd.f32 %v8960_v19, %v8880_v6  ;;  %v9130_v12 = vadd.f32 %v9129_v53, %v9049_v60  ;;  %v9052_v46 = vmul.f32 %v8883_v57, %v17461_v13  ;;  %v6705_v6 = vadd.f32 %v6621_v44, %v20633_v39  ;;  %v20636_v39 = vld [vmem:[#allocation35_spill] sm:$0xff] }
 0x9f5   :  { %v8218_v54 = vadd.f32 %v8131_v29, %v7728_v4 }
 0x9f6   :  { %v8962_v56 = vadd.f32 %v8961_v42, %v8881_v21  ;;  %v9131_v2 = vadd.f32 %v9130_v12, %v9050_v3 }
 0x9f7   :  { %v8715_v37 = vpop.f32.mrf.mxu1 }
 0x9f8   :  { %v17466_v16 = vadd.f32 %v8715_v37, %v8218_v54  ;;  %v8963_v31 = vadd.f32 %v8962_v56, %v8882_v14  ;;  %v9132_v40 = vadd.f32 %v9131_v2, %v9051_v20  ;;  %v8136_v19 = vpop.f32.mrf.mxu0 }
 0x9fa   :  { %v7644_v11 = vpop.f32.mrf.mxu3  ;;  %v8884_v50 = vmul.f32 %v20631_v47, %v17466_v16  ;;  %v8964_v10 = vadd.f32 %v8963_v31, %v8883_v57  ;;  %v9133_v1 = vadd.f32 %v9132_v40, %v9052_v46  ;;  %v9147_v40 = vld [vmem:[%s18356_s5] sm:$0x1] }
 0x9fb   :  { %v7729_v26 = vadd.f32 %v7644_v11, %v6704_v35  ;;  %v20635_v35 = vld [vmem:[#allocation149_spill] sm:$0xff] }
 0x9fc   :  { %v9053_v4 = vmul.f32 %v8884_v50, %v17466_v16  ;;  %v8965_v27 = vadd.f32 %v8964_v10, %v8884_v50 }
 0x9fd   :  { %v8219_v29 = vadd.f32 %v8134_v43, %v7729_v26 }
 0x9fe   :  { %v9134_v54 = vadd.f32 %v9133_v1, %v9053_v4  ;;  %v20637_v1 = vld [vmem:[#allocation19_spill] sm:$0xff] }
 0x9ff   :  { %v8718_v48 = vpop.f32.mrf.mxu1 }
 0xa00   :  { %v17477_v49 = vadd.f32 %v8718_v48, %v8219_v29 }
 0xa02   :  { %20632 = vst [vmem:[#allocation124_spill] sm:$0xff] %v17477_v49  ;;  %v7646_v36 = vpop.f32.mrf.mxu3  ;;  %v8885_v17 = vmul.f32 %v20634_v24, %v17477_v49 }
 0xa03   :  { %v7730_v21 = vadd.f32 %v7646_v36, %v6705_v6  ;;  %v20638_v36 = vld [vmem:[#allocation174_spill] sm:$0xff] }
 0xa04   :  { %v8966_v5 = vadd.f32 %v8965_v27, %v8885_v17  ;;  %v9054_v37 = vmul.f32 %v8885_v17, %v17477_v49  ;;  %v20639_v17 = vld [vmem:[#allocation179_spill] sm:$0xff]  ;;  %v20750_v27 = vld [vmem:[#allocation229_spill] sm:$0xff]  ;;  %v20808_v49 = vld [vmem:[#allocation30_spill] sm:$0xff] }
 0xa05   :  { %v8220_v60 = vadd.f32 %v8136_v19, %v7730_v21 }
 0xa06   :  { %v9135_v41 = vadd.f32 %v9134_v54, %v9054_v37  ;;  %v20640_v54 = vld [vmem:[#allocation39_spill] sm:$0xff]  ;;  %v20641_v37 = vld [vmem:[#allocation182_spill] sm:$0xff] }
 0xa07   :  { %v8720_v14 = vpop.f32.mrf.mxu1 }
 0xa08   :  { %v17483_v58 = vadd.f32 %v8720_v14, %v8220_v60  ;;  %v20642_v60 = vld [vmem:[#allocation180_spill] sm:$0xff]  ;;  %v20643_v14 = vld [vmem:[#allocation139_spill] sm:$0xff] }
 0xa0a   :  { %v8886_v53 = vmul.f32 %v20635_v35, %v17483_v58 }
 0xa0c   :  { %v8967_v42 = vadd.f32 %v8966_v5, %v8886_v53  ;;  %v9055_v3 = vmul.f32 %v8886_v53, %v17483_v58  ;;  %v20644_v53 = vld [vmem:[#allocation177_spill] sm:$0xff]  ;;  %v20690_v5 = vld [vmem:[#allocation23_spill] sm:$0xff] }
 0xa0e   :  { %v8968_v28 = vrot.slane %v8967_v42, 4  ;;  %v9136_v57 = vadd.f32 %v9135_v41, %v9055_v3  ;;  %v20645_v3 = vld [vmem:[#allocation102_spill] sm:$0xff] }
 0xa10   :  { %v8969_v11 = vadd.f32 %v8968_v28, %v8967_v42  ;;  %v9137_v26 = vrot.slane %v9136_v57, 4  ;;  %v20691_v28 = vld [vmem:[#allocation21_spill] sm:$0xff] }
 0xa12   :  { %v8970_v43 = vrot.slane %v8969_v11, 2  ;;  %v9138_v12 = vadd.f32 %v9137_v26, %v9136_v57  ;;  %v20646_v57 = vld [vmem:[#allocation209_spill] sm:$0xff] }
 0xa13   :  { %v20647_v26 = vld [vmem:[#allocation181_spill] sm:$0xff] }
 0xa14   :  { %v8971_v56 = vadd.f32 %v8970_v43, %v8969_v11  ;;  %v9139_v20 = vrot.slane %v9138_v12, 2 }
 0xa16   :  { %v8972_v47 = vrot.slane %v8971_v56, 1  ;;  %v9140_v50 = vadd.f32 %v9139_v20, %v9138_v12  ;;  %v20648_v12 = vld [vmem:[#allocation211_spill] sm:$0xff] }
 0xa17   :  { %v20649_v20 = vld [vmem:[#allocation63_spill] sm:$0xff] }
 0xa18   :  { %v8973_v44 = vadd.f32 %v8972_v47, %v8971_v56  ;;  %v9141_v2 = vrot.slane %v9140_v50, 1  ;;  %v20654_v47 = vld [vmem:[#allocation224_spill] sm:$0xff]  ;;  %v20677_v56 = vld [vmem:[#allocation246_spill] sm:$0xff] }
 0xa1a   :  { %v9142_v31 = vadd.f32 %v9141_v2, %v9140_v50  ;;  %v17488_v46 = vmul.f32 0.001953125, %v8973_v44  ;;  %v20650_v50 = vld [vmem:[#allocation213_spill] sm:$0xff] }
 0xa1b   :  { %v20687_v2 = vld [vmem:[#allocation113_spill] sm:$0xff] }
 0xa1c   :  { %v9144_v29 = vmul.f32 0.001953125, %v9142_v31  ;;  %v9145_v48 = vmul.f32 %v17488_v46, %v17488_v46  ;;  %v20693_v19 = vsub.f32 %v17483_v58, %v17488_v46  ;;  %v20700_v58 = vsub.f32 %v20639_v17, %v17488_v46 }
 0xa1e   :  { %v9146_v10 = vsub.f32 %v9144_v29, %v9145_v48  ;;  %v20651_v29 = vld [vmem:[#allocation227_spill] sm:$0xff]  ;;  %v20652_v48 = vld [vmem:[#allocation225_spill] sm:$0xff] }
 0xa20   :  { %v17494_v4 = vadd.f32 1e-05, %v9146_v10  ;;  %v20653_v10 = vld [vmem:[#allocation257_spill] sm:$0xff] }
 0xa22   :  { %11991 = vrsqrt.f32 %v17494_v4  ;;  %vm9155_vm9 = vweird.f32 %v17494_v4 }
 0xa28   :  { %v11992_v11 = vpop.eup %11991 }
 0xa29   :  { %v9150_v31 = vmul.f32 %v11992_v11, %v17494_v4  ;;  %vm9156_vm10 = vweird.f32 %v11992_v11 }
 0xa2a   :  { %vm9157_vm11 = vmor %vm9155_vm9, %vm9156_vm10 }
 0xa2b   :  { %v9151_v44 = vmul.f32 %v11992_v11, %v9150_v31 }
 0xa2d   :  { %v9152_v31 = vmul.f32 0.5, %v9151_v44  ;;  %v20676_v44 = vld [vmem:[#allocation25_spill] sm:$0xff] }
 0xa2f   :  { %v9153_v41 = vsub.f32 1.5, %v9152_v31  ;;  %v20688_v31 = vld [vmem:[#allocation28_spill] sm:$0xff] }
 0xa31   :  { %v9154_v43 = vmul.f32 %v11992_v11, %v9153_v41  ;;  %v20689_v41 = vld [vmem:[#allocation29_spill] sm:$0xff] }
 0xa33   :  { %v9158_v21 = vsel %vm9157_vm11, %v11992_v11, %v9154_v43  ;;  %v20694_v43 = vsub.f32 %v20636_v39, %v17488_v46 }
 0xa34   :  { %v9159_v6 = vmul.f32 %v9158_v21, %v9147_v40  ;;  %v17656_v21 = vld [vmem:[%s18357_s6] ss:$0 sm:$0xff]  ;;  %v20696_v40 = vsub.f32 %v20637_v1, %v17488_v46  ;;  %s12132_s6 = smov [#allocation8]  }
 0xa35   :  { %20692 = vst [vmem:[#allocation37_spill] sm:$0xff] %v17656_v21  ;;  %s9581_s16 = sshll.u32 %s12132_s6, 4  ;;  %s9582_s16 = int_to_ptr.vmem [resolvable:$true] %s9581_s16 }
 0xa36   :  { %v17658_v24 = vperm.slane %v9159_v6, 0  ;;  %v20698_v6 = vsub.f32 %v20638_v36, %v17488_v46 }
 0xa38   :  { %v9326_v11 = vmul.f32 %v17658_v24, %v20693_v19  ;;  %v17682_v42 = vmul.f32 %v17658_v24, %v20694_v43  ;;  %v17688_v4 = vmul.f32 %v17658_v24, %v20696_v40  ;;  %v17694_v35 = vmul.f32 %v17658_v24, %v20698_v6 }
 0xa39   :  { %v17700_v39 = vmul.f32 %v17658_v24, %v20700_v58  ;;  %v20702_v19 = vsub.f32 %v20640_v54, %v17488_v46  ;;  %v20704_v43 = vsub.f32 %v20641_v37, %v17488_v46  ;;  %v20706_v40 = vsub.f32 %v20642_v60, %v17488_v46 }
 0xa3a   :  { %20695 = vst [vmem:[#allocation249_spill] sm:$0xff] %v17682_v42  ;;  %v9412_v6 = vadd.f32 %v17656_v21, %v9326_v11  ;;  %v20708_v54 = vsub.f32 %v20643_v14, %v17488_v46  ;;  %v20710_v37 = vsub.f32 %v20644_v53, %v17488_v46  ;;  %v20712_v60 = vsub.f32 %v20645_v3, %v17488_v46  ;;  %v20804_v21 = vld [vmem:[#allocation130_spill] sm:$0xff]  ;;  %v20806_v42 = vld [vmem:[#allocation248_spill] sm:$0xff] }
 0xa3b   :  { %20697 = vst [vmem:[#allocation33_spill] sm:$0xff] %v17688_v4  ;;  %v17706_v1 = vmul.f32 %v17658_v24, %v20702_v19  ;;  %v17712_v36 = vmul.f32 %v17658_v24, %v20704_v43  ;;  %v17718_v17 = vmul.f32 %v17658_v24, %v20706_v40  ;;  %v20714_v11 = vsub.f32 %v20646_v57, %v17488_v46  ;;  %v20802_v4 = vld [vmem:[#allocation12_spill] sm:$0xff] }
 0xa3c   :  { %20699 = vst [vmem:[#allocation36_spill] sm:$0xff] %v17694_v35  ;;  %v17725_v58 = vmul.f32 %v17658_v24, %v20708_v54  ;;  %v17731_v19 = vmul.f32 %v17658_v24, %v20710_v37  ;;  %v17737_v43 = vmul.f32 %v17658_v24, %v20712_v60  ;;  %v20716_v40 = vsub.f32 %v20647_v26, %v17488_v46  ;;  %v20800_v35 = vld [vmem:[#allocation31_spill] sm:$0xff] }
 0xa3d   :  { %20701 = vst [vmem:[#allocation94_spill] sm:$0xff] %v17700_v39  ;;  %v17743_v14 = vmul.f32 %v17658_v24, %v20714_v11  ;;  %v20718_v54 = vsub.f32 %v20648_v12, %v17488_v46  ;;  %v20720_v37 = vsub.f32 %v20649_v20, %v17488_v46  ;;  %v9494_v60 = vmax.f32 %v9412_v6, 0.0  ;;  %v20798_v39 = vld [vmem:[#allocation107_spill] sm:$0xff] }
 0xa3e   :  { %20703 = vst [vmem:[#allocation250_spill] sm:$0xff] %v17706_v1  ;;  %v17749_v53 = vmul.f32 %v17658_v24, %v20716_v40  ;;  %v20722_v11 = vsub.f32 %v20650_v50, %v17488_v46  ;;  %v20724_v40 = vsub.f32 %v20529_v9, %v17488_v46  ;;  %v20728_v6 = vsub.f32 %v20533_v25, %v17488_v46  ;;  %v20796_v1 = vld [vmem:[#allocation40_spill] sm:$0xff] }
 0xa3f   :  { %20705 = vst [vmem:[#allocation41_spill] sm:$0xff] %v17712_v36  ;;  %v17755_v3 = vmul.f32 %v17658_v24, %v20718_v54  ;;  %v17761_v57 = vmul.f32 %v17658_v24, %v20720_v37  ;;  %v20726_v54 = vsub.f32 %v20531_v45, %v17488_v46  ;;  %v20730_v37 = vsub.f32 %v20535_v32, %v17488_v46  ;;  %v20794_v36 = vld [vmem:[#allocation247_spill] sm:$0xff] }
 0xa40   :  { %20707 = vst [vmem:[#allocation26_spill] sm:$0xff] %v17718_v17  ;;  %v17767_v26 = vmul.f32 %v17658_v24, %v20722_v11  ;;  %v17773_v12 = vmul.f32 %v17658_v24, %v20724_v40  ;;  %v17785_v50 = vmul.f32 %v17658_v24, %v20728_v6  ;;  %v20732_v11 = vsub.f32 %v20539_v15, %v17488_v46  ;;  %v20792_v17 = vld [vmem:[#allocation245_spill] sm:$0xff] }
 0xa41   :  { %20709 = vst [vmem:[#allocation44_spill] sm:$0xff] %v17725_v58  ;;  %v17779_v20 = vmul.f32 %v17658_v24, %v20726_v54  ;;  %v17791_v9 = vmul.f32 %v17658_v24, %v20730_v37  ;;  %v20734_v40 = vsub.f32 %v20541_v61, %v17488_v46  ;;  %v20736_v54 = vsub.f32 %v20543_v22, %v17488_v46  ;;  %v20788_v58 = vld [vmem:[#allocation242_spill] sm:$0xff] }
 0xa42   :  { %20711 = vst [vmem:[#allocation100_spill] sm:$0xff] %v17731_v19  ;;  %v17797_v45 = vmul.f32 %v17658_v24, %v20732_v11  ;;  %v20738_v6 = vsub.f32 %v16854_v30, %v17488_v46  ;;  %v20740_v37 = vsub.f32 %v16864_v51, %v17488_v46  ;;  %v20744_v11 = vsub.f32 %v20652_v48, %v17488_v46  ;;  %v20786_v19 = vld [vmem:[#allocation243_spill] sm:$0xff] }
 0xa43   :  { %20713 = vst [vmem:[#allocation13_spill] sm:$0xff] %v17737_v43  ;;  %v17803_v25 = vmul.f32 %v17658_v24, %v20734_v40  ;;  %v17809_v32 = vmul.f32 %v17658_v24, %v20736_v54  ;;  %v20746_v40 = vsub.f32 %v20653_v10, %v17488_v46  ;;  %v20747_v54 = vsub.f32 %v20654_v47, %v17488_v46  ;;  %v20784_v43 = vld [vmem:[#allocation240_spill] sm:$0xff] }
 0xa44   :  { %20715 = vst [vmem:[#allocation47_spill] sm:$0xff] %v17743_v14  ;;  %v17815_v15 = vmul.f32 %v17658_v24, %v20738_v6  ;;  %v17821_v61 = vmul.f32 %v17658_v24, %v20740_v37  ;;  %v17833_v30 = vmul.f32 %v17658_v24, %v20744_v11  ;;  %v20751_v48 = vsub.f32 %v20750_v27, %v17488_v46  ;;  %v20782_v14 = vld [vmem:[#allocation22_spill] sm:$0xff] }
 0xa45   :  { %20717 = vst [vmem:[#allocation253_spill] sm:$0xff] %v17749_v53  ;;  %v9271_v51 = vmul.f32 %v17658_v24, %v20746_v40  ;;  %v9272_v6 = vmul.f32 %v17658_v24, %v20747_v54  ;;  %v20780_v53 = vld [vmem:[#allocation241_spill] sm:$0xff] }
 0xa46   :  { %20719 = vst [vmem:[#allocation27_spill] sm:$0xff] %v17755_v3  ;;  %v9274_v11 = vmul.f32 %v17658_v24, %v20751_v48  ;;  %v20778_v3 = vld [vmem:[#allocation16_spill] sm:$0xff] }
 0xa47   :  { %20721 = vst [vmem:[#allocation18_spill] sm:$0xff] %v17761_v57  ;;  %v20776_v57 = vld [vmem:[#allocation244_spill] sm:$0xff] }
 0xa48   :  { %20723 = vst [vmem:[#allocation251_spill] sm:$0xff] %v17767_v26  ;;  %v20774_v26 = vld [vmem:[#allocation14_spill] sm:$0xff] }
 0xa49   :  { %20725 = vst [vmem:[#allocation254_spill] sm:$0xff] %v17773_v12  ;;  %v20772_v12 = vld [vmem:[#allocation239_spill] sm:$0xff] }
 0xa4a   :  { %20727 = vst [vmem:[#allocation51_spill] sm:$0xff] %v17779_v20  ;;  %v20770_v20 = vld [vmem:[#allocation17_spill] sm:$0xff] }
 0xa4b   :  { %20729 = vst [vmem:[#allocation252_spill] sm:$0xff] %v17785_v50  ;;  %v20768_v50 = vld [vmem:[#allocation237_spill] sm:$0xff] }
 0xa4c   :  { %20731 = vst [vmem:[#allocation71_spill] sm:$0xff] %v17791_v9  ;;  %v20766_v9 = vld [vmem:[#allocation238_spill] sm:$0xff] }
 0xa4d   :  { %20733 = vst [vmem:[#allocation15_spill] sm:$0xff] %v17797_v45  ;;  %v20764_v45 = vld [vmem:[#allocation234_spill] sm:$0xff] }
 0xa4e   :  { %20735 = vst [vmem:[#allocation81_spill] sm:$0xff] %v17803_v25  ;;  %v20762_v25 = vld [vmem:[#allocation236_spill] sm:$0xff] }
 0xa4f   :  { %9576 = vst [vmem:[#allocation8 + $0x288] sm:$0xff] %v9494_v60  ;;  %v20742_v60 = vsub.f32 %v20651_v29, %v17488_v46  ;;  %v20748_v29 = vld [vmem:[#allocation256_spill] sm:$0xff] }
 0xa50   :  { %20737 = vst [vmem:[#allocation48_spill] sm:$0xff] %v17809_v32  ;;  %v20749_v37 = vsub.f32 %v20748_v29, %v17488_v46  ;;  %v20760_v32 = vld [vmem:[#allocation235_spill] sm:$0xff] }
 0xa51   :  { %20739 = vst [vmem:[#allocation65_spill] sm:$0xff] %v17815_v15  ;;  %v17827_v22 = vmul.f32 %v17658_v24, %v20742_v60  ;;  %v20758_v15 = vld [vmem:[#allocation232_spill] sm:$0xff] }
 0xa52   :  { %20741 = vst [vmem:[#allocation76_spill] sm:$0xff] %v17821_v61  ;;  %v9273_v60 = vmul.f32 %v17658_v24, %v20749_v37  ;;  %v20756_v61 = vld [vmem:[#allocation230_spill] sm:$0xff]  ;;  %v20759_v27 = vsub.f32 %v20758_v15, %v17488_v46  ;;  %v20767_v15 = vsub.f32 %v20766_v9, %v17488_v46  ;;  %v20775_v9 = vsub.f32 %v20774_v26, %v17488_v46 }
 0xa53   :  { %20743 = vst [vmem:[#allocation42_spill] sm:$0xff] %v17827_v22  ;;  %v20754_v22 = vld [vmem:[#allocation231_spill] sm:$0xff]  ;;  %v20757_v29 = vsub.f32 %v20756_v61, %v17488_v46  ;;  %v20765_v61 = vsub.f32 %v20764_v45, %v17488_v46  ;;  %v20773_v45 = vsub.f32 %v20772_v12, %v17488_v46  ;;  %v20781_v12 = vsub.f32 %v20780_v53, %v17488_v46 }
 0xa54   :  { %20745 = vst [vmem:[#allocation24_spill] sm:$0xff] %v17833_v30  ;;  %v20752_v30 = vld [vmem:[#allocation233_spill] sm:$0xff]  ;;  %v20755_v47 = vsub.f32 %v20754_v22, %v17488_v46  ;;  %v9278_v48 = vmul.f32 %v17658_v24, %v20759_v27  ;;  %v20763_v22 = vsub.f32 %v20762_v25, %v17488_v46  ;;  %v9282_v27 = vmul.f32 %v17658_v24, %v20767_v15 }
 0xa55   :  { %v20753_v10 = vsub.f32 %v20752_v30, %v17488_v46  ;;  %v9277_v37 = vmul.f32 %v17658_v24, %v20757_v29  ;;  %v20761_v30 = vsub.f32 %v20760_v32, %v17488_v46  ;;  %v9281_v29 = vmul.f32 %v17658_v24, %v20765_v61 }
 0xa56   :  { %v9276_v54 = vmul.f32 %v17658_v24, %v20755_v47  ;;  %v9280_v47 = vmul.f32 %v17658_v24, %v20763_v22  ;;  %v20769_v32 = vsub.f32 %v20768_v50, %v17488_v46  ;;  %v20771_v25 = vsub.f32 %v20770_v20, %v17488_v46 }
 0xa57   :  { %v9275_v40 = vmul.f32 %v17658_v24, %v20753_v10  ;;  %v9279_v10 = vmul.f32 %v17658_v24, %v20761_v30  ;;  %v9285_v61 = vmul.f32 %v17658_v24, %v20773_v45  ;;  %v9286_v15 = vmul.f32 %v17658_v24, %v20775_v9 }
 0xa58   :  { %v9283_v30 = vmul.f32 %v17658_v24, %v20769_v32  ;;  %v9284_v22 = vmul.f32 %v17658_v24, %v20771_v25  ;;  %v20777_v50 = vsub.f32 %v20776_v57, %v17488_v46  ;;  %v20779_v20 = vsub.f32 %v20778_v3, %v17488_v46 }
 0xa59   :  { %v9289_v45 = vmul.f32 %v17658_v24, %v20781_v12  ;;  %v20783_v26 = vsub.f32 %v20782_v14, %v17488_v46  ;;  %v20785_v57 = vsub.f32 %v20784_v43, %v17488_v46  ;;  %v20787_v3 = vsub.f32 %v20786_v19, %v17488_v46 }
 0xa5a   :  { %v9287_v32 = vmul.f32 %v17658_v24, %v20777_v50  ;;  %v9288_v25 = vmul.f32 %v17658_v24, %v20779_v20  ;;  %v20789_v53 = vsub.f32 %v20788_v58, %v17488_v46  ;;  %v20790_v14 = vsub.f32 %v20676_v44, %v17488_v46 }
 0xa5b   :  { %v9290_v9 = vmul.f32 %v17658_v24, %v20783_v26  ;;  %v9291_v50 = vmul.f32 %v17658_v24, %v20785_v57  ;;  %v9292_v20 = vmul.f32 %v17658_v24, %v20787_v3  ;;  %v20791_v43 = vsub.f32 %v20677_v56, %v17488_v46 }
 0xa5c   :  { %v9293_v12 = vmul.f32 %v17658_v24, %v20789_v53  ;;  %v9294_v26 = vmul.f32 %v17658_v24, %v20790_v14  ;;  %v20793_v19 = vsub.f32 %v20792_v17, %v17488_v46  ;;  %v20795_v58 = vsub.f32 %v20794_v36, %v17488_v46 }
 0xa5d   :  { %v9295_v57 = vmul.f32 %v17658_v24, %v20791_v43  ;;  %v20797_v44 = vsub.f32 %v20796_v1, %v17488_v46  ;;  %v20799_v56 = vsub.f32 %v20798_v39, %v17488_v46  ;;  %v20801_v17 = vsub.f32 %v20800_v35, %v17488_v46 }
 0xa5e   :  { %v9296_v3 = vmul.f32 %v17658_v24, %v20793_v19  ;;  %v9297_v53 = vmul.f32 %v17658_v24, %v20795_v58  ;;  %v20803_v36 = vsub.f32 %v20802_v4, %v17488_v46  ;;  %v20805_v1 = vsub.f32 %v20804_v21, %v17488_v46 }
 0xa5f   :  { %v9298_v14 = vmul.f32 %v17658_v24, %v20797_v44  ;;  %v9299_v43 = vmul.f32 %v17658_v24, %v20799_v56  ;;  %v9300_v19 = vmul.f32 %v17658_v24, %v20801_v17  ;;  %v20807_v39 = vsub.f32 %v20806_v42, %v17488_v46 }
 0xa60   :  { %v9301_v58 = vmul.f32 %v17658_v24, %v20803_v36  ;;  %v9302_v44 = vmul.f32 %v17658_v24, %v20805_v1  ;;  %v20809_v35 = vsub.f32 %v20808_v49, %v17488_v46  ;;  %v20810_v4 = vsub.f32 %v20687_v2, %v17488_v46 }
 0xa61   :  { %v9303_v56 = vmul.f32 %v17658_v24, %v20807_v39  ;;  %v20811_v21 = vsub.f32 %v20688_v31, %v17488_v46  ;;  %v20812_v42 = vsub.f32 %v20689_v41, %v17488_v46  ;;  %v20813_v49 = vsub.f32 %v20690_v5, %v17488_v46 }
 0xa62   :  { %v9304_v17 = vmul.f32 %v17658_v24, %v20809_v35  ;;  %v9305_v36 = vmul.f32 %v17658_v24, %v20810_v4  ;;  %v20814_v2 = vsub.f32 %v20691_v28, %v17488_v46  ;;  %v20815_v31 = vsub.f32 %v17178_v18, %v17488_v46 }
 0xa63   :  { %v9306_v1 = vmul.f32 %v17658_v24, %v20811_v21  ;;  %v9307_v39 = vmul.f32 %v17658_v24, %v20812_v42  ;;  %v9308_v35 = vmul.f32 %v17658_v24, %v20813_v49  ;;  %v20816_v41 = vsub.f32 %v17196_v62, %v17488_v46 }
 0xa64   :  { %v9309_v4 = vmul.f32 %v17658_v24, %v20814_v2  ;;  %v9310_v21 = vmul.f32 %v17658_v24, %v20815_v31  ;;  %v20817_v5 = vsub.f32 %v17212_v7, %v17488_v46  ;;  %v20818_v28 = vsub.f32 %v17230_v0, %v17488_v46 }
 0xa65   :  { %v9311_v42 = vmul.f32 %v17658_v24, %v20816_v41  ;;  %v20819_v18 = vsub.f32 %v17250_v34, %v17488_v46  ;;  %v20820_v62 = vsub.f32 %v17269_v23, %v17488_v46  ;;  %v20821_v7 = vsub.f32 %v17405_v63, %v17488_v46 }
 0xa66   :  { %v9312_v49 = vmul.f32 %v17658_v24, %v20817_v5  ;;  %v9313_v2 = vmul.f32 %v17658_v24, %v20818_v28  ;;  %v20822_v0 = vsub.f32 %v17415_v8, %v17488_v46  ;;  %v20823_v34 = vsub.f32 %v17425_v59, %v17488_v46 }
 0xa67   :  { %v9314_v31 = vmul.f32 %v17658_v24, %v20819_v18  ;;  %v9315_v41 = vmul.f32 %v17658_v24, %v20820_v62  ;;  %v9316_v5 = vmul.f32 %v17658_v24, %v20821_v7  ;;  %v20824_v23 = vsub.f32 %v17435_v38, %v17488_v46 }
 0xa68   :  { %v9317_v28 = vmul.f32 %v17658_v24, %v20822_v0  ;;  %v9318_v18 = vmul.f32 %v17658_v24, %v20823_v34  ;;  %v20825_v63 = vsub.f32 %v17442_v52, %v17488_v46  ;;  %v20826_v8 = vsub.f32 %v17450_v33, %v17488_v46  ;;  %v20830_v33 = vld [vmem:[#allocation124_spill] sm:$0xff] }
 0xa69   :  { %v9319_v62 = vmul.f32 %v17658_v24, %v20824_v23  ;;  %v20827_v59 = vsub.f32 %v17456_v55, %v17488_v46  ;;  %v20828_v38 = vsub.f32 %v17461_v13, %v17488_v46  ;;  %v20829_v52 = vsub.f32 %v17466_v16, %v17488_v46  ;;  %v20833_v13 = vld [vmem:[#allocation37_spill] sm:$0xff] }
 0xa6a   :  { %v9320_v7 = vmul.f32 %v17658_v24, %v20825_v63  ;;  %v9321_v0 = vmul.f32 %v17658_v24, %v20826_v8  ;;  %v20831_v8 = vsub.f32 %v20830_v33, %v17488_v46  ;;  %v20835_v16 = vld [vmem:[#allocation33_spill] sm:$0xff]  ;;  %v20837_v33 = vld [vmem:[#allocation36_spill] sm:$0xff] }
 0xa6b   :  { %v9322_v34 = vmul.f32 %v17658_v24, %v20827_v59  ;;  %v9323_v23 = vmul.f32 %v17658_v24, %v20828_v38  ;;  %v9324_v63 = vmul.f32 %v17658_v24, %v20829_v52  ;;  %v20832_v59 = vld [vmem:[#allocation249_spill] sm:$0xff]  ;;  %v18061_v52 = vadd.f32 %v20833_v13, %v20835_v16 }
 0xa6c   :  { %v9325_v55 = vmul.f32 %v17658_v24, %v20831_v8  ;;  %v18057_v38 = vadd.f32 %v20833_v13, %v20832_v59  ;;  %v18065_v46 = vadd.f32 %v20833_v13, %v20837_v33  ;;  %v20839_v8 = vld [vmem:[#allocation94_spill] sm:$0xff]  ;;  %v20843_v16 = vld [vmem:[#allocation41_spill] sm:$0xff] }
 0xa6d   :  { %20836 = vst [vmem:[#allocation95_spill] sm:$0xff] %v18061_v52  ;;  %v18069_v24 = vadd.f32 %v20833_v13, %v20839_v8  ;;  %v20841_v59 = vld [vmem:[#allocation250_spill] sm:$0xff]  ;;  %v18077_v52 = vadd.f32 %v20833_v13, %v20843_v16  ;;  %v18084_v8 = vadd.f32 %v20833_v13, %v9271_v51  ;;  %v18096_v16 = vadd.f32 %v20833_v13, %v9275_v40 }
 0xa6e   :  { %20834 = vst [vmem:[#allocation154_spill] sm:$0xff] %v18057_v38  ;;  %v18073_v38 = vadd.f32 %v20833_v13, %v20841_v59  ;;  %v20845_v33 = vld [vmem:[#allocation26_spill] sm:$0xff]  ;;  %v18090_v59 = vadd.f32 %v20833_v13, %v9273_v60  ;;  %v18105_v51 = vadd.f32 %v20833_v13, %v9278_v48  ;;  %v18111_v60 = vadd.f32 %v20833_v13, %v9280_v47 }
 0xa6f   :  { %20838 = vst [vmem:[#allocation150_spill] sm:$0xff] %v18065_v46  ;;  %v18081_v46 = vadd.f32 %v20833_v13, %v20845_v33  ;;  %v18102_v33 = vadd.f32 %v20833_v13, %v9277_v37  ;;  %v18117_v40 = vadd.f32 %v20833_v13, %v9282_v27  ;;  %v18123_v37 = vadd.f32 %v20833_v13, %v9284_v22 }
 0xa70   :  { %20840 = vst [vmem:[#allocation151_spill] sm:$0xff] %v18069_v24  ;;  %v18087_v24 = vadd.f32 %v20833_v13, %v9272_v6  ;;  %v18108_v6 = vadd.f32 %v20833_v13, %v9279_v10  ;;  %v18126_v48 = vadd.f32 %v20833_v13, %v9285_v61  ;;  %v18129_v10 = vadd.f32 %v20833_v13, %v9286_v15 }
 0xa71   :  { %20842 = vst [vmem:[#allocation53_spill] sm:$0xff] %v18073_v38  ;;  %v18093_v38 = vadd.f32 %v20833_v13, %v9274_v11  ;;  %v18114_v11 = vadd.f32 %v20833_v13, %v9281_v29  ;;  %v18132_v47 = vadd.f32 %v20833_v13, %v9287_v32  ;;  %v18135_v29 = vadd.f32 %v20833_v13, %v9288_v25 }
 0xa72   :  { %20844 = vst [vmem:[#allocation155_spill] sm:$0xff] %v18077_v52  ;;  %v18099_v52 = vadd.f32 %v20833_v13, %v9276_v54  ;;  %v18120_v54 = vadd.f32 %v20833_v13, %v9283_v30  ;;  %v18138_v27 = vadd.f32 %v20833_v13, %v9289_v45  ;;  %v18141_v30 = vadd.f32 %v20833_v13, %v9290_v9 }
 0xa73   :  { %v18144_v22 = vadd.f32 %v20833_v13, %v9291_v50  ;;  %v18147_v61 = vadd.f32 %v20833_v13, %v9292_v20  ;;  %v18150_v15 = vadd.f32 %v20833_v13, %v9293_v12  ;;  %v18153_v32 = vadd.f32 %v20833_v13, %v9294_v26 }
 0xa74   :  { %v18156_v25 = vadd.f32 %v20833_v13, %v9295_v57  ;;  %v18159_v45 = vadd.f32 %v20833_v13, %v9296_v3  ;;  %v18162_v9 = vadd.f32 %v20833_v13, %v9297_v53  ;;  %v18165_v50 = vadd.f32 %v20833_v13, %v9298_v14 }
 0xa75   :  { %v18168_v20 = vadd.f32 %v20833_v13, %v9299_v43  ;;  %v18171_v12 = vadd.f32 %v20833_v13, %v9300_v19  ;;  %v18174_v26 = vadd.f32 %v20833_v13, %v9301_v58  ;;  %v18177_v57 = vadd.f32 %v20833_v13, %v9302_v44 }
 0xa76   :  { %v18180_v3 = vadd.f32 %v20833_v13, %v9303_v56  ;;  %v18183_v53 = vadd.f32 %v20833_v13, %v9304_v17  ;;  %v18186_v14 = vadd.f32 %v20833_v13, %v9305_v36  ;;  %v18189_v43 = vadd.f32 %v20833_v13, %v9306_v1 }
 0xa77   :  { %v18192_v19 = vadd.f32 %v20833_v13, %v9307_v39  ;;  %v18195_v58 = vadd.f32 %v20833_v13, %v9308_v35  ;;  %v18198_v44 = vadd.f32 %v20833_v13, %v9309_v4  ;;  %v18201_v56 = vadd.f32 %v20833_v13, %v9310_v21 }
 0xa78   :  { %v18204_v17 = vadd.f32 %v20833_v13, %v9311_v42  ;;  %v18207_v36 = vadd.f32 %v20833_v13, %v9312_v49  ;;  %v18210_v1 = vadd.f32 %v20833_v13, %v9313_v2  ;;  %v18213_v39 = vadd.f32 %v20833_v13, %v9314_v31 }
 0xa79   :  { %v18216_v35 = vadd.f32 %v20833_v13, %v9315_v41  ;;  %v18219_v4 = vadd.f32 %v20833_v13, %v9316_v5  ;;  %v18222_v21 = vadd.f32 %v20833_v13, %v9317_v28  ;;  %v18225_v42 = vadd.f32 %v20833_v13, %v9318_v18 }
 0xa7a   :  { %20846 = vst [vmem:[#allocation34_spill] sm:$0xff] %v18210_v1  ;;  %v18228_v49 = vadd.f32 %v20833_v13, %v9319_v62  ;;  %v18231_v2 = vadd.f32 %v20833_v13, %v9320_v7  ;;  %v18234_v31 = vadd.f32 %v20833_v13, %v9321_v0  ;;  %v18237_v41 = vadd.f32 %v20833_v13, %v9322_v34  ;;  %v20859_v62 = vld [vmem:[#allocation154_spill] sm:$0xff]  ;;  %v20862_v0 = vld [vmem:[#allocation44_spill] sm:$0xff]  ;;  %v20863_v34 = vld [vmem:[#allocation151_spill] sm:$0xff] }
 0xa7b   :  { %20847 = vst [vmem:[#allocation158_spill] sm:$0xff] %v18213_v39  ;;  %v18240_v5 = vadd.f32 %v20833_v13, %v9323_v23  ;;  %v18243_v28 = vadd.f32 %v20833_v13, %v9324_v63  ;;  %v18246_v18 = vadd.f32 %v20833_v13, %v9325_v55  ;;  %v20872_v1 = vld [vmem:[#allocation251_spill] sm:$0xff] }
 0xa7c   :  { %20848 = vst [vmem:[#allocation161_spill] sm:$0xff] %v18216_v35  ;;  %v9419_v35 = vmax.f32 %v18081_v46, 0.0 }
 0xa7d   :  { %20849 = vst [vmem:[#allocation135_spill] sm:$0xff] %v18219_v4  ;;  %v20864_v4 = vld [vmem:[#allocation100_spill] sm:$0xff] }
 0xa7e   :  { %20850 = vst [vmem:[#allocation162_spill] sm:$0xff] %v18222_v21  ;;  %v9339_v23 = vadd.f32 %v20833_v13, %v20864_v4  ;;  %v20870_v4 = vld [vmem:[#allocation27_spill] sm:$0xff] }
 0xa7f   :  { %20851 = vst [vmem:[#allocation159_spill] sm:$0xff] %v18225_v42  ;;  %v20860_v42 = vld [vmem:[#allocation95_spill] sm:$0xff] }
 0xa80   :  { %20852 = vst [vmem:[#allocation168_spill] sm:$0xff] %v18228_v49  ;;  %v9413_v49 = vmax.f32 %v20859_v62, 0.0  ;;  %v9414_v7 = vmax.f32 %v20860_v42, 0.0  ;;  %v20868_v42 = vld [vmem:[#allocation47_spill] sm:$0xff] }
 0xa81   :  { %20853 = vst [vmem:[#allocation164_spill] sm:$0xff] %v18231_v2  ;;  %v20861_v2 = vld [vmem:[#allocation150_spill] sm:$0xff] }
 0xa82   :  { %20854 = vst [vmem:[#allocation167_spill] sm:$0xff] %v18234_v31  ;;  %v9415_v21 = vmax.f32 %v20861_v2, 0.0  ;;  %v9338_v31 = vadd.f32 %v20833_v13, %v20862_v0  ;;  %v9341_v2 = vadd.f32 %v20833_v13, %v20868_v42  ;;  %v20869_v0 = vld [vmem:[#allocation253_spill] sm:$0xff]  ;;  %v9345_v42 = vadd.f32 %v20833_v13, %v20872_v1 }
 0xa83   :  { %20855 = vst [vmem:[#allocation166_spill] sm:$0xff] %v18237_v41  ;;  %v9416_v41 = vmax.f32 %v20863_v34, 0.0  ;;  %v9342_v34 = vadd.f32 %v20833_v13, %v20869_v0 }
 0xa84   :  { %20856 = vst [vmem:[#allocation169_spill] sm:$0xff] %v18240_v5  ;;  %v20865_v5 = vld [vmem:[#allocation53_spill] sm:$0xff]  ;;  %v9420_v39 = vmax.f32 %v9338_v31, 0.0  ;;  %v9423_v46 = vmax.f32 %v9341_v2, 0.0  ;;  %v9427_v2 = vmax.f32 %v9345_v42, 0.0 }
 0xa85   :  { %20857 = vst [vmem:[#allocation170_spill] sm:$0xff] %v18243_v28  ;;  %v9417_v63 = vmax.f32 %v20865_v5, 0.0  ;;  %v20866_v28 = vld [vmem:[#allocation13_spill] sm:$0xff]  ;;  %v9421_v5 = vmax.f32 %v9339_v23, 0.0  ;;  %v9424_v31 = vmax.f32 %v9342_v34, 0.0 }
 0xa86   :  { %20858 = vst [vmem:[#allocation176_spill] sm:$0xff] %v18246_v18  ;;  %v9340_v55 = vadd.f32 %v20833_v13, %v20866_v28  ;;  %v20867_v18 = vld [vmem:[#allocation155_spill] sm:$0xff]  ;;  %v20871_v28 = vld [vmem:[#allocation18_spill] sm:$0xff] }
 0xa87   :  { %9495 = vst [vmem:[#allocation8] sm:$0xff] %v9413_v49  ;;  %v9418_v62 = vmax.f32 %v20867_v18, 0.0  ;;  %v9343_v49 = vadd.f32 %v20833_v13, %v20870_v4  ;;  %v9344_v18 = vadd.f32 %v20833_v13, %v20871_v28 }
 0xa88   :  { %9496 = vst [vmem:[#allocation8 + $0x8] sm:$0xff] %v9414_v7  ;;  %v9422_v7 = vmax.f32 %v9340_v55, 0.0 }
 0xa89   :  { %9497 = vst [vmem:[#allocation8 + $0x10] sm:$0xff] %v9415_v21  ;;  %v20873_v21 = vld [vmem:[#allocation254_spill] sm:$0xff]  ;;  %v9425_v23 = vmax.f32 %v9343_v49, 0.0  ;;  %v9426_v55 = vmax.f32 %v9344_v18, 0.0 }
 0xa8a   :  { %9498 = vst [vmem:[#allocation8 + $0x18] sm:$0xff] %v9416_v41  ;;  %v9346_v0 = vadd.f32 %v20833_v13, %v20873_v21  ;;  %v20874_v41 = vld [vmem:[#allocation51_spill] sm:$0xff] }
 0xa8b   :  { %9499 = vst [vmem:[#allocation8 + $0x20] sm:$0xff] %v9417_v63  ;;  %v9347_v4 = vadd.f32 %v20833_v13, %v20874_v41  ;;  %v20875_v63 = vld [vmem:[#allocation252_spill] sm:$0xff] }
 0xa8c   :  { %9500 = vst [vmem:[#allocation8 + $0x28] sm:$0xff] %v9418_v62  ;;  %v9348_v28 = vadd.f32 %v20833_v13, %v20875_v63  ;;  %v20876_v62 = vld [vmem:[#allocation71_spill] sm:$0xff]  ;;  %v9428_v34 = vmax.f32 %v9346_v0, 0.0 }
 0xa8d   :  { %9501 = vst [vmem:[#allocation8 + $0x30] sm:$0xff] %v9419_v35  ;;  %v9349_v1 = vadd.f32 %v20833_v13, %v20876_v62  ;;  %v20877_v35 = vld [vmem:[#allocation15_spill] sm:$0xff]  ;;  %v9429_v49 = vmax.f32 %v9347_v4, 0.0 }
 0xa8e   :  { %9502 = vst [vmem:[#allocation8 + $0x38] sm:$0xff] %v9420_v39  ;;  %v9350_v21 = vadd.f32 %v20833_v13, %v20877_v35  ;;  %v20878_v39 = vld [vmem:[#allocation81_spill] sm:$0xff]  ;;  %v9430_v18 = vmax.f32 %v9348_v28, 0.0 }
 0xa8f   :  { %9503 = vst [vmem:[#allocation8 + $0x40] sm:$0xff] %v9421_v5  ;;  %v9351_v41 = vadd.f32 %v20833_v13, %v20878_v39  ;;  %v20879_v5 = vld [vmem:[#allocation48_spill] sm:$0xff]  ;;  %v9431_v42 = vmax.f32 %v9349_v1, 0.0 }
 0xa90   :  { %9504 = vst [vmem:[#allocation8 + $0x48] sm:$0xff] %v9422_v7  ;;  %v9352_v63 = vadd.f32 %v20833_v13, %v20879_v5  ;;  %v20880_v7 = vld [vmem:[#allocation65_spill] sm:$0xff]  ;;  %v9432_v0 = vmax.f32 %v9350_v21, 0.0  ;;  %v9439_v21 = vmax.f32 %v18084_v8, 0.0  ;;  %v9446_v8 = vmax.f32 %v18105_v51, 0.0 }
 0xa91   :  { %9505 = vst [vmem:[#allocation8 + $0x50] sm:$0xff] %v9423_v46  ;;  %v9353_v62 = vadd.f32 %v20833_v13, %v20880_v7  ;;  %v20881_v46 = vld [vmem:[#allocation76_spill] sm:$0xff]  ;;  %v9433_v4 = vmax.f32 %v9351_v41, 0.0  ;;  %v9441_v41 = vmax.f32 %v18090_v59, 0.0  ;;  %v9448_v59 = vmax.f32 %v18111_v60, 0.0 }
 0xa92   :  { %9506 = vst [vmem:[#allocation8 + $0x58] sm:$0xff] %v9424_v31  ;;  %v9354_v35 = vadd.f32 %v20833_v13, %v20881_v46  ;;  %v20882_v31 = vld [vmem:[#allocation42_spill] sm:$0xff]  ;;  %v9434_v28 = vmax.f32 %v9352_v63, 0.0  ;;  %v9444_v63 = vmax.f32 %v18099_v52, 0.0  ;;  %v9451_v52 = vmax.f32 %v18120_v54, 0.0 }
 0xa93   :  { %9507 = vst [vmem:[#allocation8 + $0x60] sm:$0xff] %v9425_v23  ;;  %v9355_v39 = vadd.f32 %v20833_v13, %v20882_v31  ;;  %v20883_v23 = vld [vmem:[#allocation24_spill] sm:$0xff]  ;;  %v9453_v51 = vmax.f32 %v18126_v48, 0.0  ;;  %v9455_v60 = vmax.f32 %v18132_v47, 0.0  ;;  %v9458_v54 = vmax.f32 %v18141_v30, 0.0 }
 0xa94   :  { %9508 = vst [vmem:[#allocation8 + $0x68] sm:$0xff] %v9426_v55  ;;  %v9356_v5 = vadd.f32 %v20833_v13, %v20883_v23  ;;  %v9435_v55 = vmax.f32 %v9353_v62, 0.0  ;;  %v9436_v7 = vmax.f32 %v9354_v35, 0.0  ;;  %v9442_v13 = vmax.f32 %v18093_v38, 0.0 }
 0xa95   :  { %9509 = vst [vmem:[#allocation8 + $0x70] sm:$0xff] %v9427_v2  ;;  %v9437_v1 = vmax.f32 %v9355_v39, 0.0  ;;  %v9449_v38 = vmax.f32 %v18114_v11, 0.0  ;;  %v9456_v11 = vmax.f32 %v18135_v29, 0.0  ;;  %v9460_v48 = vmax.f32 %v18147_v61, 0.0 }
 0xa96   :  { %9510 = vst [vmem:[#allocation8 + $0x78] sm:$0xff] %v9428_v34  ;;  %v9438_v2 = vmax.f32 %v9356_v5, 0.0  ;;  %v9440_v34 = vmax.f32 %v18087_v24, 0.0  ;;  %v9447_v24 = vmax.f32 %v18108_v6, 0.0  ;;  %v9454_v6 = vmax.f32 %v18129_v10, 0.0  ;;  %v20892_v5 = vld [vmem:[#allocation167_spill] sm:$0xff] }
 0xa97   :  { %9511 = vst [vmem:[#allocation8 + $0x80] sm:$0xff] %v9429_v49  ;;  %v9443_v49 = vmax.f32 %v18096_v16, 0.0  ;;  %v9450_v16 = vmax.f32 %v18117_v40, 0.0  ;;  %v9457_v40 = vmax.f32 %v18138_v27, 0.0  ;;  %v9461_v10 = vmax.f32 %v18150_v15, 0.0 }
 0xa98   :  { %9512 = vst [vmem:[#allocation8 + $0x88] sm:$0xff] %v9430_v18  ;;  %v9445_v18 = vmax.f32 %v18102_v33, 0.0  ;;  %v9452_v33 = vmax.f32 %v18123_v37, 0.0  ;;  %v9459_v37 = vmax.f32 %v18144_v22, 0.0  ;;  %v9462_v47 = vmax.f32 %v18153_v32, 0.0 }
 0xa99   :  { %9513 = vst [vmem:[#allocation8 + $0x90] sm:$0xff] %v9431_v42  ;;  %v9463_v29 = vmax.f32 %v18156_v25, 0.0  ;;  %v9464_v27 = vmax.f32 %v18159_v45, 0.0  ;;  %v9465_v30 = vmax.f32 %v18162_v9, 0.0  ;;  %v9466_v22 = vmax.f32 %v18165_v50, 0.0 }
 0xa9a   :  { %9514 = vst [vmem:[#allocation8 + $0x98] sm:$0xff] %v9432_v0  ;;  %v9467_v61 = vmax.f32 %v18168_v20, 0.0  ;;  %v9468_v15 = vmax.f32 %v18171_v12, 0.0  ;;  %v9469_v32 = vmax.f32 %v18174_v26, 0.0  ;;  %v9470_v25 = vmax.f32 %v18177_v57, 0.0 }
 0xa9b   :  { %9515 = vst [vmem:[#allocation8 + $0xa0] sm:$0xff] %v9433_v4  ;;  %v9471_v45 = vmax.f32 %v18180_v3, 0.0  ;;  %v9472_v9 = vmax.f32 %v18183_v53, 0.0  ;;  %v9473_v50 = vmax.f32 %v18186_v14, 0.0  ;;  %v9474_v20 = vmax.f32 %v18189_v43, 0.0  ;;  %v20884_v43 = vld [vmem:[#allocation34_spill] sm:$0xff] }
 0xa9c   :  { %9516 = vst [vmem:[#allocation8 + $0xa8] sm:$0xff] %v9434_v28  ;;  %v9475_v12 = vmax.f32 %v18192_v19, 0.0  ;;  %v9476_v26 = vmax.f32 %v18195_v58, 0.0  ;;  %v9477_v57 = vmax.f32 %v18198_v44, 0.0  ;;  %v9478_v3 = vmax.f32 %v18201_v56, 0.0  ;;  %v20885_v19 = vld [vmem:[#allocation158_spill] sm:$0xff] }
 0xa9d   :  { %9517 = vst [vmem:[#allocation8 + $0xb0] sm:$0xff] %v9435_v55  ;;  %v9479_v53 = vmax.f32 %v18204_v17, 0.0  ;;  %v9480_v14 = vmax.f32 %v18207_v36, 0.0  ;;  %v9481_v62 = vmax.f32 %v20884_v43, 0.0  ;;  %v9482_v42 = vmax.f32 %v20885_v19, 0.0  ;;  %v20886_v58 = vld [vmem:[#allocation161_spill] sm:$0xff] }
 0xa9e   :  { %9518 = vst [vmem:[#allocation8 + $0xb8] sm:$0xff] %v9436_v7  ;;  %v9483_v46 = vmax.f32 %v20886_v58, 0.0  ;;  %v20887_v44 = vld [vmem:[#allocation135_spill] sm:$0xff]  ;;  %v20888_v56 = vld [vmem:[#allocation162_spill] sm:$0xff]  ;;  %v20890_v36 = vld [vmem:[#allocation168_spill] sm:$0xff]  ;;  %v9489_v28 = vmax.f32 %v20892_v5, 0.0 }
 0xa9f   :  { %9519 = vst [vmem:[#allocation8 + $0xc0] sm:$0xff] %v9437_v1  ;;  %v9484_v35 = vmax.f32 %v20887_v44, 0.0  ;;  %v9485_v0 = vmax.f32 %v20888_v56, 0.0  ;;  %v20889_v17 = vld [vmem:[#allocation159_spill] sm:$0xff]  ;;  %v9487_v39 = vmax.f32 %v20890_v36, 0.0  ;;  %v20891_v4 = vld [vmem:[#allocation164_spill] sm:$0xff] }
 0xaa0   :  { %9520 = vst [vmem:[#allocation8 + $0xc8] sm:$0xff] %v9438_v2  ;;  %v9486_v31 = vmax.f32 %v20889_v17, 0.0  ;;  %v9488_v23 = vmax.f32 %v20891_v4, 0.0  ;;  %v20893_v55 = vld [vmem:[#allocation166_spill] sm:$0xff]  ;;  %v20894_v1 = vld [vmem:[#allocation169_spill] sm:$0xff] }
 0xaa1   :  { %9521 = vst [vmem:[#allocation8 + $0xd0] sm:$0xff] %v9439_v21  ;;  %v9490_v7 = vmax.f32 %v20893_v55, 0.0  ;;  %v9491_v2 = vmax.f32 %v20894_v1, 0.0  ;;  %v20895_v21 = vld [vmem:[#allocation170_spill] sm:$0xff] }
 0xaa2   :  { %9522 = vst [vmem:[#allocation8 + $0xd8] sm:$0xff] %v9440_v34  ;;  %v9492_v34 = vmax.f32 %v20895_v21, 0.0 }
 0xaa3   :  { %9523 = vst [vmem:[#allocation8 + $0xe0] sm:$0xff] %v9441_v41  ;;  %v20896_v41 = vld [vmem:[#allocation176_spill] sm:$0xff] }
 0xaa4   :  { %9524 = vst [vmem:[#allocation8 + $0xe8] sm:$0xff] %v9442_v13  ;;  %v9493_v13 = vmax.f32 %v20896_v41, 0.0 }
 0xaa5   :  { %9525 = vst [vmem:[#allocation8 + $0xf0] sm:$0xff] %v9443_v49 }
 0xaa6   :  { %9526 = vst [vmem:[#allocation8 + $0xf8] sm:$0xff] %v9444_v63 }
 0xaa7   :  { %9527 = vst [vmem:[#allocation8 + $0x100] sm:$0xff] %v9445_v18 }
 0xaa8   :  { %9528 = vst [vmem:[#allocation8 + $0x108] sm:$0xff] %v9446_v8 }
 0xaa9   :  { %9529 = vst [vmem:[#allocation8 + $0x110] sm:$0xff] %v9447_v24 }
 0xaaa   :  { %9530 = vst [vmem:[#allocation8 + $0x118] sm:$0xff] %v9448_v59 }
 0xaab   :  { %9531 = vst [vmem:[#allocation8 + $0x120] sm:$0xff] %v9449_v38 }
 0xaac   :  { %9532 = vst [vmem:[#allocation8 + $0x128] sm:$0xff] %v9450_v16 }
 0xaad   :  { %9533 = vst [vmem:[#allocation8 + $0x130] sm:$0xff] %v9451_v52 }
 0xaae   :  { %9534 = vst [vmem:[#allocation8 + $0x138] sm:$0xff] %v9452_v33 }
 0xaaf   :  { %9535 = vst [vmem:[#allocation8 + $0x140] sm:$0xff] %v9453_v51 }
 0xab0   :  { %9536 = vst [vmem:[#allocation8 + $0x148] sm:$0xff] %v9454_v6 }
 0xab1   :  { %9537 = vst [vmem:[#allocation8 + $0x150] sm:$0xff] %v9455_v60 }
 0xab2   :  { %9538 = vst [vmem:[#allocation8 + $0x158] sm:$0xff] %v9456_v11 }
 0xab3   :  { %9539 = vst [vmem:[#allocation8 + $0x160] sm:$0xff] %v9457_v40 }
 0xab4   :  { %9540 = vst [vmem:[#allocation8 + $0x168] sm:$0xff] %v9458_v54 }
 0xab5   :  { %9541 = vst [vmem:[#allocation8 + $0x170] sm:$0xff] %v9459_v37 }
 0xab6   :  { %9542 = vst [vmem:[#allocation8 + $0x178] sm:$0xff] %v9460_v48 }
 0xab7   :  { %9543 = vst [vmem:[#allocation8 + $0x180] sm:$0xff] %v9461_v10 }
 0xab8   :  { %9544 = vst [vmem:[#allocation8 + $0x188] sm:$0xff] %v9462_v47 }
 0xab9   :  { %9545 = vst [vmem:[#allocation8 + $0x190] sm:$0xff] %v9463_v29 }
 0xaba   :  { %9546 = vst [vmem:[#allocation8 + $0x198] sm:$0xff] %v9464_v27 }
 0xabb   :  { %9547 = vst [vmem:[#allocation8 + $0x1a0] sm:$0xff] %v9465_v30 }
 0xabc   :  { %9548 = vst [vmem:[#allocation8 + $0x1a8] sm:$0xff] %v9466_v22 }
 0xabd   :  { %9549 = vst [vmem:[#allocation8 + $0x1b0] sm:$0xff] %v9467_v61 }
 0xabe   :  { %9550 = vst [vmem:[#allocation8 + $0x1b8] sm:$0xff] %v9468_v15 }
 0xabf   :  { %9551 = vst [vmem:[#allocation8 + $0x1c0] sm:$0xff] %v9469_v32 }
 0xac0   :  { %9552 = vst [vmem:[#allocation8 + $0x1c8] sm:$0xff] %v9470_v25 }
 0xac1   :  { %9553 = vst [vmem:[#allocation8 + $0x1d0] sm:$0xff] %v9471_v45 }
 0xac2   :  { %9554 = vst [vmem:[#allocation8 + $0x1d8] sm:$0xff] %v9472_v9 }
 0xac3   :  { %9555 = vst [vmem:[#allocation8 + $0x1e0] sm:$0xff] %v9473_v50 }
 0xac4   :  { %9556 = vst [vmem:[#allocation8 + $0x1e8] sm:$0xff] %v9474_v20 }
 0xac5   :  { %9557 = vst [vmem:[#allocation8 + $0x1f0] sm:$0xff] %v9475_v12 }
 0xac6   :  { %9558 = vst [vmem:[#allocation8 + $0x1f8] sm:$0xff] %v9476_v26 }
 0xac7   :  { %9559 = vst [vmem:[#allocation8 + $0x200] sm:$0xff] %v9477_v57 }
 0xac8   :  { %9560 = vst [vmem:[#allocation8 + $0x208] sm:$0xff] %v9478_v3 }
 0xac9   :  { %9561 = vst [vmem:[#allocation8 + $0x210] sm:$0xff] %v9479_v53 }
 0xaca   :  { %9562 = vst [vmem:[#allocation8 + $0x218] sm:$0xff] %v9480_v14 }
 0xacb   :  { %9563 = vst [vmem:[#allocation8 + $0x220] sm:$0xff] %v9481_v62 }
 0xacc   :  { %9564 = vst [vmem:[#allocation8 + $0x228] sm:$0xff] %v9482_v42 }
 0xacd   :  { %9565 = vst [vmem:[#allocation8 + $0x230] sm:$0xff] %v9483_v46 }
 0xace   :  { %9566 = vst [vmem:[#allocation8 + $0x238] sm:$0xff] %v9484_v35 }
 0xacf   :  { %9567 = vst [vmem:[#allocation8 + $0x240] sm:$0xff] %v9485_v0 }
 0xad0   :  { %9568 = vst [vmem:[#allocation8 + $0x248] sm:$0xff] %v9486_v31 }
 0xad1   :  { %9569 = vst [vmem:[#allocation8 + $0x250] sm:$0xff] %v9487_v39 }
 0xad2   :  { %9570 = vst [vmem:[#allocation8 + $0x258] sm:$0xff] %v9488_v23 }
 0xad3   :  { %9571 = vst [vmem:[#allocation8 + $0x260] sm:$0xff] %v9489_v28 }
 0xad4   :  { %9572 = vst [vmem:[#allocation8 + $0x268] sm:$0xff] %v9490_v7 }
 0xad5   :  { %9573 = vst [vmem:[#allocation8 + $0x270] sm:$0xff] %v9491_v2 }
 0xad6   :  { %9574 = vst [vmem:[#allocation8 + $0x278] sm:$0xff] %v9492_v34 }
 0xad7   :  { %9575 = vst [vmem:[#allocation8 + $0x280] sm:$0xff] %v9493_v13 }
 0xad8   :  { %9589 = dma.vmem_to_hbm [thread:$0]  %s9582_s16, 10496, %s9584_s17, [#allocation5], %s12133_s18, %s12133_s18, %s12134_s19  }
 0xad9   :  { %12125 = dma.done.wait [#allocation5], 10496  }
 0xada   :  { %12126 = vsyncadd [#allocation5], 4294956800 }
 0xadb   :  { %9594 = vsyncpa [#allocation4], 1 }
 0xadc   :  { %9595 = vsyncpa [#allocation7], 1 }
 0xadd   :  { %9596 = vsyncpa [#allocation5], 1 }

</bundles_post_ra>
